<compile_context>
chip_gen: v5e
topology: v5e:2x2
jax: 0.10.0
libtpu: 0.0.40
codegen_flags: <defaults>
</compile_context>

<pallas_src>
import jax
import jax.numpy as jnp
from jax.experimental import pallas as pl
from jax.experimental.pallas import tpu as pltpu

_COLPAD = 2          # zero columns added on the left of W by the wrapper
_NEG = -3.0e38       # stands in for -inf in the max-pool padding (never wins)


# ------------------------------ Pallas kernel ------------------------------ #

def _inception_kernel(x_ref, wA_ref, bA_ref, w4_ref, b4_ref,
                      w2b_ref, b2b_ref, w3b_ref, b3b_ref, out_ref):
    f32, bf16 = jnp.float32, jnp.bfloat16
    _, H, W, four_bc = out_ref.shape
    bc = four_bc // 4
    _, _, Wc, Cin = x_ref.shape
    c0 = _COLPAD

    xp = x_ref[0]                                   # (H, Wc, Cin), f32

    col = jax.lax.broadcasted_iota(jnp.int32, (H, Wc, 1), 1)
    in_cols = (col >= c0) & (col < c0 + W)          # real-data columns

    def shift_rows(a, dy, fill):
        """b[i] = a[i + dy] if 0 <= i + dy < H else fill (row halo)."""
        if dy == 0:
            return a
        pad = jnp.full((abs(dy),) + a.shape[1:], fill, a.dtype)
        if dy > 0:
            return jnp.concatenate([a[dy:], pad], axis=0)
        return jnp.concatenate([pad, a[:H + dy]], axis=0)

    def col_window(a, dx):
        """(H, W, C) window whose column j reads padded column c0 + j + dx."""
        return a[:, c0 + dx:c0 + dx + W, :]

    # ---- fused 1x1 convolutions (branch1 / branch2a / branch3a) ----
    yA = jnp.dot(xp.reshape(H * Wc, Cin).astype(bf16), wA_ref[...],
                 preferred_element_type=f32) + bA_ref[...]
    yA = yA.reshape(H, Wc, 3 * bc)
    br1 = col_window(yA[:, :, 0:bc], 0).reshape(H * W, bc)
    # ReLU, then zero outside the real columns (realizes the convs' zero pad).
    y2 = jnp.where(in_cols, jnp.maximum(yA[:, :, bc:2 * bc], 0.0), 0.0)
    y3 = jnp.where(in_cols, jnp.maximum(yA[:, :, 2 * bc:3 * bc], 0.0), 0.0)

    # ---- branch 4: 3x3 max-pool (stride 1, pad 1) then 1x1 conv ----
    xm = jnp.where(in_cols, xp, _NEG)               # pad columns act as -inf
    rmax = jnp.maximum(jnp.maximum(shift_rows(xm, -1, _NEG), xm),
                       shift_rows(xm, 1, _NEG))
    mp = jnp.maximum(jnp.maximum(col_window(rmax, -1), col_window(rmax, 0)),
                     col_window(rmax, 1))           # (H, W, Cin), always finite
    br4 = jnp.dot(mp.reshape(H * W, Cin).astype(bf16), w4_ref[...],
                  preferred_element_type=f32) + b4_ref[...]

    # ---- branch 2: 3x3 conv (pad 1) as 9 shift-and-accumulate GEMMs ----
    w2b = w2b_ref[...]                              # (9, bc, bc) bf16
    acc2 = jnp.zeros((H * W, bc), f32)
    k = 0
    for dy in (-1, 0, 1):
        rsh = shift_rows(y2, dy, 0.0)
        for dx in (-1, 0, 1):
            tap = col_window(rsh, dx).reshape(H * W, bc)
            acc2 = acc2 + jnp.dot(tap.astype(bf16), w2b[k],
                                  preferred_element_type=f32)
            k += 1
    acc2 = acc2 + b2b_ref[...]

    # ---- branch 3: 5x5 conv (pad 2) as 25 shift-and-accumulate GEMMs ----
    w3b = w3b_ref[...]                              # (25, bc, bc) bf16
    acc3 = jnp.zeros((H * W, bc), f32)
    k = 0
    for dy in (-2, -1, 0, 1, 2):
        rsh = shift_rows(y3, dy, 0.0)
        for dx in (-2, -1, 0, 1, 2):
            tap = col_window(rsh, dx).reshape(H * W, bc)
            acc3 = acc3 + jnp.dot(tap.astype(bf16), w3b[k],
                                  preferred_element_type=f32)
            k += 1
    acc3 = acc3 + b3b_ref[...]

    # ---- lane-dense concatenated output, one full-block store ----
    out = jnp.concatenate([br1, acc2, acc3, br4], axis=-1)      # (H*W, 4*bc)
    out_ref[...] = out.reshape(1, H, W, 4 * bc)


# ------------------------------ JAX wrapper -------------------------------- #

def inception_block_forward(x_nchw, params):
    """Pallas implementation of InceptionBlock.forward. Input/output are NCHW."""
    B, Cin, H, W = x_nchw.shape
    bc = params["w1"].shape[0]            # branch_channels = out_channels // 4
    f32, bf16 = jnp.float32, jnp.bfloat16

    # NCHW -> NHWC boundary transpose (kernel layout is channels-last).
    x_nhwc = jnp.transpose(x_nchw, (0, 2, 3, 1)).astype(f32)

    # Zero-pad only the W axis: _COLPAD columns on the left, and enough on the
    # right so the padded width is a multiple of 8 (sublane-aligned reshapes).
    Wc = ((W + 2 * _COLPAD + 7) // 8) * 8
    xp = jnp.pad(x_nhwc, ((0, 0), (0, 0), (_COLPAD, Wc - W - _COLPAD), (0, 0)))

    def w1x1(w):   # (out, in, 1, 1) -> (in, out)
        return jnp.transpose(w[:, :, 0, 0], (1, 0))

    def wkxk(w):   # (out, in, kh, kw) -> (kh*kw, in, out)
        o, i, kh, kw = w.shape
        return jnp.transpose(w, (2, 3, 1, 0)).reshape(kh * kw, i, o).astype(bf16)

    # Fused 1x1 weights for branches 1 / 2a / 3a.
    wA = jnp.concatenate([w1x1(params["w1"]), w1x1(params["w2a"]),
                          w1x1(params["w3a"])], axis=1).astype(bf16)   # (Cin, 3bc)
    bA = jnp.concatenate([params["b1"], params["b2a"],
                          params["b3a"]]).reshape(1, 3 * bc).astype(f32)
    w4 = w1x1(params["w4"]).astype(bf16)
    b4 = params["b4"].reshape(1, bc).astype(f32)
    w2b = wkxk(params["w2b"])
    b2b = params["b2b"].reshape(1, bc).astype(f32)
    w3b = wkxk(params["w3b"])
    b3b = params["b3b"].reshape(1, bc).astype(f32)

    N = B * H * W
    flops = 2 * N * (Cin * 3 * bc + Cin * bc + 9 * bc * bc + 25 * bc * bc)
    bytes_accessed = int(
        xp.size * 4 + N * 4 * bc * 4
        + (wA.size + w4.size + w2b.size + w3b.size) * 2
        + (bA.size + b4.size + b2b.size + b3b.size) * 4)

    out_nhwc = pl.pallas_call(
        _inception_kernel,
        out_shape=jax.ShapeDtypeStruct((B, H, W, 4 * bc), f32),
        grid=(B,),
        in_specs=[
            pl.BlockSpec((1, H, Wc, Cin), lambda b: (b, 0, 0, 0)),   # x (padded)
            pl.BlockSpec((Cin, 3 * bc), lambda b: (0, 0)),           # wA (resident)
            pl.BlockSpec((1, 3 * bc), lambda b: (0, 0)),             # bA
            pl.BlockSpec((Cin, bc), lambda b: (0, 0)),               # w4
            pl.BlockSpec((1, bc), lambda b: (0, 0)),                 # b4
            pl.BlockSpec((9, bc, bc), lambda b: (0, 0, 0)),          # w2b
            pl.BlockSpec((1, bc), lambda b: (0, 0)),                 # b2b
            pl.BlockSpec((25, bc, bc), lambda b: (0, 0, 0)),         # w3b
            pl.BlockSpec((1, bc), lambda b: (0, 0)),                 # b3b
        ],
        out_specs=pl.BlockSpec((1, H, W, 4 * bc), lambda b: (b, 0, 0, 0)),
        compiler_params=pltpu.CompilerParams(
            dimension_semantics=("parallel",),
            vmem_limit_bytes=32 * 1024 * 1024),
        cost_estimate=pl.CostEstimate(flops=flops, transcendentals=0,
                                      bytes_accessed=bytes_accessed),
    )(xp, wA, bA, w4, b4, w2b, b2b, w3b, b3b)

    # NHWC -> NCHW boundary transpose to match the PyTorch interface.
    return jnp.transpose(out_nhwc, (0, 3, 1, 2))


# ----------------------------- pure-JAX reference --------------------------- #

def _ref_forward(x, params):
    def conv(x, w, b, pad):
        y = jax.lax.conv_general_dilated(
            x, w, (1, 1), [(pad, pad), (pad, pad)],
            dimension_numbers=("NCHW", "OIHW", "NCHW"),
            precision=jax.lax.Precision.HIGHEST)
        return y + b[None, :, None, None]

    def maxpool3(x):
        return jax.lax.reduce_window(
            x, -jnp.inf, jax.lax.max, (1, 1, 3, 3), (1, 1, 1, 1),
            [(0, 0), (0, 0), (1, 1), (1, 1)])

    b1 = conv(x, params["w1"], params["b1"], 0)
    b2 = conv(jax.nn.relu(conv(x, params["w2a"], params["b2a"], 0)),
              params["w2b"], params["b2b"], 1)
    b3 = conv(jax.nn.relu(conv(x, params["w3a"], params["b3a"], 0)),
              params["w3b"], params["b3b"], 2)
    b4 = conv(maxpool3(x), params["w4"], params["b4"], 0)
    return jnp.concatenate([b1, b2, b3, b4], axis=1)


# ---------------------------------- main ------------------------------------ #

if __name__ == "__main__":
    B, Cin, H, W = 2, 4, 16, 16
    out_channels = 8
    bc = out_channels // 4

    key = jax.random.PRNGKey(0)
    keys = jax.random.split(key, 13)

    def nrm(k, shape, scale=0.1):
        return (scale * jax.random.normal(k, shape)).astype(jnp.float32)

    params = {
        "w1":  nrm(keys[0], (bc, Cin, 1, 1)), "b1":  nrm(keys[1], (bc,)),
        "w2a": nrm(keys[2], (bc, Cin, 1, 1)), "b2a": nrm(keys[3], (bc,)),
        "w2b": nrm(keys[4], (bc, bc, 3, 3)),  "b2b": nrm(keys[5], (bc,)),
        "w3a": nrm(keys[6], (bc, Cin, 1, 1)), "b3a": nrm(keys[7], (bc,)),
        "w3b": nrm(keys[8], (bc, bc, 5, 5)),  "b3b": nrm(keys[9], (bc,)),
        "w4":  nrm(keys[10], (bc, Cin, 1, 1)), "b4": nrm(keys[11], (bc,)),
    }

    x = jax.random.normal(keys[12], (B, Cin, H, W), dtype=jnp.float32)

    out = jax.jit(inception_block_forward)(x, params)
    out = jax.block_until_ready(out)

    ref = jax.block_until_ready(_ref_forward(x, params))

    assert out.shape == (B, out_channels, H, W), out.shape
    assert jnp.allclose(out, ref, atol=2e-2, rtol=2e-2), (
        "max abs err = %g" % float(jnp.max(jnp.abs(out - ref))))

    print("KERNEL_OK")
</pallas_src>

<mosaic_0001>
module attributes {stable_mosaic.version = 11 : i64} {
  func.func @_inception_kernel(%arg0: i32, %arg1: memref<1x16x24x4xf32, #tpu.memory_space<vmem>>, %arg2: memref<4x6xbf16, #tpu.memory_space<vmem>>, %arg3: memref<1x6xf32, #tpu.memory_space<vmem>>, %arg4: memref<4x2xbf16, #tpu.memory_space<vmem>>, %arg5: memref<1x2xf32, #tpu.memory_space<vmem>>, %arg6: memref<9x2x2xbf16, #tpu.memory_space<vmem>>, %arg7: memref<1x2xf32, #tpu.memory_space<vmem>>, %arg8: memref<25x2x2xbf16, #tpu.memory_space<vmem>>, %arg9: memref<1x2xf32, #tpu.memory_space<vmem>>, %arg10: memref<1x16x16x8xf32, #tpu.memory_space<vmem>>) attributes {dimension_semantics = [#tpu.dimension_semantics<parallel>], iteration_bounds = array<i64: 2>, scalar_prefetch = 0 : i64, scratch_operands = 0 : i64, tpu.core_type = #tpu.core_type<tc>, window_params = [{transform_indices = @transform_0, window_bounds = array<i64: 1, 16, 24, 4>}, {pipeline_mode = #tpu.pipeline_mode<synchronous>, transform_indices = @transform_1, window_bounds = array<i64: 4, 6>}, {pipeline_mode = #tpu.pipeline_mode<synchronous>, transform_indices = @transform_2, window_bounds = array<i64: 1, 6>}, {pipeline_mode = #tpu.pipeline_mode<synchronous>, transform_indices = @transform_3, window_bounds = array<i64: 4, 2>}, {pipeline_mode = #tpu.pipeline_mode<synchronous>, transform_indices = @transform_4, window_bounds = array<i64: 1, 2>}, {pipeline_mode = #tpu.pipeline_mode<synchronous>, transform_indices = @transform_5, window_bounds = array<i64: 9, 2, 2>}, {pipeline_mode = #tpu.pipeline_mode<synchronous>, transform_indices = @transform_6, window_bounds = array<i64: 1, 2>}, {pipeline_mode = #tpu.pipeline_mode<synchronous>, transform_indices = @transform_7, window_bounds = array<i64: 25, 2, 2>}, {pipeline_mode = #tpu.pipeline_mode<synchronous>, transform_indices = @transform_8, window_bounds = array<i64: 1, 2>}, {transform_indices = @transform_9, window_bounds = array<i64: 1, 16, 16, 8>}]} {
    %c0 = arith.constant 0 : index
    %c0_0 = arith.constant 0 : index
    %c0_1 = arith.constant 0 : index
    %c0_2 = arith.constant 0 : index
    %0 = vector.load %arg1[%c0, %c0_0, %c0_1, %c0_2] : memref<1x16x24x4xf32, #tpu.memory_space<vmem>>, vector<1x16x24x4xf32>
    %1 = vector.shape_cast %0 : vector<1x16x24x4xf32> to vector<16x24x4xf32>
    %2 = tpu.iota {dimensions = array<i32: 1>} : vector<16x24x1xi32>
    %c2_i32 = arith.constant 2 : i32
    %3 = vector.broadcast %c2_i32 : i32 to vector<16x24x1xi32>
    %4 = arith.cmpi sge, %2, %3 : vector<16x24x1xi32>
    %c18_i32 = arith.constant 18 : i32
    %5 = vector.broadcast %c18_i32 : i32 to vector<16x24x1xi32>
    %6 = arith.cmpi slt, %2, %5 : vector<16x24x1xi32>
    %7 = arith.andi %4, %6 : vector<16x24x1xi1>
    %8 = vector.shape_cast %1 : vector<16x24x4xf32> to vector<384x4xf32>
    %9 = arith.truncf %8 : vector<384x4xf32> to vector<384x4xbf16>
    %c0_3 = arith.constant 0 : index
    %c0_4 = arith.constant 0 : index
    %10 = vector.load %arg2[%c0_3, %c0_4] : memref<4x6xbf16, #tpu.memory_space<vmem>>, vector<4x6xbf16>
    %cst = arith.constant dense<0.000000e+00> : vector<384x6xf32>
    %11 = tpu.matmul %9, %10, %cst {dimension_numbers = #tpu.dot_dimension_numbers<[1], [0], [0], [1], [0, 0, 1, 1], [], []>} : vector<384x4xbf16>, vector<4x6xbf16>, vector<384x6xf32> -> vector<384x6xf32>
    %c0_5 = arith.constant 0 : index
    %c0_6 = arith.constant 0 : index
    %12 = vector.load %arg3[%c0_5, %c0_6] : memref<1x6xf32, #tpu.memory_space<vmem>>, vector<1x6xf32>
    %13 = vector.broadcast %12 : vector<1x6xf32> to vector<384x6xf32>
    %14 = arith.addf %11, %13 : vector<384x6xf32>
    %15 = vector.shape_cast %14 : vector<384x6xf32> to vector<16x24x6xf32>
    %16 = vector.extract_strided_slice %15 {offsets = [0, 0, 0], sizes = [16, 24, 2], strides = [1, 1, 1]} : vector<16x24x6xf32> to vector<16x24x2xf32>
    %17 = vector.extract_strided_slice %16 {offsets = [0, 2, 0], sizes = [16, 16, 2], strides = [1, 1, 1]} : vector<16x24x2xf32> to vector<16x16x2xf32>
    %18 = vector.shape_cast %17 : vector<16x16x2xf32> to vector<256x2xf32>
    %19 = vector.extract_strided_slice %15 {offsets = [0, 0, 2], sizes = [16, 24, 2], strides = [1, 1, 1]} : vector<16x24x6xf32> to vector<16x24x2xf32>
    %cst_7 = arith.constant 0.000000e+00 : f32
    %20 = vector.broadcast %cst_7 : f32 to vector<16x24x2xf32>
    %21 = arith.maximumf %19, %20 : vector<16x24x2xf32>
    %cst_8 = arith.constant 0.000000e+00 : f32
    %22 = vector.shape_cast %7 : vector<16x24x1xi1> to vector<16x24x1xi1>
    %23 = vector.broadcast %22 : vector<16x24x1xi1> to vector<16x24x2xi1>
    %24 = vector.broadcast %cst_8 : f32 to vector<16x24x2xf32>
    %25 = arith.select %23, %21, %24 : vector<16x24x2xi1>, vector<16x24x2xf32>
    %26 = vector.extract_strided_slice %15 {offsets = [0, 0, 4], sizes = [16, 24, 2], strides = [1, 1, 1]} : vector<16x24x6xf32> to vector<16x24x2xf32>
    %cst_9 = arith.constant 0.000000e+00 : f32
    %27 = vector.broadcast %cst_9 : f32 to vector<16x24x2xf32>
    %28 = arith.maximumf %26, %27 : vector<16x24x2xf32>
    %cst_10 = arith.constant 0.000000e+00 : f32
    %29 = vector.shape_cast %7 : vector<16x24x1xi1> to vector<16x24x1xi1>
    %30 = vector.broadcast %29 : vector<16x24x1xi1> to vector<16x24x2xi1>
    %31 = vector.broadcast %cst_10 : f32 to vector<16x24x2xf32>
    %32 = arith.select %30, %28, %31 : vector<16x24x2xi1>, vector<16x24x2xf32>
    %cst_11 = arith.constant -3.000000e+38 : f32
    %33 = vector.shape_cast %7 : vector<16x24x1xi1> to vector<16x24x1xi1>
    %34 = vector.broadcast %33 : vector<16x24x1xi1> to vector<16x24x4xi1>
    %35 = vector.broadcast %cst_11 : f32 to vector<16x24x4xf32>
    %36 = arith.select %34, %1, %35 : vector<16x24x4xi1>, vector<16x24x4xf32>
    %cst_12 = arith.constant -3.000000e+38 : f32
    %37 = vector.broadcast %cst_12 : f32 to vector<1x24x4xf32>
    %38 = vector.extract_strided_slice %36 {offsets = [0, 0, 0], sizes = [15, 24, 4], strides = [1, 1, 1]} : vector<16x24x4xf32> to vector<15x24x4xf32>
    %39 = tpu.concatenate %37, %38 in 0 : vector<1x24x4xf32>, vector<15x24x4xf32> -> vector<16x24x4xf32>
    %40 = arith.maximumf %39, %36 : vector<16x24x4xf32>
    %cst_13 = arith.constant -3.000000e+38 : f32
    %41 = vector.broadcast %cst_13 : f32 to vector<1x24x4xf32>
    %42 = vector.extract_strided_slice %36 {offsets = [1, 0, 0], sizes = [15, 24, 4], strides = [1, 1, 1]} : vector<16x24x4xf32> to vector<15x24x4xf32>
    %43 = tpu.concatenate %42, %41 in 0 : vector<15x24x4xf32>, vector<1x24x4xf32> -> vector<16x24x4xf32>
    %44 = arith.maximumf %40, %43 : vector<16x24x4xf32>
    %45 = vector.extract_strided_slice %44 {offsets = [0, 1, 0], sizes = [16, 16, 4], strides = [1, 1, 1]} : vector<16x24x4xf32> to vector<16x16x4xf32>
    %46 = vector.extract_strided_slice %44 {offsets = [0, 2, 0], sizes = [16, 16, 4], strides = [1, 1, 1]} : vector<16x24x4xf32> to vector<16x16x4xf32>
    %47 = arith.maximumf %45, %46 : vector<16x16x4xf32>
    %48 = vector.extract_strided_slice %44 {offsets = [0, 3, 0], sizes = [16, 16, 4], strides = [1, 1, 1]} : vector<16x24x4xf32> to vector<16x16x4xf32>
    %49 = arith.maximumf %47, %48 : vector<16x16x4xf32>
    %50 = vector.shape_cast %49 : vector<16x16x4xf32> to vector<256x4xf32>
    %51 = arith.truncf %50 : vector<256x4xf32> to vector<256x4xbf16>
    %c0_14 = arith.constant 0 : index
    %c0_15 = arith.constant 0 : index
    %52 = vector.load %arg4[%c0_14, %c0_15] : memref<4x2xbf16, #tpu.memory_space<vmem>>, vector<4x2xbf16>
    %cst_16 = arith.constant dense<0.000000e+00> : vector<256x2xf32>
    %53 = tpu.matmul %51, %52, %cst_16 {dimension_numbers = #tpu.dot_dimension_numbers<[1], [0], [0], [1], [0, 0, 1, 1], [], []>} : vector<256x4xbf16>, vector<4x2xbf16>, vector<256x2xf32> -> vector<256x2xf32>
    %c0_17 = arith.constant 0 : index
    %c0_18 = arith.constant 0 : index
    %54 = vector.load %arg5[%c0_17, %c0_18] : memref<1x2xf32, #tpu.memory_space<vmem>>, vector<1x2xf32>
    %55 = vector.broadcast %54 : vector<1x2xf32> to vector<256x2xf32>
    %56 = arith.addf %53, %55 : vector<256x2xf32>
    %c0_19 = arith.constant 0 : index
    %c0_20 = arith.constant 0 : index
    %c0_21 = arith.constant 0 : index
    %57 = vector.load %arg6[%c0_19, %c0_20, %c0_21] : memref<9x2x2xbf16, #tpu.memory_space<vmem>>, vector<9x2x2xbf16>
    %cst_22 = arith.constant 0.000000e+00 : f32
    %58 = vector.broadcast %cst_22 : f32 to vector<256x2xf32>
    %cst_23 = arith.constant 0.000000e+00 : f32
    %59 = vector.broadcast %cst_23 : f32 to vector<1x24x2xf32>
    %60 = vector.extract_strided_slice %25 {offsets = [0, 0, 0], sizes = [15, 24, 2], strides = [1, 1, 1]} : vector<16x24x2xf32> to vector<15x24x2xf32>
    %61 = tpu.concatenate %59, %60 in 0 : vector<1x24x2xf32>, vector<15x24x2xf32> -> vector<16x24x2xf32>
    %62 = vector.extract_strided_slice %61 {offsets = [0, 1, 0], sizes = [16, 16, 2], strides = [1, 1, 1]} : vector<16x24x2xf32> to vector<16x16x2xf32>
    %63 = vector.shape_cast %62 : vector<16x16x2xf32> to vector<256x2xf32>
    %64 = arith.truncf %63 : vector<256x2xf32> to vector<256x2xbf16>
    %65 = vector.extract_strided_slice %57 {offsets = [0, 0, 0], sizes = [1, 2, 2], strides = [1, 1, 1]} : vector<9x2x2xbf16> to vector<1x2x2xbf16>
    %66 = vector.shape_cast %65 : vector<1x2x2xbf16> to vector<2x2xbf16>
    %cst_24 = arith.constant dense<0.000000e+00> : vector<256x2xf32>
    %67 = tpu.matmul %64, %66, %cst_24 {dimension_numbers = #tpu.dot_dimension_numbers<[1], [0], [0], [1], [0, 0, 1, 1], [], []>} : vector<256x2xbf16>, vector<2x2xbf16>, vector<256x2xf32> -> vector<256x2xf32>
    %68 = arith.addf %58, %67 : vector<256x2xf32>
    %69 = vector.extract_strided_slice %61 {offsets = [0, 2, 0], sizes = [16, 16, 2], strides = [1, 1, 1]} : vector<16x24x2xf32> to vector<16x16x2xf32>
    %70 = vector.shape_cast %69 : vector<16x16x2xf32> to vector<256x2xf32>
    %71 = arith.truncf %70 : vector<256x2xf32> to vector<256x2xbf16>
    %72 = vector.extract_strided_slice %57 {offsets = [1, 0, 0], sizes = [1, 2, 2], strides = [1, 1, 1]} : vector<9x2x2xbf16> to vector<1x2x2xbf16>
    %73 = vector.shape_cast %72 : vector<1x2x2xbf16> to vector<2x2xbf16>
    %cst_25 = arith.constant dense<0.000000e+00> : vector<256x2xf32>
    %74 = tpu.matmul %71, %73, %cst_25 {dimension_numbers = #tpu.dot_dimension_numbers<[1], [0], [0], [1], [0, 0, 1, 1], [], []>} : vector<256x2xbf16>, vector<2x2xbf16>, vector<256x2xf32> -> vector<256x2xf32>
    %75 = arith.addf %68, %74 : vector<256x2xf32>
    %76 = vector.extract_strided_slice %61 {offsets = [0, 3, 0], sizes = [16, 16, 2], strides = [1, 1, 1]} : vector<16x24x2xf32> to vector<16x16x2xf32>
    %77 = vector.shape_cast %76 : vector<16x16x2xf32> to vector<256x2xf32>
    %78 = arith.truncf %77 : vector<256x2xf32> to vector<256x2xbf16>
    %79 = vector.extract_strided_slice %57 {offsets = [2, 0, 0], sizes = [1, 2, 2], strides = [1, 1, 1]} : vector<9x2x2xbf16> to vector<1x2x2xbf16>
    %80 = vector.shape_cast %79 : vector<1x2x2xbf16> to vector<2x2xbf16>
    %cst_26 = arith.constant dense<0.000000e+00> : vector<256x2xf32>
    %81 = tpu.matmul %78, %80, %cst_26 {dimension_numbers = #tpu.dot_dimension_numbers<[1], [0], [0], [1], [0, 0, 1, 1], [], []>} : vector<256x2xbf16>, vector<2x2xbf16>, vector<256x2xf32> -> vector<256x2xf32>
    %82 = arith.addf %75, %81 : vector<256x2xf32>
    %83 = vector.extract_strided_slice %25 {offsets = [0, 1, 0], sizes = [16, 16, 2], strides = [1, 1, 1]} : vector<16x24x2xf32> to vector<16x16x2xf32>
    %84 = vector.shape_cast %83 : vector<16x16x2xf32> to vector<256x2xf32>
    %85 = arith.truncf %84 : vector<256x2xf32> to vector<256x2xbf16>
    %86 = vector.extract_strided_slice %57 {offsets = [3, 0, 0], sizes = [1, 2, 2], strides = [1, 1, 1]} : vector<9x2x2xbf16> to vector<1x2x2xbf16>
    %87 = vector.shape_cast %86 : vector<1x2x2xbf16> to vector<2x2xbf16>
    %cst_27 = arith.constant dense<0.000000e+00> : vector<256x2xf32>
    %88 = tpu.matmul %85, %87, %cst_27 {dimension_numbers = #tpu.dot_dimension_numbers<[1], [0], [0], [1], [0, 0, 1, 1], [], []>} : vector<256x2xbf16>, vector<2x2xbf16>, vector<256x2xf32> -> vector<256x2xf32>
    %89 = arith.addf %82, %88 : vector<256x2xf32>
    %90 = vector.extract_strided_slice %25 {offsets = [0, 2, 0], sizes = [16, 16, 2], strides = [1, 1, 1]} : vector<16x24x2xf32> to vector<16x16x2xf32>
    %91 = vector.shape_cast %90 : vector<16x16x2xf32> to vector<256x2xf32>
    %92 = arith.truncf %91 : vector<256x2xf32> to vector<256x2xbf16>
    %93 = vector.extract_strided_slice %57 {offsets = [4, 0, 0], sizes = [1, 2, 2], strides = [1, 1, 1]} : vector<9x2x2xbf16> to vector<1x2x2xbf16>
    %94 = vector.shape_cast %93 : vector<1x2x2xbf16> to vector<2x2xbf16>
    %cst_28 = arith.constant dense<0.000000e+00> : vector<256x2xf32>
    %95 = tpu.matmul %92, %94, %cst_28 {dimension_numbers = #tpu.dot_dimension_numbers<[1], [0], [0], [1], [0, 0, 1, 1], [], []>} : vector<256x2xbf16>, vector<2x2xbf16>, vector<256x2xf32> -> vector<256x2xf32>
    %96 = arith.addf %89, %95 : vector<256x2xf32>
    %97 = vector.extract_strided_slice %25 {offsets = [0, 3, 0], sizes = [16, 16, 2], strides = [1, 1, 1]} : vector<16x24x2xf32> to vector<16x16x2xf32>
    %98 = vector.shape_cast %97 : vector<16x16x2xf32> to vector<256x2xf32>
    %99 = arith.truncf %98 : vector<256x2xf32> to vector<256x2xbf16>
    %100 = vector.extract_strided_slice %57 {offsets = [5, 0, 0], sizes = [1, 2, 2], strides = [1, 1, 1]} : vector<9x2x2xbf16> to vector<1x2x2xbf16>
    %101 = vector.shape_cast %100 : vector<1x2x2xbf16> to vector<2x2xbf16>
    %cst_29 = arith.constant dense<0.000000e+00> : vector<256x2xf32>
    %102 = tpu.matmul %99, %101, %cst_29 {dimension_numbers = #tpu.dot_dimension_numbers<[1], [0], [0], [1], [0, 0, 1, 1], [], []>} : vector<256x2xbf16>, vector<2x2xbf16>, vector<256x2xf32> -> vector<256x2xf32>
    %103 = arith.addf %96, %102 : vector<256x2xf32>
    %cst_30 = arith.constant 0.000000e+00 : f32
    %104 = vector.broadcast %cst_30 : f32 to vector<1x24x2xf32>
    %105 = vector.extract_strided_slice %25 {offsets = [1, 0, 0], sizes = [15, 24, 2], strides = [1, 1, 1]} : vector<16x24x2xf32> to vector<15x24x2xf32>
    %106 = tpu.concatenate %105, %104 in 0 : vector<15x24x2xf32>, vector<1x24x2xf32> -> vector<16x24x2xf32>
    %107 = vector.extract_strided_slice %106 {offsets = [0, 1, 0], sizes = [16, 16, 2], strides = [1, 1, 1]} : vector<16x24x2xf32> to vector<16x16x2xf32>
    %108 = vector.shape_cast %107 : vector<16x16x2xf32> to vector<256x2xf32>
    %109 = arith.truncf %108 : vector<256x2xf32> to vector<256x2xbf16>
    %110 = vector.extract_strided_slice %57 {offsets = [6, 0, 0], sizes = [1, 2, 2], strides = [1, 1, 1]} : vector<9x2x2xbf16> to vector<1x2x2xbf16>
    %111 = vector.shape_cast %110 : vector<1x2x2xbf16> to vector<2x2xbf16>
    %cst_31 = arith.constant dense<0.000000e+00> : vector<256x2xf32>
    %112 = tpu.matmul %109, %111, %cst_31 {dimension_numbers = #tpu.dot_dimension_numbers<[1], [0], [0], [1], [0, 0, 1, 1], [], []>} : vector<256x2xbf16>, vector<2x2xbf16>, vector<256x2xf32> -> vector<256x2xf32>
    %113 = arith.addf %103, %112 : vector<256x2xf32>
    %114 = vector.extract_strided_slice %106 {offsets = [0, 2, 0], sizes = [16, 16, 2], strides = [1, 1, 1]} : vector<16x24x2xf32> to vector<16x16x2xf32>
    %115 = vector.shape_cast %114 : vector<16x16x2xf32> to vector<256x2xf32>
    %116 = arith.truncf %115 : vector<256x2xf32> to vector<256x2xbf16>
    %117 = vector.extract_strided_slice %57 {offsets = [7, 0, 0], sizes = [1, 2, 2], strides = [1, 1, 1]} : vector<9x2x2xbf16> to vector<1x2x2xbf16>
    %118 = vector.shape_cast %117 : vector<1x2x2xbf16> to vector<2x2xbf16>
    %cst_32 = arith.constant dense<0.000000e+00> : vector<256x2xf32>
    %119 = tpu.matmul %116, %118, %cst_32 {dimension_numbers = #tpu.dot_dimension_numbers<[1], [0], [0], [1], [0, 0, 1, 1], [], []>} : vector<256x2xbf16>, vector<2x2xbf16>, vector<256x2xf32> -> vector<256x2xf32>
    %120 = arith.addf %113, %119 : vector<256x2xf32>
    %121 = vector.extract_strided_slice %106 {offsets = [0, 3, 0], sizes = [16, 16, 2], strides = [1, 1, 1]} : vector<16x24x2xf32> to vector<16x16x2xf32>
    %122 = vector.shape_cast %121 : vector<16x16x2xf32> to vector<256x2xf32>
    %123 = arith.truncf %122 : vector<256x2xf32> to vector<256x2xbf16>
    %124 = vector.extract_strided_slice %57 {offsets = [8, 0, 0], sizes = [1, 2, 2], strides = [1, 1, 1]} : vector<9x2x2xbf16> to vector<1x2x2xbf16>
    %125 = vector.shape_cast %124 : vector<1x2x2xbf16> to vector<2x2xbf16>
    %cst_33 = arith.constant dense<0.000000e+00> : vector<256x2xf32>
    %126 = tpu.matmul %123, %125, %cst_33 {dimension_numbers = #tpu.dot_dimension_numbers<[1], [0], [0], [1], [0, 0, 1, 1], [], []>} : vector<256x2xbf16>, vector<2x2xbf16>, vector<256x2xf32> -> vector<256x2xf32>
    %127 = arith.addf %120, %126 : vector<256x2xf32>
    %c0_34 = arith.constant 0 : index
    %c0_35 = arith.constant 0 : index
    %128 = vector.load %arg7[%c0_34, %c0_35] : memref<1x2xf32, #tpu.memory_space<vmem>>, vector<1x2xf32>
    %129 = vector.broadcast %128 : vector<1x2xf32> to vector<256x2xf32>
    %130 = arith.addf %127, %129 : vector<256x2xf32>
    %c0_36 = arith.constant 0 : index
    %c0_37 = arith.constant 0 : index
    %c0_38 = arith.constant 0 : index
    %131 = vector.load %arg8[%c0_36, %c0_37, %c0_38] : memref<25x2x2xbf16, #tpu.memory_space<vmem>>, vector<25x2x2xbf16>
    %cst_39 = arith.constant 0.000000e+00 : f32
    %132 = vector.broadcast %cst_39 : f32 to vector<256x2xf32>
    %cst_40 = arith.constant 0.000000e+00 : f32
    %133 = vector.broadcast %cst_40 : f32 to vector<2x24x2xf32>
    %134 = vector.extract_strided_slice %32 {offsets = [0, 0, 0], sizes = [14, 24, 2], strides = [1, 1, 1]} : vector<16x24x2xf32> to vector<14x24x2xf32>
    %135 = tpu.concatenate %133, %134 in 0 : vector<2x24x2xf32>, vector<14x24x2xf32> -> vector<16x24x2xf32>
    %136 = vector.extract_strided_slice %135 {offsets = [0, 0, 0], sizes = [16, 16, 2], strides = [1, 1, 1]} : vector<16x24x2xf32> to vector<16x16x2xf32>
    %137 = vector.shape_cast %136 : vector<16x16x2xf32> to vector<256x2xf32>
    %138 = arith.truncf %137 : vector<256x2xf32> to vector<256x2xbf16>
    %139 = vector.extract_strided_slice %131 {offsets = [0, 0, 0], sizes = [1, 2, 2], strides = [1, 1, 1]} : vector<25x2x2xbf16> to vector<1x2x2xbf16>
    %140 = vector.shape_cast %139 : vector<1x2x2xbf16> to vector<2x2xbf16>
    %cst_41 = arith.constant dense<0.000000e+00> : vector<256x2xf32>
    %141 = tpu.matmul %138, %140, %cst_41 {dimension_numbers = #tpu.dot_dimension_numbers<[1], [0], [0], [1], [0, 0, 1, 1], [], []>} : vector<256x2xbf16>, vector<2x2xbf16>, vector<256x2xf32> -> vector<256x2xf32>
    %142 = arith.addf %132, %141 : vector<256x2xf32>
    %143 = vector.extract_strided_slice %135 {offsets = [0, 1, 0], sizes = [16, 16, 2], strides = [1, 1, 1]} : vector<16x24x2xf32> to vector<16x16x2xf32>
    %144 = vector.shape_cast %143 : vector<16x16x2xf32> to vector<256x2xf32>
    %145 = arith.truncf %144 : vector<256x2xf32> to vector<256x2xbf16>
    %146 = vector.extract_strided_slice %131 {offsets = [1, 0, 0], sizes = [1, 2, 2], strides = [1, 1, 1]} : vector<25x2x2xbf16> to vector<1x2x2xbf16>
    %147 = vector.shape_cast %146 : vector<1x2x2xbf16> to vector<2x2xbf16>
    %cst_42 = arith.constant dense<0.000000e+00> : vector<256x2xf32>
    %148 = tpu.matmul %145, %147, %cst_42 {dimension_numbers = #tpu.dot_dimension_numbers<[1], [0], [0], [1], [0, 0, 1, 1], [], []>} : vector<256x2xbf16>, vector<2x2xbf16>, vector<256x2xf32> -> vector<256x2xf32>
    %149 = arith.addf %142, %148 : vector<256x2xf32>
    %150 = vector.extract_strided_slice %135 {offsets = [0, 2, 0], sizes = [16, 16, 2], strides = [1, 1, 1]} : vector<16x24x2xf32> to vector<16x16x2xf32>
    %151 = vector.shape_cast %150 : vector<16x16x2xf32> to vector<256x2xf32>
    %152 = arith.truncf %151 : vector<256x2xf32> to vector<256x2xbf16>
    %153 = vector.extract_strided_slice %131 {offsets = [2, 0, 0], sizes = [1, 2, 2], strides = [1, 1, 1]} : vector<25x2x2xbf16> to vector<1x2x2xbf16>
    %154 = vector.shape_cast %153 : vector<1x2x2xbf16> to vector<2x2xbf16>
    %cst_43 = arith.constant dense<0.000000e+00> : vector<256x2xf32>
    %155 = tpu.matmul %152, %154, %cst_43 {dimension_numbers = #tpu.dot_dimension_numbers<[1], [0], [0], [1], [0, 0, 1, 1], [], []>} : vector<256x2xbf16>, vector<2x2xbf16>, vector<256x2xf32> -> vector<256x2xf32>
    %156 = arith.addf %149, %155 : vector<256x2xf32>
    %157 = vector.extract_strided_slice %135 {offsets = [0, 3, 0], sizes = [16, 16, 2], strides = [1, 1, 1]} : vector<16x24x2xf32> to vector<16x16x2xf32>
    %158 = vector.shape_cast %157 : vector<16x16x2xf32> to vector<256x2xf32>
    %159 = arith.truncf %158 : vector<256x2xf32> to vector<256x2xbf16>
    %160 = vector.extract_strided_slice %131 {offsets = [3, 0, 0], sizes = [1, 2, 2], strides = [1, 1, 1]} : vector<25x2x2xbf16> to vector<1x2x2xbf16>
    %161 = vector.shape_cast %160 : vector<1x2x2xbf16> to vector<2x2xbf16>
    %cst_44 = arith.constant dense<0.000000e+00> : vector<256x2xf32>
    %162 = tpu.matmul %159, %161, %cst_44 {dimension_numbers = #tpu.dot_dimension_numbers<[1], [0], [0], [1], [0, 0, 1, 1], [], []>} : vector<256x2xbf16>, vector<2x2xbf16>, vector<256x2xf32> -> vector<256x2xf32>
    %163 = arith.addf %156, %162 : vector<256x2xf32>
    %164 = vector.extract_strided_slice %135 {offsets = [0, 4, 0], sizes = [16, 16, 2], strides = [1, 1, 1]} : vector<16x24x2xf32> to vector<16x16x2xf32>
    %165 = vector.shape_cast %164 : vector<16x16x2xf32> to vector<256x2xf32>
    %166 = arith.truncf %165 : vector<256x2xf32> to vector<256x2xbf16>
    %167 = vector.extract_strided_slice %131 {offsets = [4, 0, 0], sizes = [1, 2, 2], strides = [1, 1, 1]} : vector<25x2x2xbf16> to vector<1x2x2xbf16>
    %168 = vector.shape_cast %167 : vector<1x2x2xbf16> to vector<2x2xbf16>
    %cst_45 = arith.constant dense<0.000000e+00> : vector<256x2xf32>
    %169 = tpu.matmul %166, %168, %cst_45 {dimension_numbers = #tpu.dot_dimension_numbers<[1], [0], [0], [1], [0, 0, 1, 1], [], []>} : vector<256x2xbf16>, vector<2x2xbf16>, vector<256x2xf32> -> vector<256x2xf32>
    %170 = arith.addf %163, %169 : vector<256x2xf32>
    %cst_46 = arith.constant 0.000000e+00 : f32
    %171 = vector.broadcast %cst_46 : f32 to vector<1x24x2xf32>
    %172 = vector.extract_strided_slice %32 {offsets = [0, 0, 0], sizes = [15, 24, 2], strides = [1, 1, 1]} : vector<16x24x2xf32> to vector<15x24x2xf32>
    %173 = tpu.concatenate %171, %172 in 0 : vector<1x24x2xf32>, vector<15x24x2xf32> -> vector<16x24x2xf32>
    %174 = vector.extract_strided_slice %173 {offsets = [0, 0, 0], sizes = [16, 16, 2], strides = [1, 1, 1]} : vector<16x24x2xf32> to vector<16x16x2xf32>
    %175 = vector.shape_cast %174 : vector<16x16x2xf32> to vector<256x2xf32>
    %176 = arith.truncf %175 : vector<256x2xf32> to vector<256x2xbf16>
    %177 = vector.extract_strided_slice %131 {offsets = [5, 0, 0], sizes = [1, 2, 2], strides = [1, 1, 1]} : vector<25x2x2xbf16> to vector<1x2x2xbf16>
    %178 = vector.shape_cast %177 : vector<1x2x2xbf16> to vector<2x2xbf16>
    %cst_47 = arith.constant dense<0.000000e+00> : vector<256x2xf32>
    %179 = tpu.matmul %176, %178, %cst_47 {dimension_numbers = #tpu.dot_dimension_numbers<[1], [0], [0], [1], [0, 0, 1, 1], [], []>} : vector<256x2xbf16>, vector<2x2xbf16>, vector<256x2xf32> -> vector<256x2xf32>
    %180 = arith.addf %170, %179 : vector<256x2xf32>
    %181 = vector.extract_strided_slice %173 {offsets = [0, 1, 0], sizes = [16, 16, 2], strides = [1, 1, 1]} : vector<16x24x2xf32> to vector<16x16x2xf32>
    %182 = vector.shape_cast %181 : vector<16x16x2xf32> to vector<256x2xf32>
    %183 = arith.truncf %182 : vector<256x2xf32> to vector<256x2xbf16>
    %184 = vector.extract_strided_slice %131 {offsets = [6, 0, 0], sizes = [1, 2, 2], strides = [1, 1, 1]} : vector<25x2x2xbf16> to vector<1x2x2xbf16>
    %185 = vector.shape_cast %184 : vector<1x2x2xbf16> to vector<2x2xbf16>
    %cst_48 = arith.constant dense<0.000000e+00> : vector<256x2xf32>
    %186 = tpu.matmul %183, %185, %cst_48 {dimension_numbers = #tpu.dot_dimension_numbers<[1], [0], [0], [1], [0, 0, 1, 1], [], []>} : vector<256x2xbf16>, vector<2x2xbf16>, vector<256x2xf32> -> vector<256x2xf32>
    %187 = arith.addf %180, %186 : vector<256x2xf32>
    %188 = vector.extract_strided_slice %173 {offsets = [0, 2, 0], sizes = [16, 16, 2], strides = [1, 1, 1]} : vector<16x24x2xf32> to vector<16x16x2xf32>
    %189 = vector.shape_cast %188 : vector<16x16x2xf32> to vector<256x2xf32>
    %190 = arith.truncf %189 : vector<256x2xf32> to vector<256x2xbf16>
    %191 = vector.extract_strided_slice %131 {offsets = [7, 0, 0], sizes = [1, 2, 2], strides = [1, 1, 1]} : vector<25x2x2xbf16> to vector<1x2x2xbf16>
    %192 = vector.shape_cast %191 : vector<1x2x2xbf16> to vector<2x2xbf16>
    %cst_49 = arith.constant dense<0.000000e+00> : vector<256x2xf32>
    %193 = tpu.matmul %190, %192, %cst_49 {dimension_numbers = #tpu.dot_dimension_numbers<[1], [0], [0], [1], [0, 0, 1, 1], [], []>} : vector<256x2xbf16>, vector<2x2xbf16>, vector<256x2xf32> -> vector<256x2xf32>
    %194 = arith.addf %187, %193 : vector<256x2xf32>
    %195 = vector.extract_strided_slice %173 {offsets = [0, 3, 0], sizes = [16, 16, 2], strides = [1, 1, 1]} : vector<16x24x2xf32> to vector<16x16x2xf32>
    %196 = vector.shape_cast %195 : vector<16x16x2xf32> to vector<256x2xf32>
    %197 = arith.truncf %196 : vector<256x2xf32> to vector<256x2xbf16>
    %198 = vector.extract_strided_slice %131 {offsets = [8, 0, 0], sizes = [1, 2, 2], strides = [1, 1, 1]} : vector<25x2x2xbf16> to vector<1x2x2xbf16>
    %199 = vector.shape_cast %198 : vector<1x2x2xbf16> to vector<2x2xbf16>
    %cst_50 = arith.constant dense<0.000000e+00> : vector<256x2xf32>
    %200 = tpu.matmul %197, %199, %cst_50 {dimension_numbers = #tpu.dot_dimension_numbers<[1], [0], [0], [1], [0, 0, 1, 1], [], []>} : vector<256x2xbf16>, vector<2x2xbf16>, vector<256x2xf32> -> vector<256x2xf32>
    %201 = arith.addf %194, %200 : vector<256x2xf32>
    %202 = vector.extract_strided_slice %173 {offsets = [0, 4, 0], sizes = [16, 16, 2], strides = [1, 1, 1]} : vector<16x24x2xf32> to vector<16x16x2xf32>
    %203 = vector.shape_cast %202 : vector<16x16x2xf32> to vector<256x2xf32>
    %204 = arith.truncf %203 : vector<256x2xf32> to vector<256x2xbf16>
    %205 = vector.extract_strided_slice %131 {offsets = [9, 0, 0], sizes = [1, 2, 2], strides = [1, 1, 1]} : vector<25x2x2xbf16> to vector<1x2x2xbf16>
    %206 = vector.shape_cast %205 : vector<1x2x2xbf16> to vector<2x2xbf16>
    %cst_51 = arith.constant dense<0.000000e+00> : vector<256x2xf32>
    %207 = tpu.matmul %204, %206, %cst_51 {dimension_numbers = #tpu.dot_dimension_numbers<[1], [0], [0], [1], [0, 0, 1, 1], [], []>} : vector<256x2xbf16>, vector<2x2xbf16>, vector<256x2xf32> -> vector<256x2xf32>
    %208 = arith.addf %201, %207 : vector<256x2xf32>
    %209 = vector.extract_strided_slice %32 {offsets = [0, 0, 0], sizes = [16, 16, 2], strides = [1, 1, 1]} : vector<16x24x2xf32> to vector<16x16x2xf32>
    %210 = vector.shape_cast %209 : vector<16x16x2xf32> to vector<256x2xf32>
    %211 = arith.truncf %210 : vector<256x2xf32> to vector<256x2xbf16>
    %212 = vector.extract_strided_slice %131 {offsets = [10, 0, 0], sizes = [1, 2, 2], strides = [1, 1, 1]} : vector<25x2x2xbf16> to vector<1x2x2xbf16>
    %213 = vector.shape_cast %212 : vector<1x2x2xbf16> to vector<2x2xbf16>
    %cst_52 = arith.constant dense<0.000000e+00> : vector<256x2xf32>
    %214 = tpu.matmul %211, %213, %cst_52 {dimension_numbers = #tpu.dot_dimension_numbers<[1], [0], [0], [1], [0, 0, 1, 1], [], []>} : vector<256x2xbf16>, vector<2x2xbf16>, vector<256x2xf32> -> vector<256x2xf32>
    %215 = arith.addf %208, %214 : vector<256x2xf32>
    %216 = vector.extract_strided_slice %32 {offsets = [0, 1, 0], sizes = [16, 16, 2], strides = [1, 1, 1]} : vector<16x24x2xf32> to vector<16x16x2xf32>
    %217 = vector.shape_cast %216 : vector<16x16x2xf32> to vector<256x2xf32>
    %218 = arith.truncf %217 : vector<256x2xf32> to vector<256x2xbf16>
    %219 = vector.extract_strided_slice %131 {offsets = [11, 0, 0], sizes = [1, 2, 2], strides = [1, 1, 1]} : vector<25x2x2xbf16> to vector<1x2x2xbf16>
    %220 = vector.shape_cast %219 : vector<1x2x2xbf16> to vector<2x2xbf16>
    %cst_53 = arith.constant dense<0.000000e+00> : vector<256x2xf32>
    %221 = tpu.matmul %218, %220, %cst_53 {dimension_numbers = #tpu.dot_dimension_numbers<[1], [0], [0], [1], [0, 0, 1, 1], [], []>} : vector<256x2xbf16>, vector<2x2xbf16>, vector<256x2xf32> -> vector<256x2xf32>
    %222 = arith.addf %215, %221 : vector<256x2xf32>
    %223 = vector.extract_strided_slice %32 {offsets = [0, 2, 0], sizes = [16, 16, 2], strides = [1, 1, 1]} : vector<16x24x2xf32> to vector<16x16x2xf32>
    %224 = vector.shape_cast %223 : vector<16x16x2xf32> to vector<256x2xf32>
    %225 = arith.truncf %224 : vector<256x2xf32> to vector<256x2xbf16>
    %226 = vector.extract_strided_slice %131 {offsets = [12, 0, 0], sizes = [1, 2, 2], strides = [1, 1, 1]} : vector<25x2x2xbf16> to vector<1x2x2xbf16>
    %227 = vector.shape_cast %226 : vector<1x2x2xbf16> to vector<2x2xbf16>
    %cst_54 = arith.constant dense<0.000000e+00> : vector<256x2xf32>
    %228 = tpu.matmul %225, %227, %cst_54 {dimension_numbers = #tpu.dot_dimension_numbers<[1], [0], [0], [1], [0, 0, 1, 1], [], []>} : vector<256x2xbf16>, vector<2x2xbf16>, vector<256x2xf32> -> vector<256x2xf32>
    %229 = arith.addf %222, %228 : vector<256x2xf32>
    %230 = vector.extract_strided_slice %32 {offsets = [0, 3, 0], sizes = [16, 16, 2], strides = [1, 1, 1]} : vector<16x24x2xf32> to vector<16x16x2xf32>
    %231 = vector.shape_cast %230 : vector<16x16x2xf32> to vector<256x2xf32>
    %232 = arith.truncf %231 : vector<256x2xf32> to vector<256x2xbf16>
    %233 = vector.extract_strided_slice %131 {offsets = [13, 0, 0], sizes = [1, 2, 2], strides = [1, 1, 1]} : vector<25x2x2xbf16> to vector<1x2x2xbf16>
    %234 = vector.shape_cast %233 : vector<1x2x2xbf16> to vector<2x2xbf16>
    %cst_55 = arith.constant dense<0.000000e+00> : vector<256x2xf32>
    %235 = tpu.matmul %232, %234, %cst_55 {dimension_numbers = #tpu.dot_dimension_numbers<[1], [0], [0], [1], [0, 0, 1, 1], [], []>} : vector<256x2xbf16>, vector<2x2xbf16>, vector<256x2xf32> -> vector<256x2xf32>
    %236 = arith.addf %229, %235 : vector<256x2xf32>
    %237 = vector.extract_strided_slice %32 {offsets = [0, 4, 0], sizes = [16, 16, 2], strides = [1, 1, 1]} : vector<16x24x2xf32> to vector<16x16x2xf32>
    %238 = vector.shape_cast %237 : vector<16x16x2xf32> to vector<256x2xf32>
    %239 = arith.truncf %238 : vector<256x2xf32> to vector<256x2xbf16>
    %240 = vector.extract_strided_slice %131 {offsets = [14, 0, 0], sizes = [1, 2, 2], strides = [1, 1, 1]} : vector<25x2x2xbf16> to vector<1x2x2xbf16>
    %241 = vector.shape_cast %240 : vector<1x2x2xbf16> to vector<2x2xbf16>
    %cst_56 = arith.constant dense<0.000000e+00> : vector<256x2xf32>
    %242 = tpu.matmul %239, %241, %cst_56 {dimension_numbers = #tpu.dot_dimension_numbers<[1], [0], [0], [1], [0, 0, 1, 1], [], []>} : vector<256x2xbf16>, vector<2x2xbf16>, vector<256x2xf32> -> vector<256x2xf32>
    %243 = arith.addf %236, %242 : vector<256x2xf32>
    %cst_57 = arith.constant 0.000000e+00 : f32
    %244 = vector.broadcast %cst_57 : f32 to vector<1x24x2xf32>
    %245 = vector.extract_strided_slice %32 {offsets = [1, 0, 0], sizes = [15, 24, 2], strides = [1, 1, 1]} : vector<16x24x2xf32> to vector<15x24x2xf32>
    %246 = tpu.concatenate %245, %244 in 0 : vector<15x24x2xf32>, vector<1x24x2xf32> -> vector<16x24x2xf32>
    %247 = vector.extract_strided_slice %246 {offsets = [0, 0, 0], sizes = [16, 16, 2], strides = [1, 1, 1]} : vector<16x24x2xf32> to vector<16x16x2xf32>
    %248 = vector.shape_cast %247 : vector<16x16x2xf32> to vector<256x2xf32>
    %249 = arith.truncf %248 : vector<256x2xf32> to vector<256x2xbf16>
    %250 = vector.extract_strided_slice %131 {offsets = [15, 0, 0], sizes = [1, 2, 2], strides = [1, 1, 1]} : vector<25x2x2xbf16> to vector<1x2x2xbf16>
    %251 = vector.shape_cast %250 : vector<1x2x2xbf16> to vector<2x2xbf16>
    %cst_58 = arith.constant dense<0.000000e+00> : vector<256x2xf32>
    %252 = tpu.matmul %249, %251, %cst_58 {dimension_numbers = #tpu.dot_dimension_numbers<[1], [0], [0], [1], [0, 0, 1, 1], [], []>} : vector<256x2xbf16>, vector<2x2xbf16>, vector<256x2xf32> -> vector<256x2xf32>
    %253 = arith.addf %243, %252 : vector<256x2xf32>
    %254 = vector.extract_strided_slice %246 {offsets = [0, 1, 0], sizes = [16, 16, 2], strides = [1, 1, 1]} : vector<16x24x2xf32> to vector<16x16x2xf32>
    %255 = vector.shape_cast %254 : vector<16x16x2xf32> to vector<256x2xf32>
    %256 = arith.truncf %255 : vector<256x2xf32> to vector<256x2xbf16>
    %257 = vector.extract_strided_slice %131 {offsets = [16, 0, 0], sizes = [1, 2, 2], strides = [1, 1, 1]} : vector<25x2x2xbf16> to vector<1x2x2xbf16>
    %258 = vector.shape_cast %257 : vector<1x2x2xbf16> to vector<2x2xbf16>
    %cst_59 = arith.constant dense<0.000000e+00> : vector<256x2xf32>
    %259 = tpu.matmul %256, %258, %cst_59 {dimension_numbers = #tpu.dot_dimension_numbers<[1], [0], [0], [1], [0, 0, 1, 1], [], []>} : vector<256x2xbf16>, vector<2x2xbf16>, vector<256x2xf32> -> vector<256x2xf32>
    %260 = arith.addf %253, %259 : vector<256x2xf32>
    %261 = vector.extract_strided_slice %246 {offsets = [0, 2, 0], sizes = [16, 16, 2], strides = [1, 1, 1]} : vector<16x24x2xf32> to vector<16x16x2xf32>
    %262 = vector.shape_cast %261 : vector<16x16x2xf32> to vector<256x2xf32>
    %263 = arith.truncf %262 : vector<256x2xf32> to vector<256x2xbf16>
    %264 = vector.extract_strided_slice %131 {offsets = [17, 0, 0], sizes = [1, 2, 2], strides = [1, 1, 1]} : vector<25x2x2xbf16> to vector<1x2x2xbf16>
    %265 = vector.shape_cast %264 : vector<1x2x2xbf16> to vector<2x2xbf16>
    %cst_60 = arith.constant dense<0.000000e+00> : vector<256x2xf32>
    %266 = tpu.matmul %263, %265, %cst_60 {dimension_numbers = #tpu.dot_dimension_numbers<[1], [0], [0], [1], [0, 0, 1, 1], [], []>} : vector<256x2xbf16>, vector<2x2xbf16>, vector<256x2xf32> -> vector<256x2xf32>
    %267 = arith.addf %260, %266 : vector<256x2xf32>
    %268 = vector.extract_strided_slice %246 {offsets = [0, 3, 0], sizes = [16, 16, 2], strides = [1, 1, 1]} : vector<16x24x2xf32> to vector<16x16x2xf32>
    %269 = vector.shape_cast %268 : vector<16x16x2xf32> to vector<256x2xf32>
    %270 = arith.truncf %269 : vector<256x2xf32> to vector<256x2xbf16>
    %271 = vector.extract_strided_slice %131 {offsets = [18, 0, 0], sizes = [1, 2, 2], strides = [1, 1, 1]} : vector<25x2x2xbf16> to vector<1x2x2xbf16>
    %272 = vector.shape_cast %271 : vector<1x2x2xbf16> to vector<2x2xbf16>
    %cst_61 = arith.constant dense<0.000000e+00> : vector<256x2xf32>
    %273 = tpu.matmul %270, %272, %cst_61 {dimension_numbers = #tpu.dot_dimension_numbers<[1], [0], [0], [1], [0, 0, 1, 1], [], []>} : vector<256x2xbf16>, vector<2x2xbf16>, vector<256x2xf32> -> vector<256x2xf32>
    %274 = arith.addf %267, %273 : vector<256x2xf32>
    %275 = vector.extract_strided_slice %246 {offsets = [0, 4, 0], sizes = [16, 16, 2], strides = [1, 1, 1]} : vector<16x24x2xf32> to vector<16x16x2xf32>
    %276 = vector.shape_cast %275 : vector<16x16x2xf32> to vector<256x2xf32>
    %277 = arith.truncf %276 : vector<256x2xf32> to vector<256x2xbf16>
    %278 = vector.extract_strided_slice %131 {offsets = [19, 0, 0], sizes = [1, 2, 2], strides = [1, 1, 1]} : vector<25x2x2xbf16> to vector<1x2x2xbf16>
    %279 = vector.shape_cast %278 : vector<1x2x2xbf16> to vector<2x2xbf16>
    %cst_62 = arith.constant dense<0.000000e+00> : vector<256x2xf32>
    %280 = tpu.matmul %277, %279, %cst_62 {dimension_numbers = #tpu.dot_dimension_numbers<[1], [0], [0], [1], [0, 0, 1, 1], [], []>} : vector<256x2xbf16>, vector<2x2xbf16>, vector<256x2xf32> -> vector<256x2xf32>
    %281 = arith.addf %274, %280 : vector<256x2xf32>
    %cst_63 = arith.constant 0.000000e+00 : f32
    %282 = vector.broadcast %cst_63 : f32 to vector<2x24x2xf32>
    %283 = vector.extract_strided_slice %32 {offsets = [2, 0, 0], sizes = [14, 24, 2], strides = [1, 1, 1]} : vector<16x24x2xf32> to vector<14x24x2xf32>
    %284 = tpu.concatenate %283, %282 in 0 : vector<14x24x2xf32>, vector<2x24x2xf32> -> vector<16x24x2xf32>
    %285 = vector.extract_strided_slice %284 {offsets = [0, 0, 0], sizes = [16, 16, 2], strides = [1, 1, 1]} : vector<16x24x2xf32> to vector<16x16x2xf32>
    %286 = vector.shape_cast %285 : vector<16x16x2xf32> to vector<256x2xf32>
    %287 = arith.truncf %286 : vector<256x2xf32> to vector<256x2xbf16>
    %288 = vector.extract_strided_slice %131 {offsets = [20, 0, 0], sizes = [1, 2, 2], strides = [1, 1, 1]} : vector<25x2x2xbf16> to vector<1x2x2xbf16>
    %289 = vector.shape_cast %288 : vector<1x2x2xbf16> to vector<2x2xbf16>
    %cst_64 = arith.constant dense<0.000000e+00> : vector<256x2xf32>
    %290 = tpu.matmul %287, %289, %cst_64 {dimension_numbers = #tpu.dot_dimension_numbers<[1], [0], [0], [1], [0, 0, 1, 1], [], []>} : vector<256x2xbf16>, vector<2x2xbf16>, vector<256x2xf32> -> vector<256x2xf32>
    %291 = arith.addf %281, %290 : vector<256x2xf32>
    %292 = vector.extract_strided_slice %284 {offsets = [0, 1, 0], sizes = [16, 16, 2], strides = [1, 1, 1]} : vector<16x24x2xf32> to vector<16x16x2xf32>
    %293 = vector.shape_cast %292 : vector<16x16x2xf32> to vector<256x2xf32>
    %294 = arith.truncf %293 : vector<256x2xf32> to vector<256x2xbf16>
    %295 = vector.extract_strided_slice %131 {offsets = [21, 0, 0], sizes = [1, 2, 2], strides = [1, 1, 1]} : vector<25x2x2xbf16> to vector<1x2x2xbf16>
    %296 = vector.shape_cast %295 : vector<1x2x2xbf16> to vector<2x2xbf16>
    %cst_65 = arith.constant dense<0.000000e+00> : vector<256x2xf32>
    %297 = tpu.matmul %294, %296, %cst_65 {dimension_numbers = #tpu.dot_dimension_numbers<[1], [0], [0], [1], [0, 0, 1, 1], [], []>} : vector<256x2xbf16>, vector<2x2xbf16>, vector<256x2xf32> -> vector<256x2xf32>
    %298 = arith.addf %291, %297 : vector<256x2xf32>
    %299 = vector.extract_strided_slice %284 {offsets = [0, 2, 0], sizes = [16, 16, 2], strides = [1, 1, 1]} : vector<16x24x2xf32> to vector<16x16x2xf32>
    %300 = vector.shape_cast %299 : vector<16x16x2xf32> to vector<256x2xf32>
    %301 = arith.truncf %300 : vector<256x2xf32> to vector<256x2xbf16>
    %302 = vector.extract_strided_slice %131 {offsets = [22, 0, 0], sizes = [1, 2, 2], strides = [1, 1, 1]} : vector<25x2x2xbf16> to vector<1x2x2xbf16>
    %303 = vector.shape_cast %302 : vector<1x2x2xbf16> to vector<2x2xbf16>
    %cst_66 = arith.constant dense<0.000000e+00> : vector<256x2xf32>
    %304 = tpu.matmul %301, %303, %cst_66 {dimension_numbers = #tpu.dot_dimension_numbers<[1], [0], [0], [1], [0, 0, 1, 1], [], []>} : vector<256x2xbf16>, vector<2x2xbf16>, vector<256x2xf32> -> vector<256x2xf32>
    %305 = arith.addf %298, %304 : vector<256x2xf32>
    %306 = vector.extract_strided_slice %284 {offsets = [0, 3, 0], sizes = [16, 16, 2], strides = [1, 1, 1]} : vector<16x24x2xf32> to vector<16x16x2xf32>
    %307 = vector.shape_cast %306 : vector<16x16x2xf32> to vector<256x2xf32>
    %308 = arith.truncf %307 : vector<256x2xf32> to vector<256x2xbf16>
    %309 = vector.extract_strided_slice %131 {offsets = [23, 0, 0], sizes = [1, 2, 2], strides = [1, 1, 1]} : vector<25x2x2xbf16> to vector<1x2x2xbf16>
    %310 = vector.shape_cast %309 : vector<1x2x2xbf16> to vector<2x2xbf16>
    %cst_67 = arith.constant dense<0.000000e+00> : vector<256x2xf32>
    %311 = tpu.matmul %308, %310, %cst_67 {dimension_numbers = #tpu.dot_dimension_numbers<[1], [0], [0], [1], [0, 0, 1, 1], [], []>} : vector<256x2xbf16>, vector<2x2xbf16>, vector<256x2xf32> -> vector<256x2xf32>
    %312 = arith.addf %305, %311 : vector<256x2xf32>
    %313 = vector.extract_strided_slice %284 {offsets = [0, 4, 0], sizes = [16, 16, 2], strides = [1, 1, 1]} : vector<16x24x2xf32> to vector<16x16x2xf32>
    %314 = vector.shape_cast %313 : vector<16x16x2xf32> to vector<256x2xf32>
    %315 = arith.truncf %314 : vector<256x2xf32> to vector<256x2xbf16>
    %316 = vector.extract_strided_slice %131 {offsets = [24, 0, 0], sizes = [1, 2, 2], strides = [1, 1, 1]} : vector<25x2x2xbf16> to vector<1x2x2xbf16>
    %317 = vector.shape_cast %316 : vector<1x2x2xbf16> to vector<2x2xbf16>
    %cst_68 = arith.constant dense<0.000000e+00> : vector<256x2xf32>
    %318 = tpu.matmul %315, %317, %cst_68 {dimension_numbers = #tpu.dot_dimension_numbers<[1], [0], [0], [1], [0, 0, 1, 1], [], []>} : vector<256x2xbf16>, vector<2x2xbf16>, vector<256x2xf32> -> vector<256x2xf32>
    %319 = arith.addf %312, %318 : vector<256x2xf32>
    %c0_69 = arith.constant 0 : index
    %c0_70 = arith.constant 0 : index
    %320 = vector.load %arg9[%c0_69, %c0_70] : memref<1x2xf32, #tpu.memory_space<vmem>>, vector<1x2xf32>
    %321 = vector.broadcast %320 : vector<1x2xf32> to vector<256x2xf32>
    %322 = arith.addf %319, %321 : vector<256x2xf32>
    %323 = tpu.concatenate %18, %130, %322, %56 in 1 : vector<256x2xf32>, vector<256x2xf32>, vector<256x2xf32>, vector<256x2xf32> -> vector<256x8xf32>
    %324 = vector.shape_cast %323 : vector<256x8xf32> to vector<1x16x16x8xf32>
    %c0_71 = arith.constant 0 : index
    %c0_72 = arith.constant 0 : index
    %c0_73 = arith.constant 0 : index
    %c0_74 = arith.constant 0 : index
    %325 = vector.load %arg10[%c0_71, %c0_72, %c0_73, %c0_74] : memref<1x16x16x8xf32, #tpu.memory_space<vmem>>, vector<1x16x16x8xf32>
    tpu.vector_store %arg10[%c0_71, %c0_72, %c0_73, %c0_74], %324 {strides = array<i32>} : memref<1x16x16x8xf32, #tpu.memory_space<vmem>>, vector<1x16x16x8xf32>,
    return
  }
  func.func @transform_0(%arg0: i32) -> (i32, i32, i32, i32) {
    %c0_i32 = arith.constant 0 : i32
    %c0_i32_0 = arith.constant 0 : i32
    %c0_i32_1 = arith.constant 0 : i32
    %c0_i32_2 = arith.constant 0 : i32
    return %arg0, %c0_i32, %c0_i32_0, %c0_i32_1 : i32, i32, i32, i32
  }
  func.func @transform_1(%arg0: i32) -> (i32, i32) {
    %c0_i32 = arith.constant 0 : i32
    %c0_i32_0 = arith.constant 0 : i32
    %c0_i32_1 = arith.constant 0 : i32
    return %c0_i32, %c0_i32_0 : i32, i32
  }
  func.func @transform_2(%arg0: i32) -> (i32, i32) {
    %c0_i32 = arith.constant 0 : i32
    %c0_i32_0 = arith.constant 0 : i32
    %c0_i32_1 = arith.constant 0 : i32
    return %c0_i32, %c0_i32_0 : i32, i32
  }
  func.func @transform_3(%arg0: i32) -> (i32, i32) {
    %c0_i32 = arith.constant 0 : i32
    %c0_i32_0 = arith.constant 0 : i32
    %c0_i32_1 = arith.constant 0 : i32
    return %c0_i32, %c0_i32_0 : i32, i32
  }
  func.func @transform_4(%arg0: i32) -> (i32, i32) {
    %c0_i32 = arith.constant 0 : i32
    %c0_i32_0 = arith.constant 0 : i32
    %c0_i32_1 = arith.constant 0 : i32
    return %c0_i32, %c0_i32_0 : i32, i32
  }
  func.func @transform_5(%arg0: i32) -> (i32, i32, i32) {
    %c0_i32 = arith.constant 0 : i32
    %c0_i32_0 = arith.constant 0 : i32
    %c0_i32_1 = arith.constant 0 : i32
    %c0_i32_2 = arith.constant 0 : i32
    return %c0_i32, %c0_i32_0, %c0_i32_1 : i32, i32, i32
  }
  func.func @transform_6(%arg0: i32) -> (i32, i32) {
    %c0_i32 = arith.constant 0 : i32
    %c0_i32_0 = arith.constant 0 : i32
    %c0_i32_1 = arith.constant 0 : i32
    return %c0_i32, %c0_i32_0 : i32, i32
  }
  func.func @transform_7(%arg0: i32) -> (i32, i32, i32) {
    %c0_i32 = arith.constant 0 : i32
    %c0_i32_0 = arith.constant 0 : i32
    %c0_i32_1 = arith.constant 0 : i32
    %c0_i32_2 = arith.constant 0 : i32
    return %c0_i32, %c0_i32_0, %c0_i32_1 : i32, i32, i32
  }
  func.func @transform_8(%arg0: i32) -> (i32, i32) {
    %c0_i32 = arith.constant 0 : i32
    %c0_i32_0 = arith.constant 0 : i32
    %c0_i32_1 = arith.constant 0 : i32
    return %c0_i32, %c0_i32_0 : i32, i32
  }
  func.func @transform_9(%arg0: i32) -> (i32, i32, i32, i32) {
    %c0_i32 = arith.constant 0 : i32
    %c0_i32_0 = arith.constant 0 : i32
    %c0_i32_1 = arith.constant 0 : i32
    %c0_i32_2 = arith.constant 0 : i32
    return %arg0, %c0_i32, %c0_i32_0, %c0_i32_1 : i32, i32, i32, i32
  }
}

</mosaic_0001>

<bundles_post_ra>
// kernel: inception_block_forward.1
= control target key start
LH: loop header
LB: loop body
LE: loop exit
PB: predicated region body
PF: predicated region fallthrough
CT: control target
= control target key end

     0   :  { %s10162_s30 = smov 0   ;;  %s17050_s0 = inlined_call_operand.vmem [shape: f32[2,16,24,4], index: 0, kind: input, shape index: {}]   ;;  %s17051_s1 = inlined_call_operand.vmem [shape: bf16[4,6], index: 1, kind: input, shape index: {}]   ;;  %s17052_s2 = inlined_call_operand.vmem [shape: f32[1,6], index: 2, kind: input, shape index: {}]   ;;  %s17053_s3 = inlined_call_operand.vmem [shape: bf16[4,2], index: 3, kind: input, shape index: {}]   ;;  %s17054_s4 = inlined_call_operand.vmem [shape: f32[1,2], index: 4, kind: input, shape index: {}]   ;;  %s17055_s5 = inlined_call_operand.vmem [shape: bf16[9,2,2], index: 5, kind: input, shape index: {}]   ;;  %s17056_s6 = inlined_call_operand.vmem [shape: f32[1,2], index: 6, kind: input, shape index: {}]   ;;  %s17057_s7 = inlined_call_operand.vmem [shape: bf16[25,2,2], index: 7, kind: input, shape index: {}]   ;;  %s17058_s8 = inlined_call_operand.vmem [shape: f32[1,2], index: 8, kind: input, shape index: {}]   ;;  %s17059_s9 = inlined_call_operand.vmem [shape: f32[2,16,16,8], index: 9, kind: output, shape index: {}]  }
   0x1 LB: > { %s9325_s10 = sadd.s32 4294967295, %s10103_s30   ;;  %p9329_p0 = scmp.ge.s32.totalorder %s10103_s30, 1  ;;  %s10103_s30 = sphi %s10162_s30, %s19_s30  }
   0x2   : > { %p287_p1 = scmp.lt.s32.totalorder %s10103_s30, 3 }
   0x4   : > { %p288_p2 = pnand %p9329_p0, %p287_p1 }
   0x6   : > { %291 = sbr.rel (%p288_p2) target bundleno = 2920 (0xb68), region = 56 }
   0xb   : > { %v419_v0 = vld [vmem:[%s17051_s1] sm:$0x3]  ;;  %vm497_vm0 = vcmask 1041408   ;;  %p323_p3 = scmp.lt.s32.totalorder %s9325_s10, 1  ;;  %v382_v4 = vlaneseq  ;;  %vm424_vm1 = vcmask 31744   ;;  %vm1085_vm4 = vcmask 1046528  }
   0xc   : > { %v499_v1 = vsel %vm497_vm0, %v419_v0, 0  ;;  %v1614_v2 = vld [vmem:[%s17053_s3] sm:$0x3]  ;;  %vm678_vm5 = vcmask 1045504   ;;  %vm2434_vm6 = vcmask 1044480   ;;  %s10105_s21 = smov 126  }
   0xd   : > { %508 = vmatpush.bf16.msra.mxu0 %v499_v1  ;;  %9917 = vmatpush.bf16.msra.mxu1 %v499_v1  ;;  %s18943_s10 = smov (!%p323_p3, %s9325_s10), 1  ;;  %v1668_v3 = vsel %vm497_vm0, %v1614_v2, 0  ;;  %v10188_v7 = vshrl.u32 %v382_v4, 7  ;;  %vm5295_vm7 = vcmask 1043456   ;;  %vm2201_vm8 = vcmask 1040384   ;;  %s10107_s19 = smov 124  }
   0xe   : > { %9918 = vmatpush.bf16.msra.mxu2 %v499_v1  ;;  %s9920_s15 = smul.u32 384, %s18943_s10  ;;  %9919 = vmatpush.bf16.msra.mxu3 %v499_v1  ;;  %vm2152_vm9 = vcmask 15360   ;;  %s10109_s20 = smov 6   ;;  %vm9204_vm10 = vcmask 48128   ;;  %vm9237_vm11 = vcmask 64512  }
   0xf   : > { %17449 = vst [vmem:[#allocation2_spill] sm:$0xff] %v10188_v7  ;;  %vm386_vm2 = vcmp.ge.s32.totalorder %v10188_v7, 2  ;;  %v10199_v12 = vadd.s32 16, %v10188_v7  ;;  %s10110_s23 = smov 2   ;;  %s10111_s29 = smov 4  }
  0x10   : > { %s10182_s18 = scalar_lea.vmem %s17050_s0, %s9920_s15  ;;  %s9916_s11 = sshll.u32 %s18943_s10, 8 }
  0x11   : > { %1677 = vmatpush.bf16.msrb.mxu1 %v1668_v3  ;;  %v334_v5 = vld [vmem:[%s10182_s18] sm:$0xff]  ;;  %v10186_v6 = vld [vmem:[%s10182_s18 + $0x8] sm:$0xff]  ;;  %v336_v17 = vld [vmem:[%s10182_s18 + $0x10] sm:$0xff]  ;;  %vm391_vm3 = vcmp.lt.s32.totalorder %v10199_v12, 18  ;;  %s16771_s14 = scalar_lea.vmem %s17059_s9, %s9916_s11 }
  0x12   : > { %v395_v8 = vpack.c.bf16 %v10186_v6, %v334_v5  ;;  %v370_v9 = vld [vmem:[%s10182_s18 + $0x120] sm:$0xff]  ;;  %v10194_v10 = vld [vmem:[%s10182_s18 + $0x128] sm:$0xff]  ;;  %v893_v14 = vsel %vm386_vm2, %v334_v5, -3e+38  ;;  %v337_v20 = vld [vmem:[%s10182_s18 + $0x18] sm:$0xff] }
  0x13   : > { %v413_v11 = vpack.c.bf16 %v10194_v10, %v370_v9  ;;  %v367_v13 = vld [vmem:[%s10182_s18 + $0x108] sm:$0xff]  ;;  %v10211_v16 = vsel %vm386_vm2, %v370_v9, -3e+38  ;;  %v941_v18 = vmax.f32 %v893_v14, -3e+38  ;;  %v373_v22 = vld [vmem:[%s10182_s18 + $0x138] sm:$0xff]  ;;  %v396_v30 = vpack.c.bf16 %v337_v20, %v336_v17 }
  0x14   : > { %9333 = vmatmul.msk.bf16.vlgmr.msra.gmra.mxu0 %vm424_vm1, %v395_v8  ;;  %v10207_v15 = vsel %vm386_vm2, %v367_v13, -3e+38  ;;  %v10220_v21 = vsel %vm386_vm2, %v337_v20, -3e+38  ;;  %v895_v23 = vsel %vm391_vm3, %v336_v17, -3e+38 }
  0x15   : > { %9351 = vmatmul.msk.bf16.vlgmr.msra.gmra.mxu1 %vm424_vm1, %v413_v11  ;;  %v977_v19 = vmax.f32 %v10207_v15, %v10211_v16  ;;  %v10227_v24 = vsel %vm386_vm2, %v373_v22, -3e+38  ;;  %v339_v25 = vld [vmem:[%s10182_s18 + $0x28] sm:$0xff]  ;;  %v989_v26 = vmax.f32 %v941_v18, %v10220_v21  ;;  %v942_v29 = vmax.f32 %v10186_v6, -3e+38  ;;  %v10238_v32 = vld [vmem:[%s10182_s18 + $0x130] sm:$0xff] }
  0x16   : > { %v943_v31 = vmax.f32 %v895_v23, -3e+38  ;;  %v10241_v33 = vld [vmem:[%s10182_s18 + $0x20] sm:$0xff]  ;;  %v10248_v35 = vsel %vm391_vm3, %v339_v25, -3e+38  ;;  %v10251_v36 = vld [vmem:[%s10182_s18 + $0x30] sm:$0xff]  ;;  %v944_v37 = vmax.f32 %v893_v14, %v10220_v21  ;;  %v414_v39 = vpack.c.bf16 %v373_v22, %v10238_v32 }
  0x17   : > { %v10234_v28 = vmax.f32 %v977_v19, %v10227_v24  ;;  %v10244_v34 = vld [vmem:[%s10182_s18 + $0x40] sm:$0xff]  ;;  %v1086_v38 = vrot.slane %v989_v26, 1  ;;  %v946_v40 = vmax.f32 %v895_v23, %v10248_v35  ;;  %v1262_v41 = vrot.slane %v989_v26, 2  ;;  %v10272_v51 = vld [vmem:[%s10182_s18 + $0x38] sm:$0xff]  ;;  %v10291_v23 = vld [vmem:[%s10182_s18 + $0x48] sm:$0xff] }
  0x18   : > { %v10260_v42 = vsel %vm391_vm3, %v10244_v34, -3e+38  ;;  %v990_v43 = vmax.f32 %v942_v29, %v10241_v33  ;;  %v991_v44 = vmax.f32 %v943_v31, %v10248_v35  ;;  %v945_v45 = vmax.f32 %v10186_v6, %v10241_v33  ;;  %v10288_v20 = vld [vmem:[%s10182_s18 + $0x58] sm:$0xff] }
  0x19   : > { %v10269_v46 = vsel %vm386_vm2, %v10251_v36, -3e+38  ;;  %v994_v52 = vmax.f32 %v946_v40, %v10260_v42  ;;  %v397_v8 = vpack.c.bf16 %v339_v25, %v10241_v33  ;;  %v949_v25 = vmax.f32 %v10248_v35, %v10260_v42  ;;  %v10308_v35 = vld [vmem:[%s10182_s18 + $0x50] sm:$0xff] }
  0x1a   : > { %v1087_v47 = vrot.slane %v990_v43, 1  ;;  %v1089_v48 = vrot.slane %v991_v44, 1  ;;  %v1263_v49 = vrot.slane %v990_v43, 2  ;;  %v1265_v50 = vrot.slane %v991_v44, 2 }
  0x1b   : > { %v992_v53 = vmax.f32 %v944_v37, %v10269_v46  ;;  %v993_v61 = vmax.f32 %v945_v45, %v10272_v51  ;;  %v1094_v6 = vrot.slane %v994_v52, 1  ;;  %v1270_v19 = vrot.slane %v994_v52, 2 }
  0x1c   : > { %v1216_v54 = vmax.f32 %v991_v44, %v1089_v48  ;;  %v1088_v55 = vsel %vm1085_vm4, %v1086_v38, %v1087_v47  ;;  %v1090_v56 = vsel %vm1085_vm4, %v1087_v47, %v1089_v48  ;;  %v1264_v57 = vsel %vm678_vm5, %v1262_v41, %v1263_v49 }
  0x1d   : > { %v1214_v58 = vmax.f32 %v989_v26, %v1088_v55  ;;  %v1215_v59 = vmax.f32 %v990_v43, %v1090_v56  ;;  %v1266_v60 = vsel %vm678_vm5, %v1263_v49, %v1265_v50  ;;  %v1091_v2 = vrot.slane %v992_v53, 1  ;;  %v10320_v55 = vld [vmem:[%s10182_s18 + $0x70] sm:$0xff] }
  0x1e   : > { %v1392_v62 = vmax.f32 %v1216_v54, %v1265_v50  ;;  %v1092_v5 = vrot.slane %v993_v61, 1  ;;  %v1267_v13 = vrot.slane %v992_v53, 2  ;;  %v1268_v18 = vrot.slane %v993_v61, 2 }
  0x1f   : > { %v1390_v63 = vmax.f32 %v1214_v58, %v1264_v57  ;;  %v1391_v0 = vmax.f32 %v1215_v59, %v1266_v60  ;;  %v947_v31 = vmax.f32 %v10220_v21, %v10269_v46  ;;  %v948_v37 = vmax.f32 %v10241_v33, %v10272_v51  ;;  %v10327_v60 = vld [vmem:[%s10182_s18 + $0x60] sm:$0xff] }
  0x20   : > { %v1489_v1 = vrot.slane %v1392_v62, 1  ;;  %v1093_v14 = vsel %vm1085_vm4, %v1091_v2, %v1092_v5  ;;  %v1095_v17 = vsel %vm1085_vm4, %v1092_v5, %v1094_v6  ;;  %v1269_v38 = vsel %vm678_vm5, %v1267_v13, %v1268_v18  ;;  %v10343_v5 = vld [vmem:[%s10182_s18 + $0x68] sm:$0xff] }
  0x21   : > { %v1486_v3 = vrot.slane %v1390_v63, 1  ;;  %v1487_v4 = vrot.slane %v1391_v0, 1  ;;  %v1217_v26 = vmax.f32 %v992_v53, %v1093_v14  ;;  %v1218_v29 = vmax.f32 %v993_v61, %v1095_v17 }
  0x22   : > { %v10305_v40 = vsel %vm391_vm3, %v10288_v20, -3e+38  ;;  %v10313_v41 = vsel %vm386_vm2, %v10291_v23, -3e+38  ;;  %v996_v45 = vmax.f32 %v948_v37, %v10308_v35  ;;  %v398_v56 = vpack.c.bf16 %v10272_v51, %v10251_v36 }
  0x23   : > { %v1488_v9 = vsel %vm1085_vm4, %v1486_v3, %v1487_v4  ;;  %v1490_v11 = vsel %vm1085_vm4, %v1487_v4, %v1489_v1  ;;  %v1393_v21 = vmax.f32 %v1217_v26, %v1269_v38  ;;  %v997_v44 = vmax.f32 %v949_v25, %v10305_v40 }
  0x24   : > { %9334 = vmatmul.msk.bf16.gmra.mxu0 %vm424_vm1, %v396_v30  ;;  %v1598_v22 = vpack.c.bf16 %v1490_v11, %v1488_v9  ;;  %v1219_v30 = vmax.f32 %v994_v52, %v1094_v6  ;;  %v995_v47 = vmax.f32 %v947_v31, %v10313_v41  ;;  %v1097_v53 = vrot.slane %v996_v45, 1 }
  0x25   : > { %9352 = vmatmul.msk.bf16.gmra.mxu1 %vm424_vm1, %v414_v39  ;;  %v1271_v39 = vsel %vm678_vm5, %v1268_v18, %v1270_v19  ;;  %v1491_v48 = vrot.slane %v1393_v21, 1  ;;  %v1099_v54 = vrot.slane %v997_v44, 1  ;;  %v1273_v59 = vrot.slane %v996_v45, 2 }
  0x26   : > { %v1394_v33 = vmax.f32 %v1218_v29, %v1271_v39  ;;  %v1395_v43 = vmax.f32 %v1219_v30, %v1270_v19  ;;  %v1096_v52 = vrot.slane %v995_v47, 1  ;;  %v1272_v61 = vrot.slane %v995_v47, 2 }
  0x27   : > { %v1100_v63 = vsel %vm1085_vm4, %v1097_v53, %v1099_v54  ;;  %v1275_v0 = vrot.slane %v997_v44, 2  ;;  %v10334_v1 = vsel %vm391_vm3, %v10320_v55, -3e+38  ;;  %v952_v36 = vmax.f32 %v10260_v42, %v10305_v40 }
  0x28   : > { %v1492_v49 = vrot.slane %v1394_v33, 1  ;;  %v1494_v50 = vrot.slane %v1395_v43, 1  ;;  %v1098_v62 = vsel %vm1085_vm4, %v1096_v52, %v1097_v53  ;;  %v951_v2 = vmax.f32 %v10272_v51, %v10308_v35 }
  0x29   : > { %v950_v4 = vmax.f32 %v10269_v46, %v10313_v41  ;;  %v10349_v6 = vsel %vm386_vm2, %v10327_v60, -3e+38  ;;  %v1221_v9 = vmax.f32 %v996_v45, %v1100_v63  ;;  %v1222_v11 = vmax.f32 %v997_v44, %v1099_v54 }
  0x2a   : > { %v1493_v57 = vsel %vm1085_vm4, %v1491_v48, %v1492_v49  ;;  %v1495_v58 = vsel %vm1085_vm4, %v1492_v49, %v1494_v50  ;;  %v1274_v42 = vsel %vm678_vm5, %v1272_v61, %v1273_v59  ;;  %v1276_v51 = vsel %vm678_vm5, %v1273_v59, %v1275_v0  ;;  %v10366_v48 = vld [vmem:[%s10182_s18 + $0x78] sm:$0xff]  ;;  %v10369_v49 = vld [vmem:[%s10182_s18 + $0x88] sm:$0xff] }
  0x2b   : > { %v1599_v3 = vpack.c.bf16 %v1495_v58, %v1493_v57  ;;  %v1000_v13 = vmax.f32 %v952_v36, %v10334_v1  ;;  %v999_v46 = vmax.f32 %v951_v2, %v10343_v5  ;;  %v998_v14 = vmax.f32 %v950_v4, %v10349_v6  ;;  %v10384_v58 = vld [vmem:[%s10182_s18 + $0x80] sm:$0xff] }
  0x2c   : > { %v1397_v18 = vmax.f32 %v1221_v9, %v1276_v51  ;;  %v1398_v19 = vmax.f32 %v1222_v11, %v1275_v0  ;;  %v399_v37 = vpack.c.bf16 %v10291_v23, %v10244_v34  ;;  %v953_v53 = vmax.f32 %v10313_v41, %v10349_v6 }
  0x2d   : > { %v1102_v25 = vrot.slane %v999_v46, 1  ;;  %v1104_v26 = vrot.slane %v1000_v13, 1  ;;  %v1277_v38 = vrot.slane %v998_v14, 2  ;;  %v1278_v44 = vrot.slane %v999_v46, 2 }
  0x2e   : > { %v1497_v30 = vrot.slane %v1397_v18, 1  ;;  %v1499_v31 = vrot.slane %v1398_v19, 1  ;;  %v1280_v45 = vrot.slane %v1000_v13, 2  ;;  %v10381_v57 = vsel %vm386_vm2, %v10366_v48, -3e+38 }
  0x2f   : > { %v1105_v21 = vsel %vm1085_vm4, %v1102_v25, %v1104_v26  ;;  %v1225_v52 = vmax.f32 %v1000_v13, %v1104_v26  ;;  %v1279_v54 = vsel %vm678_vm5, %v1277_v38, %v1278_v44  ;;  %v10389_v59 = vsel %vm391_vm3, %v10369_v49, -3e+38 }
  0x30   : > { %v1500_v43 = vsel %vm1085_vm4, %v1497_v30, %v1499_v31  ;;  %v1224_v50 = vmax.f32 %v999_v46, %v1105_v21  ;;  %v1001_v63 = vmax.f32 %v953_v53, %v10381_v57  ;;  %v400_v51 = vpack.c.bf16 %v10288_v20, %v10308_v35  ;;  %v10407_v20 = vld [vmem:[%s10182_s18 + $0xa0] sm:$0xff] }
  0x31   : > { %v957_v38 = vmax.f32 %v10343_v5, %v10384_v58  ;;  %v958_v21 = vmax.f32 %v10334_v1, %v10389_v59 }
  0x34   : > { %9335 = vmatmul.msk.bf16.gmra.mxu0 %vm424_vm1, %v397_v8  ;;  %v1220_v8 = vmax.f32 %v995_v47, %v1098_v62  ;;  %v955_v47 = vmax.f32 %v10305_v40, %v10334_v1  ;;  %v954_v40 = vmax.f32 %v10308_v35, %v10343_v5  ;;  %v1401_v62 = vmax.f32 %v1225_v52, %v1280_v45 }
  0x35   : > { %9357 = vmatmul.msk.bf16.vlgmr.msrb.gmra.mxu1 %vm424_vm1, %v1598_v22  ;;  %v1101_v22 = vrot.slane %v998_v14, 1 }
  0x36   : > { %v1396_v17 = vmax.f32 %v1220_v8, %v1274_v42  ;;  %v1002_v0 = vmax.f32 %v954_v40, %v10384_v58  ;;  %v1003_v36 = vmax.f32 %v955_v47, %v10389_v59  ;;  %v1504_v4 = vrot.slane %v1401_v62, 1 }
  0x37   : > { %v1103_v39 = vsel %vm1085_vm4, %v1101_v22, %v1102_v25  ;;  %v1106_v8 = vrot.slane %v1001_v63, 1  ;;  %v1282_v42 = vrot.slane %v1001_v63, 2  ;;  %v10402_v22 = vld [vmem:[%s10182_s18 + $0x90] sm:$0xff]  ;;  %v956_v25 = vmax.f32 %v10349_v6, %v10381_v57  ;;  %v10420_v6 = vld [vmem:[%s10182_s18 + $0x98] sm:$0xff] }
  0x38   : > { %v1496_v29 = vrot.slane %v1396_v17, 1  ;;  %v1223_v23 = vmax.f32 %v998_v14, %v1103_v39  ;;  %v1107_v9 = vrot.slane %v1002_v0, 1  ;;  %v1109_v11 = vrot.slane %v1003_v36, 1 }
  0x39   : > { %v1283_v18 = vrot.slane %v1002_v0, 2  ;;  %v1285_v19 = vrot.slane %v1003_v36, 2  ;;  %v10417_v39 = vsel %vm386_vm2, %v10402_v22, -3e+38  ;;  %v401_v40 = vpack.c.bf16 %v10343_v5, %v10327_v60  ;;  %v10445_v60 = vld [vmem:[%s10182_s18 + $0xb8] sm:$0xff] }
  0x3a   : > { %v1498_v33 = vsel %vm1085_vm4, %v1496_v29, %v1497_v30  ;;  %v1399_v41 = vmax.f32 %v1223_v23, %v1279_v54  ;;  %v1108_v14 = vsel %vm1085_vm4, %v1106_v8, %v1107_v9  ;;  %v1110_v17 = vsel %vm1085_vm4, %v1107_v9, %v1109_v11 }
  0x3b   : > { %v1600_v34 = vpack.c.bf16 %v1500_v43, %v1498_v33  ;;  %v1226_v29 = vmax.f32 %v1001_v63, %v1108_v14  ;;  %v1227_v30 = vmax.f32 %v1002_v0, %v1110_v17  ;;  %v1228_v35 = vmax.f32 %v1003_v36, %v1109_v11 }
  0x3c   : > { %v1501_v2 = vrot.slane %v1399_v41, 1  ;;  %v1284_v31 = vsel %vm678_vm5, %v1282_v42, %v1283_v18  ;;  %v10427_v33 = vsel %vm391_vm3, %v10407_v20, -3e+38  ;;  %v10465_v17 = vsel %vm391_vm3, %v10445_v60, -3e+38 }
  0x3d   : > { %v1402_v43 = vmax.f32 %v1226_v29, %v1284_v31  ;;  %v1404_v47 = vmax.f32 %v1228_v35, %v1285_v19  ;;  %v1006_v23 = vmax.f32 %v958_v21, %v10427_v33  ;;  %v961_v14 = vmax.f32 %v10389_v59, %v10427_v33  ;;  %v10472_v31 = vld [vmem:[%s10182_s18 + $0xc0] sm:$0xff]  ;;  %v10475_v59 = vld [vmem:[%s10182_s18 + $0xd0] sm:$0xff] }
  0x3f   : > { %v1509_v1 = vrot.slane %v1404_v47, 1 }
  0x44   : > { %9336 = vmatmul.msk.bf16.gmra.mxu0 %vm424_vm1, %v398_v56  ;;  %v1281_v56 = vsel %vm678_vm5, %v1278_v44, %v1280_v45  ;;  %v1004_v45 = vmax.f32 %v956_v25, %v10417_v39 }
  0x45   : > { %9358 = vmatmul.msk.bf16.gmra.mxu1 %vm424_vm1, %v1599_v3  ;;  %v1400_v61 = vmax.f32 %v1224_v50, %v1281_v56  ;;  %v1506_v50 = vrot.slane %v1402_v43, 1  ;;  %v1114_v56 = vrot.slane %v1006_v23, 1 }
  0x46   : > { %v1111_v53 = vrot.slane %v1004_v45, 1  ;;  %v1287_v63 = vrot.slane %v1004_v45, 2 }
  0x47   : > { %v1502_v3 = vrot.slane %v1400_v61, 1  ;;  %v1231_v11 = vmax.f32 %v1006_v23, %v1114_v56 }
  0x49   : > { %v1503_v13 = vsel %vm1085_vm4, %v1501_v2, %v1502_v3  ;;  %v1505_v46 = vsel %vm1085_vm4, %v1502_v3, %v1504_v4  ;;  %v1290_v2 = vrot.slane %v1006_v23, 2  ;;  %v10440_v3 = vld [vmem:[%s10182_s18 + $0xa8] sm:$0xff]  ;;  %v959_v4 = vmax.f32 %v10381_v57, %v10417_v39 }
  0x4a   : > { %v1601_v26 = vpack.c.bf16 %v1505_v46, %v1503_v13  ;;  %v10453_v46 = vld [vmem:[%s10182_s18 + $0xb0] sm:$0xff]  ;;  %v10458_v57 = vsel %vm386_vm2, %v10440_v3, -3e+38  ;;  %v10486_v23 = vsel %vm386_vm2, %v10472_v31, -3e+38 }
  0x4b   : > { %v1407_v25 = vmax.f32 %v1231_v11, %v1290_v2  ;;  %v963_v47 = vmax.f32 %v10420_v6, %v10453_v46 }
  0x54   : > { %9337 = vmatmul.msk.bf16.gmra.mxu0 %vm424_vm1, %v399_v37  ;;  %v1286_v37 = vsel %vm678_vm5, %v1283_v18, %v1285_v19 }
  0x55   : > { %9359 = vmatmul.msk.bf16.gmra.mxu1 %vm424_vm1, %v1600_v34  ;;  %v1403_v44 = vmax.f32 %v1227_v30, %v1286_v37  ;;  %v1005_v34 = vmax.f32 %v957_v38, %v10420_v6  ;;  %v1009_v30 = vmax.f32 %v961_v14, %v10465_v17  ;;  %v1514_v38 = vrot.slane %v1407_v25, 1 }
  0x57   : > { %v1507_v52 = vrot.slane %v1403_v44, 1  ;;  %v1112_v54 = vrot.slane %v1005_v34, 1  ;;  %v1288_v0 = vrot.slane %v1005_v34, 2  ;;  %v1119_v44 = vrot.slane %v1009_v30, 1 }
  0x59   : > { %v1508_v41 = vsel %vm1085_vm4, %v1506_v50, %v1507_v52  ;;  %v1510_v61 = vsel %vm1085_vm4, %v1507_v52, %v1509_v1  ;;  %v1113_v62 = vsel %vm1085_vm4, %v1111_v53, %v1112_v54  ;;  %v1115_v36 = vsel %vm1085_vm4, %v1112_v54, %v1114_v56  ;;  %v10494_v52 = vld [vmem:[%s10182_s18 + $0xc8] sm:$0xff] }
  0x5a   : > { %v1602_v8 = vpack.c.bf16 %v1510_v61, %v1508_v41  ;;  %v1229_v9 = vmax.f32 %v1004_v45, %v1113_v62  ;;  %v1230_v5 = vmax.f32 %v1005_v34, %v1115_v36  ;;  %v1289_v42 = vsel %vm678_vm5, %v1287_v63, %v1288_v0 }
  0x5b   : > { %v1291_v13 = vsel %vm678_vm5, %v1288_v0, %v1290_v2  ;;  %v962_v45 = vmax.f32 %v10417_v39, %v10458_v57  ;;  %v964_v34 = vmax.f32 %v10427_v33, %v10465_v17  ;;  %v10491_v50 = vsel %vm391_vm3, %v10475_v59, -3e+38 }
  0x5c   : > { %v1405_v18 = vmax.f32 %v1229_v9, %v1289_v42  ;;  %v1406_v19 = vmax.f32 %v1230_v5, %v1291_v13  ;;  %v402_v39 = vpack.c.bf16 %v10366_v48, %v10320_v55  ;;  %v1295_v41 = vrot.slane %v1009_v30, 2 }
  0x5d   : > { %v1010_v61 = vmax.f32 %v962_v45, %v10486_v23  ;;  %v1011_v62 = vmax.f32 %v963_v47, %v10494_v52  ;;  %v1012_v63 = vmax.f32 %v964_v34, %v10491_v50  ;;  %v1234_v36 = vmax.f32 %v1009_v30, %v1119_v44 }
  0x5e   : > { %v1511_v35 = vrot.slane %v1405_v18, 1  ;;  %v1512_v37 = vrot.slane %v1406_v19, 1  ;;  %v965_v45 = vmax.f32 %v10458_v57, %v10486_v23  ;;  %v966_v47 = vmax.f32 %v10453_v46, %v10494_v52 }
  0x5f   : > { %v1122_v9 = vrot.slane %v1011_v62, 1  ;;  %v1124_v5 = vrot.slane %v1012_v63, 1  ;;  %v1297_v18 = vrot.slane %v1010_v61, 2  ;;  %v1298_v19 = vrot.slane %v1011_v62, 2 }
  0x60   : > { %v1513_v1 = vsel %vm1085_vm4, %v1511_v35, %v1512_v37  ;;  %v1515_v53 = vsel %vm1085_vm4, %v1512_v37, %v1514_v38  ;;  %v1300_v25 = vrot.slane %v1012_v63, 2  ;;  %v10515_v37 = vld [vmem:[%s10182_s18 + $0xe8] sm:$0xff] }
  0x61   : > { %v1603_v0 = vpack.c.bf16 %v1515_v53, %v1513_v1  ;;  %v1125_v14 = vsel %vm1085_vm4, %v1122_v9, %v1124_v5  ;;  %v10527_v1 = vld [vmem:[%s10182_s18 + $0xe0] sm:$0xff]  ;;  %v967_v53 = vmax.f32 %v10465_v17, %v10491_v50 }
  0x64   : > { %9338 = vmatmul.msk.bf16.gmra.mxu0 %vm424_vm1, %v400_v51  ;;  %v960_v51 = vmax.f32 %v10384_v58, %v10420_v6 }
  0x65   : > { %9360 = vmatmul.msk.bf16.gmra.mxu1 %vm424_vm1, %v1601_v26  ;;  %v1007_v26 = vmax.f32 %v959_v4, %v10458_v57  ;;  %v10534_v57 = vsel %vm391_vm3, %v10515_v37, -3e+38 }
  0x66   : > { %v1008_v29 = vmax.f32 %v960_v51, %v10453_v46  ;;  %v1410_v51 = vmax.f32 %v1234_v36, %v1295_v41  ;;  %v10560_v36 = vmax.f32 %v967_v53, %v10534_v57 }
  0x67   : > { %v1116_v21 = vrot.slane %v1007_v26, 1  ;;  %v1292_v56 = vrot.slane %v1007_v26, 2 }
  0x68   : > { %v1117_v43 = vrot.slane %v1008_v29, 1  ;;  %v1519_v35 = vrot.slane %v1410_v51, 1  ;;  %v10576_v51 = vld [vmem:[%s10182_s18 + $0x100] sm:$0xff] }
  0x69   : > { %17452 = vst [vmem:[#allocation5_spill] sm:$0xff] %v10576_v51 }
  0x6a   : > { %v1118_v33 = vsel %vm1085_vm4, %v1116_v21, %v1117_v43  ;;  %v1120_v54 = vsel %vm1085_vm4, %v1117_v43, %v1119_v44  ;;  %v1236_v21 = vmax.f32 %v1011_v62, %v1125_v14  ;;  %v1237_v43 = vmax.f32 %v1012_v63, %v1124_v5  ;;  %v369_v14 = vld [vmem:[%s10182_s18 + $0x118] sm:$0xff] }
  0x6b   : > { %v1232_v55 = vmax.f32 %v1007_v26, %v1118_v33  ;;  %v1233_v48 = vmax.f32 %v1008_v29, %v1120_v54  ;;  %v10512_v26 = vld [vmem:[%s10182_s18 + $0xd8] sm:$0xff]  ;;  %v1299_v44 = vsel %vm678_vm5, %v1297_v18, %v1298_v19  ;;  %v10539_v33 = vld [vmem:[%s17052_s2] ss:$0 sm:$0xff]  ;;  %v403_v54 = vpack.c.bf16 %v10369_v49, %v10384_v58  ;;  %v10557_v49 = vld [vmem:[%s10182_s18 + $0x110] sm:$0xff] }
  0x6c   : > { %v920_v34 = vsel %vm386_vm2, %v10512_v26, -3e+38  ;;  %v1413_v63 = vmax.f32 %v1237_v43, %v1300_v25 }
  0x6d   : > { %v968_v5 = vmax.f32 %v10486_v23, %v920_v34  ;;  %v1129_v23 = vrot.slane %v10560_v36, 1 }
  0x74   : > { %9339 = vmatmul.msk.bf16.gmra.mxu0 %vm424_vm1, %v401_v40  ;;  %v1293_v40 = vrot.slane %v1008_v29, 2 }
  0x75   : > { %9361 = vmatmul.msk.bf16.gmra.mxu1 %vm424_vm1, %v1602_v8  ;;  %v1121_v8 = vrot.slane %v1010_v61, 1 }
  0x76   : > { %v1294_v2 = vsel %vm678_vm5, %v1292_v56, %v1293_v40  ;;  %v1296_v4 = vsel %vm678_vm5, %v1293_v40, %v1295_v41  ;;  %v10546_v41 = vld [vmem:[%s10182_s18 + $0xf0] sm:$0xff] }
  0x77   : > { %v1408_v11 = vmax.f32 %v1232_v55, %v1294_v2  ;;  %v1409_v42 = vmax.f32 %v1233_v48, %v1296_v4  ;;  %v1123_v13 = vsel %vm1085_vm4, %v1121_v8, %v1122_v9  ;;  %v10551_v55 = vmax.f32 %v966_v47, %v10527_v1  ;;  %v10554_v48 = vld [vmem:[%s10182_s18 + $0xf8] sm:$0xff] }
  0x78   : > { %v1235_v38 = vmax.f32 %v1010_v61, %v1123_v13  ;;  %17450 = vst [vmem:[#allocation3_spill] sm:$0xff] %v10554_v48  ;;  %v923_v2 = vsel %vm386_vm2, %v10546_v41, -3e+38  ;;  %v975_v4 = vmax.f32 %v10554_v48, %v10557_v49  ;;  %v10606_v47 = vsel %vm391_vm3, %v369_v14, -3e+38 }
  0x79   : > { %v1516_v29 = vrot.slane %v1408_v11, 1  ;;  %v1517_v30 = vrot.slane %v1409_v42, 1  ;;  %v971_v11 = vmax.f32 %v920_v34, %v923_v2  ;;  %v974_v42 = vmax.f32 %v923_v2, %v10207_v15 }
  0x7a   : > { %v1411_v61 = vmax.f32 %v1235_v38, %v1299_v44  ;;  %v10588_v38 = vmax.f32 %v975_v4, %v10194_v10  ;;  %v10596_v44 = vmax.f32 %v968_v5, %v923_v2  ;;  %v1240_v14 = vmax.f32 %v10560_v36, %v1129_v23 }
  0x7b   : > { %v1518_v56 = vsel %vm1085_vm4, %v1516_v29, %v1517_v30  ;;  %v1520_v40 = vsel %vm1085_vm4, %v1517_v30, %v1519_v35  ;;  %v1127_v29 = vrot.slane %v10551_v55, 1  ;;  %v970_v30 = vmax.f32 %v10491_v50, %v10534_v57 }
  0x7c   : > { %v1604_v58 = vpack.c.bf16 %v1520_v40, %v1518_v56  ;;  %v1521_v13 = vrot.slane %v1411_v61, 1  ;;  %v969_v35 = vmax.f32 %v10494_v52, %v10527_v1  ;;  %v10599_v50 = vmax.f32 %v971_v11, %v10207_v15 }
  0x7d   : > { %v10617_v15 = vsel %vm391_vm3, %v10238_v32, -3e+38  ;;  %v404_v32 = vpack.c.bf16 %v10420_v6, %v10402_v22  ;;  %v1303_v11 = vrot.slane %v10551_v55, 2  ;;  %v1131_v22 = vrot.slane %v10596_v44, 1 }
  0x7e   : > { %v10624_v61 = vmax.f32 %v969_v35, %v10554_v48 }
  0x80   : > { %v1132_v6 = vrot.slane %v10624_v61, 1 }
  0x84   : > { %9340 = vmatmul.msk.bf16.gmra.mxu0 %vm424_vm1, %v402_v39  ;;  %v1301_v39 = vsel %vm678_vm5, %v1298_v19, %v1300_v25  ;;  %v1524_v19 = vrot.slane %v1413_v63, 1 }
  0x85   : > { %9362 = vmatmul.msk.bf16.gmra.mxu1 %vm424_vm1, %v1603_v0  ;;  %v1412_v62 = vmax.f32 %v1236_v21, %v1301_v39  ;;  %v10548_v0 = vmax.f32 %v965_v45, %v920_v34  ;;  %v10593_v21 = vsel %vm391_vm3, %v10576_v51, -3e+38  ;;  %v10602_v45 = vmax.f32 %v974_v42, %v10211_v16 }
  0x86   : > { %v10620_v40 = vmax.f32 %v970_v30, %v10593_v21 }
  0x87   : > { %v1522_v18 = vrot.slane %v1412_v62, 1  ;;  %v1126_v25 = vrot.slane %v10548_v0, 1  ;;  %v1302_v5 = vrot.slane %v10548_v0, 2 }
  0x89   : > { %v1523_v53 = vsel %vm1085_vm4, %v1521_v13, %v1522_v18  ;;  %v1128_v56 = vsel %vm1085_vm4, %v1126_v25, %v1127_v29 }
  0x8a   : > { %v1238_v4 = vmax.f32 %v10548_v0, %v1128_v56 }
  0x91   : > { %v510_v17 = vpop.f32.mrf.mxu0 }
  0x92   : > { %v10568_v8 = vadd.f32 %v10539_v33, %v510_v17  ;;  %v10570_v9 = vpop.f32.mrf.mxu1  ;;  %v1130_v17 = vsel %vm1085_vm4, %v1127_v29, %v1129_v23 }
  0x93   : > { %17451 = vst [vmem:[#allocation4_spill] sm:$0xff] %v10570_v9  ;;  %v1239_v13 = vmax.f32 %v10551_v55, %v1130_v17 }
  0x94   : > { %9341 = vmatmul.msk.bf16.gmra.mxu0 %vm424_vm1, %v403_v54  ;;  %v791_v43 = vmax.f32 %v10568_v8, 0.0  ;;  %v1525_v54 = vsel %vm1085_vm4, %v1522_v18, %v1524_v19  ;;  %v1305_v18 = vrot.slane %v10560_v36, 2  ;;  %v1134_v19 = vrot.slane %v10620_v40, 1 }
  0x95   : > { %9363 = vmatmul.msk.bf16.gmra.mxu1 %vm424_vm1, %v1604_v58  ;;  %v1605_v2 = vpack.c.bf16 %v1525_v54, %v1523_v53  ;;  %v1304_v36 = vsel %vm678_vm5, %v1302_v5, %v1303_v11 }
  0x96   : > { %v10628_v62 = vsel %vm386_vm2, %v791_v43, 0.0  ;;  %v1306_v53 = vsel %vm678_vm5, %v1303_v11, %v1305_v18  ;;  %v1133_v11 = vsel %vm1085_vm4, %v1131_v22, %v1132_v6  ;;  %v1414_v22 = vmax.f32 %v1238_v4, %v1304_v36 }
  0x97   : > { %17453 = vst [vmem:[#allocation6_spill] sm:$0xff] %v10628_v62  ;;  %v2734_v0 = vrot.slane %v10628_v62, 1  ;;  %v3082_v23 = vrot.slane %v10628_v62, 2  ;;  %v3430_v35 = vrot.slane %v10628_v62, 3  ;;  %v7105_v5 = vrot.slane %v10628_v62, 4 }
  0x98   : > { %v1416_v9 = vmax.f32 %v1240_v14, %v1305_v18 }
  0x99   : > { %v512_v34 = vpop.f32.mrf.mxu0 }
  0x9a   : > { %v10609_v39 = vadd.f32 %v10539_v33, %v512_v34  ;;  %v10633_v58 = vpop.f32.mrf.mxu1 }
  0x9b   : > { %17455 = vst [vmem:[#allocation8_spill] sm:$0xff] %v10633_v58 }
  0x9c   : > { %v10631_v63 = vmax.f32 %v10609_v39, 0.0 }
  0x9e   : > { %17454 = vst [vmem:[#allocation7_spill] sm:$0xff] %v10631_v63  ;;  %v10642_v42 = vpack.i.bf16 %v10631_v63, %v10628_v62  ;;  %v2735_v25 = vrot.slane %v10631_v63, 1  ;;  %v3083_v55 = vrot.slane %v10631_v63, 2  ;;  %v3431_v29 = vrot.slane %v10631_v63, 3 }
  0x9f   : > { %v7106_v27 = vrot.slane %v10631_v63, 4  ;;  %v976_v63 = vmax.f32 %v10593_v21, %v10606_v47 }
  0xa0   : > { %17456 = vst [vmem:[#allocation9_spill] sm:$0xff] %v10642_v42  ;;  %9937 = vrot.lane.b32.xlu0 %v10642_v42, %s10105_s21  ;;  %v2736_v54 = vsel %vm1085_vm4, %v2734_v0, %v2735_v25  ;;  %v3084_v56 = vsel %vm678_vm5, %v3082_v23, %v3083_v55  ;;  %v3432_v17 = vsel %vm2434_vm6, %v3430_v35, %v3431_v29  ;;  %v1308_v23 = vrot.slane %v10624_v61, 2 }
  0xa1   : > { %v515_v30 = vpop.f32.mrf.mxu0  ;;  %v1135_v0 = vsel %vm1085_vm4, %v1132_v6, %v1134_v19  ;;  %v1310_v35 = vrot.slane %v10620_v40, 2  ;;  %v10681_v62 = vsel %vm5295_vm7, %v7105_v5, %v7106_v27  ;;  %v973_v42 = vmax.f32 %v10534_v57, %v10593_v21 }
  0xa2   : > { %v10662_v34 = vadd.f32 %v10539_v33, %v515_v30  ;;  %v10672_v58 = vpop.f32.mrf.mxu1  ;;  %v1307_v30 = vrot.slane %v10596_v44, 2  ;;  %17458 = vst [vmem:[#allocation11_spill] sm:$0xff] %v10681_v62  ;;  %v679_v6 = vrot.slane %v10568_v8, 2  ;;  %v1241_v5 = vmax.f32 %v10596_v44, %v1133_v11 }
  0xa3   : > { %17457 = vst [vmem:[#allocation10_spill] sm:$0xff] %v10672_v58  ;;  %v1415_v58 = vmax.f32 %v1239_v13, %v1306_v53  ;;  %v1242_v57 = vmax.f32 %v10624_v61, %v1135_v0  ;;  %v972_v13 = vmax.f32 %v10527_v1, %v10554_v48  ;;  %v17460_v44 = vrot.slane %v10609_v39, 2 }
  0xa4   : > { %v793_v43 = vmax.f32 %v10662_v34, 0.0  ;;  %9342 = vmatmul.msk.bf16.gmra.mxu0 %vm424_vm1, %v404_v32  ;;  %v1309_v8 = vsel %vm678_vm5, %v1307_v30, %v1308_v23 }
  0xa5   : > { %9364 = vmatmul.msk.bf16.gmra.mxu1 %vm424_vm1, %v1605_v2  ;;  %v1311_v2 = vsel %vm678_vm5, %v1308_v23, %v1310_v35  ;;  %v10707_v14 = vsel %vm678_vm5, %v679_v6, %v17460_v44  ;;  %v1526_v6 = vrot.slane %v1414_v22, 1  ;;  %v1527_v44 = vrot.slane %v1415_v58, 1 }
  0xa6   : > { %v10689_v32 = vsel %vm391_vm3, %v793_v43, 0.0  ;;  %17461 = vst [vmem:[#allocation13_spill] sm:$0xff] %v10707_v14  ;;  %v10735_v22 = vmax.f32 %v973_v42, %v10606_v47 }
  0xa7   : > { %17459 = vst [vmem:[#allocation12_spill] sm:$0xff] %v10689_v32  ;;  %v2737_v21 = vrot.slane %v10689_v32, 1  ;;  %v3085_v51 = vrot.slane %v10689_v32, 2  ;;  %v3433_v43 = vrot.slane %v10689_v32, 3  ;;  %v7108_v53 = vrot.slane %v10689_v32, 4 }
  0xa8   : > { %1817 = vrot.lane.b32.xlu0 %v10689_v32, %s10105_s21 }
  0xa9   : > { %v517_v4 = vpop.f32.mrf.mxu0  ;;  %v2738_v61 = vsel %vm1085_vm4, %v2735_v25, %v2737_v21  ;;  %v3086_v18 = vsel %vm678_vm5, %v3083_v55, %v3085_v51  ;;  %v3434_v36 = vsel %vm2434_vm6, %v3431_v29, %v3433_v43  ;;  %v1529_v25 = vrot.slane %v1416_v9, 1 }
  0xaa   : > { %v10714_v11 = vadd.f32 %v10539_v33, %v517_v4  ;;  %v10716_v0 = vpack.c.bf16 %v2738_v61, %v2736_v54  ;;  %v10718_v30 = vpack.c.bf16 %v3086_v18, %v3084_v56  ;;  %v10720_v23 = vpack.c.bf16 %v3434_v36, %v3432_v17  ;;  %v10722_v48 = vpop.f32.mrf.mxu1 }
  0xab   : > { %v1243_v51 = vmax.f32 %v10620_v40, %v1134_v19  ;;  %v1417_v55 = vmax.f32 %v1241_v5, %v1309_v8  ;;  %v1418_v29 = vmax.f32 %v1242_v57, %v1311_v2  ;;  %v10726_v21 = vmax.f32 %v972_v13, %v10557_v49 }
  0xac   : > { %17462 = vst [vmem:[#allocation14_spill] sm:$0xff] %v10716_v0  ;;  %v1136_v43 = vrot.slane %v10599_v50, 1  ;;  %v1141_v54 = vrot.slane %v10602_v45, 1  ;;  %v17065_v56 = vrot.slane %v10588_v38, 1  ;;  %v10732_v17 = vsel %vm5295_vm7, %v7106_v27, %v7108_v53 }
  0xad   : > { %17463 = vst [vmem:[#allocation15_spill] sm:$0xff] %v10718_v30  ;;  %v10738_v9 = vmax.f32 %v976_v63, %v10617_v15  ;;  %v682_v40 = vrot.slane %v10662_v34, 2  ;;  %v794_v58 = vmax.f32 %v10714_v11, 0.0  ;;  %v405_v19 = vpack.c.bf16 %v10440_v3, %v10407_v20 }
  0xae   : > { %17464 = vst [vmem:[#allocation16_spill] sm:$0xff] %v10720_v23  ;;  %v1528_v5 = vsel %vm1085_vm4, %v1526_v6, %v1527_v44  ;;  %v1530_v57 = vsel %vm1085_vm4, %v1527_v44, %v1529_v25  ;;  %v1419_v4 = vmax.f32 %v1243_v51, %v1310_v35  ;;  %v1531_v8 = vrot.slane %v1417_v55, 1 }
  0xaf   : > { %17465 = vst [vmem:[#allocation17_spill] sm:$0xff] %v10732_v17  ;;  %v1532_v2 = vrot.slane %v1418_v29, 1  ;;  %v1137_v42 = vrot.slane %v10726_v21, 1  ;;  %v1312_v13 = vrot.slane %v10599_v50, 2  ;;  %v1318_v20 = vrot.slane %v10588_v38, 2 }
  0xb0   : > { %v1317_v35 = vrot.slane %v10602_v45, 2  ;;  %v10759_v61 = vsel %vm386_vm2, %v794_v58, 0.0  ;;  %v1606_v18 = vpack.c.bf16 %v1530_v57, %v1528_v5  ;;  %v17467_v36 = vrot.slane %v10609_v39, 2 }
  0xb1   : > { %v520_v27 = vpop.f32.mrf.mxu0  ;;  %17466 = vst [vmem:[#allocation18_spill] sm:$0xff] %v10759_v61  ;;  %v1143_v6 = vsel %vm1085_vm4, %v1141_v54, %v17065_v56  ;;  %v1139_v44 = vrot.slane %v10735_v22, 1  ;;  %v1144_v25 = vrot.slane %v10738_v9, 1  ;;  %v10778_v39 = vsel %vm1085_vm4, %v1531_v8, %v1532_v2 }
  0xb2   : > { %v10754_v3 = vadd.f32 %v10539_v33, %v520_v27  ;;  %v10764_v53 = vsel %vm678_vm5, %v17467_v36, %v682_v40  ;;  %v10774_v55 = vpop.f32.mrf.mxu1  ;;  %v1534_v29 = vrot.slane %v1419_v4, 1  ;;  %v1138_v40 = vsel %vm1085_vm4, %v1136_v43, %v1137_v42 }
  0xb3   : > { %17468 = vst [vmem:[#allocation19_spill] sm:$0xff] %v10764_v53  ;;  %v1313_v58 = vrot.slane %v10726_v21, 2  ;;  %v2739_v5 = vrot.slane %v10759_v61, 1  ;;  %v3087_v27 = vrot.slane %v10759_v61, 2  ;;  %v3435_v4 = vrot.slane %v10759_v61, 3 }
  0xb4   : > { %v10772_v51 = vmax.f32 %v10754_v3, 0.0  ;;  %17470 = vst [vmem:[#allocation21_spill] sm:$0xff] %v10774_v55  ;;  %9343 = vmatmul.msk.bf16.gmra.mxu0 %vm424_vm1, %v405_v19  ;;  %v7110_v63 = vrot.slane %v10759_v61, 4  ;;  %v1140_v14 = vsel %vm1085_vm4, %v1137_v42, %v1139_v44  ;;  %v1315_v36 = vrot.slane %v10735_v22, 2 }
  0xb5   : > { %9365 = vmatmul.msk.bf16.gmra.mxu1 %vm424_vm1, %v1606_v18  ;;  %v1535_v18 = vsel %vm1085_vm4, %v1532_v2, %v1534_v29  ;;  %v1249_v2 = vmax.f32 %v10738_v9, %v1144_v25  ;;  %v1320_v42 = vrot.slane %v10738_v9, 2  ;;  %v1314_v29 = vsel %vm678_vm5, %v1312_v13, %v1313_v58 }
  0xb6   : > { %17469 = vst [vmem:[#allocation20_spill] sm:$0xff] %v10772_v51  ;;  %v10784_v54 = vpack.i.bf16 %v10772_v51, %v10759_v61  ;;  %v2740_v57 = vrot.slane %v10772_v51, 1  ;;  %v3088_v19 = vrot.slane %v10772_v51, 2  ;;  %v3436_v43 = vrot.slane %v10772_v51, 3 }
  0xb7   : > { %v7111_v34 = vrot.slane %v10772_v51, 4  ;;  %v1247_v61 = vmax.f32 %v10602_v45, %v1143_v6  ;;  %v1245_v45 = vmax.f32 %v10726_v21, %v1140_v14  ;;  %v1246_v6 = vmax.f32 %v10735_v22, %v1139_v44 }
  0xb8   : > { %17471 = vst [vmem:[#allocation22_spill] sm:$0xff] %v10784_v54  ;;  %9942 = vrot.lane.b32.xlu1 %v10784_v54, %s10105_s21  ;;  %v2741_v8 = vsel %vm1085_vm4, %v2739_v5, %v2740_v57  ;;  %v3089_v53 = vsel %vm678_vm5, %v3087_v27, %v3088_v19  ;;  %v3437_v55 = vsel %vm2434_vm6, %v3435_v4, %v3436_v43  ;;  %v684_v27 = vrot.slane %v10714_v11, 2 }
  0xb9   : > { %v522_v56 = vpop.f32.mrf.mxu0  ;;  %v1244_v5 = vmax.f32 %v10599_v50, %v1138_v40  ;;  %v10810_v17 = vsel %vm5295_vm7, %v7110_v63, %v7111_v34  ;;  %v406_v50 = vpack.c.bf16 %v10445_v60, %v10453_v46  ;;  %v1607_v63 = vpack.c.bf16 %v1535_v18, %v10778_v39 }
  0xba   : > { %v10805_v62 = vadd.f32 %v10539_v33, %v522_v56  ;;  %17472 = vst [vmem:[#allocation23_spill] sm:$0xff] %v10810_v17  ;;  %v10818_v4 = vpop.f32.mrf.mxu1  ;;  %v685_v40 = vrot.slane %v10754_v3, 2  ;;  %v17474_v9 = vrot.slane %v10588_v38, 1  ;;  %v1319_v46 = vsel %vm678_vm5, %v1317_v35, %v1318_v20 }
  0xbb   : > { %17473 = vst [vmem:[#allocation24_spill] sm:$0xff] %v10818_v4  ;;  %v1316_v4 = vsel %vm678_vm5, %v1313_v58, %v1315_v36  ;;  %v1420_v51 = vmax.f32 %v1244_v5, %v1314_v29  ;;  %v1321_v3 = vsel %vm678_vm5, %v1318_v20, %v1320_v42  ;;  %v1423_v22 = vmax.f32 %v1247_v61, %v1319_v46  ;;  %v10880_v46 = vld [vmem:[%s10182_s18 + $0x140] sm:$0xff] }
  0xbc   : > { %v796_v56 = vmax.f32 %v10805_v62, 0.0  ;;  %v1145_v13 = vsel %vm1085_vm4, %v17474_v9, %v1144_v25  ;;  %v1425_v25 = vmax.f32 %v1249_v2, %v1320_v42  ;;  %v10846_v20 = vsel %vm678_vm5, %v684_v27, %v685_v40 }
  0xbd   : > { %v1248_v60 = vmax.f32 %v10588_v38, %v1145_v13  ;;  %17476 = vst [vmem:[#allocation26_spill] sm:$0xff] %v10846_v20  ;;  %v1422_v5 = vmax.f32 %v1246_v6, %v1315_v36  ;;  %v1541_v29 = vrot.slane %v1423_v22, 1  ;;  %v1421_v36 = vmax.f32 %v1245_v45, %v1316_v4  ;;  %v375_v45 = vld [vmem:[%s10182_s18 + $0x148] sm:$0xff] }
  0xbe   : > { %v10831_v11 = vsel %vm391_vm3, %v796_v56, 0.0  ;;  %v1544_v9 = vrot.slane %v1425_v25, 1 }
  0xbf   : > { %17475 = vst [vmem:[#allocation25_spill] sm:$0xff] %v10831_v11  ;;  %v2742_v14 = vrot.slane %v10831_v11, 1  ;;  %v3090_v21 = vrot.slane %v10831_v11, 2  ;;  %v1424_v44 = vmax.f32 %v1248_v60, %v1321_v3  ;;  %v3438_v39 = vrot.slane %v10831_v11, 3 }
  0xc0   : > { %1823 = vrot.lane.b32.xlu1 %v10831_v11, %s10105_s21  ;;  %v7113_v35 = vrot.slane %v10831_v11, 4  ;;  %v1537_v6 = vrot.slane %v1421_v36, 1  ;;  %v1539_v60 = vrot.slane %v1422_v5, 1  ;;  %v415_v36 = vpack.c.bf16 %v375_v45, %v10880_v46 }
  0xc1   : > { %v525_v58 = vpop.f32.mrf.mxu0  ;;  %v2743_v18 = vsel %vm1085_vm4, %v2740_v57, %v2742_v14  ;;  %v3091_v38 = vsel %vm678_vm5, %v3088_v19, %v3090_v21  ;;  %v1542_v56 = vrot.slane %v1424_v44, 1  ;;  %v3439_v2 = vsel %vm2434_vm6, %v3436_v43, %v3438_v39 }
  0xc2   : > { %v10848_v13 = vpack.c.bf16 %v2743_v18, %v2741_v8  ;;  %v10850_v61 = vpack.c.bf16 %v3091_v38, %v3089_v53  ;;  %v10854_v57 = vsel %vm5295_vm7, %v7111_v34, %v7113_v35  ;;  %v687_v19 = vrot.slane %v10805_v62, 2  ;;  %v10857_v42 = vpop.f32.mrf.mxu1  ;;  %9353 = vmatmul.msk.bf16.vlgmr.msra.gmra.mxu2 %vm424_vm1, %v415_v36 }
  0xc3   : > { %17478 = vst [vmem:[#allocation28_spill] sm:$0xff] %v10854_v57  ;;  %v10861_v27 = vsel %vm1085_vm4, %v1541_v29, %v1542_v56  ;;  %v10864_v53 = vsel %vm1085_vm4, %v1542_v56, %v1544_v9  ;;  %v979_v43 = vmax.f32 %v10606_v47, %v10617_v15  ;;  %v10869_v34 = vadd.f32 %v10539_v33, %v525_v58 }
  0xc4   : > { %17477 = vst [vmem:[#allocation27_spill] sm:$0xff] %v10848_v13  ;;  %9344 = vmatmul.msk.bf16.gmra.mxu0 %vm424_vm1, %v406_v50  ;;  %v10873_v8 = vpack.c.bf16 %v3439_v2, %v3437_v55  ;;  %v1536_v50 = vrot.slane %v1420_v51, 1  ;;  %v10884_v47 = vsel %vm391_vm3, %v375_v45, -3e+38  ;;  %v10887_v3 = vsel %vm678_vm5, %v685_v40, %v687_v19 }
  0xc5   : > { %17479 = vst [vmem:[#allocation29_spill] sm:$0xff] %v10857_v42  ;;  %9366 = vmatmul.msk.bf16.gmra.mxu1 %vm424_vm1, %v1607_v63  ;;  %v1146_v55 = vrot.slane %v10234_v28, 1  ;;  %v797_v14 = vmax.f32 %v10869_v34, 0.0  ;;  %v17482_v51 = vmax.f32 %v10557_v49, %v10194_v10  ;;  %v1027_v22 = vmax.f32 %v979_v43, %v10884_v47  ;;  %v378_v43 = vld [vmem:[%s10182_s18 + $0x160] sm:$0xff] }
  0xc6   : > { %17480 = vst [vmem:[#allocation30_spill] sm:$0xff] %v10873_v8  ;;  %v1322_v40 = vrot.slane %v10234_v28, 2  ;;  %v1538_v38 = vsel %vm1085_vm4, %v1536_v50, %v1537_v6  ;;  %v1540_v10 = vsel %vm1085_vm4, %v1537_v6, %v1539_v60  ;;  %v10921_v50 = vld [vmem:[%s10182_s18 + $0x168] sm:$0xff]  ;;  %v407_v60 = vpack.c.bf16 %v10494_v52, %v10472_v31 }
  0xc7   : > { %17481 = vst [vmem:[#allocation31_spill] sm:$0xff] %v10887_v3  ;;  %v1026_v63 = vmax.f32 %v17482_v51, %v10880_v46  ;;  %v1149_v39 = vrot.slane %v1027_v22, 1  ;;  %v10909_v49 = vsel %vm386_vm2, %v797_v14, 0.0  ;;  %v1325_v5 = vrot.slane %v1027_v22, 2 }
  0xc8   : > { %17485 = vst [vmem:[#allocation34_spill] sm:$0xff] %v10909_v49  ;;  %v417_v14 = vpack.c.bf16 %v10921_v50, %v378_v43  ;;  %v689_v51 = vrot.slane %v10869_v34, 2  ;;  %v3092_v34 = vrot.slane %v10909_v49, 2 }
  0xc9   : > { %v527_v21 = vpop.f32.mrf.mxu0  ;;  %v1147_v25 = vrot.slane %v1026_v63, 1  ;;  %v1323_v35 = vrot.slane %v1026_v63, 2  ;;  %v1252_v9 = vmax.f32 %v1027_v22, %v1149_v39 }
  0xca   : > { %v10897_v44 = vadd.f32 %v10539_v33, %v527_v21  ;;  %v10903_v18 = vpop.f32.mrf.mxu1  ;;  %9355 = vmatmul.msk.bf16.vlgmr.msra.gmra.mxu3 %vm424_vm1, %v417_v14  ;;  %v10952_v14 = vsel %vm391_vm3, %v378_v43, -3e+38  ;;  %v376_v43 = vld [vmem:[%s10182_s18 + $0x150] sm:$0xff] }
  0xcb   : > { %17484 = vst [vmem:[#allocation33_spill] sm:$0xff] %v10903_v18  ;;  %v1148_v29 = vsel %vm1085_vm4, %v1146_v55, %v1147_v25  ;;  %v1150_v2 = vsel %vm1085_vm4, %v1147_v25, %v1149_v39  ;;  %v1608_v55 = vpack.c.bf16 %v1540_v10, %v1538_v38  ;;  %v1324_v21 = vsel %vm678_vm5, %v1322_v40, %v1323_v35 }
  0xcc   : > { %v10901_v58 = vmax.f32 %v10897_v44, 0.0  ;;  %v1250_v19 = vmax.f32 %v10234_v28, %v1148_v29  ;;  %v1251_v6 = vmax.f32 %v1026_v63, %v1150_v2  ;;  %v1326_v45 = vsel %vm678_vm5, %v1323_v35, %v1325_v5 }
  0xcd   : > { %v2744_v63 = vrot.slane %v10909_v49, 1  ;;  %v1428_v52 = vmax.f32 %v1252_v9, %v1325_v5  ;;  %v3440_v10 = vrot.slane %v10909_v49, 3  ;;  %v10090_v9 = vld [vmem:[%s10182_s18 + $0x128] sm:$0xff] }
  0xce   : > { %17483 = vst [vmem:[#allocation32_spill] sm:$0xff] %v10901_v58  ;;  %v10914_v56 = vpack.i.bf16 %v10901_v58, %v10909_v49  ;;  %v1426_v22 = vmax.f32 %v1250_v19, %v1324_v21  ;;  %v1427_v31 = vmax.f32 %v1251_v6, %v1326_v45  ;;  %v2745_v39 = vrot.slane %v10901_v58, 1 }
  0xcf   : > { %v3093_v38 = vrot.slane %v10901_v58, 2  ;;  %v1549_v5 = vrot.slane %v1428_v52, 1  ;;  %v981_v36 = vmax.f32 %v10090_v9, %v10880_v46  ;;  %v982_v6 = vmax.f32 %v10617_v15, %v10884_v47 }
  0xd0   : > { %17486 = vst [vmem:[#allocation35_spill] sm:$0xff] %v10914_v56  ;;  %9947 = vrot.lane.b32.xlu2 %v10914_v56, %s10105_s21  ;;  %v1546_v40 = vrot.slane %v1426_v22, 1  ;;  %v1547_v19 = vrot.slane %v1427_v31, 1  ;;  %v2746_v21 = vsel %vm1085_vm4, %v2744_v63, %v2745_v39  ;;  %v3441_v52 = vrot.slane %v10901_v58, 3 }
  0xd1   : > { %v530_v28 = vpop.f32.mrf.mxu0  ;;  %v3094_v22 = vsel %vm678_vm5, %v3092_v34, %v3093_v38  ;;  %v10980_v34 = vsel %vm386_vm2, %v376_v43, -3e+38  ;;  %v1030_v35 = vmax.f32 %v982_v6, %v10952_v14 }
  0xd2   : > { %v10934_v25 = vadd.f32 %v10539_v33, %v530_v28  ;;  %v10943_v2 = vpop.f32.mrf.mxu1  ;;  %v10963_v45 = vsel %vm1085_vm4, %v1547_v19, %v1549_v5  ;;  %v17489_v5 = vmax.f32 %v10211_v16, %v10227_v24 }
  0xd3   : > { %17487 = vst [vmem:[#allocation36_spill] sm:$0xff] %v10943_v2 }
  0xd4   : > { %v799_v29 = vmax.f32 %v10934_v25, 0.0  ;;  %9345 = vmatmul.msk.bf16.gmra.mxu0 %vm424_vm1, %v407_v60  ;;  %v10960_v60 = vsel %vm1085_vm4, %v1546_v40, %v1547_v19  ;;  %v10976_v40 = vld [vmem:[%s10182_s18 + $0x158] sm:$0xff]  ;;  %v1028_v9 = vmax.f32 %v17489_v5, %v10980_v34  ;;  %v17515_v2 = vrot.slane %v10934_v25, 2 }
  0xd5   : > { %9367 = vmatmul.msk.bf16.gmra.mxu1 %vm424_vm1, %v1608_v55  ;;  %v1029_v4 = vmax.f32 %v981_v36, %v10976_v40  ;;  %v17493_v36 = vrot.slane %v10897_v44, 2  ;;  %v416_v6 = vpack.c.bf16 %v10976_v40, %v376_v43  ;;  %v17521_v25 = vrot.slane %v10901_v58, 4 }
  0xd6   : > { %v10957_v28 = vsel %vm391_vm3, %v799_v29, 0.0  ;;  %v3442_v29 = vsel %vm2434_vm6, %v3440_v10, %v3441_v52  ;;  %v11016_v10 = vld [vmem:[%s10182_s18 + $0x178] sm:$0xff] }
  0xd7   : > { %17488 = vst [vmem:[#allocation37_spill] sm:$0xff] %v10957_v28  ;;  %v2747_v63 = vrot.slane %v10957_v28, 1  ;;  %v3095_v31 = vrot.slane %v10957_v28, 2  ;;  %v3443_v55 = vrot.slane %v10957_v28, 3  ;;  %9354 = vmatmul.msk.bf16.gmra.mxu2 %vm424_vm1, %v416_v6 }
  0xd8   : > { %1829 = vrot.lane.b32.xlu2 %v10957_v28, %s10105_s21 }
  0xd9   : > { %v532_v19 = vpop.f32.mrf.mxu0  ;;  %v2748_v15 = vsel %vm1085_vm4, %v2745_v39, %v2747_v63  ;;  %v3096_v62 = vsel %vm678_vm5, %v3093_v38, %v3095_v31  ;;  %v3444_v18 = vsel %vm2434_vm6, %v3441_v52, %v3443_v55  ;;  %v11006_v39 = vsel %vm678_vm5, %v689_v51, %v17493_v36 }
  0xda   : > { %v10993_v3 = vpack.c.bf16 %v2748_v15, %v2746_v21  ;;  %v10995_v20 = vpack.c.bf16 %v3096_v62, %v3094_v22  ;;  %v10999_v16 = vpop.f32.mrf.mxu1  ;;  %v11001_v5 = vpack.c.bf16 %v3444_v18, %v3442_v29  ;;  %17494 = vst [vmem:[#allocation41_spill] sm:$0xff] %v11006_v39  ;;  %v11009_v38 = vadd.f32 %v10539_v33, %v532_v19  ;;  %v11013_v22 = vld [vmem:[%s10182_s18 + $0x170] sm:$0xff] }
  0xdb   : > { %17491 = vst [vmem:[#allocation39_spill] sm:$0xff] %v10999_v16  ;;  %v1151_v62 = vrot.slane %v1028_v9, 1  ;;  %v1152_v21 = vrot.slane %v1029_v4, 1  ;;  %v1154_v15 = vrot.slane %v1030_v35, 1  ;;  %v418_v18 = vpack.c.bf16 %v11016_v10, %v11013_v22 }
  0xdc   : > { %17490 = vst [vmem:[#allocation38_spill] sm:$0xff] %v10993_v3  ;;  %v408_v63 = vpack.c.bf16 %v10512_v26, %v10475_v59  ;;  %v800_v51 = vmax.f32 %v11009_v38, 0.0  ;;  %v1327_v52 = vrot.slane %v1028_v9, 2  ;;  %v1328_v55 = vrot.slane %v1029_v4, 2 }
  0xdd   : > { %17492 = vst [vmem:[#allocation40_spill] sm:$0xff] %v11001_v5  ;;  %v1153_v43 = vsel %vm1085_vm4, %v1151_v62, %v1152_v21  ;;  %v1330_v19 = vrot.slane %v1030_v35, 2  ;;  %9356 = vmatmul.msk.bf16.gmra.mxu3 %vm424_vm1, %v418_v18  ;;  %v1155_v36 = vsel %vm1085_vm4, %v1152_v21, %v1154_v15  ;;  %v1255_v62 = vmax.f32 %v1030_v35, %v1154_v15 }
  0xde   : > { %v1253_v26 = vmax.f32 %v1028_v9, %v1153_v43  ;;  %v11038_v6 = vsel %vm386_vm2, %v800_v51, 0.0  ;;  %v1329_v16 = vsel %vm678_vm5, %v1327_v52, %v1328_v55 }
  0xdf   : > { %17497 = vst [vmem:[#allocation44_spill] sm:$0xff] %v11038_v6  ;;  %v1331_v21 = vsel %vm678_vm5, %v1328_v55, %v1330_v19  ;;  %v1431_v15 = vmax.f32 %v1255_v62, %v1330_v19  ;;  %v3097_v55 = vrot.slane %v11038_v6, 2 }
  0xe0   : > { %v1429_v9 = vmax.f32 %v1253_v26, %v1329_v16  ;;  %v985_v16 = vmax.f32 %v10884_v47, %v10952_v14  ;;  %v409_v26 = vpack.c.bf16 %v10515_v37, %v10527_v1 }
  0xe1   : > { %v535_v31 = vpop.f32.mrf.mxu0 }
  0xe2   : > { %v11026_v29 = vadd.f32 %v10539_v33, %v535_v31  ;;  %v11033_v59 = vpop.f32.mrf.mxu1  ;;  %v1254_v31 = vmax.f32 %v1029_v4, %v1155_v36  ;;  %v938_v4 = vsel %vm386_vm2, %v10921_v50, -3e+38  ;;  %v1551_v52 = vrot.slane %v1429_v9, 1 }
  0xe3   : > { %17496 = vst [vmem:[#allocation43_spill] sm:$0xff] %v11033_v59  ;;  %v17499_v59 = vpack.c.bf16 %v10864_v53, %v10861_v27  ;;  %v2749_v27 = vrot.slane %v11038_v6, 1  ;;  %v986_v37 = vmax.f32 %v10980_v34, %v938_v4 }
  0xe4   : > { %v11031_v39 = vmax.f32 %v11026_v29, 0.0  ;;  %9346 = vmatmul.msk.bf16.gmra.mxu0 %vm424_vm1, %v408_v63  ;;  %v1430_v35 = vmax.f32 %v1254_v31, %v1331_v21  ;;  %v983_v21 = vmax.f32 %v10227_v24, %v10980_v34  ;;  %v1760_v24 = vld [vmem:[%s17055_s5 + $0x1] sm:$0x1] }
  0xe5   : > { %9368 = vmatmul.msk.bf16.gmra.mxu1 %vm424_vm1, %v17499_v59  ;;  %v1554_v59 = vrot.slane %v1431_v15, 1  ;;  %v1759_v15 = vld [vmem:[%s17055_s5] sm:$0x1]  ;;  %v2203_v34 = vsel %vm2201_vm8, %v1760_v24, 0 }
  0xe6   : > { %17495 = vst [vmem:[#allocation42_spill] sm:$0xff] %v11031_v39  ;;  %v11043_v18 = vpack.i.bf16 %v11031_v39, %v11038_v6  ;;  %v2750_v53 = vrot.slane %v11031_v39, 1  ;;  %v1552_v36 = vrot.slane %v1430_v35, 1  ;;  %2212 = vmatpush.bf16.msrb.mxu2 %v2203_v34  ;;  %v11103_v31 = vmax.f32 %v983_v21, %v938_v4 }
  0xe7   : > { %v3446_v24 = vrot.slane %v11031_v39, 3  ;;  %v940_v4 = vsel %vm391_vm3, %v11016_v10, -3e+38  ;;  %v3445_v10 = vrot.slane %v11038_v6, 3 }
  0xe8   : > { %17498 = vst [vmem:[#allocation45_spill] sm:$0xff] %v11043_v18  ;;  %9952 = vrot.lane.b32.xlu0 %v11043_v18, %s10105_s21  ;;  %v2751_v62 = vsel %vm1085_vm4, %v2749_v27, %v2750_v53  ;;  %v11074_v9 = vsel %vm1085_vm4, %v1551_v52, %v1552_v36  ;;  %v11077_v47 = vsel %vm1085_vm4, %v1552_v36, %v1554_v59  ;;  %v2343_v27 = vsel %vm2201_vm8, %v1759_v15, 0 }
  0xe9   : > { %v537_v63 = vpop.f32.mrf.mxu0  ;;  %v984_v52 = vmax.f32 %v10880_v46, %v10976_v40  ;;  %v694_v36 = vrot.slane %v11009_v38, 2  ;;  %2352 = vmatpush.bf16.msrb.mxu3 %v2343_v27  ;;  %v17070_v59 = vmov 0.0  }
  0xea   : > { %v11057_v43 = vadd.f32 %v10539_v33, %v537_v63  ;;  %v11065_v19 = vpop.f32.mrf.mxu1  ;;  %v3098_v63 = vrot.slane %v11031_v39, 2  ;;  %v1904_v1 = vrot.slane %v17070_v59, 1 }
  0xeb   : > { %17500 = vst [vmem:[#allocation46_spill] sm:$0xff] %v11065_v19  ;;  %v11121_v21 = vmax.f32 %v984_v52, %v11013_v22  ;;  %v17505_v52 = vpack.c.bf16 %v10963_v45, %v10960_v60  ;;  %v7121_v45 = vrot.slane %v11031_v39, 4 }
  0xec   : > { %v802_v50 = vmax.f32 %v11057_v43, 0.0  ;;  %v11112_v34 = vpack.c.bf16 %v1904_v1, %v1904_v1  ;;  %v3099_v27 = vsel %vm678_vm5, %v3097_v55, %v3098_v63  ;;  %v1156_v1 = vrot.slane %v11103_v31, 1 }
  0xee   : > { %v11082_v35 = vsel %vm391_vm3, %v802_v50, 0.0  ;;  %v2028_v50 = vrot.slane %v17070_v59, 2  ;;  %17503 = vst [vmem:[#allocation49_spill] sm:$0xff] %v11112_v34  ;;  %v11115_v59 = vmax.f32 %v986_v37, -3e+38  ;;  %9389 = vmatmul.msk.bf16.vlgmr.msrb.gmra.mxu3 %vm2152_vm9, %v11112_v34 }
  0xef   : > { %17501 = vst [vmem:[#allocation47_spill] sm:$0xff] %v11082_v35  ;;  %1835 = vrot.lane.b32.xlu1 %v11082_v35, %s10105_s21  ;;  %v2752_v46 = vrot.slane %v11082_v35, 1  ;;  %v3100_v37 = vrot.slane %v11082_v35, 2 }
  0xf0   : > { %v11110_v38 = vpack.c.bf16 %v2028_v50, %v2028_v50  ;;  %v988_v50 = vmax.f32 %v10952_v14, %v940_v4  ;;  %v1157_v14 = vrot.slane %v11121_v21, 1 }
  0xf1   : > { %v540_v51 = vpop.f32.mrf.mxu0  ;;  %v2753_v19 = vsel %vm1085_vm4, %v2750_v53, %v2752_v46  ;;  %v987_v53 = vmax.f32 %v10976_v40, %v11013_v22  ;;  %v3447_v46 = vsel %vm2434_vm6, %v3445_v10, %v3446_v24  ;;  %v3448_v22 = vrot.slane %v11082_v35, 3 }
  0xf2   : > { %v11108_v15 = vadd.f32 %v10539_v33, %v540_v51  ;;  %17502 = vst [vmem:[#allocation48_spill] sm:$0xff] %v11110_v38  ;;  %v11125_v42 = vpop.f32.mrf.mxu1  ;;  %9373 = vmatmul.msk.bf16.vlgmr.msrb.gmra.mxu2 %vm2152_vm9, %v11110_v38  ;;  %v11130_v55 = vpack.c.bf16 %v2753_v19, %v2751_v62  ;;  %v11142_v19 = vmax.f32 %v985_v16, %v940_v4  ;;  %v7123_v4 = vrot.slane %v11082_v35, 4 }
  0xf3   : > { %17504 = vst [vmem:[#allocation50_spill] sm:$0xff] %v11125_v42  ;;  %v3101_v62 = vsel %vm678_vm5, %v3098_v63, %v3100_v37  ;;  %v695_v42 = vrot.slane %v11026_v29, 2  ;;  %v7120_v29 = vrot.slane %v11038_v6, 4  ;;  %v3449_v60 = vsel %vm2434_vm6, %v3446_v24, %v3448_v22 }
  0xf4   : > { %v803_v51 = vmax.f32 %v11108_v15, 0.0  ;;  %9347 = vmatmul.msk.bf16.gmra.mxu0 %vm424_vm1, %v409_v26  ;;  %v697_v26 = vrot.slane %v11057_v43, 2  ;;  %v11152_v40 = vpack.c.bf16 %v3101_v62, %v3099_v27  ;;  %v17508_v27 = vrot.slane %v10901_v58, 4 }
  0xf5   : > { %9369 = vmatmul.msk.bf16.gmra.mxu1 %vm424_vm1, %v17505_v52  ;;  %v17509_v37 = vrot.slane %v10909_v49, 4  ;;  %v11175_v52 = vpack.c.bf16 %v3449_v60, %v3447_v46  ;;  %v7118_v62 = vrot.slane %v10957_v28, 4  ;;  %v11182_v22 = vsel %vm5295_vm7, %v7120_v29, %v7121_v45 }
  0xf6   : > { %17506 = vst [vmem:[#allocation51_spill] sm:$0xff] %v11152_v40  ;;  %v11157_v43 = vsel %vm386_vm2, %v803_v51, 0.0  ;;  %v11179_v24 = vsel %vm678_vm5, %v695_v42, %v697_v26  ;;  %v11185_v16 = vsel %vm5295_vm7, %v7121_v45, %v7123_v4  ;;  %v11195_v46 = vsel %vm678_vm5, %v694_v36, %v695_v42 }
  0xf7   : > { %17507 = vst [vmem:[#allocation52_spill] sm:$0xff] %v11157_v43  ;;  %v11170_v10 = vsel %vm5295_vm7, %v17509_v37, %v17508_v27  ;;  %v17516_v27 = vrot.slane %v10897_v44, 2  ;;  %v1159_v29 = vrot.slane %v11142_v19, 1  ;;  %v11208_v44 = vsel %vm5295_vm7, %v17521_v25, %v7118_v62 }
  0xf8   : > { %17510 = vst [vmem:[#allocation53_spill] sm:$0xff] %v11170_v10  ;;  %v11212_v4 = vmax.f32 %v988_v50, -3e+38  ;;  %v1333_v42 = vrot.slane %v11121_v21, 2  ;;  %v3450_v50 = vrot.slane %v11157_v43, 3  ;;  %v1335_v36 = vrot.slane %v11142_v19, 2 }
  0xf9   : > { %v542_v63 = vpop.f32.mrf.mxu0  ;;  %17511 = vst [vmem:[#allocation54_spill] sm:$0xff] %v11175_v52 }
  0xfa   : > { %v11173_v51 = vadd.f32 %v10539_v33, %v542_v63  ;;  %17512 = vst [vmem:[#allocation55_spill] sm:$0xff] %v11179_v24  ;;  %v11192_v63 = vsel %vm678_vm5, %v17516_v27, %v17515_v2  ;;  %v11200_v26 = vpop.f32.mrf.mxu1  ;;  %v11210_v2 = vmax.f32 %v987_v53, -3e+38  ;;  %v2754_v27 = vrot.slane %v11157_v43, 1 }
  0xfb   : > { %17513 = vst [vmem:[#allocation56_spill] sm:$0xff] %v11182_v22  ;;  %v3102_v53 = vrot.slane %v11157_v43, 2  ;;  %v1164_v6 = vrot.slane %v11212_v4, 1 }
  0xfc   : > { %17514 = vst [vmem:[#allocation57_spill] sm:$0xff] %v11185_v16  ;;  %v11198_v60 = vmax.f32 %v11173_v51, 0.0  ;;  %v1162_v16 = vrot.slane %v11210_v2, 1  ;;  %v1338_v49 = vrot.slane %v11210_v2, 2 }
  0xfd   : > { %17517 = vst [vmem:[#allocation58_spill] sm:$0xff] %v11192_v63  ;;  %v17524_v63 = vld [vmem:[#allocation3_spill] sm:$0xff] }
  0xfe   : > { %17518 = vst [vmem:[#allocation59_spill] sm:$0xff] %v11195_v46  ;;  %v11219_v37 = vpack.i.bf16 %v11198_v60, %v11157_v43  ;;  %v2755_v45 = vrot.slane %v11198_v60, 1  ;;  %v3103_v62 = vrot.slane %v11198_v60, 2  ;;  %v3451_v25 = vrot.slane %v11198_v60, 3 }
  0xff   : > { %17519 = vst [vmem:[#allocation60_spill] sm:$0xff] %v11198_v60  ;;  %v1160_v46 = vsel %vm1085_vm4, %v1157_v14, %v1159_v29  ;;  %v410_v24 = vpack.c.bf16 %v17524_v63, %v10546_v41  ;;  %v1161_v41 = vrot.slane %v11115_v59, 1  ;;  %v1337_v63 = vrot.slane %v11115_v59, 2 }
 0x100   : > { %17520 = vst [vmem:[#allocation61_spill] sm:$0xff] %v11200_v26  ;;  %9957 = vrot.lane.b32.xlu2 %v11219_v37, %s10105_s21  ;;  %v2756_v26 = vsel %vm1085_vm4, %v2754_v27, %v2755_v45  ;;  %v3104_v17 = vsel %vm678_vm5, %v3102_v53, %v3103_v62  ;;  %v3452_v57 = vsel %vm2434_vm6, %v3450_v50, %v3451_v25 }
 0x101   : > { %17522 = vst [vmem:[#allocation62_spill] sm:$0xff] %v11208_v44  ;;  %v545_v10 = vpop.f32.mrf.mxu0  ;;  %v1158_v44 = vsel %vm1085_vm4, %v1156_v1, %v1157_v14  ;;  %v1258_v27 = vmax.f32 %v11142_v19, %v1159_v29  ;;  %v700_v1 = vrot.slane %v11173_v51, 2  ;;  %v1257_v14 = vmax.f32 %v11121_v21, %v1160_v46 }
 0x102   : > { %17523 = vst [vmem:[#allocation63_spill] sm:$0xff] %v11219_v37  ;;  %v546_v39 = vadd.f32 %v10539_v33, %v545_v10  ;;  %v11247_v50 = vpop.f32.mrf.mxu1  ;;  %v1256_v22 = vmax.f32 %v11103_v31, %v1158_v44  ;;  %v1340_v33 = vrot.slane %v11212_v4, 2  ;;  %v17526_v10 = vrot.slane %v11103_v31, 2 }
 0x103   : > { %17525 = vst [vmem:[#allocation3_spill] sm:$0xff] %v11247_v50  ;;  %v1336_v19 = vsel %vm678_vm5, %v1333_v42, %v1335_v36  ;;  %v699_v51 = vrot.slane %v11108_v15, 2  ;;  %v1165_v21 = vsel %vm1085_vm4, %v1162_v16, %v1164_v6  ;;  %v17528_v29 = vpack.c.bf16 %v11077_v47, %v11074_v9 }
 0x104   : > { %v805_v53 = vmax.f32 %v546_v39, 0.0  ;;  %9348 = vmatmul.msk.bf16.gmra.mxu0 %vm424_vm1, %v410_v24  ;;  %v1334_v58 = vsel %vm678_vm5, %v17526_v10, %v1333_v42  ;;  %v7125_v24 = vrot.slane %v11157_v43, 4  ;;  %v7126_v42 = vrot.slane %v11198_v60, 4 }
 0x105   : > { %9370 = vmatmul.msk.bf16.gmra.mxu1 %vm424_vm1, %v17528_v29  ;;  %v1433_v10 = vmax.f32 %v1257_v14, %v1336_v19  ;;  %v1434_v50 = vmax.f32 %v1258_v27, %v1335_v36  ;;  %v11275_v43 = vsel %vm678_vm5, %v699_v51, %v700_v1  ;;  %v1163_v37 = vsel %vm1085_vm4, %v1161_v41, %v1162_v16  ;;  %v10092_v19 = vld [vmem:[%s10182_s18 + $0x108] sm:$0xff]  ;;  %v17535_v51 = vld [vmem:[#allocation5_spill] sm:$0xff] }
 0x106   : > { %v11261_v46 = vsel %vm391_vm3, %v805_v53, 0.0  ;;  %v1432_v53 = vmax.f32 %v1256_v22, %v1334_v58  ;;  %17529 = vst [vmem:[#allocation65_spill] sm:$0xff] %v11275_v43  ;;  %v11281_v38 = vsel %vm5295_vm7, %v7125_v24, %v7126_v42  ;;  %v702_v36 = vrot.slane %v546_v39, 2 }
 0x107   : > { %17527 = vst [vmem:[#allocation64_spill] sm:$0xff] %v11261_v46  ;;  %1841 = vrot.lane.b32.xlu0 %v11261_v46, %s10105_s21  ;;  %v2757_v31 = vrot.slane %v11261_v46, 1  ;;  %v3105_v15 = vrot.slane %v11261_v46, 2  ;;  %v3453_v44 = vrot.slane %v11261_v46, 3  ;;  %v1557_v16 = vrot.slane %v1433_v10, 1 }
 0x108   : > { %17530 = vst [vmem:[#allocation66_spill] sm:$0xff] %v11281_v38  ;;  %v1556_v27 = vrot.slane %v1432_v53, 1  ;;  %v1260_v41 = vmax.f32 %v11210_v2, %v1165_v21  ;;  %v1341_v39 = vsel %vm678_vm5, %v1338_v49, %v1340_v33  ;;  %v11306_v14 = vsel %vm678_vm5, %v700_v1, %v702_v36 }
 0x109   : > { %v547_v9 = vpop.f32.mrf.mxu0  ;;  %v2758_v47 = vsel %vm1085_vm4, %v2755_v45, %v2757_v31  ;;  %v3106_v29 = vsel %vm678_vm5, %v3103_v62, %v3105_v15  ;;  %v3454_v34 = vsel %vm2434_vm6, %v3451_v25, %v3453_v44  ;;  %v11293_v45 = vld [vmem:[%s17052_s2] ss:$0 sm:$0xff]  ;;  %17534 = vst [vmem:[#allocation70_spill] sm:$0xff] %v11306_v14  ;;  %v411_v24 = vpack.c.bf16 %v10092_v19, %v17535_v51  ;;  %v1761_v15 = vld [vmem:[%s17055_s5 + $0x2] sm:$0x1] }
 0x10a   : > { %v11284_v35 = vpack.c.bf16 %v2758_v47, %v2756_v26  ;;  %v11286_v58 = vpack.c.bf16 %v3106_v29, %v3104_v17  ;;  %v11288_v22 = vpack.c.bf16 %v3454_v34, %v3452_v57  ;;  %v11296_v62 = vadd.f32 %v11293_v45, %v547_v9  ;;  %v11298_v25 = vpop.f32.mrf.mxu1 }
 0x10b   : > { %17533 = vst [vmem:[#allocation69_spill] sm:$0xff] %v11298_v25  ;;  %v1559_v26 = vrot.slane %v1434_v50, 1  ;;  %v1259_v17 = vmax.f32 %v11115_v59, %v1163_v37  ;;  %v1339_v57 = vsel %vm678_vm5, %v1337_v63, %v1338_v49  ;;  %v1558_v31 = vsel %vm1085_vm4, %v1556_v27, %v1557_v16 }
 0x10c   : > { %17531 = vst [vmem:[#allocation67_spill] sm:$0xff] %v11286_v58  ;;  %v806_v34 = vmax.f32 %v11296_v62, 0.0  ;;  %v7128_v2 = vrot.slane %v11261_v46, 4  ;;  %v1261_v59 = vmax.f32 %v11212_v4, %v1164_v6  ;;  %v11314_v21 = vmax.f32 %v1260_v41, %v1341_v39 }
 0x10d   : > { %17532 = vst [vmem:[#allocation68_spill] sm:$0xff] %v11288_v22  ;;  %v1560_v50 = vsel %vm1085_vm4, %v1557_v16, %v1559_v26  ;;  %v1435_v63 = vmax.f32 %v1259_v17, %v1339_v57  ;;  %v2608_v10 = vsel %vm2201_vm8, %v1761_v15, 0 }
 0x10e   : > { %v11323_v44 = vsel %vm5295_vm7, %v7126_v42, %v7128_v2  ;;  %v11327_v53 = vsel %vm386_vm2, %v806_v34, 0.0  ;;  %v1612_v4 = vpack.c.bf16 %v1560_v50, %v1558_v31  ;;  %2617 = vmatpush.bf16.msra.mxu1 %v2608_v10  ;;  %v1437_v36 = vmax.f32 %v1261_v59, %v1340_v33 }
 0x10f   : > { %17536 = vst [vmem:[#allocation5_spill] sm:$0xff] %v11323_v44  ;;  %v1561_v27 = vrot.slane %v1435_v63, 1  ;;  %v1562_v16 = vrot.slane %v11314_v21, 1  ;;  %v2759_v41 = vrot.slane %v11327_v53, 1  ;;  %v3107_v17 = vrot.slane %v11327_v53, 2 }
 0x110   : > { %17537 = vst [vmem:[#allocation71_spill] sm:$0xff] %v11327_v53  ;;  %v3455_v57 = vrot.slane %v11327_v53, 3  ;;  %v1564_v10 = vrot.slane %v1437_v36, 1  ;;  %v704_v42 = vrot.slane %v11296_v62, 2  ;;  %v7130_v25 = vrot.slane %v11327_v53, 4 }
 0x111   : > { %v550_v37 = vpop.f32.mrf.mxu0 }
 0x112   : > { %v11317_v49 = vadd.f32 %v11293_v45, %v550_v37  ;;  %v9938_v1 = vpop.permute.xlu0 %9937  ;;  %v11335_v47 = vpop.f32.mrf.mxu1 }
 0x113   : > { %v11329_v6 = vunpack.i.h.bf16 %v9938_v1  ;;  %17539 = vst [vmem:[#allocation73_spill] sm:$0xff] %v11335_v47  ;;  %v11337_v29 = vunpack.i.l.bf16 %v9938_v1 }
 0x114   : > { %v11333_v9 = vmax.f32 %v11317_v49, 0.0  ;;  %9349 = vmatmul.msk.bf16.gmra.mxu0 %vm424_vm1, %v411_v24 }
 0x115   : > { %v1907_v39 = vrot.slane %v11329_v6, 1  ;;  %9371 = vmatmul.msk.bf16.gmra.mxu1 %vm424_vm1, %v1612_v4  ;;  %v2031_v51 = vrot.slane %v11329_v6, 2  ;;  %v1906_v24 = vrot.slane %v11337_v29, 1  ;;  %v2030_v31 = vrot.slane %v11337_v29, 2 }
 0x116   : > { %17538 = vst [vmem:[#allocation72_spill] sm:$0xff] %v11333_v9  ;;  %v11345_v26 = vpack.i.bf16 %v11333_v9, %v11327_v53  ;;  %v2760_v34 = vrot.slane %v11333_v9, 1  ;;  %v3108_v33 = vrot.slane %v11333_v9, 2  ;;  %v3456_v19 = vrot.slane %v11333_v9, 3 }
 0x117   : > { %v2032_v63 = vsel %vm678_vm5, %v2030_v31, %v2031_v51  ;;  %v1908_v43 = vsel %vm1085_vm4, %v1906_v24, %v1907_v39  ;;  %v7131_v24 = vrot.slane %v11333_v9, 4 }
 0x118   : > { %17540 = vst [vmem:[#allocation74_spill] sm:$0xff] %v11345_v26  ;;  %9962 = vrot.lane.b32.xlu1 %v11345_v26, %s10105_s21  ;;  %v2761_v2 = vsel %vm1085_vm4, %v2759_v41, %v2760_v34  ;;  %v3109_v59 = vsel %vm678_vm5, %v3107_v17, %v3108_v33  ;;  %v3457_v37 = vsel %vm2434_vm6, %v3455_v57, %v3456_v19  ;;  %v705_v41 = vrot.slane %v11317_v49, 2 }
 0x119   : > { %v552_v50 = vpop.f32.mrf.mxu0  ;;  %v1563_v57 = vsel %vm1085_vm4, %v1561_v27, %v1562_v16  ;;  %v11402_v38 = vsel %vm5295_vm7, %v7130_v25, %v7131_v24 }
 0x11a   : > { %v553_v21 = vadd.f32 %v11293_v45, %v552_v50  ;;  %v11366_v1 = vpop.permute.xlu0 %1817  ;;  %v11372_v17 = vpop.f32.mrf.mxu1  ;;  %17544 = vst [vmem:[#allocation78_spill] sm:$0xff] %v11402_v38 }
 0x11b   : > { %v1909_v15 = vrot.slane %v11366_v1, 1  ;;  %v2033_v4 = vrot.slane %v11366_v1, 2  ;;  %17541 = vst [vmem:[#allocation75_spill] sm:$0xff] %v11372_v17  ;;  %v2440_v9 = vrot.slane %v11366_v1, 3 }
 0x11c   : > { %v808_v14 = vmax.f32 %v553_v21, 0.0 }
 0x11d   : > { %v2034_v50 = vsel %vm678_vm5, %v2031_v51, %v2033_v4  ;;  %v1910_v47 = vsel %vm1085_vm4, %v1907_v39, %v1909_v15  ;;  %v10094_v39 = vld [vmem:[%s10182_s18 + $0x118] sm:$0xff] }
 0x11e   : > { %v11381_v62 = vsel %vm391_vm3, %v808_v14, 0.0  ;;  %v2137_v49 = vpack.c.bf16 %v2034_v50, %v2032_v63  ;;  %v2013_v36 = vpack.c.bf16 %v1910_v47, %v1908_v43  ;;  %v10093_v14 = vld [vmem:[%s10182_s18 + $0x110] sm:$0xff]  ;;  %v1565_v47 = vsel %vm1085_vm4, %v1562_v16, %v1564_v10 }
 0x11f   : > { %17542 = vst [vmem:[#allocation76_spill] sm:$0xff] %v11381_v62  ;;  %1847 = vrot.lane.b32.xlu2 %v11381_v62, %s10105_s21  ;;  %v2762_v27 = vrot.slane %v11381_v62, 1  ;;  %v3110_v31 = vrot.slane %v11381_v62, 2  ;;  %v3458_v51 = vrot.slane %v11381_v62, 3  ;;  %v412_v43 = vpack.c.bf16 %v10094_v39, %v10093_v14 }
 0x120   : > { %9374 = vmatmul.msk.bf16.gmra.mxu2 %vm2152_vm9, %v2137_v49  ;;  %9390 = vmatmul.msk.bf16.gmra.mxu3 %vm2152_vm9, %v2013_v36  ;;  %v11396_v63 = vsel %vm678_vm5, %v704_v42, %v705_v41  ;;  %v1613_v16 = vpack.c.bf16 %v1565_v47, %v1563_v57  ;;  %v707_v42 = vrot.slane %v553_v21, 2  ;;  %v7133_v25 = vrot.slane %v11381_v62, 4 }
 0x121   : > { %17543 = vst [vmem:[#allocation77_spill] sm:$0xff] %v11396_v63  ;;  %v555_v15 = vpop.f32.mrf.mxu0  ;;  %v2763_v4 = vsel %vm1085_vm4, %v2760_v34, %v2762_v27  ;;  %v3111_v50 = vsel %vm678_vm5, %v3108_v33, %v3110_v31  ;;  %v3459_v17 = vsel %vm2434_vm6, %v3456_v19, %v3458_v51  ;;  %v17554_v39 = vmov 0.0  }
 0x122   : > { %v11404_v49 = vpack.c.bf16 %v2763_v4, %v2761_v2  ;;  %v11406_v36 = vpack.c.bf16 %v3111_v50, %v3109_v59  ;;  %v11408_v14 = vpack.c.bf16 %v3459_v17, %v3457_v37  ;;  %v11410_v10 = vpop.f32.mrf.mxu1  ;;  %v11414_v34 = vadd.f32 %v11293_v45, %v555_v15 }
 0x123   : > { %17548 = vst [vmem:[#allocation82_spill] sm:$0xff] %v11410_v10  ;;  %v11422_v59 = vsel %vm5295_vm7, %v7131_v24, %v7133_v25  ;;  %v11425_v37 = vsel %vm678_vm5, %v705_v41, %v707_v42  ;;  %v1764_v24 = vld [vmem:[%s17055_s5 + $0x5] sm:$0x1] }
 0x124   : > { %17545 = vst [vmem:[#allocation79_spill] sm:$0xff] %v11404_v49  ;;  %9350 = vmatmul.msk.bf16.gmra.mxu0 %vm424_vm1, %v412_v43  ;;  %v809_v21 = vmax.f32 %v11414_v34, 0.0  ;;  %v2435_v43 = vrot.slane %v17554_v39, 3  ;;  %v3655_v42 = vsel %vm2201_vm8, %v1764_v24, 0  ;;  %v709_v60 = vrot.slane %v11414_v34, 2 }
 0x125   : > { %17546 = vst [vmem:[#allocation80_spill] sm:$0xff] %v11406_v36  ;;  %9372 = vmatmul.msk.bf16.gmra.mxu1 %vm424_vm1, %v1613_v16  ;;  %3664 = vmatpush.bf16.msrb.mxu0 %v3655_v42 }
 0x126   : > { %17547 = vst [vmem:[#allocation81_spill] sm:$0xff] %v11408_v14  ;;  %v11444_v41 = vsel %vm386_vm2, %v809_v21, 0.0  ;;  %v11465_v63 = vpack.c.bf16 %v2435_v43, %v2435_v43 }
 0x127   : > { %17549 = vst [vmem:[#allocation83_spill] sm:$0xff] %v11422_v59  ;;  %v2764_v27 = vrot.slane %v11444_v41, 1  ;;  %v3112_v59 = vrot.slane %v11444_v41, 2  ;;  %v3460_v1 = vrot.slane %v11444_v41, 3  ;;  %v7135_v62 = vrot.slane %v11444_v41, 4 }
 0x128   : > { %17550 = vst [vmem:[#allocation84_spill] sm:$0xff] %v11425_v37 }
 0x129   : > { %v557_v33 = vpop.f32.mrf.mxu0  ;;  %17553 = vst [vmem:[#allocation87_spill] sm:$0xff] %v11444_v41 }
 0x12a   : > { %v11419_v19 = vadd.f32 %v11293_v45, %v557_v33  ;;  %v9943_v2 = vpop.permute.xlu1 %9942  ;;  %v11431_v57 = vpop.f32.mrf.mxu1  ;;  %17556 = vst [vmem:[#allocation89_spill] sm:$0xff] %v11465_v63 }
 0x12b   : > { %17552 = vst [vmem:[#allocation86_spill] sm:$0xff] %v11431_v57  ;;  %v11435_v31 = vunpack.i.h.bf16 %v9943_v2  ;;  %v11437_v51 = vunpack.i.l.bf16 %v9943_v2  ;;  %v9948_v15 = vpop.permute.xlu2 %9947 }
 0x12c   : > { %v11429_v17 = vmax.f32 %v11419_v19, 0.0  ;;  %v710_v34 = vrot.slane %v11419_v19, 2 }
 0x12d   : > { %v1912_v4 = vrot.slane %v11435_v31, 1  ;;  %v1911_v50 = vrot.slane %v11437_v51, 1  ;;  %v2036_v25 = vrot.slane %v11435_v31, 2  ;;  %v2035_v33 = vrot.slane %v11437_v51, 2 }
 0x12e   : > { %17551 = vst [vmem:[#allocation85_spill] sm:$0xff] %v11429_v17  ;;  %v11449_v47 = vpack.i.bf16 %v11429_v17, %v11444_v41  ;;  %v2765_v39 = vrot.slane %v11429_v17, 1 }
 0x12f   : > { %v1913_v38 = vsel %vm1085_vm4, %v1911_v50, %v1912_v4  ;;  %v11490_v50 = vunpack.i.h.bf16 %v9948_v15 }
 0x130   : > { %17555 = vst [vmem:[#allocation88_spill] sm:$0xff] %v11449_v47  ;;  %9967 = vrot.lane.b32.xlu0 %v11449_v47, %s10105_s21 }
 0x131   : > { %v560_v16 = vpop.f32.mrf.mxu0 }
 0x132   : > { %v11459_v2 = vadd.f32 %v11293_v45, %v560_v16  ;;  %v11461_v21 = vpop.permute.xlu1 %1823  ;;  %v11468_v57 = vpop.f32.mrf.mxu1  ;;  %v3113_v16 = vrot.slane %v11429_v17, 2 }
 0x133   : > { %v1914_v37 = vrot.slane %v11461_v21, 1  ;;  %17557 = vst [vmem:[#allocation90_spill] sm:$0xff] %v11468_v57  ;;  %v2038_v10 = vrot.slane %v11461_v21, 2  ;;  %v2037_v57 = vsel %vm678_vm5, %v2035_v33, %v2036_v25 }
 0x134   : > { %v811_v24 = vmax.f32 %v11459_v2, 0.0 }
 0x135   : > { %v1915_v42 = vsel %vm1085_vm4, %v1912_v4, %v1914_v37  ;;  %v2039_v44 = vsel %vm678_vm5, %v2036_v25, %v2038_v10  ;;  %9405 = vmatmul.msk.bf16.vlgmr.msra.gmra.mxu1 %vm2152_vm9, %v11465_v63  ;;  %v2766_v10 = vsel %vm1085_vm4, %v2764_v27, %v2765_v39  ;;  %v11507_v27 = vunpack.i.l.bf16 %v9948_v15 }
 0x136   : > { %v11479_v43 = vsel %vm391_vm3, %v811_v24, 0.0  ;;  %v2014_v53 = vpack.c.bf16 %v1915_v42, %v1913_v38  ;;  %v2138_v37 = vpack.c.bf16 %v2039_v44, %v2037_v57  ;;  %v3114_v38 = vsel %vm678_vm5, %v3112_v59, %v3113_v16  ;;  %v11509_v42 = vpop.permute.xlu2 %1829 }
 0x137   : > { %17558 = vst [vmem:[#allocation91_spill] sm:$0xff] %v11479_v43  ;;  %1853 = vrot.lane.b32.xlu1 %v11479_v43, %s10105_s21  ;;  %v2767_v4 = vrot.slane %v11479_v43, 1  ;;  %v3115_v44 = vrot.slane %v11479_v43, 2  ;;  %v3461_v57 = vrot.slane %v11429_v17, 3  ;;  %v3463_v59 = vrot.slane %v11479_v43, 3 }
 0x138   : > { %9391 = vmatmul.msk.bf16.gmra.mxu3 %vm2152_vm9, %v2014_v53  ;;  %9375 = vmatmul.msk.bf16.gmra.mxu2 %vm2152_vm9, %v2138_v37 }
 0x139   : > { %v562_v25 = vpop.f32.mrf.mxu0  ;;  %v2768_v33 = vsel %vm1085_vm4, %v2765_v39, %v2767_v4  ;;  %v3116_v19 = vsel %vm678_vm5, %v3113_v16, %v3115_v44  ;;  %v3462_v37 = vsel %vm2434_vm6, %v3460_v1, %v3461_v57  ;;  %v2437_v4 = vrot.slane %v11337_v29, 3 }
 0x13a   : > { %v11502_v24 = vadd.f32 %v11293_v45, %v562_v25  ;;  %v11504_v53 = vpack.c.bf16 %v2768_v33, %v2766_v10  ;;  %v712_v25 = vrot.slane %v11459_v2, 2  ;;  %v11517_v63 = vpop.f32.mrf.mxu1  ;;  %v11519_v10 = vpack.c.bf16 %v3116_v19, %v3114_v38 }
 0x13b   : > { %17560 = vst [vmem:[#allocation93_spill] sm:$0xff] %v11517_v63  ;;  %v3464_v15 = vsel %vm2434_vm6, %v3461_v57, %v3463_v59  ;;  %v7136_v16 = vrot.slane %v11429_v17, 4  ;;  %v11527_v1 = vsel %vm678_vm5, %v709_v60, %v710_v34  ;;  %v1919_v44 = vrot.slane %v11509_v42, 1 }
 0x13c   : > { %17559 = vst [vmem:[#allocation92_spill] sm:$0xff] %v11504_v53  ;;  %v11522_v33 = vpack.c.bf16 %v3464_v15, %v3462_v37  ;;  %v812_v29 = vmax.f32 %v11502_v24, 0.0  ;;  %v17564_v2 = vrot.slane %v11329_v6, 3  ;;  %v1917_v19 = vrot.slane %v11490_v50, 1 }
 0x13d   : > { %17561 = vst [vmem:[#allocation94_spill] sm:$0xff] %v11519_v10  ;;  %v2041_v57 = vrot.slane %v11490_v50, 2  ;;  %v1916_v59 = vrot.slane %v11507_v27, 1  ;;  %v11538_v37 = vsel %vm5295_vm7, %v7135_v62, %v7136_v16  ;;  %v2040_v60 = vrot.slane %v11507_v27, 2 }
 0x13e   : > { %17562 = vst [vmem:[#allocation95_spill] sm:$0xff] %v11522_v33  ;;  %v2441_v38 = vsel %vm2434_vm6, %v17564_v2, %v2440_v9  ;;  %v2043_v15 = vrot.slane %v11509_v42, 2  ;;  %v7138_v39 = vrot.slane %v11479_v43, 4  ;;  %v17567_v9 = vmov %v17564_v2 }
 0x13f   : > { %17563 = vst [vmem:[#allocation96_spill] sm:$0xff] %v11527_v1  ;;  %v11544_v1 = vsel %vm678_vm5, %v710_v34, %v712_v25  ;;  %v2439_v2 = vsel %vm2434_vm6, %v2437_v4, %v17567_v9  ;;  %v11551_v41 = vsel %vm386_vm2, %v812_v29, 0.0  ;;  %v1920_v17 = vsel %vm1085_vm4, %v1917_v19, %v1919_v44 }
 0x140   : > { %17565 = vst [vmem:[#allocation97_spill] sm:$0xff] %v11538_v37  ;;  %v11558_v26 = vsel %vm5295_vm7, %v7136_v16, %v7138_v39  ;;  %v2544_v43 = vpack.c.bf16 %v2441_v38, %v2439_v2  ;;  %v2042_v25 = vsel %vm678_vm5, %v2040_v60, %v2041_v57  ;;  %v2044_v29 = vsel %vm678_vm5, %v2041_v57, %v2043_v15  ;;  %v1762_v2 = vld [vmem:[%s17055_s5 + $0x3] sm:$0x1]  ;;  %v1763_v15 = vld [vmem:[%s17055_s5 + $0x4] sm:$0x1] }
 0x141   : > { %17566 = vst [vmem:[#allocation98_spill] sm:$0xff] %v11544_v1  ;;  %v565_v63 = vpop.f32.mrf.mxu0  ;;  %v2769_v44 = vrot.slane %v11551_v41, 1  ;;  %v3117_v39 = vrot.slane %v11551_v41, 2  ;;  %v3465_v16 = vrot.slane %v11551_v41, 3  ;;  %v3307_v34 = vsel %vm2201_vm8, %v1763_v15, 0 }
 0x142   : > { %17568 = vst [vmem:[#allocation99_spill] sm:$0xff] %v11551_v41  ;;  %v11554_v62 = vadd.f32 %v11293_v45, %v565_v63  ;;  %v11565_v4 = vpop.f32.mrf.mxu1  ;;  %v1918_v63 = vsel %vm1085_vm4, %v1916_v59, %v1917_v19  ;;  %v2139_v19 = vpack.c.bf16 %v2044_v29, %v2042_v25  ;;  %v2959_v59 = vsel %vm2201_vm8, %v1762_v2, 0  ;;  %3316 = vmatpush.bf16.msra.mxu3 %v3307_v34 }
 0x143   : > { %17569 = vst [vmem:[#allocation100_spill] sm:$0xff] %v11558_v26  ;;  %v2015_v9 = vpack.c.bf16 %v1920_v17, %v1918_v63  ;;  %2968 = vmatpush.bf16.msra.mxu2 %v2959_v59  ;;  %v2443_v15 = vrot.slane %v11435_v31, 3 }
 0x144   : > { %v11563_v6 = vmax.f32 %v11554_v62, 0.0  ;;  %17571 = vst [vmem:[#allocation102_spill] sm:$0xff] %v11565_v4 }
 0x145   : > { %9406 = vmatmul.msk.bf16.gmra.mxu1 %vm2152_vm9, %v2544_v43 }
 0x146   : > { %17570 = vst [vmem:[#allocation101_spill] sm:$0xff] %v11563_v6  ;;  %v11575_v38 = vpack.i.bf16 %v11563_v6, %v11551_v41  ;;  %v2770_v60 = vrot.slane %v11563_v6, 1  ;;  %v3118_v57 = vrot.slane %v11563_v6, 2  ;;  %v3466_v17 = vrot.slane %v11563_v6, 3 }
 0x147   : > { %v17109_v59 = vrot.slane %v11563_v6, 4 }
 0x148   : > { %17572 = vst [vmem:[#allocation103_spill] sm:$0xff] %v11575_v38  ;;  %9972 = vrot.lane.b32.xlu2 %v11575_v38, %s10105_s21  ;;  %9392 = vmatmul.msk.bf16.gmra.mxu3 %vm2152_vm9, %v2015_v9  ;;  %v2771_v1 = vsel %vm1085_vm4, %v2769_v44, %v2770_v60  ;;  %v3119_v43 = vsel %vm678_vm5, %v3117_v39, %v3118_v57  ;;  %v2445_v9 = vrot.slane %v11461_v21, 3  ;;  %v7140_v39 = vrot.slane %v11551_v41, 4 }
 0x149   : > { %v3467_v25 = vsel %vm2434_vm6, %v3465_v16, %v3466_v17  ;;  %9376 = vmatmul.msk.bf16.gmra.mxu2 %vm2152_vm9, %v2139_v19  ;;  %v567_v29 = vpop.f32.mrf.mxu0  ;;  %v2442_v21 = vrot.slane %v11437_v51, 3 }
 0x14a   : > { %v11599_v2 = vadd.f32 %v11293_v45, %v567_v29  ;;  %v11602_v4 = vpop.f32.mrf.mxu1  ;;  %v11624_v26 = vsel %vm5295_vm7, %v7140_v39, %v17109_v59  ;;  %v2446_v41 = vsel %vm2434_vm6, %v2443_v15, %v2445_v9  ;;  %v714_v39 = vrot.slane %v11502_v24, 2 }
 0x14b   : > { %17573 = vst [vmem:[#allocation104_spill] sm:$0xff] %v11602_v4 }
 0x14c   : > { %v814_v63 = vmax.f32 %v11599_v2, 0.0  ;;  %17575 = vst [vmem:[#allocation106_spill] sm:$0xff] %v11624_v26  ;;  %v17600_v26 = vrot.slane %v11554_v62, 2 }
 0x14e   : > { %v11607_v44 = vsel %vm391_vm3, %v814_v63, 0.0 }
 0x14f   : > { %17574 = vst [vmem:[#allocation105_spill] sm:$0xff] %v11607_v44  ;;  %1859 = vrot.lane.b32.xlu0 %v11607_v44, %s10105_s21  ;;  %v2772_v34 = vrot.slane %v11607_v44, 1  ;;  %v3120_v16 = vrot.slane %v11607_v44, 2  ;;  %v3468_v19 = vrot.slane %v11607_v44, 3 }
 0x151   : > { %v570_v29 = vpop.f32.mrf.mxu0  ;;  %v2773_v63 = vsel %vm1085_vm4, %v2770_v60, %v2772_v34  ;;  %v3121_v4 = vsel %vm678_vm5, %v3118_v57, %v3120_v16  ;;  %v3469_v37 = vsel %vm2434_vm6, %v3466_v17, %v3468_v19  ;;  %v2444_v60 = vsel %vm2434_vm6, %v2442_v21, %v2443_v15  ;;  %v11637_v34 = vpop.f32.mrf.mxu2 }
 0x152   : > { %v11627_v38 = vpack.c.bf16 %v2773_v63, %v2771_v1  ;;  %v11629_v47 = vpack.c.bf16 %v3121_v4, %v3119_v43  ;;  %v11631_v31 = vpack.c.bf16 %v3469_v37, %v3467_v25  ;;  %v11633_v51 = vpop.f32.mrf.mxu1  ;;  %v17108_v57 = vrot.slane %v11554_v62, 2  ;;  %v11639_v16 = vpop.f32.mrf.mxu3 }
 0x153   : > { %17579 = vst [vmem:[#allocation110_spill] sm:$0xff] %v11633_v51  ;;  %v2545_v17 = vpack.c.bf16 %v2446_v41, %v2444_v60  ;;  %v11643_v1 = vadd.f32 %v11293_v45, %v570_v29  ;;  %v2448_v21 = vrot.slane %v11490_v50, 3  ;;  %v2450_v29 = vrot.slane %v11509_v42, 3 }
 0x154   : > { %17576 = vst [vmem:[#allocation107_spill] sm:$0xff] %v11627_v38  ;;  %v11649_v4 = vsel %vm678_vm5, %v714_v39, %v17108_v57 }
 0x155   : > { %17577 = vst [vmem:[#allocation108_spill] sm:$0xff] %v11629_v47  ;;  %9407 = vmatmul.msk.bf16.gmra.mxu1 %vm2152_vm9, %v2545_v17  ;;  %v815_v25 = vmax.f32 %v11643_v1, 0.0  ;;  %v2447_v17 = vrot.slane %v11507_v27, 3  ;;  %v2451_v51 = vsel %vm2434_vm6, %v2448_v21, %v2450_v29 }
 0x156   : > { %17578 = vst [vmem:[#allocation109_spill] sm:$0xff] %v11631_v31 }
 0x157   : > { %17580 = vst [vmem:[#allocation111_spill] sm:$0xff] %v11649_v4  ;;  %v11673_v39 = vsel %vm386_vm2, %v815_v25, 0.0  ;;  %v2449_v28 = vsel %vm2434_vm6, %v2447_v17, %v2448_v21 }
 0x158   : > { %17584 = vst [vmem:[#allocation115_spill] sm:$0xff] %v11673_v39  ;;  %v2546_v18 = vpack.c.bf16 %v2451_v51, %v2449_v28  ;;  %v3122_v51 = vrot.slane %v11673_v39, 2 }
 0x159   : > { %v572_v37 = vpop.f32.mrf.mxu0  ;;  %v11666_v63 = vpop.f32.mrf.mxu2 }
 0x15a   : > { %v11652_v43 = vadd.f32 %v11293_v45, %v572_v37  ;;  %v9953_v41 = vpop.permute.xlu0 %9952  ;;  %v11662_v15 = vpop.f32.mrf.mxu1 }
 0x15b   : > { %v11655_v9 = vunpack.i.h.bf16 %v9953_v41  ;;  %v11657_v24 = vunpack.i.l.bf16 %v9953_v41  ;;  %17582 = vst [vmem:[#allocation113_spill] sm:$0xff] %v11662_v15  ;;  %v11668_v60 = vpop.f32.mrf.mxu3 }
 0x15c   : > { %v11660_v19 = vmax.f32 %v11652_v43, 0.0  ;;  %17583 = vst [vmem:[#allocation114_spill] sm:$0xff] %v11668_v60 }
 0x15d   : > { %v2046_v37 = vrot.slane %v11655_v9, 2  ;;  %v2045_v41 = vrot.slane %v11657_v24, 2  ;;  %v1922_v57 = vrot.slane %v11655_v9, 1  ;;  %v1921_v50 = vrot.slane %v11657_v24, 1 }
 0x15e   : > { %17581 = vst [vmem:[#allocation112_spill] sm:$0xff] %v11660_v19  ;;  %v11681_v42 = vpack.i.bf16 %v11660_v19, %v11673_v39  ;;  %v3123_v28 = vrot.slane %v11660_v19, 2 }
 0x15f   : > { %v2047_v56 = vsel %vm678_vm5, %v2045_v41, %v2046_v37 }
 0x160   : > { %17585 = vst [vmem:[#allocation116_spill] sm:$0xff] %v11681_v42  ;;  %9977 = vrot.lane.b32.xlu1 %v11681_v42, %s10105_s21  ;;  %v1923_v42 = vsel %vm1085_vm4, %v1921_v50, %v1922_v57 }
 0x161   : > { %v575_v59 = vpop.f32.mrf.mxu0  ;;  %v11683_v4 = vpop.permute.xlu1 %1835 }
 0x162   : > { %v11688_v27 = vadd.f32 %v11293_v45, %v575_v59  ;;  %v1924_v25 = vrot.slane %v11683_v4, 1  ;;  %v2048_v15 = vrot.slane %v11683_v4, 2  ;;  %v11696_v54 = vpop.f32.mrf.mxu1  ;;  %v11705_v21 = vpop.f32.mrf.mxu2 }
 0x163   : > { %17586 = vst [vmem:[#allocation117_spill] sm:$0xff] %v11696_v54  ;;  %v11707_v17 = vpop.f32.mrf.mxu3  ;;  %v17591_v54 = vrot.slane %v11563_v6, 4 }
 0x164   : > { %v817_v46 = vmax.f32 %v11688_v27, 0.0  ;;  %v2049_v32 = vsel %vm678_vm5, %v2046_v37, %v2048_v15  ;;  %v1925_v59 = vsel %vm1085_vm4, %v1922_v57, %v1924_v25  ;;  %17588 = vst [vmem:[#allocation119_spill] sm:$0xff] %v11707_v17  ;;  %v2775_v15 = vrot.slane %v11660_v19, 1  ;;  %v17589_v37 = vld [vmem:[#allocation4_spill] sm:$0xff] }
 0x165   : > { %v2140_v11 = vpack.c.bf16 %v2049_v32, %v2047_v56  ;;  %v2016_v31 = vpack.c.bf16 %v1925_v59, %v1923_v42  ;;  %9408 = vmatmul.msk.bf16.gmra.mxu1 %vm2152_vm9, %v2546_v18  ;;  %v7143_v57 = vrot.slane %v11607_v44, 4  ;;  %v2774_v32 = vrot.slane %v11673_v39, 1 }
 0x166   : > { %v11703_v29 = vsel %vm391_vm3, %v817_v46, 0.0  ;;  %v11723_v41 = vadd.f32 %v11293_v45, %v17589_v37  ;;  %v3124_v25 = vsel %vm678_vm5, %v3122_v51, %v3123_v28  ;;  %v2455_v37 = vrot.slane %v11683_v4, 3 }
 0x167   : > { %17587 = vst [vmem:[#allocation118_spill] sm:$0xff] %v11703_v29  ;;  %1865 = vrot.lane.b32.xlu2 %v11703_v29, %s10105_s21  ;;  %9377 = vmatmul.msk.bf16.gmra.mxu2 %vm2152_vm9, %v2140_v11  ;;  %v2777_v56 = vrot.slane %v11703_v29, 1  ;;  %v3125_v46 = vrot.slane %v11703_v29, 2  ;;  %v2776_v11 = vsel %vm1085_vm4, %v2774_v32, %v2775_v15  ;;  %v11737_v44 = vsel %vm5295_vm7, %v17591_v54, %v7143_v57 }
 0x168   : > { %9393 = vmatmul.msk.bf16.gmra.mxu3 %vm2152_vm9, %v2016_v31  ;;  %17592 = vst [vmem:[#allocation120_spill] sm:$0xff] %v11737_v44  ;;  %v3470_v32 = vrot.slane %v11673_v39, 3  ;;  %v3473_v51 = vrot.slane %v11703_v29, 3  ;;  %v720_v54 = vrot.slane %v11652_v43, 2  ;;  %v9958_v43 = vpop.permute.xlu2 %9957  ;;  %v827_v33 = vmax.f32 %v11723_v41, 0.0 }
 0x169   : > { %v577_v18 = vpop.f32.mrf.mxu0  ;;  %v2778_v31 = vsel %vm1085_vm4, %v2775_v15, %v2777_v56  ;;  %v3126_v59 = vsel %vm678_vm5, %v3123_v28, %v3125_v46  ;;  %v3471_v15 = vrot.slane %v11660_v19, 3  ;;  %v719_v28 = vrot.slane %v11643_v1, 2 }
 0x16a   : > { %v11726_v50 = vadd.f32 %v11293_v45, %v577_v18  ;;  %v11730_v42 = vpack.c.bf16 %v2778_v31, %v2776_v11  ;;  %v11740_v47 = vpop.f32.mrf.mxu1  ;;  %v11742_v18 = vpack.c.bf16 %v3126_v59, %v3124_v25  ;;  %v11751_v57 = vpop.f32.mrf.mxu2  ;;  %v717_v31 = vrot.slane %v11599_v2, 2 }
 0x16b   : > { %17593 = vst [vmem:[#allocation121_spill] sm:$0xff] %v11740_v47  ;;  %v11753_v4 = vpop.f32.mrf.mxu3  ;;  %v3472_v46 = vsel %vm2434_vm6, %v3470_v32, %v3471_v15  ;;  %v2453_v25 = vrot.slane %v11655_v9, 3  ;;  %v2452_v59 = vrot.slane %v11657_v24, 3  ;;  %v3474_v47 = vsel %vm2434_vm6, %v3471_v15, %v3473_v51 }
 0x16c   : > { %17590 = vst [vmem:[#allocation4_spill] sm:$0xff] %v11730_v42  ;;  %v818_v56 = vmax.f32 %v11726_v50, 0.0  ;;  %v11763_v6 = vpack.c.bf16 %v3474_v47, %v3472_v46  ;;  %v7146_v32 = vrot.slane %v11660_v19, 4  ;;  %v7148_v47 = vrot.slane %v11703_v29, 4 }
 0x16d   : > { %17594 = vst [vmem:[#allocation122_spill] sm:$0xff] %v11742_v18  ;;  %v7145_v18 = vrot.slane %v11673_v39, 4  ;;  %v2456_v24 = vsel %vm2434_vm6, %v2453_v25, %v2455_v37  ;;  %v11781_v51 = vsel %vm678_vm5, %v719_v28, %v720_v54  ;;  %v11783_v46 = vunpack.i.h.bf16 %v9958_v43 }
 0x16e   : > { %17595 = vst [vmem:[#allocation123_spill] sm:$0xff] %v11753_v4  ;;  %v11770_v2 = vsel %vm386_vm2, %v818_v56, 0.0  ;;  %v11785_v11 = vunpack.i.l.bf16 %v9958_v43  ;;  %v2454_v56 = vsel %vm2434_vm6, %v2452_v59, %v2453_v25  ;;  %v11791_v37 = vsel %vm678_vm5, %v17600_v26, %v717_v31 }
 0x16f   : > { %17596 = vst [vmem:[#allocation124_spill] sm:$0xff] %v11763_v6  ;;  %v11777_v1 = vsel %vm5295_vm7, %v7145_v18, %v7146_v32  ;;  %v2547_v28 = vpack.c.bf16 %v2456_v24, %v2454_v56  ;;  %v2779_v43 = vrot.slane %v11770_v2, 1  ;;  %v3127_v25 = vrot.slane %v11770_v2, 2  ;;  %v17606_v24 = vld [vmem:[#allocation8_spill] sm:$0xff] }
 0x170   : > { %17597 = vst [vmem:[#allocation125_spill] sm:$0xff] %v11770_v2  ;;  %v3475_v62 = vrot.slane %v11770_v2, 3  ;;  %v2051_v56 = vrot.slane %v11783_v46, 2  ;;  %v1927_v19 = vrot.slane %v11783_v46, 1  ;;  %v2458_v14 = vrot.slane %v11783_v46, 3 }
 0x171   : > { %v580_v9 = vpop.f32.mrf.mxu0  ;;  %17598 = vst [vmem:[#allocation126_spill] sm:$0xff] %v11777_v1  ;;  %v2457_v46 = vrot.slane %v11785_v11, 3 }
 0x172   : > { %v11774_v15 = vadd.f32 %v11293_v45, %v580_v9  ;;  %17599 = vst [vmem:[#allocation127_spill] sm:$0xff] %v11781_v51  ;;  %v722_v9 = vrot.slane %v11688_v27, 2  ;;  %v11797_v44 = vpop.f32.mrf.mxu1  ;;  %v11800_v51 = vsel %vm5295_vm7, %v7146_v32, %v7148_v47  ;;  %v11816_v47 = vadd.f32 %v11293_v45, %v17606_v24 }
 0x173   : > { %17601 = vst [vmem:[#allocation128_spill] sm:$0xff] %v11791_v37  ;;  %v2050_v37 = vrot.slane %v11785_v11, 2  ;;  %v2354_v1 = vpop.f32.mrf.mxu3 }
 0x174   : > { %v11795_v18 = vmax.f32 %v11774_v15, 0.0  ;;  %17603 = vst [vmem:[#allocation130_spill] sm:$0xff] %v11797_v44  ;;  %v11833_v26 = vsel %vm678_vm5, %v720_v54, %v722_v9 }
 0x175   : > { %17604 = vst [vmem:[#allocation131_spill] sm:$0xff] %v11800_v51  ;;  %9409 = vmatmul.msk.bf16.gmra.mxu1 %vm2152_vm9, %v2547_v28  ;;  %v2214_v44 = vpop.f32.mrf.mxu2  ;;  %v1926_v28 = vrot.slane %v11785_v11, 1  ;;  %v2052_v54 = vsel %vm678_vm5, %v2050_v37, %v2051_v56 }
 0x176   : > { %17602 = vst [vmem:[#allocation129_spill] sm:$0xff] %v11795_v18  ;;  %v11809_v27 = vpack.i.bf16 %v11795_v18, %v11770_v2  ;;  %v2780_v31 = vrot.slane %v11795_v18, 1  ;;  %v3128_v59 = vrot.slane %v11795_v18, 2  ;;  %v3476_v32 = vrot.slane %v11795_v18, 3 }
 0x177   : > { %v11830_v6 = vadd.f32 %v2354_v1, %v2214_v44  ;;  %17607 = vst [vmem:[#allocation8_spill] sm:$0xff] %v11833_v26  ;;  %v1928_v9 = vsel %vm1085_vm4, %v1926_v28, %v1927_v19 }
 0x178   : > { %17605 = vst [vmem:[#allocation132_spill] sm:$0xff] %v11809_v27  ;;  %9982 = vrot.lane.b32.xlu0 %v11809_v27, %s10105_s21  ;;  %v2781_v51 = vsel %vm1085_vm4, %v2779_v43, %v2780_v31  ;;  %v3129_v39 = vsel %vm678_vm5, %v3127_v25, %v3128_v59  ;;  %v3477_v24 = vsel %vm2434_vm6, %v3475_v62, %v3476_v32  ;;  %v11839_v43 = vmax.f32 %v11816_v47, 0.0 }
 0x179   : > { %v582_v29 = vpop.f32.mrf.mxu0  ;;  %v1842_v10 = vpop.permute.xlu0 %1841  ;;  %v11843_v62 = vsel %vm386_vm2, %v827_v33, 0.0 }
 0x17a   : > { %v11836_v27 = vadd.f32 %v11293_v45, %v582_v29  ;;  %17608 = vst [vmem:[#allocation133_spill] sm:$0xff] %v11839_v43  ;;  %v1929_v25 = vrot.slane %v1842_v10, 1  ;;  %v2053_v42 = vrot.slane %v1842_v10, 2  ;;  %v11846_v44 = vpop.f32.mrf.mxu1  ;;  %v2460_v1 = vrot.slane %v1842_v10, 3 }
 0x17b   : > { %17609 = vst [vmem:[#allocation134_spill] sm:$0xff] %v11843_v62  ;;  %v11861_v10 = vpack.i.bf16 %v11839_v43, %v11843_v62 }
 0x17c   : > { %v820_v4 = vmax.f32 %v11836_v27, 0.0  ;;  %17610 = vst [vmem:[#allocation135_spill] sm:$0xff] %v11846_v44  ;;  %v2054_v29 = vsel %vm678_vm5, %v2051_v56, %v2053_v42  ;;  %v1930_v26 = vsel %vm1085_vm4, %v1927_v19, %v1929_v25  ;;  %v2461_v28 = vsel %vm2434_vm6, %v2458_v14, %v2460_v1 }
 0x17d   : > { %v2141_v33 = vpack.c.bf16 %v2054_v29, %v2052_v54  ;;  %v2017_v38 = vpack.c.bf16 %v1930_v26, %v1928_v9  ;;  %17612 = vst [vmem:[#allocation137_spill] sm:$0xff] %v11861_v10  ;;  %v7151_v26 = vrot.slane %v11795_v18, 4 }
 0x17e   : > { %v11855_v36 = vsel %vm391_vm3, %v820_v4, 0.0  ;;  %v7150_v4 = vrot.slane %v11770_v2, 4 }
 0x17f   : > { %17611 = vst [vmem:[#allocation136_spill] sm:$0xff] %v11855_v36  ;;  %1871 = vrot.lane.b32.xlu1 %v11855_v36, %s10105_s21  ;;  %v2782_v42 = vrot.slane %v11855_v36, 1  ;;  %v3130_v37 = vrot.slane %v11855_v36, 2  ;;  %v3478_v19 = vrot.slane %v11855_v36, 3  ;;  %9378 = vmatmul.msk.bf16.gmra.mxu2 %vm2152_vm9, %v2141_v33 }
 0x180   : > { %9394 = vmatmul.msk.bf16.gmra.mxu3 %vm2152_vm9, %v2017_v38  ;;  %v11885_v44 = vsel %vm5295_vm7, %v7150_v4, %v7151_v26 }
 0x181   : > { %v585_v56 = vpop.f32.mrf.mxu0  ;;  %v2783_v25 = vsel %vm1085_vm4, %v2780_v31, %v2782_v42  ;;  %v3131_v54 = vsel %vm678_vm5, %v3128_v59, %v3130_v37  ;;  %v3479_v29 = vsel %vm2434_vm6, %v3476_v32, %v3478_v19  ;;  %17616 = vst [vmem:[#allocation141_spill] sm:$0xff] %v11885_v44  ;;  %v2459_v31 = vsel %vm2434_vm6, %v2457_v46, %v2458_v14  ;;  %v17618_v42 = vld [vmem:[#allocation10_spill] sm:$0xff] }
 0x182   : > { %v11876_v9 = vadd.f32 %v11293_v45, %v585_v56  ;;  %v11878_v11 = vpack.c.bf16 %v2783_v25, %v2781_v51  ;;  %v11880_v33 = vpack.c.bf16 %v3131_v54, %v3129_v39  ;;  %v11882_v38 = vpack.c.bf16 %v3479_v29, %v3477_v24  ;;  %v11887_v2 = vpop.f32.mrf.mxu1  ;;  %v1848_v24 = vpop.permute.xlu2 %1847 }
 0x183   : > { %17617 = vst [vmem:[#allocation142_spill] sm:$0xff] %v11887_v2  ;;  %v725_v59 = vrot.slane %v11774_v15, 2  ;;  %v2548_v1 = vpack.c.bf16 %v2461_v28, %v2459_v31  ;;  %v11894_v51 = vadd.f32 %v11293_v45, %v17618_v42  ;;  %v724_v39 = vrot.slane %v11726_v50, 2 }
 0x184   : > { %17613 = vst [vmem:[#allocation138_spill] sm:$0xff] %v11878_v11  ;;  %v821_v32 = vmax.f32 %v11876_v9, 0.0  ;;  %v7153_v37 = vrot.slane %v11855_v36, 4  ;;  %v1934_v4 = vrot.slane %v1848_v24, 1  ;;  %v2058_v25 = vrot.slane %v1848_v24, 2 }
 0x185   : > { %17614 = vst [vmem:[#allocation139_spill] sm:$0xff] %v11880_v33  ;;  %9410 = vmatmul.msk.bf16.gmra.mxu1 %vm2152_vm9, %v2548_v1  ;;  %v11904_v15 = vsel %vm678_vm5, %v724_v39, %v725_v59  ;;  %v829_v46 = vmax.f32 %v11894_v51, 0.0  ;;  %v2465_v1 = vrot.slane %v1848_v24, 3 }
 0x186   : > { %17615 = vst [vmem:[#allocation140_spill] sm:$0xff] %v11882_v38  ;;  %v11901_v19 = vsel %vm386_vm2, %v821_v32, 0.0  ;;  %v11911_v28 = vsel %vm5295_vm7, %v7151_v26, %v7153_v37  ;;  %v727_v32 = vrot.slane %v11836_v27, 2 }
 0x187   : > { %17619 = vst [vmem:[#allocation10_spill] sm:$0xff] %v11901_v19  ;;  %v3132_v37 = vrot.slane %v11901_v19, 2  ;;  %v3480_v44 = vrot.slane %v11901_v19, 3 }
 0x188   : > { %17620 = vst [vmem:[#allocation143_spill] sm:$0xff] %v11904_v15 }
 0x189   : > { %v587_v14 = vpop.f32.mrf.mxu0  ;;  %17621 = vst [vmem:[#allocation144_spill] sm:$0xff] %v11911_v28 }
 0x18a   : > { %v11908_v56 = vadd.f32 %v11293_v45, %v587_v14  ;;  %v9963_v50 = vpop.permute.xlu1 %9962  ;;  %v11919_v39 = vpop.f32.mrf.mxu1  ;;  %v2784_v14 = vrot.slane %v11901_v19, 1 }
 0x18b   : > { %v9965_v54 = vunpack.i.h.bf16 %v9963_v50  ;;  %v9964_v29 = vunpack.i.l.bf16 %v9963_v50  ;;  %17623 = vst [vmem:[#allocation146_spill] sm:$0xff] %v11919_v39 }
 0x18c   : > { %v11917_v42 = vmax.f32 %v11908_v56, 0.0 }
 0x18d   : > { %v1932_v15 = vrot.slane %v9965_v54, 1  ;;  %v2056_v2 = vrot.slane %v9965_v54, 2  ;;  %v2463_v26 = vrot.slane %v9965_v54, 3  ;;  %v1931_v18 = vrot.slane %v9964_v29, 1 }
 0x18e   : > { %17622 = vst [vmem:[#allocation145_spill] sm:$0xff] %v11917_v42  ;;  %v2055_v50 = vrot.slane %v9964_v29, 2  ;;  %v2462_v36 = vrot.slane %v9964_v29, 3  ;;  %v11925_v31 = vpack.i.bf16 %v11917_v42, %v11901_v19  ;;  %v2785_v39 = vrot.slane %v11917_v42, 1 }
 0x18f   : > { %v2059_v27 = vsel %vm678_vm5, %v2056_v2, %v2058_v25  ;;  %v1935_v24 = vsel %vm1085_vm4, %v1932_v15, %v1934_v4  ;;  %v1933_v28 = vsel %vm1085_vm4, %v1931_v18, %v1932_v15  ;;  %v2466_v29 = vsel %vm2434_vm6, %v2463_v26, %v2465_v1 }
 0x190   : > { %17624 = vst [vmem:[#allocation147_spill] sm:$0xff] %v11925_v31  ;;  %9987 = vrot.lane.b32.xlu2 %v11925_v31, %s10105_s21  ;;  %v2057_v54 = vsel %vm678_vm5, %v2055_v50, %v2056_v2  ;;  %v3133_v38 = vrot.slane %v11917_v42, 2  ;;  %v2018_v25 = vpack.c.bf16 %v1935_v24, %v1933_v28  ;;  %v2464_v4 = vsel %vm2434_vm6, %v2462_v36, %v2463_v26 }
 0x191   : > { %v590_v33 = vpop.f32.mrf.mxu0  ;;  %v2142_v11 = vpack.c.bf16 %v2059_v27, %v2057_v54  ;;  %v2786_v22 = vsel %vm1085_vm4, %v2784_v14, %v2785_v39  ;;  %v3481_v2 = vrot.slane %v11917_v42, 3  ;;  %v11949_v15 = vsel %vm678_vm5, %v725_v59, %v727_v32 }
 0x192   : > { %v11940_v58 = vadd.f32 %v11293_v45, %v590_v33  ;;  %v3134_v31 = vsel %vm678_vm5, %v3132_v37, %v3133_v38  ;;  %9395 = vmatmul.msk.bf16.gmra.mxu3 %vm2152_vm9, %v2018_v25  ;;  %17625 = vst [vmem:[#allocation148_spill] sm:$0xff] %v11949_v15  ;;  %v11953_v36 = vsel %vm391_vm3, %v829_v46, 0.0  ;;  %v11956_v28 = vpop.f32.mrf.mxu1  ;;  %v2549_v14 = vpack.c.bf16 %v2466_v29, %v2464_v4  ;;  %v11974_v37 = vpop.f32.mrf.mxu2 }
 0x193   : > { %9379 = vmatmul.msk.bf16.gmra.mxu2 %vm2152_vm9, %v2142_v11  ;;  %17626 = vst [vmem:[#allocation149_spill] sm:$0xff] %v11956_v28  ;;  %v3482_v1 = vsel %vm2434_vm6, %v3480_v44, %v3481_v2  ;;  %v11961_v11 = vadd.f32 %v11293_v45, %v10722_v48  ;;  %v2794_v46 = vrot.slane %v11843_v62, 1  ;;  %v2795_v44 = vrot.slane %v11839_v43, 1  ;;  %v11980_v29 = vpop.f32.mrf.mxu3 }
 0x194   : > { %v823_v33 = vmax.f32 %v11940_v58, 0.0  ;;  %v2797_v32 = vrot.slane %v11953_v36, 1  ;;  %17628 = vst [vmem:[#allocation151_spill] sm:$0xff] %v11974_v37  ;;  %v3142_v27 = vrot.slane %v11843_v62, 2  ;;  %v3143_v24 = vrot.slane %v11839_v43, 2 }
 0x195   : > { %9411 = vmatmul.msk.bf16.gmra.mxu1 %vm2152_vm9, %v2549_v14  ;;  %17629 = vst [vmem:[#allocation152_spill] sm:$0xff] %v11980_v29  ;;  %v2796_v4 = vsel %vm1085_vm4, %v2794_v46, %v2795_v44  ;;  %v11987_v14 = vadd.f32 %v11293_v45, %v11666_v63  ;;  %v830_v46 = vmax.f32 %v11961_v11, 0.0 }
 0x196   : > { %v11965_v26 = vsel %vm391_vm3, %v823_v33, 0.0  ;;  %v2798_v33 = vsel %vm1085_vm4, %v2795_v44, %v2797_v32  ;;  %v12007_v32 = vadd.f32 %v11293_v45, %v11705_v21 }
 0x197   : > { %17627 = vst [vmem:[#allocation150_spill] sm:$0xff] %v11965_v26  ;;  %1877 = vrot.lane.b32.xlu0 %v11965_v26, %s10105_s21  ;;  %v2787_v59 = vrot.slane %v11965_v26, 1  ;;  %v3135_v48 = vrot.slane %v11965_v26, 2  ;;  %v3483_v50 = vrot.slane %v11965_v26, 3  ;;  %v11991_v15 = vpack.c.bf16 %v2798_v33, %v2796_v4 }
 0x198   : > { %17630 = vst [vmem:[#allocation153_spill] sm:$0xff] %v11987_v14 }
 0x199   : > { %v592_v54 = vpop.f32.mrf.mxu0  ;;  %v2788_v25 = vsel %vm1085_vm4, %v2785_v39, %v2787_v59  ;;  %17632 = vst [vmem:[#allocation155_spill] sm:$0xff] %v11991_v15  ;;  %v3136_v28 = vsel %vm678_vm5, %v3133_v38, %v3135_v48  ;;  %v3484_v29 = vsel %vm2434_vm6, %v3481_v2, %v3483_v50  ;;  %v3144_v39 = vsel %vm678_vm5, %v3142_v27, %v3143_v24 }
 0x19a   : > { %v11989_v18 = vpack.c.bf16 %v2788_v25, %v2786_v22  ;;  %v11994_v37 = vpack.c.bf16 %v3136_v28, %v3134_v31  ;;  %v3145_v59 = vrot.slane %v11953_v36, 2  ;;  %v12000_v44 = vpop.f32.mrf.mxu1  ;;  %v12002_v63 = vpack.c.bf16 %v3484_v29, %v3482_v1  ;;  %17636 = vst [vmem:[#allocation159_spill] sm:$0xff] %v12007_v32  ;;  %v12015_v28 = vld [vmem:[%s17052_s2] ss:$0 sm:$0xff] }
 0x19b   : > { %17634 = vst [vmem:[#allocation157_spill] sm:$0xff] %v12000_v44  ;;  %v3490_v22 = vrot.slane %v11843_v62, 3  ;;  %v3491_v31 = vrot.slane %v11839_v43, 3  ;;  %v3493_v2 = vrot.slane %v11953_v36, 3  ;;  %v12018_v1 = vadd.f32 %v12015_v28, %v592_v54 }
 0x19c   : > { %17631 = vst [vmem:[#allocation154_spill] sm:$0xff] %v11989_v18  ;;  %v3146_v38 = vsel %vm678_vm5, %v3143_v24, %v3145_v59  ;;  %v12026_v21 = vadd.f32 %v12015_v28, %v11637_v34  ;;  %v832_v50 = vmax.f32 %v11987_v14, 0.0  ;;  %v12031_v27 = vadd.f32 %v12015_v28, %v11751_v57 }
 0x19d   : > { %17633 = vst [vmem:[#allocation156_spill] sm:$0xff] %v11994_v37  ;;  %v12020_v48 = vpack.c.bf16 %v3146_v38, %v3144_v39  ;;  %v3492_v24 = vsel %vm2434_vm6, %v3490_v22, %v3491_v31  ;;  %v3494_v54 = vsel %vm2434_vm6, %v3491_v31, %v3493_v2  ;;  %v7155_v29 = vrot.slane %v11901_v19, 4 }
 0x19e   : > { %17635 = vst [vmem:[#allocation158_spill] sm:$0xff] %v12002_v63  ;;  %v7156_v25 = vrot.slane %v11917_v42, 4  ;;  %v7158_v34 = vrot.slane %v11965_v26, 4  ;;  %v12042_v4 = vadd.f32 %v12015_v28, %v11639_v16  ;;  %v833_v57 = vmax.f32 %v12007_v32, 0.0 }
 0x19f   : > { %17637 = vst [vmem:[#allocation160_spill] sm:$0xff] %v12015_v28  ;;  %9997 = vrot.lane.b32.xlu0 %v11861_v10, %s10105_s21  ;;  %v12045_v39 = vpack.c.bf16 %v3494_v54, %v3492_v24  ;;  %v824_v59 = vmax.f32 %v12018_v1, 0.0  ;;  %v12059_v16 = vsel %vm386_vm2, %v830_v46, 0.0  ;;  %v12062_v2 = vmax.f32 %v12026_v21, 0.0 }
 0x1a0   : > { %17638 = vst [vmem:[#allocation161_spill] sm:$0xff] %v12020_v48  ;;  %v12052_v38 = vsel %vm5295_vm7, %v7155_v29, %v7156_v25  ;;  %v12055_v31 = vsel %vm5295_vm7, %v7156_v25, %v7158_v34  ;;  %v12071_v29 = vmax.f32 %v12031_v27, 0.0  ;;  %v12083_v45 = vsel %vm386_vm2, %v833_v57, 0.0 }
 0x1a1   : > { %17639 = vst [vmem:[#allocation162_spill] sm:$0xff] %v12031_v27  ;;  %v595_v33 = vpop.f32.mrf.mxu0  ;;  %v12100_v57 = vpack.i.bf16 %v12062_v2, %v12059_v16 }
 0x1a2   : > { %17640 = vst [vmem:[#allocation163_spill] sm:$0xff] %v12045_v39  ;;  %v12049_v22 = vadd.f32 %v12015_v28, %v595_v33  ;;  %v12068_v33 = vsel %vm391_vm3, %v832_v50, 0.0  ;;  %v12076_v46 = vpop.f32.mrf.mxu1  ;;  %v9968_v34 = vpop.permute.xlu0 %9967 }
 0x1a3   : > { %17641 = vst [vmem:[#allocation164_spill] sm:$0xff] %v12052_v38  ;;  %v2219_v24 = vpop.f32.mrf.mxu2  ;;  %v2359_v54 = vpop.f32.mrf.mxu3  ;;  %v9970_v42 = vunpack.i.h.bf16 %v9968_v34  ;;  %v9969_v10 = vunpack.i.l.bf16 %v9968_v34 }
 0x1a4   : > { %17642 = vst [vmem:[#allocation165_spill] sm:$0xff] %v12055_v31  ;;  %v12074_v25 = vmax.f32 %v12049_v22, 0.0  ;;  %v12078_v44 = vadd.f32 %v2359_v54, %v2219_v24  ;;  %v12089_v31 = vsel %vm386_vm2, %v824_v59, 0.0  ;;  %v12104_v59 = vpack.i.bf16 %v12071_v29, %v12083_v45 }
 0x1a5   : > { %17643 = vst [vmem:[#allocation166_spill] sm:$0xff] %v12059_v16  ;;  %v1937_v54 = vrot.slane %v9970_v42, 1  ;;  %v2061_v50 = vrot.slane %v9970_v42, 2  ;;  %v2468_v34 = vrot.slane %v9970_v42, 3  ;;  %v1936_v38 = vrot.slane %v9969_v10, 1 }
 0x1a6   : > { %17644 = vst [vmem:[#allocation167_spill] sm:$0xff] %v12062_v2  ;;  %v12096_v24 = vpack.i.bf16 %v12074_v25, %v12089_v31  ;;  %v2060_v19 = vrot.slane %v9969_v10, 2  ;;  %v2467_v26 = vrot.slane %v9969_v10, 3  ;;  %v2789_v18 = vrot.slane %v12089_v31, 1 }
 0x1a7   : > { %17645 = vst [vmem:[#allocation168_spill] sm:$0xff] %v12071_v29  ;;  %1895 = vrot.lane.b32.xlu0 %v12068_v33, %s10105_s21  ;;  %v3137_v32 = vrot.slane %v12089_v31, 2  ;;  %v3138_v42 = vrot.slane %v12074_v25, 2  ;;  %v3485_v27 = vrot.slane %v12089_v31, 3  ;;  %v1938_v52 = vsel %vm1085_vm4, %v1936_v38, %v1937_v54 }
 0x1a8   : > { %17646 = vst [vmem:[#allocation169_spill] sm:$0xff] %v12076_v46  ;;  %v2790_v46 = vrot.slane %v12074_v25, 1  ;;  %9992 = vrot.lane.b32.xlu1 %v12096_v24, %s10105_s21 }
 0x1a9   : > { %17647 = vst [vmem:[#allocation170_spill] sm:$0xff] %v12083_v45  ;;  %v597_v39 = vpop.f32.mrf.mxu0  ;;  %v1854_v48 = vpop.permute.xlu1 %1853 }
 0x1aa   : > { %17648 = vst [vmem:[#allocation171_spill] sm:$0xff] %v12089_v31  ;;  %v12110_v7 = vadd.f32 %v12015_v28, %v597_v39  ;;  %v1939_v63 = vrot.slane %v1854_v48, 1  ;;  %v2063_v37 = vrot.slane %v1854_v48, 2  ;;  %v2470_v15 = vrot.slane %v1854_v48, 3  ;;  %v12117_v53 = vpop.f32.mrf.mxu1 }
 0x1ab   : > { %17649 = vst [vmem:[#allocation172_spill] sm:$0xff] %v12096_v24  ;;  %v2062_v24 = vsel %vm678_vm5, %v2060_v19, %v2061_v50  ;;  %v2469_v28 = vsel %vm2434_vm6, %v2467_v26, %v2468_v34  ;;  %v2800_v26 = vrot.slane %v12062_v2, 1 }
 0x1ac   : > { %17650 = vst [vmem:[#allocation173_spill] sm:$0xff] %v12100_v57  ;;  %v826_v10 = vmax.f32 %v12110_v7, 0.0  ;;  %v2064_v39 = vsel %vm678_vm5, %v2061_v50, %v2063_v37  ;;  %v1940_v48 = vsel %vm1085_vm4, %v1937_v54, %v1939_v63  ;;  %v2471_v60 = vsel %vm2434_vm6, %v2468_v34, %v2470_v15  ;;  %v12157_v54 = vpop.f32.mrf.mxu3 }
 0x1ad   : > { %17651 = vst [vmem:[#allocation174_spill] sm:$0xff] %v12104_v59  ;;  %v2143_v17 = vpack.c.bf16 %v2064_v39, %v2062_v24  ;;  %v2019_v49 = vpack.c.bf16 %v1940_v48, %v1938_v52  ;;  %v2550_v14 = vpack.c.bf16 %v2471_v60, %v2469_v28  ;;  %v2799_v37 = vrot.slane %v12059_v16, 1  ;;  %v12164_v48 = vpop.f32.mrf.mxu2 }
 0x1ae   : > { %17652 = vst [vmem:[#allocation175_spill] sm:$0xff] %v12117_v53  ;;  %v12127_v40 = vsel %vm391_vm3, %v826_v10, 0.0  ;;  %v2791_v53 = vsel %vm1085_vm4, %v2789_v18, %v2790_v46  ;;  %v2802_v15 = vrot.slane %v12068_v33, 1  ;;  %v3139_v52 = vsel %vm678_vm5, %v3137_v32, %v3138_v42 }
 0x1af   : > { %1883 = vrot.lane.b32.xlu2 %v12127_v40, %s10105_s21  ;;  %9380 = vmatmul.msk.bf16.gmra.mxu2 %vm2152_vm9, %v2143_v17  ;;  %v2792_v19 = vrot.slane %v12127_v40, 1  ;;  %v3140_v60 = vrot.slane %v12127_v40, 2  ;;  %v3486_v18 = vrot.slane %v12074_v25, 3  ;;  %v3488_v17 = vrot.slane %v12127_v40, 3  ;;  %17655 = vst [vmem:[#allocation178_spill] sm:$0xff] %v12157_v54 }
 0x1b0   : > { %9396 = vmatmul.msk.bf16.gmra.mxu3 %vm2152_vm9, %v2019_v49  ;;  %9412 = vmatmul.msk.bf16.gmra.mxu1 %vm2152_vm9, %v2550_v14  ;;  %v2801_v49 = vsel %vm1085_vm4, %v2799_v37, %v2800_v26  ;;  %v2803_v14 = vsel %vm1085_vm4, %v2800_v26, %v2802_v15  ;;  %v3147_v32 = vrot.slane %v12059_v16, 2  ;;  %v3148_v10 = vrot.slane %v12062_v2, 2  ;;  %17657 = vst [vmem:[#allocation180_spill] sm:$0xff] %v12164_v48 }
 0x1b1   : > { %2878 = vrot.lane.b32.xlu0 %v10716_v0, %s10105_s21  ;;  %1889 = vrot.lane.b32.xlu1 %v11953_v36, %s10105_s21  ;;  %v2793_v63 = vsel %vm1085_vm4, %v2790_v46, %v2792_v19  ;;  %v12153_v38 = vpack.c.bf16 %v2803_v14, %v2801_v49  ;;  %v3141_v50 = vsel %vm678_vm5, %v3138_v42, %v3140_v60  ;;  %v3150_v39 = vrot.slane %v12068_v33, 2 }
 0x1b2   : > { %v12151_v28 = vpack.c.bf16 %v2793_v63, %v2791_v53  ;;  %v3487_v24 = vsel %vm2434_vm6, %v3485_v27, %v3486_v18  ;;  %v12159_v34 = vpack.c.bf16 %v3141_v50, %v3139_v52  ;;  %v3489_v46 = vsel %vm2434_vm6, %v3486_v18, %v3488_v17  ;;  %v2619_v53 = vpop.f32.mrf.mxu1  ;;  %v9973_v63 = vpop.permute.xlu2 %9972 }
 0x1b3   : > { %17654 = vst [vmem:[#allocation177_spill] sm:$0xff] %v12153_v38  ;;  %v12166_v19 = vpack.c.bf16 %v3489_v46, %v3487_v24  ;;  %v3495_v37 = vrot.slane %v12059_v16, 3  ;;  %v3496_v42 = vrot.slane %v12062_v2, 3  ;;  %v3498_v27 = vrot.slane %v12068_v33, 3 }
 0x1b4   : > { %17653 = vst [vmem:[#allocation176_spill] sm:$0xff] %v12151_v28  ;;  %v12172_v26 = vadd.f32 %v2619_v53, %v11830_v6  ;;  %v3149_v15 = vsel %vm678_vm5, %v3147_v32, %v3148_v10  ;;  %v3151_v52 = vsel %vm678_vm5, %v3148_v10, %v3150_v39  ;;  %v7165_v32 = vrot.slane %v11843_v62, 4 }
 0x1b5   : > { %17656 = vst [vmem:[#allocation179_spill] sm:$0xff] %v12159_v34  ;;  %v12176_v60 = vpack.c.bf16 %v3151_v52, %v3149_v15  ;;  %v3497_v18 = vsel %vm2434_vm6, %v3495_v37, %v3496_v42  ;;  %v3499_v17 = vsel %vm2434_vm6, %v3496_v42, %v3498_v27  ;;  %v7166_v50 = vrot.slane %v11839_v43, 4 }
 0x1b6   : > { %17658 = vst [vmem:[#allocation181_spill] sm:$0xff] %v12166_v19  ;;  %v12182_v49 = vpack.c.bf16 %v3499_v17, %v3497_v18  ;;  %v7160_v24 = vrot.slane %v12089_v31, 4  ;;  %v17172_v46 = vrot.slane %v12074_v25, 4  ;;  %v17662_v10 = vmax.f32 %v12042_v4, 0.0 }
 0x1b7   : > { %17659 = vst [vmem:[#allocation182_spill] sm:$0xff] %v12172_v26  ;;  %10002 = vrot.lane.b32.xlu2 %v12100_v57, %s10105_s21  ;;  %v17663_v53 = vrot.slane %v11908_v56, 2  ;;  %v17664_v37 = vrot.slane %v11876_v9, 2  ;;  %v17666_v27 = vrot.slane %v11940_v58, 2  ;;  %v9975_v18 = vunpack.i.h.bf16 %v9973_v63 }
 0x1b8   : > { %17660 = vst [vmem:[#allocation183_spill] sm:$0xff] %v12176_v60  ;;  %v12196_v39 = vsel %vm391_vm3, %v17662_v10, 0.0  ;;  %v9974_v17 = vunpack.i.l.bf16 %v9973_v63  ;;  %v12217_v10 = vsel %vm5295_vm7, %v7165_v32, %v7166_v50  ;;  %v12222_v14 = vsel %vm5295_vm7, %v7160_v24, %v17172_v46 }
 0x1b9   : > { %17661 = vst [vmem:[#allocation184_spill] sm:$0xff] %v12182_v49  ;;  %2880 = vrot.lane.b32.xlu0 %v10848_v13, %s10105_s21  ;;  %10007 = vrot.lane.b32.xlu1 %v12104_v59, %s10105_s21  ;;  %v12207_v42 = vsel %vm678_vm5, %v17664_v37, %v17663_v53  ;;  %v17667_v15 = vmov %v17663_v53  ;;  %v2804_v53 = vrot.slane %v12083_v45, 1  ;;  %v2805_v58 = vrot.slane %v12071_v29, 1 }
 0x1ba   : > { %17665 = vst [vmem:[#allocation185_spill] sm:$0xff] %v12207_v42  ;;  %v12214_v52 = vsel %vm678_vm5, %v17667_v15, %v17666_v27  ;;  %v2807_v56 = vrot.slane %v12196_v39, 1  ;;  %v12227_v37 = vpop.f32.mrf.mxu1  ;;  %v3152_v63 = vrot.slane %v12083_v45, 2  ;;  %v3153_v32 = vrot.slane %v12071_v29, 2 }
 0x1bb   : > { %17668 = vst [vmem:[#allocation186_spill] sm:$0xff] %v12214_v52  ;;  %v2364_v9 = vpop.f32.mrf.mxu3  ;;  %v2224_v27 = vpop.f32.mrf.mxu2  ;;  %v2806_v6 = vsel %vm1085_vm4, %v2804_v53, %v2805_v58  ;;  %v2066_v46 = vrot.slane %v9975_v18, 2  ;;  %v2065_v52 = vrot.slane %v9974_v17, 2  ;;  %v740_v48 = vrot.slane %v11816_v47, 2 }
 0x1bc   : > { %17669 = vst [vmem:[#allocation187_spill] sm:$0xff] %v12217_v10  ;;  %v12231_v15 = vadd.f32 %v2364_v9, %v2224_v27  ;;  %v2808_v24 = vsel %vm1085_vm4, %v2805_v58, %v2807_v56  ;;  %v3154_v54 = vsel %vm678_vm5, %v3152_v63, %v3153_v32  ;;  %v3500_v9 = vrot.slane %v12083_v45, 3 }
 0x1bd   : > { %17670 = vst [vmem:[#allocation188_spill] sm:$0xff] %v12222_v14  ;;  %v12235_v42 = vpack.c.bf16 %v2808_v24, %v2806_v6  ;;  %v3501_v27 = vrot.slane %v12071_v29, 3  ;;  %v742_v53 = vrot.slane %v11894_v51, 2  ;;  %v1942_v58 = vrot.slane %v9975_v18, 1 }
 0x1be   : > { %17671 = vst [vmem:[#allocation189_spill] sm:$0xff] %v12227_v37  ;;  %v3155_v37 = vrot.slane %v12196_v39, 2  ;;  %v1941_v56 = vrot.slane %v9974_v17, 1  ;;  %v3503_v6 = vrot.slane %v12196_v39, 3  ;;  %v735_v24 = vrot.slane %v12049_v22, 2 }
 0x1bf   : > { %17672 = vst [vmem:[#allocation190_spill] sm:$0xff] %v12235_v42  ;;  %1901 = vrot.lane.b32.xlu2 %v12196_v39, %s10105_s21  ;;  %v3502_v62 = vsel %vm2434_vm6, %v3500_v9, %v3501_v27  ;;  %v7168_v43 = vrot.slane %v11953_v36, 4  ;;  %v2473_v51 = vrot.slane %v9975_v18, 3  ;;  %v2472_v26 = vrot.slane %v9974_v17, 3 }
 0x1c0   : > { %v3156_v63 = vsel %vm678_vm5, %v3153_v32, %v3155_v37  ;;  %v2067_v13 = vsel %vm678_vm5, %v2065_v52, %v2066_v46  ;;  %v1943_v37 = vsel %vm1085_vm4, %v1941_v56, %v1942_v58  ;;  %v7163_v17 = vrot.slane %v12127_v40, 4 }
 0x1c1   : > { %2882 = vrot.lane.b32.xlu0 %v10993_v3, %s10105_s21  ;;  %3226 = vrot.lane.b32.xlu1 %v10718_v30, %s10105_s21  ;;  %v1860_v47 = vpop.permute.xlu0 %1859  ;;  %v12257_v3 = vpack.c.bf16 %v3156_v63, %v3154_v54  ;;  %v3504_v30 = vsel %vm2434_vm6, %v3501_v27, %v3503_v6  ;;  %v737_v27 = vrot.slane %v12110_v7, 2  ;;  %v2474_v56 = vsel %vm2434_vm6, %v2472_v26, %v2473_v51 }
 0x1c2   : > { %v1944_v31 = vrot.slane %v1860_v47, 1  ;;  %v2068_v0 = vrot.slane %v1860_v47, 2  ;;  %v2475_v22 = vrot.slane %v1860_v47, 3  ;;  %v2624_v57 = vpop.f32.mrf.mxu1  ;;  %v12264_v18 = vpack.c.bf16 %v3504_v30, %v3502_v62 }
 0x1c3   : > { %v12255_v59 = vpop.f32.mrf.mxu3  ;;  %17673 = vst [vmem:[#allocation191_spill] sm:$0xff] %v12257_v3  ;;  %v12260_v49 = vpop.f32.mrf.mxu2  ;;  %v12268_v52 = vadd.f32 %v2624_v57, %v12078_v44  ;;  %v12272_v47 = vsel %vm5295_vm7, %v7166_v50, %v7168_v43  ;;  %v739_v30 = vrot.slane %v11723_v41, 2  ;;  %v734_v43 = vrot.slane %v12018_v1, 2 }
 0x1c4   : > { %v1945_v32 = vsel %vm1085_vm4, %v1942_v58, %v1944_v31  ;;  %17674 = vst [vmem:[#allocation192_spill] sm:$0xff] %v12264_v18  ;;  %v2069_v9 = vsel %vm678_vm5, %v2066_v46, %v2068_v0  ;;  %v2476_v31 = vsel %vm2434_vm6, %v2473_v51, %v2475_v22  ;;  %v7170_v44 = vrot.slane %v12059_v16, 4  ;;  %v17768_v16 = vld [vmem:[#allocation37_spill] sm:$0xff] }
 0x1c5   : > { %17675 = vst [vmem:[#allocation193_spill] sm:$0xff] %v12268_v52  ;;  %v2020_v54 = vpack.c.bf16 %v1945_v32, %v1943_v37  ;;  %v2144_v6 = vpack.c.bf16 %v2069_v9, %v2067_v13  ;;  %v2551_v62 = vpack.c.bf16 %v2476_v31, %v2474_v56  ;;  %v17677_v13 = vrot.slane %v12074_v25, 4 }
 0x1c6   : > { %17676 = vst [vmem:[#allocation194_spill] sm:$0xff] %v12272_v47  ;;  %v7171_v57 = vrot.slane %v12062_v2, 4  ;;  %v7173_v26 = vrot.slane %v12068_v33, 4  ;;  %v12303_v50 = vsel %vm678_vm5, %v734_v43, %v735_v24  ;;  %v12306_v46 = vsel %vm678_vm5, %v740_v48, %v742_v53 }
 0x1c7   : > { %9397 = vmatmul.msk.bf16.gmra.mxu3 %vm2152_vm9, %v2020_v54  ;;  %3574 = vrot.lane.b32.xlu2 %v10720_v23, %s10105_s21  ;;  %v12290_v41 = vsel %vm5295_vm7, %v17677_v13, %v7163_v17  ;;  %17679 = vst [vmem:[#allocation196_spill] sm:$0xff] %v12303_v50  ;;  %v12309_v58 = vsel %vm678_vm5, %v735_v24, %v737_v27  ;;  %v744_v24 = vrot.slane %v11961_v11, 2  ;;  %v745_v54 = vrot.slane %v12026_v21, 2  ;;  %v1866_v27 = vpop.permute.xlu2 %1865 }
 0x1c8   : > { %9381 = vmatmul.msk.bf16.gmra.mxu2 %vm2152_vm9, %v2144_v6  ;;  %17678 = vst [vmem:[#allocation195_spill] sm:$0xff] %v12290_v41  ;;  %9413 = vmatmul.msk.bf16.gmra.mxu1 %vm2152_vm9, %v2551_v62  ;;  %v12312_v51 = vsel %vm5295_vm7, %v7170_v44, %v7171_v57  ;;  %v12315_v22 = vsel %vm5295_vm7, %v7171_v57, %v7173_v26  ;;  %v1949_v31 = vrot.slane %v1866_v27, 1  ;;  %v2073_v62 = vrot.slane %v1866_v27, 2 }
 0x1c9   : > { %2884 = vrot.lane.b32.xlu0 %v11130_v55, %s10105_s21  ;;  %3228 = vrot.lane.b32.xlu1 %v10850_v61, %s10105_s21  ;;  %17680 = vst [vmem:[#allocation197_spill] sm:$0xff] %v12306_v46  ;;  %v12318_v37 = vsel %vm678_vm5, %v739_v30, %v740_v48  ;;  %v12333_v48 = vsel %vm678_vm5, %v744_v24, %v745_v54  ;;  %v2480_v43 = vrot.slane %v1866_v27, 3  ;;  %v7175_v13 = vrot.slane %v12083_v45, 4  ;;  %v17687_v24 = vld [vmem:[#allocation153_spill] sm:$0xff] }
 0x1ca   : > { %17681 = vst [vmem:[#allocation198_spill] sm:$0xff] %v12309_v58  ;;  %v12320_v32 = vpop.f32.mrf.mxu1  ;;  %v7176_v44 = vrot.slane %v12071_v29, 4  ;;  %v747_v53 = vrot.slane %v17687_v24, 2 }
 0x1cb   : > { %v2369_v63 = vpop.f32.mrf.mxu3  ;;  %17682 = vst [vmem:[#allocation199_spill] sm:$0xff] %v12312_v51 }
 0x1cc   : > { %17683 = vst [vmem:[#allocation200_spill] sm:$0xff] %v12315_v22  ;;  %v2229_v17 = vpop.f32.mrf.mxu2  ;;  %v12354_v46 = vsel %vm5295_vm7, %v7175_v13, %v7176_v44 }
 0x1cd   : > { %17684 = vst [vmem:[#allocation201_spill] sm:$0xff] %v12318_v37  ;;  %v2370_v9 = vadd.f32 %v2369_v63, %v2229_v17 }
 0x1ce   : > { %17685 = vst [vmem:[#allocation202_spill] sm:$0xff] %v12333_v48 }
 0x1cf   : > { %3576 = vrot.lane.b32.xlu2 %v10873_v8, %s10105_s21  ;;  %17690 = vst [vmem:[#allocation153_spill] sm:$0xff] %v12354_v46 }
 0x1d1   : > { %2886 = vrot.lane.b32.xlu0 %v11284_v35, %s10105_s21  ;;  %3230 = vrot.lane.b32.xlu1 %v10995_v20, %s10105_s21 }
 0x1d2   : > { %v2629_v6 = vpop.f32.mrf.mxu1  ;;  %v9978_v56 = vpop.permute.xlu1 %9977 }
 0x1d3   : > { %v12336_v11 = vadd.f32 %v2629_v6, %v12231_v15  ;;  %v9980_v21 = vunpack.i.h.bf16 %v9978_v56  ;;  %v9979_v30 = vunpack.i.l.bf16 %v9978_v56  ;;  %v17688_v6 = vld [vmem:[#allocation79_spill] sm:$0xff] }
 0x1d5   : > { %17686 = vst [vmem:[#allocation203_spill] sm:$0xff] %v12336_v11  ;;  %v1947_v57 = vrot.slane %v9980_v21, 1  ;;  %v2071_v26 = vrot.slane %v9980_v21, 2  ;;  %v2478_v63 = vrot.slane %v9980_v21, 3  ;;  %v1946_v17 = vrot.slane %v9979_v30, 1  ;;  %v17689_v21 = vld [vmem:[#allocation51_spill] sm:$0xff] }
 0x1d6   : > { %v2070_v1 = vrot.slane %v9979_v30, 2  ;;  %v2477_v15 = vrot.slane %v9979_v30, 3 }
 0x1d7   : > { %3578 = vrot.lane.b32.xlu2 %v11001_v5, %s10105_s21  ;;  %v2074_v27 = vsel %vm678_vm5, %v2071_v26, %v2073_v62  ;;  %v1948_v56 = vsel %vm1085_vm4, %v1946_v17, %v1947_v57  ;;  %v1950_v7 = vsel %vm1085_vm4, %v1947_v57, %v1949_v31  ;;  %v2481_v0 = vsel %vm2434_vm6, %v2478_v63, %v2480_v43  ;;  %v17696_v43 = vld [vmem:[#allocation119_spill] sm:$0xff] }
 0x1d8   : > { %v2072_v48 = vsel %vm678_vm5, %v2070_v1, %v2071_v26  ;;  %v2021_v37 = vpack.c.bf16 %v1950_v7, %v1948_v56  ;;  %v2479_v24 = vsel %vm2434_vm6, %v2477_v15, %v2478_v63  ;;  %v7178_v62 = vrot.slane %v12196_v39, 4  ;;  %v17695_v1 = vld [vmem:[#allocation160_spill] sm:$0xff]  ;;  %v17699_v26 = vld [vmem:[#allocation162_spill] sm:$0xff]  ;;  %v17700_v15 = vld [vmem:[#allocation67_spill] sm:$0xff]  ;;  %v12390_v56 = vpop.f32.mrf.mxu3 }
 0x1d9   : > { %2888 = vrot.lane.b32.xlu0 %v17688_v6, %s10105_s21  ;;  %3232 = vrot.lane.b32.xlu1 %v17689_v21, %s10105_s21  ;;  %v2145_v30 = vpack.c.bf16 %v2074_v27, %v2072_v48  ;;  %v2552_v58 = vpack.c.bf16 %v2481_v0, %v2479_v24  ;;  %v12361_v31 = vsel %vm678_vm5, %v745_v54, %v747_v53  ;;  %v17694_v0 = vld [vmem:[#allocation114_spill] sm:$0xff]  ;;  %v17698_v54 = vld [vmem:[#allocation92_spill] sm:$0xff]  ;;  %v750_v63 = vrot.slane %v17699_v26, 2  ;;  %v12388_v27 = vpop.f32.mrf.mxu2  ;;  %v17703_v24 = vld [vmem:[#allocation159_spill] sm:$0xff] }
 0x1da   : > { %v12357_v17 = vpop.f32.mrf.mxu1  ;;  %9398 = vmatmul.msk.bf16.gmra.mxu3 %vm2152_vm9, %v2021_v37  ;;  %17692 = vst [vmem:[#allocation51_spill] sm:$0xff] %v12361_v31  ;;  %v12366_v7 = vsel %vm5295_vm7, %v7176_v44, %v7178_v62  ;;  %v12370_v48 = vadd.f32 %v17695_v1, %v17694_v0  ;;  %v12374_v13 = vadd.f32 %v17695_v1, %v17696_v43  ;;  %v17697_v53 = vld [vmem:[#allocation54_spill] sm:$0xff]  ;;  %v17707_v26 = vld [vmem:[#allocation68_spill] sm:$0xff]  ;;  %v17709_v31 = vld [vmem:[#allocation107_spill] sm:$0xff] }
 0x1db   : > { %17691 = vst [vmem:[#allocation79_spill] sm:$0xff] %v12357_v17  ;;  %9382 = vmatmul.msk.bf16.gmra.mxu2 %vm2152_vm9, %v2145_v30  ;;  %9414 = vmatmul.msk.bf16.gmra.mxu1 %vm2152_vm9, %v2552_v58  ;;  %v752_v58 = vrot.slane %v12042_v4, 2  ;;  %v749_v30 = vrot.slane %v17703_v24, 2  ;;  %v17710_v24 = vld [vmem:[#allocation80_spill] sm:$0xff] }
 0x1dc   : > { %17693 = vst [vmem:[#allocation204_spill] sm:$0xff] %v12366_v7  ;;  %v754_v44 = vrot.slane %v12370_v48, 2  ;;  %v755_v57 = vrot.slane %v12374_v13, 2 }
 0x1dd   : > { %17701 = vst [vmem:[#allocation114_spill] sm:$0xff] %v12388_v27  ;;  %v12396_v4 = vsel %vm678_vm5, %v750_v63, %v752_v58  ;;  %v12404_v37 = vsel %vm678_vm5, %v749_v30, %v750_v63  ;;  %v17712_v63 = vld [vmem:[#allocation81_spill] sm:$0xff]  ;;  %v17713_v30 = vld [vmem:[#allocation123_spill] sm:$0xff] }
 0x1de   : > { %17702 = vst [vmem:[#allocation160_spill] sm:$0xff] %v12390_v56  ;;  %v12399_v43 = vsel %vm678_vm5, %v754_v44, %v755_v57 }
 0x1df   : > { %3580 = vrot.lane.b32.xlu2 %v17697_v53, %s10105_s21  ;;  %17705 = vst [vmem:[#allocation92_spill] sm:$0xff] %v12396_v4 }
 0x1e0   : > { %17706 = vst [vmem:[#allocation162_spill] sm:$0xff] %v12399_v43 }
 0x1e1   : > { %2890 = vrot.lane.b32.xlu0 %v17698_v54, %s10105_s21  ;;  %3234 = vrot.lane.b32.xlu1 %v17700_v15, %s10105_s21  ;;  %17708 = vst [vmem:[#allocation67_spill] sm:$0xff] %v12404_v37  ;;  %v12416_v37 = vadd.f32 %v17695_v1, %v17713_v30 }
 0x1e2   : > { %v2634_v62 = vpop.f32.mrf.mxu1 }
 0x1e3   : > { %v12393_v0 = vadd.f32 %v2634_v62, %v2370_v9  ;;  %v757_v47 = vrot.slane %v12416_v37, 2 }
 0x1e5   : > { %17704 = vst [vmem:[#allocation119_spill] sm:$0xff] %v12393_v0 }
 0x1e7   : > { %3582 = vrot.lane.b32.xlu2 %v17707_v26, %s10105_s21 }
 0x1e9   : > { %2892 = vrot.lane.b32.xlu0 %v17709_v31, %s10105_s21  ;;  %3236 = vrot.lane.b32.xlu1 %v17710_v24, %s10105_s21 }
 0x1ea   : > { %v9983_v9 = vpop.permute.xlu0 %9982  ;;  %v2234_v58 = vpop.f32.mrf.mxu2 }
 0x1eb   : > { %v9985_v62 = vunpack.i.h.bf16 %v9983_v9  ;;  %v9984_v50 = vunpack.i.l.bf16 %v9983_v9  ;;  %v2374_v4 = vpop.f32.mrf.mxu3  ;;  %v12410_v46 = vpop.f32.mrf.mxu1  ;;  %v17714_v9 = vld [vmem:[#allocation4_spill] sm:$0xff] }
 0x1ec   : > { %17711 = vst [vmem:[#allocation159_spill] sm:$0xff] %v12410_v46  ;;  %v2375_v44 = vadd.f32 %v2374_v4, %v2234_v58  ;;  %v17715_v4 = vld [vmem:[#allocation94_spill] sm:$0xff] }
 0x1ed   : > { %v1952_v43 = vrot.slane %v9985_v62, 1  ;;  %v2076_v7 = vrot.slane %v9985_v62, 2  ;;  %v1951_v51 = vrot.slane %v9984_v50, 1  ;;  %v2075_v22 = vrot.slane %v9984_v50, 2 }
 0x1ee   : > { %v2483_v14 = vrot.slane %v9985_v62, 3  ;;  %v2482_v41 = vrot.slane %v9984_v50, 3 }
 0x1ef   : > { %3584 = vrot.lane.b32.xlu2 %v17712_v63, %s10105_s21  ;;  %v2077_v63 = vsel %vm678_vm5, %v2075_v22, %v2076_v7  ;;  %v1953_v26 = vsel %vm1085_vm4, %v1951_v51, %v1952_v43  ;;  %v17718_v51 = vld [vmem:[#allocation95_spill] sm:$0xff]  ;;  %v9988_v22 = vpop.permute.xlu2 %9987 }
 0x1f0   : > { %v2484_v30 = vsel %vm2434_vm6, %v2482_v41, %v2483_v14  ;;  %v17719_v41 = vld [vmem:[#allocation138_spill] sm:$0xff] }
 0x1f1   : > { %2894 = vrot.lane.b32.xlu0 %v17714_v9, %s10105_s21  ;;  %v1872_v10 = vpop.permute.xlu1 %1871  ;;  %3238 = vrot.lane.b32.xlu1 %v17715_v4, %s10105_s21 }
 0x1f2   : > { %v1954_v58 = vrot.slane %v1872_v10, 1  ;;  %v2078_v53 = vrot.slane %v1872_v10, 2  ;;  %v2485_v5 = vrot.slane %v1872_v10, 3  ;;  %v12432_v10 = vsel %vm678_vm5, %v755_v57, %v757_v47  ;;  %v17723_v47 = vld [vmem:[#allocation109_spill] sm:$0xff] }
 0x1f3   : > { %v2639_v1 = vpop.f32.mrf.mxu1  ;;  %17717 = vst [vmem:[#allocation80_spill] sm:$0xff] %v12432_v10 }
 0x1f4   : > { %v2079_v62 = vsel %vm678_vm5, %v2076_v7, %v2078_v53  ;;  %v1955_v50 = vsel %vm1085_vm4, %v1952_v43, %v1954_v58  ;;  %v2486_v46 = vsel %vm2434_vm6, %v2483_v14, %v2485_v5  ;;  %v12429_v56 = vadd.f32 %v2639_v1, %v2375_v44  ;;  %v17720_v5 = vld [vmem:[#allocation108_spill] sm:$0xff]  ;;  %v12443_v14 = vpop.f32.mrf.mxu2  ;;  %v17726_v53 = vld [vmem:[#allocation122_spill] sm:$0xff] }
 0x1f5   : > { %v2146_v27 = vpack.c.bf16 %v2079_v62, %v2077_v63  ;;  %v2022_v23 = vpack.c.bf16 %v1955_v50, %v1953_v26  ;;  %v2553_v0 = vpack.c.bf16 %v2486_v46, %v2484_v30  ;;  %17721 = vst [vmem:[#allocation123_spill] sm:$0xff] %v12443_v14  ;;  %v12445_v46 = vpop.f32.mrf.mxu3  ;;  %v9989_v43 = vunpack.i.l.bf16 %v9988_v22  ;;  %v17727_v62 = vld [vmem:[#allocation124_spill] sm:$0xff] }
 0x1f6   : > { %17716 = vst [vmem:[#allocation107_spill] sm:$0xff] %v12429_v56 }
 0x1f7   : > { %9383 = vmatmul.msk.bf16.gmra.mxu2 %vm2152_vm9, %v2146_v27  ;;  %9399 = vmatmul.msk.bf16.gmra.mxu3 %vm2152_vm9, %v2022_v23  ;;  %17722 = vst [vmem:[#allocation4_spill] sm:$0xff] %v12445_v46  ;;  %v17724_v23 = vld [vmem:[#allocation154_spill] sm:$0xff]  ;;  %v1956_v58 = vrot.slane %v9989_v43, 1  ;;  %v2080_v1 = vrot.slane %v9989_v43, 2  ;;  %v2487_v30 = vrot.slane %v9989_v43, 3 }
 0x1f8   : > { %9415 = vmatmul.msk.bf16.gmra.mxu1 %vm2152_vm9, %v2553_v0  ;;  %3586 = vrot.lane.b32.xlu2 %v17718_v51, %s10105_s21  ;;  %v9990_v0 = vunpack.i.h.bf16 %v9988_v22 }
 0x1f9   : > { %2896 = vrot.lane.b32.xlu0 %v17719_v41, %s10105_s21  ;;  %3240 = vrot.lane.b32.xlu1 %v17720_v5, %s10105_s21 }
 0x1fa   : > { %v1957_v44 = vrot.slane %v9990_v0, 1  ;;  %v2081_v63 = vrot.slane %v9990_v0, 2  ;;  %v2488_v50 = vrot.slane %v9990_v0, 3 }
 0x1fb   : > { %v12451_v7 = vpop.f32.mrf.mxu1 }
 0x1fc   : > { %17725 = vst [vmem:[#allocation94_spill] sm:$0xff] %v12451_v7  ;;  %v1958_v46 = vsel %vm1085_vm4, %v1956_v58, %v1957_v44  ;;  %v2489_v56 = vsel %vm2434_vm6, %v2487_v30, %v2488_v50 }
 0x200   : > { %3588 = vrot.lane.b32.xlu2 %v17723_v47, %s10105_s21  ;;  %v17728_v47 = vld [vmem:[#allocation139_spill] sm:$0xff] }
 0x201   : > { %2898 = vrot.lane.b32.xlu0 %v17724_v23, %s10105_s21  ;;  %3242 = vrot.lane.b32.xlu1 %v17726_v53, %s10105_s21 }
 0x202   : > { %v2239_v57 = vpop.f32.mrf.mxu2 }
 0x203   : > { %v2379_v27 = vpop.f32.mrf.mxu3 }
 0x204   : > { %v2380_v26 = vadd.f32 %v2379_v27, %v2239_v57  ;;  %v2082_v27 = vsel %vm678_vm5, %v2080_v1, %v2081_v63 }
 0x208   : > { %3590 = vrot.lane.b32.xlu2 %v17727_v62, %s10105_s21  ;;  %v2644_v62 = vpop.f32.mrf.mxu1 }
 0x209   : > { %2900 = vrot.lane.b32.xlu0 %v12151_v28, %s10105_s21  ;;  %v1884_v10 = vpop.permute.xlu2 %1883  ;;  %v1878_v51 = vpop.permute.xlu0 %1877  ;;  %3244 = vrot.lane.b32.xlu1 %v17728_v47, %s10105_s21  ;;  %v12471_v52 = vadd.f32 %v2644_v62, %v2380_v26  ;;  %v17736_v62 = vld [vmem:[#allocation158_spill] sm:$0xff] }
 0x20a   : > { %v1959_v7 = vrot.slane %v1878_v51, 1  ;;  %v2083_v22 = vrot.slane %v1878_v51, 2  ;;  %v2490_v57 = vrot.slane %v1878_v51, 3  ;;  %v12467_v11 = vpop.f32.mrf.mxu2 }
 0x20b   : > { %17729 = vst [vmem:[#allocation138_spill] sm:$0xff] %v12467_v11  ;;  %v12469_v45 = vpop.f32.mrf.mxu3 }
 0x20c   : > { %v1960_v14 = vsel %vm1085_vm4, %v1957_v44, %v1959_v7  ;;  %v2084_v0 = vsel %vm678_vm5, %v2081_v63, %v2083_v22  ;;  %v2491_v8 = vsel %vm2434_vm6, %v2488_v50, %v2490_v57  ;;  %17730 = vst [vmem:[#allocation108_spill] sm:$0xff] %v12469_v45  ;;  %v17734_v63 = vld [vmem:[#allocation156_spill] sm:$0xff] }
 0x20d   : > { %v2023_v43 = vpack.c.bf16 %v1960_v14, %v1958_v46  ;;  %v2147_v29 = vpack.c.bf16 %v2084_v0, %v2082_v27  ;;  %v2554_v51 = vpack.c.bf16 %v2491_v8, %v2489_v56  ;;  %17731 = vst [vmem:[#allocation154_spill] sm:$0xff] %v12471_v52  ;;  %v17732_v14 = vld [vmem:[#allocation140_spill] sm:$0xff]  ;;  %v17733_v46 = vld [vmem:[#allocation155_spill] sm:$0xff]  ;;  %v836_v8 = vmax.f32 %v12370_v48, 0.0 }
 0x20f   : > { %9400 = vmatmul.msk.bf16.gmra.mxu3 %vm2152_vm9, %v2023_v43  ;;  %9384 = vmatmul.msk.bf16.gmra.mxu2 %vm2152_vm9, %v2147_v29  ;;  %v838_v29 = vmax.f32 %v12416_v37, 0.0  ;;  %v12498_v48 = vsel %vm386_vm2, %v836_v8, 0.0  ;;  %v12503_v37 = vmax.f32 %v12374_v13, 0.0 }
 0x210   : > { %9416 = vmatmul.msk.bf16.gmra.mxu1 %vm2152_vm9, %v2554_v51  ;;  %3592 = vrot.lane.b32.xlu2 %v17732_v14, %s10105_s21  ;;  %v12486_v1 = vpop.f32.mrf.mxu1  ;;  %v1964_v51 = vrot.slane %v1884_v10, 1  ;;  %v2809_v22 = vrot.slane %v12498_v48, 1 }
 0x211   : > { %2902 = vrot.lane.b32.xlu0 %v17733_v46, %s10105_s21  ;;  %v12480_v7 = vpop.permute.xlu2 %10002  ;;  %v9998_v44 = vpop.permute.xlu0 %9997  ;;  %3246 = vrot.lane.b32.xlu1 %v17734_v63, %s10105_s21  ;;  %17735 = vst [vmem:[#allocation122_spill] sm:$0xff] %v12486_v1  ;;  %v12507_v27 = vsel %vm391_vm3, %v838_v29, 0.0  ;;  %v2810_v13 = vrot.slane %v12503_v37, 1 }
 0x212   : > { %17738 = vst [vmem:[#allocation139_spill] sm:$0xff] %v12507_v27  ;;  %v2812_v52 = vrot.slane %v12507_v27, 1 }
 0x215   : > { %v2384_v26 = vpop.f32.mrf.mxu3 }
 0x216   : > { %v2244_v56 = vpop.f32.mrf.mxu2 }
 0x217   : > { %v2385_v58 = vadd.f32 %v2384_v26, %v2244_v56  ;;  %v2088_v56 = vrot.slane %v1884_v10, 2  ;;  %v2495_v26 = vrot.slane %v1884_v10, 3 }
 0x218   : > { %3594 = vrot.lane.b32.xlu2 %v17736_v62, %s10105_s21 }
 0x219   : > { %2904 = vrot.lane.b32.xlu0 %v12153_v38, %s10105_s21  ;;  %v12492_v50 = vpop.permute.xlu2 %1901  ;;  %v12494_v30 = vpop.permute.xlu0 %1895  ;;  %3248 = vrot.lane.b32.xlu1 %v12159_v34, %s10105_s21 }
 0x21a   : > { %v9993_v57 = vpop.permute.xlu1 %9992  ;;  %v2649_v34 = vpop.f32.mrf.mxu1 }
 0x21b   : > { %v9995_v0 = vunpack.i.h.bf16 %v9993_v57  ;;  %v9994_v43 = vunpack.i.l.bf16 %v9993_v57 }
 0x21d   : > { %v1962_v8 = vrot.slane %v9995_v0, 1  ;;  %v2086_v14 = vrot.slane %v9995_v0, 2  ;;  %v2493_v62 = vrot.slane %v9995_v0, 3  ;;  %v1961_v1 = vrot.slane %v9994_v43, 1 }
 0x21e   : > { %v2085_v45 = vrot.slane %v9994_v43, 2  ;;  %v2492_v11 = vrot.slane %v9994_v43, 3 }
 0x21f   : > { %v2089_v12 = vsel %vm678_vm5, %v2086_v14, %v2088_v56  ;;  %v1963_v29 = vsel %vm1085_vm4, %v1961_v1, %v1962_v8  ;;  %v1965_v57 = vsel %vm1085_vm4, %v1962_v8, %v1964_v51  ;;  %v2496_v10 = vsel %vm2434_vm6, %v2493_v62, %v2495_v26  ;;  %v17739_v56 = vld [vmem:[#allocation161_spill] sm:$0xff] }
 0x220   : > { %3596 = vrot.lane.b32.xlu2 %v12166_v19, %s10105_s21  ;;  %v2087_v43 = vsel %vm678_vm5, %v2085_v45, %v2086_v14  ;;  %v2024_v38 = vpack.c.bf16 %v1965_v57, %v1963_v29  ;;  %v2494_v46 = vsel %vm2434_vm6, %v2492_v11, %v2493_v62  ;;  %v12528_v19 = vadd.f32 %v2649_v34, %v2385_v58  ;;  %v12542_v34 = vpop.f32.mrf.mxu2  ;;  %v12544_v58 = vpop.f32.mrf.mxu3 }
 0x221   : > { %2906 = vrot.lane.b32.xlu0 %v12235_v42, %s10105_s21  ;;  %v3575_v0 = vpop.permute.xlu2 %3574  ;;  %3250 = vrot.lane.b32.xlu1 %v17739_v56, %s10105_s21  ;;  %v2148_v1 = vpack.c.bf16 %v2089_v12, %v2087_v43  ;;  %v2555_v51 = vpack.c.bf16 %v2496_v10, %v2494_v46  ;;  %v2811_v45 = vsel %vm1085_vm4, %v2809_v22, %v2810_v13  ;;  %v10000_v46 = vunpack.i.h.bf16 %v9998_v44  ;;  %v17742_v12 = vld [vmem:[#allocation163_spill] sm:$0xff] }
 0x222   : > { %9453 = vmatmul.msk.bf16.vlgmr.msrb.gmra.mxu0 %vm2152_vm9, %v3575_v0  ;;  %9401 = vmatmul.msk.bf16.gmra.mxu3 %vm2152_vm9, %v2024_v38  ;;  %17740 = vst [vmem:[#allocation2_spill] sm:$0xff] %v12528_v19  ;;  %v2813_v11 = vsel %vm1085_vm4, %v2810_v13, %v2812_v52  ;;  %v9999_v62 = vunpack.i.l.bf16 %v9998_v44  ;;  %v17746_v19 = vld [vmem:[#allocation184_spill] sm:$0xff] }
 0x223   : > { %v12525_v26 = vpop.permute.xlu0 %2878  ;;  %v1890_v8 = vpop.permute.xlu1 %1889  ;;  %9385 = vmatmul.msk.bf16.gmra.mxu2 %vm2152_vm9, %v2148_v1  ;;  %9417 = vmatmul.msk.bf16.gmra.mxu1 %vm2152_vm9, %v2555_v51  ;;  %v12534_v14 = vpack.c.bf16 %v2813_v11, %v2811_v45  ;;  %17744 = vst [vmem:[#allocation207_spill] sm:$0xff] %v12542_v34  ;;  %v1967_v57 = vrot.slane %v10000_v46, 1  ;;  %v2091_v0 = vrot.slane %v10000_v46, 2  ;;  %v2498_v43 = vrot.slane %v10000_v46, 3  ;;  %v17747_v46 = vld [vmem:[#allocation9_spill] sm:$0xff] }
 0x224   : > { %17745 = vst [vmem:[#allocation208_spill] sm:$0xff] %v12544_v58  ;;  %v1969_v29 = vrot.slane %v1890_v8, 1  ;;  %v2093_v52 = vrot.slane %v1890_v8, 2  ;;  %v2500_v22 = vrot.slane %v1890_v8, 3  ;;  %v1966_v10 = vrot.slane %v9999_v62, 1 }
 0x225   : > { %17741 = vst [vmem:[#allocation205_spill] sm:$0xff] %v12534_v14  ;;  %v2090_v1 = vrot.slane %v9999_v62, 2  ;;  %v2497_v51 = vrot.slane %v9999_v62, 3  ;;  %v3157_v8 = vrot.slane %v12498_v48, 2  ;;  %v3158_v34 = vrot.slane %v12503_v37, 2 }
 0x226   : > { %v1970_v45 = vsel %vm1085_vm4, %v1967_v57, %v1969_v29  ;;  %v2094_v11 = vsel %vm678_vm5, %v2091_v0, %v2093_v52  ;;  %v1968_v58 = vsel %vm1085_vm4, %v1966_v10, %v1967_v57  ;;  %v3160_v57 = vrot.slane %v12507_v27, 2 }
 0x227   : > { %v2092_v29 = vsel %vm678_vm5, %v2090_v1, %v2091_v0  ;;  %v2025_v52 = vpack.c.bf16 %v1970_v45, %v1968_v58  ;;  %v3506_v1 = vrot.slane %v12503_v37, 3  ;;  %v3159_v45 = vsel %vm678_vm5, %v3157_v8, %v3158_v34 }
 0x228   : > { %3598 = vrot.lane.b32.xlu2 %v17742_v12, %s10105_s21  ;;  %v2501_v12 = vsel %vm2434_vm6, %v2498_v43, %v2500_v22  ;;  %v2499_v22 = vsel %vm2434_vm6, %v2497_v51, %v2498_v43  ;;  %v3505_v43 = vrot.slane %v12498_v48, 3  ;;  %v12581_v51 = vpop.f32.mrf.mxu1 }
 0x229   : > { %2908 = vrot.lane.b32.xlu0 %v12534_v14, %s10105_s21  ;;  %v12540_v38 = vpop.permute.xlu2 %3576  ;;  %3252 = vrot.lane.b32.xlu1 %v12176_v60, %s10105_s21  ;;  %v2149_v14 = vpack.c.bf16 %v2094_v11, %v2092_v29  ;;  %v2556_v42 = vpack.c.bf16 %v2501_v12, %v2499_v22  ;;  %v10005_v12 = vunpack.i.h.bf16 %v12480_v7  ;;  %17749 = vst [vmem:[#allocation209_spill] sm:$0xff] %v12581_v51  ;;  %v3508_v29 = vrot.slane %v12507_v27, 3  ;;  %v17751_v22 = vld [vmem:[#allocation25_spill] sm:$0xff] }
 0x22a   : > { %17743 = vst [vmem:[#allocation206_spill] sm:$0xff] %v12540_v38  ;;  %v3161_v11 = vsel %vm678_vm5, %v3158_v34, %v3160_v57 }
 0x22b   : > { %v12548_v13 = vpop.permute.xlu0 %2880  ;;  %v12550_v44 = vpop.permute.xlu1 %10007  ;;  %v3509_v8 = vsel %vm2434_vm6, %v3506_v1, %v3508_v29  ;;  %v2096_v34 = vrot.slane %v10005_v12, 2  ;;  %v2503_v57 = vrot.slane %v10005_v12, 3 }
 0x230   : > { %3600 = vrot.lane.b32.xlu2 %v17746_v19, %s10105_s21 }
 0x231   : > { %10012 = vrot.lane.b32.xlu0 %v17747_v46, %s10107_s19  ;;  %v12562_v62 = vpop.permute.xlu2 %3578  ;;  %3254 = vrot.lane.b32.xlu1 %v12257_v3, %s10105_s21 }
 0x232   : > { %17748 = vst [vmem:[#allocation9_spill] sm:$0xff] %v12562_v62  ;;  %v2249_v10 = vpop.f32.mrf.mxu2  ;;  %9454 = vmatmul.msk.bf16.gmra.mxu0 %vm2152_vm9, %v12540_v38  ;;  %9402 = vmatmul.msk.bf16.gmra.mxu3 %vm2152_vm9, %v2025_v52  ;;  %v12587_v52 = vpack.c.bf16 %v3161_v11, %v3159_v45 }
 0x233   : > { %v12571_v19 = vpop.permute.xlu0 %2882  ;;  %v2389_v46 = vpop.f32.mrf.mxu3  ;;  %9386 = vmatmul.msk.bf16.gmra.mxu2 %vm2152_vm9, %v2149_v14  ;;  %9418 = vmatmul.msk.bf16.gmra.mxu1 %vm2152_vm9, %v2556_v42  ;;  %v10004_v14 = vunpack.i.l.bf16 %v12480_v7  ;;  %v1972_v42 = vrot.slane %v10005_v12, 1  ;;  %v1974_v7 = vrot.slane %v12494_v30, 1 }
 0x234   : > { %v2390_v58 = vadd.f32 %v2389_v46, %v2249_v10  ;;  %v12576_v0 = vpop.permute.xlu1 %3226  ;;  %17750 = vst [vmem:[#allocation210_spill] sm:$0xff] %v12587_v52  ;;  %v3507_v46 = vsel %vm2434_vm6, %v3505_v43, %v3506_v1  ;;  %v2654_v43 = vpop.f32.mrf.mxu1 }
 0x235   : > { %v1971_v38 = vrot.slane %v10004_v14, 1  ;;  %v2095_v45 = vrot.slane %v10004_v14, 2  ;;  %v2502_v11 = vrot.slane %v10004_v14, 3  ;;  %v12606_v1 = vpack.c.bf16 %v3509_v8, %v3507_v46  ;;  %v17756_v46 = vld [vmem:[#allocation45_spill] sm:$0xff] }
 0x236   : > { %v1975_v29 = vsel %vm1085_vm4, %v1972_v42, %v1974_v7  ;;  %v12610_v3 = vadd.f32 %v2654_v43, %v2390_v58  ;;  %v17759_v58 = vld [vmem:[#allocation12_spill] sm:$0xff]  ;;  %v1767_v43 = vld [vmem:[%s17055_s5 + $0x8] sm:$0x1] }
 0x237   : > { %17754 = vst [vmem:[#allocation212_spill] sm:$0xff] %v12606_v1  ;;  %v1973_v12 = vsel %vm1085_vm4, %v1971_v38, %v1972_v42  ;;  %v2504_v60 = vsel %vm2434_vm6, %v2502_v11, %v2503_v57 }
 0x238   : > { %3602 = vrot.lane.b32.xlu2 %v12264_v18, %s10105_s21  ;;  %v2098_v18 = vrot.slane %v12494_v30, 2  ;;  %17755 = vst [vmem:[#allocation213_spill] sm:$0xff] %v12610_v3  ;;  %v2026_v38 = vpack.c.bf16 %v1975_v29, %v1973_v12  ;;  %v4045_v12 = vsel %vm2201_vm8, %v1767_v43, 0  ;;  %v10010_v29 = vunpack.i.h.bf16 %v12550_v44 }
 0x239   : > { %4239 = vrot.lane.b32.xlu0 %v17751_v22, %s10107_s19  ;;  %v12593_v10 = vpop.permute.xlu2 %3580  ;;  %3256 = vrot.lane.b32.xlu1 %v12587_v52, %s10105_s21  ;;  %v2505_v22 = vrot.slane %v12494_v30, 3  ;;  %v2097_v52 = vsel %vm678_vm5, %v2095_v45, %v2096_v34 }
 0x23a   : > { %17752 = vst [vmem:[#allocation25_spill] sm:$0xff] %v12593_v10  ;;  %v2099_v14 = vsel %vm678_vm5, %v2096_v34, %v2098_v18  ;;  %v1765_v34 = vld [vmem:[%s17055_s5 + $0x6] sm:$0x1]  ;;  %4054 = vmatpush.bf16.msrb.mxu3 %v4045_v12 }
 0x23b   : > { %v12602_v27 = vpop.permute.xlu0 %2884  ;;  %v2506_v30 = vsel %vm2434_vm6, %v2503_v57, %v2505_v22  ;;  %v12622_v42 = vpop.f32.mrf.mxu3  ;;  %v2150_v7 = vpack.c.bf16 %v2099_v14, %v2097_v52  ;;  %v3785_v11 = vsel %vm2201_vm8, %v1765_v34, 0  ;;  %v1766_v52 = vld [vmem:[%s17055_s5 + $0x7] sm:$0x1]  ;;  %v10009_v14 = vunpack.i.l.bf16 %v12550_v44 }
 0x23c   : > { %v12604_v51 = vpop.permute.xlu1 %3228  ;;  %17758 = vst [vmem:[#allocation214_spill] sm:$0xff] %v12622_v42  ;;  %v2557_v18 = vpack.c.bf16 %v2506_v30, %v2504_v60  ;;  %v12631_v57 = vpop.f32.mrf.mxu2  ;;  %v3915_v22 = vsel %vm2201_vm8, %v1766_v52, 0  ;;  %3794 = vmatpush.bf16.msrb.mxu1 %v3785_v11  ;;  %v17762_v30 = vld [vmem:[#allocation22_spill] sm:$0xff]  ;;  %v2101_v11 = vrot.slane %v10010_v29, 2  ;;  %v2508_v52 = vrot.slane %v10010_v29, 3 }
 0x23d   : > { %17753 = vst [vmem:[#allocation211_spill] sm:$0xff] %v12604_v51  ;;  %3924 = vmatpush.bf16.msrb.mxu2 %v3915_v22  ;;  %v2100_v22 = vrot.slane %v10009_v14, 2  ;;  %v2507_v43 = vrot.slane %v10009_v14, 3  ;;  %v2103_v42 = vrot.slane %v12492_v50, 2 }
 0x23e   : > { %17760 = vst [vmem:[#allocation12_spill] sm:$0xff] %v12631_v57  ;;  %v12669_v57 = vpop.f32.mrf.mxu1 }
 0x23f   : > { %v2509_v56 = vsel %vm2434_vm6, %v2507_v43, %v2508_v52 }
 0x240   : > { %3604 = vrot.lane.b32.xlu2 %v12606_v1, %s10105_s21 }
 0x241   : > { %10027 = vrot.lane.b32.xlu0 %v17756_v46, %s10107_s19  ;;  %v12620_v8 = vpop.permute.xlu2 %3582  ;;  %4233 = vrot.lane.b32.xlu1 %v17759_v58, %s10107_s19  ;;  %v17763_v46 = vld [vmem:[#allocation64_spill] sm:$0xff]  ;;  %v1977_v58 = vrot.slane %v10010_v29, 1 }
 0x242   : > { %17757 = vst [vmem:[#allocation45_spill] sm:$0xff] %v12620_v8  ;;  %9455 = vmatmul.msk.bf16.gmra.mxu0 %vm2152_vm9, %v12562_v62  ;;  %9403 = vmatmul.msk.bf16.gmra.mxu3 %vm2152_vm9, %v2026_v38 }
 0x243   : > { %v12633_v45 = vpop.permute.xlu0 %2886  ;;  %9387 = vmatmul.msk.bf16.gmra.mxu2 %vm2152_vm9, %v2150_v7  ;;  %9419 = vmatmul.msk.bf16.gmra.mxu1 %vm2152_vm9, %v2557_v18  ;;  %v1976_v7 = vrot.slane %v10009_v14, 1  ;;  %v17765_v18 = vld [vmem:[#allocation35_spill] sm:$0xff] }
 0x244   : > { %v12642_v60 = vpop.permute.xlu1 %3230  ;;  %17767 = vst [vmem:[#allocation35_spill] sm:$0xff] %v12669_v57  ;;  %v17816_v57 = vld [vmem:[#allocation49_spill] sm:$0xff] }
 0x245   : > { %17761 = vst [vmem:[#allocation215_spill] sm:$0xff] %v12642_v60  ;;  %v1978_v14 = vsel %vm1085_vm4, %v1976_v7, %v1977_v58  ;;  %v17770_v7 = vld [vmem:[#allocation47_spill] sm:$0xff] }
 0x248   : > { %10017 = vrot.lane.b32.xlu2 %v17762_v30, %s10107_s19  ;;  %v1979_v30 = vrot.slane %v12492_v50, 1 }
 0x249   : > { %4257 = vrot.lane.b32.xlu0 %v17763_v46, %s10107_s19  ;;  %v12655_v38 = vpop.permute.xlu2 %3584  ;;  %10022 = vrot.lane.b32.xlu1 %v17765_v18, %s10107_s19  ;;  %v4205_v46 = vld [vmem:[%s17057_s7 + $0x1] sm:$0x1]  ;;  %v2510_v18 = vrot.slane %v12492_v50, 3  ;;  %v17769_v50 = vld [vmem:[#allocation88_spill] sm:$0xff] }
 0x24a   : > { %17764 = vst [vmem:[#allocation22_spill] sm:$0xff] %v12655_v38  ;;  %v2394_v34 = vpop.f32.mrf.mxu3  ;;  %v4511_v29 = vsel %vm2201_vm8, %v4205_v46, 0  ;;  %v1980_v3 = vsel %vm1085_vm4, %v1977_v58, %v1979_v30 }
 0x24b   : > { %v12659_v44 = vpop.permute.xlu0 %2888  ;;  %v2254_v12 = vpop.f32.mrf.mxu2  ;;  %4520 = vmatpush.bf16.msra.mxu0 %v4511_v29  ;;  %v2511_v28 = vsel %vm2434_vm6, %v2508_v52, %v2510_v18  ;;  %v2027_v46 = vpack.c.bf16 %v1980_v3, %v1978_v14  ;;  %v17778_v18 = vld [vmem:[#allocation74_spill] sm:$0xff] }
 0x24c   : > { %v2395_v62 = vadd.f32 %v2394_v34, %v2254_v12  ;;  %v12662_v1 = vpop.permute.xlu1 %3232  ;;  %v2102_v34 = vsel %vm678_vm5, %v2100_v22, %v2101_v11  ;;  %v2104_v12 = vsel %vm678_vm5, %v2101_v11, %v2103_v42  ;;  %v2558_v22 = vpack.c.bf16 %v2511_v28, %v2509_v56  ;;  %v2659_v3 = vpop.f32.mrf.mxu1  ;;  %v17776_v28 = vld [vmem:[#allocation63_spill] sm:$0xff]  ;;  %v17777_v56 = vld [vmem:[#allocation105_spill] sm:$0xff] }
 0x24d   : > { %17766 = vst [vmem:[#allocation64_spill] sm:$0xff] %v12662_v1  ;;  %v2151_v30 = vpack.c.bf16 %v2104_v12, %v2102_v34 }
 0x24e   : > { %v12695_v11 = vadd.f32 %v2659_v3, %v2395_v62 }
 0x250   : > { %4245 = vrot.lane.b32.xlu2 %v17768_v16, %s10107_s19  ;;  %17773 = vst [vmem:[#allocation47_spill] sm:$0xff] %v12695_v11  ;;  %v17814_v11 = vld [vmem:[#allocation6_spill] sm:$0xff] }
 0x251   : > { %10042 = vrot.lane.b32.xlu0 %v17769_v50, %s10107_s19  ;;  %4251 = vrot.lane.b32.xlu1 %v17770_v7, %s10107_s19  ;;  %v17782_v7 = vld [vmem:[#allocation76_spill] sm:$0xff] }
 0x252   : > { %v12684_v58 = vpop.permute.xlu2 %3586  ;;  %9456 = vmatmul.msk.bf16.gmra.mxu0 %vm2152_vm9, %v12593_v10  ;;  %9404 = vmatmul.msk.bf16.gmra.mxu3 %vm2152_vm9, %v2027_v46  ;;  %v12697_v52 = vpop.f32.mrf.mxu3  ;;  %v17794_v10 = vld [vmem:[#allocation137_spill] sm:$0xff] }
 0x253   : > { %17771 = vst [vmem:[#allocation37_spill] sm:$0xff] %v12684_v58  ;;  %v12688_v42 = vpop.permute.xlu0 %2890  ;;  %9388 = vmatmul.msk.bf16.gmra.mxu2 %vm2152_vm9, %v2151_v30  ;;  %9420 = vmatmul.msk.bf16.gmra.mxu1 %vm2152_vm9, %v2558_v22  ;;  %v12699_v43 = vpop.f32.mrf.mxu2  ;;  %v17783_v30 = vld [vmem:[#allocation132_spill] sm:$0xff]  ;;  %v17784_v22 = vld [vmem:[#allocation91_spill] sm:$0xff] }
 0x254   : > { %v12693_v16 = vpop.permute.xlu1 %3234  ;;  %17774 = vst [vmem:[#allocation216_spill] sm:$0xff] %v12697_v52  ;;  %v12713_v12 = vpop.f32.mrf.mxu1 }
 0x255   : > { %17772 = vst [vmem:[#allocation88_spill] sm:$0xff] %v12693_v16 }
 0x256   : > { %17775 = vst [vmem:[#allocation217_spill] sm:$0xff] %v12699_v43 }
 0x257   : > { %17781 = vst [vmem:[#allocation74_spill] sm:$0xff] %v12713_v12 }
 0x258   : > { %10032 = vrot.lane.b32.xlu2 %v17776_v28, %s10107_s19 }
 0x259   : > { %4275 = vrot.lane.b32.xlu0 %v17777_v56, %s10107_s19  ;;  %10037 = vrot.lane.b32.xlu1 %v17778_v18, %s10107_s19 }
 0x25a   : > { %v12707_v29 = vpop.permute.xlu2 %3588 }
 0x25b   : > { %17779 = vst [vmem:[#allocation63_spill] sm:$0xff] %v12707_v29  ;;  %v12709_v14 = vpop.permute.xlu0 %2892 }
 0x25c   : > { %v12711_v34 = vpop.permute.xlu1 %3236  ;;  %v2664_v18 = vpop.f32.mrf.mxu1 }
 0x25d   : > { %17780 = vst [vmem:[#allocation105_spill] sm:$0xff] %v12711_v34  ;;  %v2399_v62 = vpop.f32.mrf.mxu3 }
 0x25e   : > { %v2259_v50 = vpop.f32.mrf.mxu2 }
 0x25f   : > { %v2400_v46 = vadd.f32 %v2399_v62, %v2259_v50  ;;  %v17787_v62 = vld [vmem:[#allocation103_spill] sm:$0xff]  ;;  %v17788_v50 = vld [vmem:[#allocation150_spill] sm:$0xff] }
 0x260   : > { %4263 = vrot.lane.b32.xlu2 %v17782_v7, %s10107_s19 }
 0x261   : > { %10057 = vrot.lane.b32.xlu0 %v17783_v30, %s10107_s19  ;;  %4269 = vrot.lane.b32.xlu1 %v17784_v22, %s10107_s19  ;;  %v12739_v7 = vadd.f32 %v2664_v18, %v2400_v46  ;;  %v17790_v30 = vld [vmem:[#allocation116_spill] sm:$0xff] }
 0x262   : > { %v12721_v3 = vpop.permute.xlu2 %3590  ;;  %9457 = vmatmul.msk.bf16.gmra.mxu0 %vm2152_vm9, %v12620_v8  ;;  %9437 = vmatmul.msk.bf16.vlgmr.msra.gmra.mxu3 %vm2152_vm9, %v12576_v0  ;;  %v17793_v8 = vld [vmem:[#allocation118_spill] sm:$0xff]  ;;  %v17797_v46 = vld [vmem:[#allocation136_spill] sm:$0xff] }
 0x263   : > { %17785 = vst [vmem:[#allocation76_spill] sm:$0xff] %v12721_v3  ;;  %v12725_v28 = vpop.permute.xlu0 %2894  ;;  %9421 = vmatmul.msk.bf16.vlgmr.msra.gmra.mxu2 %vm2152_vm9, %v12525_v26  ;;  %9469 = vmatmul.msk.bf16.vlgmr.msrb.gmra.mxu1 %vm2152_vm9, %v12548_v13 }
 0x264   : > { %v12729_v56 = vpop.permute.xlu1 %3238  ;;  %17789 = vst [vmem:[#allocation91_spill] sm:$0xff] %v12739_v7 }
 0x265   : > { %17786 = vst [vmem:[#allocation132_spill] sm:$0xff] %v12729_v56 }
 0x268   : > { %10047 = vrot.lane.b32.xlu2 %v17787_v62, %s10107_s19  ;;  %v12753_v62 = vpop.f32.mrf.mxu2 }
 0x269   : > { %4293 = vrot.lane.b32.xlu0 %v17788_v50, %s10107_s19  ;;  %10052 = vrot.lane.b32.xlu1 %v17790_v30, %s10107_s19  ;;  %17795 = vst [vmem:[#allocation116_spill] sm:$0xff] %v12753_v62  ;;  %v12755_v50 = vpop.f32.mrf.mxu3 }
 0x26a   : > { %v12743_v0 = vpop.permute.xlu2 %3592  ;;  %17796 = vst [vmem:[#allocation118_spill] sm:$0xff] %v12755_v50  ;;  %v17804_v50 = vld [vmem:[#allocation172_spill] sm:$0xff] }
 0x26b   : > { %17791 = vst [vmem:[#allocation103_spill] sm:$0xff] %v12743_v0  ;;  %v12745_v22 = vpop.permute.xlu0 %2896 }
 0x26c   : > { %v12747_v26 = vpop.permute.xlu1 %3240 }
 0x26d   : > { %17792 = vst [vmem:[#allocation150_spill] sm:$0xff] %v12747_v26 }
 0x270   : > { %4281 = vrot.lane.b32.xlu2 %v17793_v8, %s10107_s19  ;;  %v12767_v8 = vpop.f32.mrf.mxu1 }
 0x271   : > { %10072 = vrot.lane.b32.xlu0 %v17794_v10, %s10107_s19  ;;  %4287 = vrot.lane.b32.xlu1 %v17797_v46, %s10107_s19  ;;  %17800 = vst [vmem:[#allocation218_spill] sm:$0xff] %v12767_v8  ;;  %v17802_v46 = vld [vmem:[#allocation147_spill] sm:$0xff] }
 0x272   : > { %9458 = vmatmul.msk.bf16.gmra.mxu0 %vm2152_vm9, %v12655_v38  ;;  %v12761_v18 = vpop.permute.xlu2 %3594  ;;  %9438 = vmatmul.msk.bf16.gmra.mxu3 %vm2152_vm9, %v12604_v51  ;;  %v17803_v38 = vld [vmem:[#allocation89_spill] sm:$0xff] }
 0x273   : > { %17798 = vst [vmem:[#allocation137_spill] sm:$0xff] %v12761_v18  ;;  %v12763_v30 = vpop.permute.xlu0 %2898  ;;  %9422 = vmatmul.msk.bf16.gmra.mxu2 %vm2152_vm9, %v12548_v13  ;;  %9470 = vmatmul.msk.bf16.gmra.mxu1 %vm2152_vm9, %v12571_v19 }
 0x274   : > { %17799 = vst [vmem:[#allocation136_spill] sm:$0xff] %v12763_v30  ;;  %v12769_v10 = vpop.permute.xlu1 %3242 }
 0x275   : > { %17801 = vst [vmem:[#allocation219_spill] sm:$0xff] %v12769_v10 }
 0x278   : > { %10062 = vrot.lane.b32.xlu2 %v17802_v46, %s10107_s19  ;;  %v2669_v13 = vpop.f32.mrf.mxu1 }
 0x279   : > { %4039 = vrot.lane.b32.xlu0 %v17803_v38, %s10105_s21  ;;  %10067 = vrot.lane.b32.xlu1 %v17804_v50, %s10107_s19  ;;  %v17813_v38 = vld [vmem:[#allocation7_spill] sm:$0xff] }
 0x27a   : > { %v2264_v62 = vpop.f32.mrf.mxu2  ;;  %v2404_v7 = vpop.f32.mrf.mxu3 }
 0x27b   : > { %v12781_v8 = vpop.permute.xlu2 %3596  ;;  %v12783_v12 = vpop.permute.xlu0 %2900  ;;  %v2405_v52 = vadd.f32 %v2404_v7, %v2264_v62 }
 0x27c   : > { %17805 = vst [vmem:[#allocation147_spill] sm:$0xff] %v12781_v8  ;;  %v12785_v43 = vpop.permute.xlu1 %3244 }
 0x27d   : > { %17806 = vst [vmem:[#allocation172_spill] sm:$0xff] %v12783_v12  ;;  %v17822_v12 = vld [vmem:[#allocation20_spill] sm:$0xff] }
 0x27e   : > { %17807 = vst [vmem:[#allocation220_spill] sm:$0xff] %v12785_v43 }
 0x280   : > { %4299 = vrot.lane.b32.xlu2 %v12127_v40, %s10107_s19  ;;  %v2671_v40 = vpop.f32.mrf.mxu1 }
 0x281   : > { %4311 = vrot.lane.b32.xlu0 %v12068_v33, %s10107_s19  ;;  %4305 = vrot.lane.b32.xlu1 %v11953_v36, %s10107_s19  ;;  %v12807_v36 = vadd.f32 %v2669_v13, %v2405_v52 }
 0x282   : > { %9459 = vmatmul.msk.bf16.gmra.mxu0 %vm2152_vm9, %v12684_v58  ;;  %9439 = vmatmul.msk.bf16.gmra.mxu3 %vm2152_vm9, %v12642_v60  ;;  %v2266_v33 = vpop.f32.mrf.mxu2  ;;  %v2406_v62 = vpop.f32.mrf.mxu3  ;;  %v17812_v58 = vld [vmem:[#allocation48_spill] sm:$0xff]  ;;  %v17815_v60 = vpack.c.bf16 %v17813_v38, %v17814_v11  ;;  %v17823_v38 = vld [vmem:[#allocation18_spill] sm:$0xff] }
 0x283   : > { %v12795_v50 = vpop.permute.xlu2 %3598  ;;  %v12797_v46 = vpop.permute.xlu0 %2902  ;;  %9423 = vmatmul.msk.bf16.gmra.mxu2 %vm2152_vm9, %v12571_v19  ;;  %9471 = vmatmul.msk.bf16.gmra.mxu1 %vm2152_vm9, %v12602_v27  ;;  %17811 = vst [vmem:[#allocation224_spill] sm:$0xff] %v12807_v36  ;;  %v2407_v51 = vadd.f32 %v2406_v62, %v2266_v33  ;;  %v17825_v11 = vld [vmem:[#allocation174_spill] sm:$0xff] }
 0x284   : > { %17808 = vst [vmem:[#allocation221_spill] sm:$0xff] %v12795_v50  ;;  %v12801_v7 = vpop.permute.xlu1 %3246 }
 0x285   : > { %17809 = vst [vmem:[#allocation222_spill] sm:$0xff] %v12797_v46  ;;  %v12823_v13 = vadd.f32 %v2671_v40, %v2407_v51 }
 0x286   : > { %17810 = vst [vmem:[#allocation223_spill] sm:$0xff] %v12801_v7 }
 0x287   : > { %17820 = vst [vmem:[#allocation226_spill] sm:$0xff] %v12823_v13  ;;  %v17832_v13 = vld [vmem:[#allocation14_spill] sm:$0xff] }
 0x288   : > { %3909 = vrot.lane.b32.xlu2 %v17812_v58, %s10105_s21  ;;  %v17821_v58 = vld [vmem:[#allocation173_spill] sm:$0xff] }
 0x289   : > { %6289 = vrot.lane.b32.xlu0 %v17815_v60, %s10107_s19  ;;  %3779 = vrot.lane.b32.xlu1 %v17816_v57, %s10105_s21  ;;  %v17824_v60 = vpack.c.bf16 %v17822_v12, %v17823_v38 }
 0x28b   : > { %v12817_v19 = vpop.permute.xlu2 %3600  ;;  %v12819_v46 = vpop.permute.xlu0 %2904 }
 0x28c   : > { %17817 = vst [vmem:[#allocation7_spill] sm:$0xff] %v12817_v19  ;;  %v12821_v52 = vpop.permute.xlu1 %3248 }
 0x28d   : > { %17818 = vst [vmem:[#allocation6_spill] sm:$0xff] %v12819_v46  ;;  %v2674_v36 = vpop.f32.mrf.mxu1 }
 0x28e   : > { %17819 = vst [vmem:[#allocation225_spill] sm:$0xff] %v12821_v52  ;;  %v17842_v52 = vld [vmem:[#allocation27_spill] sm:$0xff] }
 0x290   : > { %10077 = vrot.lane.b32.xlu2 %v17821_v58, %s10107_s19 }
 0x291   : > { %6291 = vrot.lane.b32.xlu0 %v17824_v60, %s10107_s19  ;;  %10082 = vrot.lane.b32.xlu1 %v17825_v11, %s10107_s19  ;;  %v17829_v60 = vld [vmem:[#allocation32_spill] sm:$0xff]  ;;  %v17830_v11 = vld [vmem:[#allocation34_spill] sm:$0xff] }
 0x292   : > { %v2409_v33 = vpop.f32.mrf.mxu3  ;;  %9460 = vmatmul.msk.bf16.gmra.mxu0 %vm2152_vm9, %v12707_v29  ;;  %9440 = vmatmul.msk.bf16.gmra.mxu3 %vm2152_vm9, %v12662_v1  ;;  %v2269_v58 = vpop.f32.mrf.mxu2  ;;  %v17831_v29 = vpack.c.bf16 %v17829_v60, %v17830_v11  ;;  %v17838_v60 = vld [vmem:[#allocation15_spill] sm:$0xff] }
 0x293   : > { %v12835_v62 = vpop.permute.xlu2 %3602  ;;  %v12837_v51 = vpop.permute.xlu0 %2906  ;;  %9424 = vmatmul.msk.bf16.gmra.mxu2 %vm2152_vm9, %v12602_v27  ;;  %9472 = vmatmul.msk.bf16.gmra.mxu1 %vm2152_vm9, %v12633_v45  ;;  %v2410_v12 = vadd.f32 %v2409_v33, %v2269_v58 }
 0x294   : > { %17826 = vst [vmem:[#allocation173_spill] sm:$0xff] %v12835_v62  ;;  %v12841_v40 = vpop.permute.xlu1 %3250  ;;  %v17860_v62 = vld [vmem:[#allocation71_spill] sm:$0xff] }
 0x295   : > { %17827 = vst [vmem:[#allocation20_spill] sm:$0xff] %v12837_v51  ;;  %v2676_v38 = vpop.f32.mrf.mxu1  ;;  %v12861_v58 = vadd.f32 %v2674_v36, %v2410_v12 }
 0x296   : > { %17828 = vst [vmem:[#allocation18_spill] sm:$0xff] %v12841_v40 }
 0x297   : > { %17836 = vst [vmem:[#allocation14_spill] sm:$0xff] %v12861_v58  ;;  %v17847_v58 = vld [vmem:[#allocation52_spill] sm:$0xff] }
 0x298   : > { %5585 = vrot.lane.b32.xlu2 %v12196_v39, %s10107_s19 }
 0x299   : > { %6293 = vrot.lane.b32.xlu0 %v17831_v29, %s10107_s19  ;;  %6493 = vrot.lane.b32.xlu1 %v17832_v13, %s10107_s19  ;;  %v17839_v29 = vld [vmem:[#allocation42_spill] sm:$0xff]  ;;  %v17840_v13 = vld [vmem:[#allocation44_spill] sm:$0xff] }
 0x29a   : > { %v2411_v1 = vpop.f32.mrf.mxu3  ;;  %v2271_v46 = vpop.f32.mrf.mxu2  ;;  %v17841_v11 = vpack.c.bf16 %v17839_v29, %v17840_v13 }
 0x29b   : > { %v12855_v51 = vpop.permute.xlu2 %3604  ;;  %v12857_v27 = vpop.permute.xlu0 %2908  ;;  %v2412_v33 = vadd.f32 %v2411_v1, %v2271_v46 }
 0x29c   : > { %17833 = vst [vmem:[#allocation174_spill] sm:$0xff] %v12855_v51  ;;  %v12859_v40 = vpop.permute.xlu1 %3252 }
 0x29d   : > { %17834 = vst [vmem:[#allocation32_spill] sm:$0xff] %v12857_v27 }
 0x29e   : > { %17835 = vst [vmem:[#allocation34_spill] sm:$0xff] %v12859_v40 }
 0x29f   : > { %v12863_v39 = vpop.f32.mrf.mxu0 }
 0x2a0   : > { %17837 = vst [vmem:[#allocation227_spill] sm:$0xff] %v12863_v39  ;;  %v2679_v57 = vpop.f32.mrf.mxu1  ;;  %6697 = vrot.lane.b32.xlu2 %v17838_v60, %s10107_s19  ;;  %v12883_v60 = vadd.f32 %v2676_v38, %v2412_v33 }
 0x2a1   : > { %6295 = vrot.lane.b32.xlu0 %v17841_v11, %s10107_s19  ;;  %6495 = vrot.lane.b32.xlu1 %v17842_v52, %s10107_s19 }
 0x2a2   : > { %9461 = vmatmul.msk.bf16.gmra.mxu0 %vm2152_vm9, %v12721_v3  ;;  %9441 = vmatmul.msk.bf16.gmra.mxu3 %vm2152_vm9, %v12693_v16  ;;  %17844 = vst [vmem:[#allocation42_spill] sm:$0xff] %v12883_v60  ;;  %v17846_v3 = vld [vmem:[#allocation60_spill] sm:$0xff] }
 0x2a3   : > { %v10018_v1 = vpop.permute.xlu2 %10017  ;;  %v10013_v46 = vpop.permute.xlu0 %10012  ;;  %9425 = vmatmul.msk.bf16.gmra.mxu2 %vm2152_vm9, %v12633_v45  ;;  %9473 = vmatmul.msk.bf16.gmra.mxu1 %vm2152_vm9, %v12659_v44  ;;  %v17848_v16 = vpack.c.bf16 %v17846_v3, %v17847_v58  ;;  %v17849_v45 = vld [vmem:[#allocation38_spill] sm:$0xff] }
 0x2a4   : > { %v12877_v36 = vpop.permute.xlu1 %3254  ;;  %v12895_v27 = vunpack.i.h.bf16 %v10018_v1  ;;  %v12897_v38 = vunpack.i.l.bf16 %v10018_v1  ;;  %v12899_v33 = vunpack.i.h.bf16 %v10013_v46  ;;  %v12901_v60 = vunpack.i.l.bf16 %v10013_v46 }
 0x2a5   : > { %17843 = vst [vmem:[#allocation15_spill] sm:$0xff] %v12877_v36  ;;  %v2414_v12 = vpop.f32.mrf.mxu3 }
 0x2a6   : > { %v2274_v52 = vpop.f32.mrf.mxu2  ;;  %17850 = vst [vmem:[#allocation27_spill] sm:$0xff] %v12895_v27  ;;  %v12913_v58 = vpack.c.bf16 %v12899_v33, %v12901_v60  ;;  %v12917_v1 = vpack.c.bf16 %v12895_v27, %v12897_v38  ;;  %v5298_v46 = vrot.slane %v12901_v60, 4  ;;  %v5303_v51 = vrot.slane %v12897_v38, 4 }
 0x2a7   : > { %v12885_v29 = vpop.f32.mrf.mxu0  ;;  %v2415_v13 = vadd.f32 %v2414_v12, %v2274_v52  ;;  %17851 = vst [vmem:[#allocation60_spill] sm:$0xff] %v12897_v38 }
 0x2a8   : > { %17845 = vst [vmem:[#allocation44_spill] sm:$0xff] %v12885_v29  ;;  %v2681_v11 = vpop.f32.mrf.mxu1  ;;  %6699 = vrot.lane.b32.xlu2 %v10850_v61, %s10107_s19 }
 0x2a9   : > { %6297 = vrot.lane.b32.xlu0 %v17848_v16, %s10107_s19  ;;  %6497 = vrot.lane.b32.xlu1 %v17849_v45, %s10107_s19  ;;  %17852 = vst [vmem:[#allocation52_spill] sm:$0xff] %v12901_v60  ;;  %v17236_v45 = vrot.slane %v12899_v33, 4 }
 0x2aa   : > { %17857 = vst [vmem:[#allocation231_spill] sm:$0xff] %v12913_v58  ;;  %v17859_v58 = vld [vmem:[#allocation72_spill] sm:$0xff] }
 0x2ab   : > { %v12903_v12 = vpop.permute.xlu2 %4245  ;;  %v12905_v52 = vpop.permute.xlu0 %4239  ;;  %17858 = vst [vmem:[#allocation232_spill] sm:$0xff] %v12917_v1  ;;  %v12931_v1 = vadd.f32 %v2679_v57, %v2415_v13  ;;  %v5017_v57 = vrot.slane %v12901_v60, 3  ;;  %v5018_v13 = vrot.slane %v12899_v33, 3 }
 0x2ac   : > { %17853 = vst [vmem:[#allocation38_spill] sm:$0xff] %v12903_v12  ;;  %v12907_v61 = vpop.permute.xlu1 %3256 }
 0x2ad   : > { %17854 = vst [vmem:[#allocation228_spill] sm:$0xff] %v12905_v52  ;;  %v2416_v36 = vpop.f32.mrf.mxu3  ;;  %v5019_v39 = vsel %vm2434_vm6, %v5017_v57, %v5018_v13  ;;  %v17866_v57 = vld [vmem:[#allocation87_spill] sm:$0xff] }
 0x2ae   : > { %17855 = vst [vmem:[#allocation229_spill] sm:$0xff] %v12907_v61  ;;  %v2276_v3 = vpop.f32.mrf.mxu2  ;;  %v5306_v61 = vrot.slane %v12905_v52, 4 }
 0x2af   : > { %v12909_v16 = vpop.f32.mrf.mxu0  ;;  %v2417_v40 = vadd.f32 %v2416_v36, %v2276_v3  ;;  %17862 = vst [vmem:[#allocation72_spill] sm:$0xff] %v12931_v1  ;;  %v12936_v36 = vsel %vm5295_vm7, %v5298_v46, %v17236_v45  ;;  %v5304_v3 = vrot.slane %v12895_v27, 4  ;;  %v4744_v45 = vrot.slane %v12897_v38, 2 }
 0x2b0   : > { %17856 = vst [vmem:[#allocation230_spill] sm:$0xff] %v12909_v16  ;;  %v12923_v7 = vpop.f32.mrf.mxu1  ;;  %6701 = vrot.lane.b32.xlu2 %v10995_v20, %s10107_s19  ;;  %v17861_v16 = vpack.c.bf16 %v17859_v58, %v17860_v62  ;;  %v4739_v20 = vrot.slane %v12901_v60, 2  ;;  %v4740_v62 = vrot.slane %v12899_v33, 2  ;;  %v5025_v1 = vrot.slane %v12905_v52, 3 }
 0x2b1   : > { %6499 = vrot.lane.b32.xlu1 %v11130_v55, %s10107_s19  ;;  %v5305_v55 = vsel %vm5295_vm7, %v5303_v51, %v5304_v3  ;;  %v5022_v60 = vrot.slane %v12897_v38, 3  ;;  %v5307_v51 = vsel %vm5295_vm7, %v5304_v3, %v5306_v61 }
 0x2b2   : > { %6299 = vrot.lane.b32.xlu0 %v17861_v16, %s10107_s19  ;;  %9462 = vmatmul.msk.bf16.gmra.mxu0 %vm2152_vm9, %v12743_v0  ;;  %v4747_v16 = vrot.slane %v12905_v52, 2  ;;  %v4745_v0 = vrot.slane %v12895_v27, 2  ;;  %v4741_v43 = vsel %vm678_vm5, %v4739_v20, %v4740_v62  ;;  %v12967_v2 = vpack.c.bf16 %v5307_v51, %v5305_v55  ;;  %v17865_v20 = vld [vmem:[#allocation85_spill] sm:$0xff] }
 0x2b3   : > { %v10033_v58 = vpop.permute.xlu2 %10032  ;;  %v10028_v46 = vpop.permute.xlu0 %10027  ;;  %9442 = vmatmul.msk.bf16.gmra.mxu3 %vm2152_vm9, %v12711_v34  ;;  %9426 = vmatmul.msk.bf16.gmra.mxu2 %vm2152_vm9, %v12659_v44  ;;  %v5023_v34 = vrot.slane %v12895_v27, 3  ;;  %v17867_v55 = vpack.c.bf16 %v17865_v20, %v17866_v57  ;;  %v12981_v51 = vadd.f32 %v2681_v11, %v2417_v40 }
 0x2b4   : > { %v12954_v29 = vpop.permute.xlu1 %4233  ;;  %9474 = vmatmul.msk.bf16.gmra.mxu1 %vm2152_vm9, %v12688_v42  ;;  %17863 = vst [vmem:[#allocation71_spill] sm:$0xff] %v12967_v2  ;;  %v4746_v44 = vsel %vm678_vm5, %v4744_v45, %v4745_v0  ;;  %v4748_v63 = vsel %vm678_vm5, %v4745_v0, %v4747_v16 }
 0x2b5   : > { %v2419_v30 = vpop.f32.mrf.mxu3  ;;  %v12971_v38 = vpack.c.bf16 %v4748_v63, %v4746_v44  ;;  %v5024_v27 = vsel %vm2434_vm6, %v5022_v60, %v5023_v34  ;;  %v5026_v61 = vsel %vm2434_vm6, %v5023_v34, %v5025_v1  ;;  %17868 = vst [vmem:[#allocation85_spill] sm:$0xff] %v12981_v51  ;;  %v12987_v63 = vunpack.i.h.bf16 %v10033_v58 }
 0x2b6   : > { %v2279_v52 = vpop.f32.mrf.mxu2  ;;  %v12983_v45 = vpack.c.bf16 %v5026_v61, %v5024_v27  ;;  %v12997_v60 = vunpack.i.l.bf16 %v10028_v46  ;;  %v5301_v40 = vrot.slane %v12954_v29, 4  ;;  %v4742_v27 = vrot.slane %v12954_v29, 2 }
 0x2b7   : > { %v12965_v19 = vpop.f32.mrf.mxu0  ;;  %v2420_v17 = vadd.f32 %v2419_v30, %v2279_v52  ;;  %17864 = vst [vmem:[#allocation233_spill] sm:$0xff] %v12971_v38  ;;  %v12993_v30 = vunpack.i.l.bf16 %v10033_v58  ;;  %v5020_v52 = vrot.slane %v12954_v29, 3  ;;  %v17878_v61 = vrot.slane %v12899_v33, 4 }
 0x2b8   : > { %v2686_v3 = vpop.f32.mrf.mxu1  ;;  %6703 = vrot.lane.b32.xlu2 %v17689_v21, %s10107_s19  ;;  %17869 = vst [vmem:[#allocation87_spill] sm:$0xff] %v12983_v45  ;;  %v12995_v21 = vunpack.i.h.bf16 %v10028_v46 }
 0x2b9   : > { %6501 = vrot.lane.b32.xlu1 %v11284_v35, %s10107_s19  ;;  %17870 = vst [vmem:[#allocation234_spill] sm:$0xff] %v12987_v63  ;;  %v13010_v46 = vpack.c.bf16 %v12987_v63, %v12993_v30  ;;  %v5302_v20 = vsel %vm5295_vm7, %v17878_v61, %v5301_v40  ;;  %v13026_v45 = vadd.f32 %v12923_v7, %v2420_v17  ;;  %v5313_v17 = vrot.slane %v12997_v60, 4 }
 0x2ba   : > { %6301 = vrot.lane.b32.xlu0 %v17867_v55, %s10107_s19  ;;  %17873 = vst [vmem:[#allocation237_spill] sm:$0xff] %v12993_v30  ;;  %v13006_v58 = vpack.c.bf16 %v12995_v21, %v12997_v60  ;;  %v13035_v40 = vpack.c.bf16 %v5302_v20, %v12936_v36  ;;  %v5021_v61 = vsel %vm2434_vm6, %v5018_v13, %v5020_v52  ;;  %v5314_v7 = vrot.slane %v12995_v21, 4 }
 0x2bb   : > { %v12989_v0 = vpop.permute.xlu2 %4263  ;;  %v12991_v34 = vpop.permute.xlu0 %4257  ;;  %17874 = vst [vmem:[#allocation238_spill] sm:$0xff] %v12995_v21  ;;  %v5318_v36 = vrot.slane %v12993_v30, 4 }
 0x2bc   : > { %17871 = vst [vmem:[#allocation235_spill] sm:$0xff] %v12989_v0  ;;  %v10023_v11 = vpop.permute.xlu1 %10022  ;;  %v5321_v13 = vrot.slane %v12991_v34, 4 }
 0x2bd   : > { %17872 = vst [vmem:[#allocation236_spill] sm:$0xff] %v12991_v34  ;;  %v2421_v35 = vpop.f32.mrf.mxu3  ;;  %v13015_v57 = vunpack.i.h.bf16 %v10023_v11  ;;  %v13028_v2 = vunpack.i.l.bf16 %v10023_v11  ;;  %v13045_v11 = vpack.c.bf16 %v5021_v61, %v5019_v39  ;;  %v5311_v61 = vrot.slane %v12903_v12, 4 }
 0x2be   : > { %17875 = vst [vmem:[#allocation239_spill] sm:$0xff] %v12997_v60  ;;  %v2281_v1 = vpop.f32.mrf.mxu2 }
 0x2bf   : > { %v13002_v16 = vpop.f32.mrf.mxu0  ;;  %v2422_v44 = vadd.f32 %v2421_v35, %v2281_v1  ;;  %17876 = vst [vmem:[#allocation240_spill] sm:$0xff] %v13006_v58  ;;  %v17880_v35 = vld [vmem:[#allocation101_spill] sm:$0xff]  ;;  %v17881_v1 = vld [vmem:[#allocation99_spill] sm:$0xff]  ;;  %v5308_v20 = vrot.slane %v13028_v2, 4 }
 0x2c0   : > { %17877 = vst [vmem:[#allocation241_spill] sm:$0xff] %v13010_v46  ;;  %v13017_v55 = vpop.f32.mrf.mxu1  ;;  %6705 = vrot.lane.b32.xlu2 %v17700_v15, %s10107_s19  ;;  %v17882_v38 = vpack.c.bf16 %v17880_v35, %v17881_v1  ;;  %v4743_v15 = vsel %vm678_vm5, %v4740_v62, %v4742_v27  ;;  %v5319_v62 = vrot.slane %v12987_v63, 4  ;;  %v17891_v46 = vld [vmem:[#allocation115_spill] sm:$0xff] }
 0x2c1   : > { %17879 = vst [vmem:[#allocation242_spill] sm:$0xff] %v13015_v57  ;;  %6503 = vrot.lane.b32.xlu1 %v17688_v6, %s10107_s19  ;;  %v13043_v6 = vpack.c.bf16 %v4743_v15, %v4741_v43  ;;  %v13058_v43 = vpack.c.bf16 %v13015_v57, %v13028_v2  ;;  %v5315_v15 = vsel %vm5295_vm7, %v5313_v17, %v5314_v7 }
 0x2c2   : > { %6303 = vrot.lane.b32.xlu0 %v17882_v38, %s10107_s19  ;;  %17883 = vst [vmem:[#allocation101_spill] sm:$0xff] %v13026_v45  ;;  %9463 = vmatmul.msk.bf16.gmra.mxu0 %vm2152_vm9, %v12761_v18  ;;  %v17890_v18 = vld [vmem:[#allocation112_spill] sm:$0xff]  ;;  %v13075_v58 = vadd.f32 %v2686_v3, %v2422_v44 }
 0x2c3   : > { %17884 = vst [vmem:[#allocation99_spill] sm:$0xff] %v13028_v2  ;;  %v10048_v35 = vpop.permute.xlu2 %10047  ;;  %v10043_v38 = vpop.permute.xlu0 %10042  ;;  %9443 = vmatmul.msk.bf16.gmra.mxu3 %vm2152_vm9, %v12729_v56  ;;  %9427 = vmatmul.msk.bf16.gmra.mxu2 %vm2152_vm9, %v12688_v42  ;;  %v5309_v42 = vrot.slane %v13015_v57, 4  ;;  %v17892_v45 = vpack.c.bf16 %v17890_v18, %v17891_v46 }
 0x2c4   : > { %17885 = vst [vmem:[#allocation243_spill] sm:$0xff] %v13035_v40  ;;  %v13047_v1 = vpop.permute.xlu1 %4251  ;;  %9475 = vmatmul.msk.bf16.gmra.mxu1 %vm2152_vm9, %v12709_v14  ;;  %v13092_v3 = vunpack.i.l.bf16 %v10048_v35  ;;  %v13096_v44 = vunpack.i.l.bf16 %v10043_v38 }
 0x2c5   : > { %17886 = vst [vmem:[#allocation244_spill] sm:$0xff] %v13043_v6  ;;  %v2424_v27 = vpop.f32.mrf.mxu3  ;;  %v5310_v56 = vsel %vm5295_vm7, %v5308_v20, %v5309_v42  ;;  %v5312_v17 = vsel %vm5295_vm7, %v5309_v42, %v5311_v61  ;;  %v4750_v20 = vrot.slane %v13015_v57, 2  ;;  %v4752_v42 = vrot.slane %v12903_v12, 2 }
 0x2c6   : > { %17887 = vst [vmem:[#allocation245_spill] sm:$0xff] %v13045_v11  ;;  %v2284_v39 = vpop.f32.mrf.mxu2  ;;  %v5320_v11 = vsel %vm5295_vm7, %v5318_v36, %v5319_v62  ;;  %v5322_v36 = vsel %vm5295_vm7, %v5319_v62, %v5321_v13  ;;  %v13088_v51 = vpack.c.bf16 %v5312_v17, %v5310_v56  ;;  %v4749_v13 = vrot.slane %v13028_v2, 2 }
 0x2c7   : > { %17888 = vst [vmem:[#allocation246_spill] sm:$0xff] %v13047_v1  ;;  %v13060_v52 = vpop.f32.mrf.mxu0  ;;  %v2425_v6 = vadd.f32 %v2424_v27, %v2284_v39  ;;  %v13082_v27 = vunpack.i.h.bf16 %v10048_v35  ;;  %v13090_v18 = vpack.c.bf16 %v5322_v36, %v5320_v11  ;;  %v5027_v35 = vrot.slane %v13028_v2, 3 }
 0x2c8   : > { %17889 = vst [vmem:[#allocation247_spill] sm:$0xff] %v13058_v43  ;;  %v13067_v40 = vpop.f32.mrf.mxu1  ;;  %6707 = vrot.lane.b32.xlu2 %v17710_v24, %s10107_s19  ;;  %v5028_v11 = vrot.slane %v13015_v57, 3 }
 0x2c9   : > { %17893 = vst [vmem:[#allocation112_spill] sm:$0xff] %v13075_v58  ;;  %6505 = vrot.lane.b32.xlu1 %v17698_v54, %s10107_s19  ;;  %v5316_v54 = vrot.slane %v13047_v1, 4  ;;  %v13112_v36 = vpack.c.bf16 %v13082_v27, %v13092_v3 }
 0x2ca   : > { %6305 = vrot.lane.b32.xlu0 %v17892_v45, %s10107_s19  ;;  %17895 = vst [vmem:[#allocation248_spill] sm:$0xff] %v13088_v51  ;;  %v13094_v45 = vunpack.i.h.bf16 %v10043_v38  ;;  %v5030_v51 = vrot.slane %v12903_v12, 3 }
 0x2cb   : > { %v13084_v39 = vpop.permute.xlu2 %4281  ;;  %v13086_v24 = vpop.permute.xlu0 %4275  ;;  %17896 = vst [vmem:[#allocation249_spill] sm:$0xff] %v13090_v18  ;;  %v5317_v18 = vsel %vm5295_vm7, %v5314_v7, %v5316_v54  ;;  %v4753_v54 = vsel %vm678_vm5, %v4750_v20, %v4752_v42  ;;  %v4754_v42 = vrot.slane %v12997_v60, 2 }
 0x2cc   : > { %17894 = vst [vmem:[#allocation115_spill] sm:$0xff] %v13086_v24  ;;  %v10038_v46 = vpop.permute.xlu1 %10037  ;;  %v13108_v38 = vpack.c.bf16 %v13094_v45, %v13096_v44  ;;  %v13135_v7 = vpack.c.bf16 %v5317_v18, %v5315_v15  ;;  %v5328_v15 = vrot.slane %v13096_v44, 4  ;;  %v5329_v18 = vrot.slane %v13094_v45, 4 }
 0x2cd   : > { %17897 = vst [vmem:[#allocation250_spill] sm:$0xff] %v13094_v45  ;;  %v2426_v62 = vpop.f32.mrf.mxu3  ;;  %v13116_v58 = vunpack.i.h.bf16 %v10038_v46 }
 0x2ce   : > { %17898 = vst [vmem:[#allocation251_spill] sm:$0xff] %v13096_v44  ;;  %v2286_v56 = vpop.f32.mrf.mxu2 }
 0x2cf   : > { %v13102_v61 = vpop.f32.mrf.mxu0  ;;  %v2427_v17 = vadd.f32 %v2426_v62, %v2286_v56  ;;  %17899 = vst [vmem:[#allocation252_spill] sm:$0xff] %v13108_v38  ;;  %v17902_v62 = vld [vmem:[#allocation129_spill] sm:$0xff]  ;;  %v13127_v38 = vadd.f32 %v13017_v55, %v2425_v6  ;;  %v5029_v55 = vsel %vm2434_vm6, %v5027_v35, %v5028_v11 }
 0x2d0   : > { %17900 = vst [vmem:[#allocation253_spill] sm:$0xff] %v13112_v36  ;;  %v13118_v43 = vpop.f32.mrf.mxu1  ;;  %6709 = vrot.lane.b32.xlu2 %v17715_v4, %s10107_s19  ;;  %v17903_v56 = vld [vmem:[#allocation125_spill] sm:$0xff]  ;;  %v13129_v36 = vunpack.i.l.bf16 %v10038_v46  ;;  %v4751_v4 = vsel %vm678_vm5, %v4749_v13, %v4750_v20  ;;  %v4757_v46 = vrot.slane %v13047_v1, 2 }
 0x2d1   : > { %17901 = vst [vmem:[#allocation254_spill] sm:$0xff] %v13116_v58  ;;  %v17904_v57 = vpack.c.bf16 %v17902_v62, %v17903_v56  ;;  %6507 = vrot.lane.b32.xlu1 %v17709_v31, %s10107_s19  ;;  %v5031_v31 = vsel %vm2434_vm6, %v5028_v11, %v5030_v51  ;;  %v5324_v11 = vrot.slane %v13116_v58, 4  ;;  %v13177_v2 = vadd.f32 %v13067_v40, %v2427_v17 }
 0x2d2   : > { %17905 = vst [vmem:[#allocation129_spill] sm:$0xff] %v13127_v38  ;;  %9464 = vmatmul.msk.bf16.gmra.mxu0 %vm2152_vm9, %v12781_v8  ;;  %v13156_v20 = vpack.c.bf16 %v13116_v58, %v13129_v36  ;;  %v5323_v51 = vrot.slane %v13129_v36, 4  ;;  %v17913_v38 = vld [vmem:[#allocation10_spill] sm:$0xff] }
 0x2d3   : > { %6307 = vrot.lane.b32.xlu0 %v17904_v57, %s10107_s19  ;;  %17906 = vst [vmem:[#allocation125_spill] sm:$0xff] %v13129_v36  ;;  %v10063_v12 = vpop.permute.xlu2 %10062  ;;  %v10058_v62 = vpop.permute.xlu0 %10057  ;;  %9444 = vmatmul.msk.bf16.gmra.mxu3 %vm2152_vm9, %v12747_v26  ;;  %v13141_v57 = vpack.c.bf16 %v4753_v54, %v4751_v4  ;;  %v13164_v4 = vpack.c.bf16 %v5031_v31, %v5029_v55  ;;  %v5326_v54 = vrot.slane %v12989_v0, 4 }
 0x2d4   : > { %17907 = vst [vmem:[#allocation255_spill] sm:$0xff] %v13135_v7  ;;  %v13144_v6 = vpop.permute.xlu1 %4269  ;;  %9428 = vmatmul.msk.bf16.gmra.mxu2 %vm2152_vm9, %v12709_v14  ;;  %9476 = vmatmul.msk.bf16.gmra.mxu1 %vm2152_vm9, %v12725_v28  ;;  %v4755_v14 = vrot.slane %v12995_v21, 2  ;;  %v5330_v7 = vsel %vm5295_vm7, %v5328_v15, %v5329_v18  ;;  %v5325_v55 = vsel %vm5295_vm7, %v5323_v51, %v5324_v11  ;;  %v13195_v17 = vunpack.i.l.bf16 %v10063_v12 }
 0x2d5   : > { %17908 = vst [vmem:[#allocation256_spill] sm:$0xff] %v13141_v57  ;;  %v2429_v13 = vpop.f32.mrf.mxu3  ;;  %v5327_v31 = vsel %vm5295_vm7, %v5324_v11, %v5326_v54  ;;  %v5032_v11 = vrot.slane %v12997_v60, 3  ;;  %v5033_v54 = vrot.slane %v12995_v21, 3 }
 0x2d6   : > { %17909 = vst [vmem:[#allocation257_spill] sm:$0xff] %v13144_v6  ;;  %v2289_v35 = vpop.f32.mrf.mxu2  ;;  %v4756_v15 = vsel %vm678_vm5, %v4754_v42, %v4755_v14  ;;  %v5331_v42 = vrot.slane %v13144_v6, 4 }
 0x2d7   : > { %17910 = vst [vmem:[#allocation258_spill] sm:$0xff] %v13156_v20  ;;  %v13160_v56 = vpop.f32.mrf.mxu0  ;;  %v2430_v57 = vadd.f32 %v2429_v13, %v2289_v35  ;;  %v17912_v20 = vld [vmem:[#allocation145_spill] sm:$0xff]  ;;  %v4758_v13 = vsel %vm678_vm5, %v4755_v14, %v4757_v46  ;;  %v5035_v46 = vrot.slane %v13047_v1, 3 }
 0x2d8   : > { %17911 = vst [vmem:[#allocation259_spill] sm:$0xff] %v13164_v4  ;;  %v13168_v8 = vpop.f32.mrf.mxu1  ;;  %6711 = vrot.lane.b32.xlu2 %v17720_v5, %s10107_s19  ;;  %v17914_v26 = vpack.c.bf16 %v17912_v20, %v17913_v38  ;;  %v13185_v5 = vunpack.i.h.bf16 %v10063_v12  ;;  %v13193_v40 = vpack.c.bf16 %v4758_v13, %v4756_v15  ;;  %v13197_v20 = vunpack.i.h.bf16 %v10058_v62 }
 0x2d9   : > { %17915 = vst [vmem:[#allocation145_spill] sm:$0xff] %v13177_v2  ;;  %6509 = vrot.lane.b32.xlu1 %v17714_v9, %s10107_s19  ;;  %v13199_v9 = vunpack.i.l.bf16 %v10058_v62  ;;  %v5333_v12 = vrot.slane %v13092_v3, 4  ;;  %v5334_v62 = vrot.slane %v13082_v27, 4 }
 0x2da   : > { %17917 = vst [vmem:[#allocation260_spill] sm:$0xff] %v13193_v40  ;;  %v13216_v4 = vpack.c.bf16 %v13185_v5, %v13195_v17 }
 0x2db   : > { %6309 = vrot.lane.b32.xlu0 %v17914_v26, %s10107_s19  ;;  %v13187_v35 = vpop.permute.xlu2 %4299  ;;  %v13189_v38 = vpop.permute.xlu0 %4293  ;;  %v13191_v26 = vpack.c.bf16 %v5327_v31, %v5325_v55  ;;  %v5336_v55 = vrot.slane %v13086_v24, 4  ;;  %v13212_v40 = vpack.c.bf16 %v13197_v20, %v13199_v9 }
 0x2dc   : > { %v10053_v51 = vpop.permute.xlu1 %10052  ;;  %17919 = vst [vmem:[#allocation262_spill] sm:$0xff] %v13216_v4  ;;  %v4759_v4 = vrot.slane %v12993_v30, 2 }
 0x2dd   : > { %17916 = vst [vmem:[#allocation10_spill] sm:$0xff] %v13191_v26  ;;  %v2431_v14 = vpop.f32.mrf.mxu3  ;;  %v5332_v26 = vsel %vm5295_vm7, %v5329_v18, %v5331_v42  ;;  %v13219_v2 = vunpack.i.h.bf16 %v10053_v51  ;;  %v13221_v21 = vunpack.i.l.bf16 %v10053_v51  ;;  %v4760_v42 = vrot.slane %v12987_v63, 2 }
 0x2de   : > { %v2291_v31 = vpop.f32.mrf.mxu2  ;;  %17918 = vst [vmem:[#allocation261_spill] sm:$0xff] %v13212_v40  ;;  %v13232_v40 = vadd.f32 %v13118_v43, %v2430_v57  ;;  %v13239_v18 = vpack.c.bf16 %v5332_v26, %v5330_v7  ;;  %v4762_v51 = vrot.slane %v12991_v34, 2  ;;  %v5337_v7 = vsel %vm5295_vm7, %v5334_v62, %v5336_v55 }
 0x2df   : > { %v13206_v15 = vpop.f32.mrf.mxu0  ;;  %v2432_v13 = vadd.f32 %v2431_v14, %v2291_v31  ;;  %v17920_v14 = vld [vmem:[#allocation171_spill] sm:$0xff]  ;;  %v13266_v55 = vpack.c.bf16 %v13219_v2, %v13221_v21 }
 0x2e0   : > { %6713 = vrot.lane.b32.xlu2 %v17726_v53, %s10107_s19  ;;  %v17921_v31 = vpack.c.bf16 %v12074_v25, %v17920_v14  ;;  %v13229_v60 = vpop.f32.mrf.mxu1  ;;  %17922 = vst [vmem:[#allocation171_spill] sm:$0xff] %v13232_v40  ;;  %v5034_v53 = vsel %vm2434_vm6, %v5032_v11, %v5033_v54  ;;  %v5036_v25 = vsel %vm2434_vm6, %v5033_v54, %v5035_v46  ;;  %v5037_v54 = vrot.slane %v12993_v30, 3 }
 0x2e1   : > { %6511 = vrot.lane.b32.xlu1 %v17719_v41, %s10107_s19  ;;  %17923 = vst [vmem:[#allocation263_spill] sm:$0xff] %v13239_v18  ;;  %v13249_v41 = vpack.c.bf16 %v5036_v25, %v5034_v53  ;;  %v5335_v14 = vsel %vm5295_vm7, %v5333_v12, %v5334_v62  ;;  %v4761_v11 = vsel %vm678_vm5, %v4759_v4, %v4760_v42  ;;  %v17928_v12 = vld [vmem:[#allocation151_spill] sm:$0xff]  ;;  %v17929_v62 = vld [vmem:[#allocation152_spill] sm:$0xff]  ;;  %v4764_v4 = vrot.slane %v13129_v36, 2 }
 0x2e2   : > { %9465 = vmatmul.msk.bf16.gmra.mxu0 %vm2152_vm9, %v12795_v50  ;;  %v13259_v46 = vpack.c.bf16 %v5337_v7, %v5335_v14  ;;  %17927 = vst [vmem:[#allocation267_spill] sm:$0xff] %v13266_v55  ;;  %v2357_v25 = vadd.f32 %v17929_v62, %v17928_v12  ;;  %v4763_v14 = vsel %vm678_vm5, %v4760_v42, %v4762_v51  ;;  %v5038_v7 = vrot.slane %v12987_v63, 3  ;;  %v17932_v12 = vld [vmem:[#allocation133_spill] sm:$0xff]  ;;  %v17933_v42 = vld [vmem:[#allocation134_spill] sm:$0xff] }
 0x2e3   : > { %6311 = vrot.lane.b32.xlu0 %v17921_v31, %s10107_s19  ;;  %v13245_v43 = vpop.permute.xlu2 %3909  ;;  %v10073_v57 = vpop.permute.xlu0 %10072  ;;  %9445 = vmatmul.msk.bf16.gmra.mxu3 %vm2152_vm9, %v12769_v10  ;;  %17925 = vst [vmem:[#allocation265_spill] sm:$0xff] %v13249_v41  ;;  %v5040_v31 = vrot.slane %v12991_v34, 3  ;;  %v13279_v40 = vpack.c.bf16 %v4763_v14, %v4761_v11  ;;  %v17934_v51 = vpack.c.bf16 %v17932_v12, %v17933_v42  ;;  %v17962_v34 = vld [vmem:[#allocation44_spill] sm:$0xff] }
 0x2e4   : > { %17924 = vst [vmem:[#allocation264_spill] sm:$0xff] %v13245_v43  ;;  %v13253_v26 = vpop.permute.xlu1 %4287  ;;  %9429 = vmatmul.msk.bf16.gmra.mxu2 %vm2152_vm9, %v12725_v28  ;;  %9477 = vmatmul.msk.bf16.gmra.mxu1 %vm2152_vm9, %v12745_v22  ;;  %v13276_v18 = vunpack.i.h.bf16 %v10073_v57  ;;  %v17930_v43 = vld [vmem:[#allocation182_spill] sm:$0xff]  ;;  %v13281_v55 = vunpack.i.l.bf16 %v10073_v57  ;;  %v13292_v10 = vadd.f32 %v13168_v8, %v2432_v13  ;;  %v5039_v63 = vsel %vm2434_vm6, %v5037_v54, %v5038_v7  ;;  %v17938_v54 = vld [vmem:[#allocation180_spill] sm:$0xff] }
 0x2e5   : > { %17926 = vst [vmem:[#allocation266_spill] sm:$0xff] %v13259_v46  ;;  %v3318_v53 = vpop.f32.mrf.mxu3  ;;  %v4767_v46 = vrot.slane %v12989_v0, 2  ;;  %v5042_v57 = vrot.slane %v13129_v36, 3 }
 0x2e6   : > { %v2970_v28 = vpop.f32.mrf.mxu2  ;;  %17931 = vst [vmem:[#allocation151_spill] sm:$0xff] %v13279_v40 }
 0x2e7   : > { %v13270_v41 = vpop.f32.mrf.mxu0  ;;  %v3050_v50 = vadd.f32 %v2970_v28, %v17930_v43  ;;  %17935 = vst [vmem:[#allocation152_spill] sm:$0xff] %v13292_v10  ;;  %v4765_v43 = vrot.slane %v13116_v58, 2  ;;  %v5043_v28 = vrot.slane %v13116_v58, 3  ;;  %v2367_v10 = vadd.f32 %v12255_v59, %v12260_v49 }
 0x2e8   : > { %6715 = vrot.lane.b32.xlu2 %v17728_v47, %s10107_s19  ;;  %v13289_v62 = vpop.f32.mrf.mxu1  ;;  %v5041_v47 = vsel %vm2434_vm6, %v5038_v7, %v5040_v31  ;;  %v17941_v7 = vld [vmem:[#allocation189_spill] sm:$0xff]  ;;  %v5341_v59 = vrot.slane %v13084_v39, 4 }
 0x2e9   : > { %v3398_v11 = vadd.f32 %v3318_v53, %v3050_v50  ;;  %6513 = vrot.lane.b32.xlu1 %v17724_v23, %s10107_s19  ;;  %v13303_v42 = vpack.c.bf16 %v5041_v47, %v5039_v63  ;;  %v4766_v8 = vsel %vm678_vm5, %v4764_v4, %v4765_v43  ;;  %v4768_v13 = vsel %vm678_vm5, %v4765_v43, %v4767_v46  ;;  %v17939_v50 = vld [vmem:[#allocation178_spill] sm:$0xff] }
 0x2ea   : > { %v2362_v53 = vadd.f32 %v17939_v50, %v17938_v54  ;;  %v5045_v23 = vrot.slane %v12989_v0, 3  ;;  %v13310_v31 = vpack.c.bf16 %v4768_v13, %v4766_v8  ;;  %v2700_v40 = vadd.f32 %v17941_v7, %v2357_v25  ;;  %v17943_v13 = vld [vmem:[#allocation79_spill] sm:$0xff] }
 0x2eb   : > { %6313 = vrot.lane.b32.xlu0 %v17934_v51, %s10107_s19  ;;  %v10078_v14 = vpop.permute.xlu2 %10077  ;;  %v13301_v12 = vpop.permute.xlu0 %4039  ;;  %17937 = vst [vmem:[#allocation133_spill] sm:$0xff] %v13303_v42  ;;  %v5343_v4 = vrot.slane %v13199_v9, 4  ;;  %v13323_v47 = vpack.c.bf16 %v13276_v18, %v13281_v55  ;;  %v5044_v8 = vsel %vm2434_vm6, %v5042_v57, %v5043_v28  ;;  %v13328_v54 = vadd.f32 %v17943_v13, %v2367_v10  ;;  %v17947_v10 = vld [vmem:[#allocation167_spill] sm:$0xff] }
 0x2ec   : > { %17936 = vst [vmem:[#allocation182_spill] sm:$0xff] %v13301_v12  ;;  %v10068_v51 = vpop.permute.xlu1 %10067  ;;  %v13319_v46 = vadd.f32 %v12320_v32, %v2362_v53  ;;  %v5046_v25 = vsel %vm2434_vm6, %v5043_v28, %v5045_v23  ;;  %v17288_v32 = vrot.slane %v13197_v20, 4  ;;  %v5338_v63 = vrot.slane %v13221_v21, 4  ;;  %v17946_v28 = vld [vmem:[#allocation156_spill] sm:$0xff]  ;;  %v17948_v23 = vld [vmem:[#allocation166_spill] sm:$0xff] }
 0x2ed   : > { %17940 = vst [vmem:[#allocation134_spill] sm:$0xff] %v13310_v31  ;;  %v3320_v43 = vpop.f32.mrf.mxu3  ;;  %v13333_v7 = vpack.c.bf16 %v5046_v25, %v5044_v8  ;;  %v5339_v31 = vrot.slane %v13219_v2, 4  ;;  %v4769_v57 = vrot.slane %v13096_v44, 2  ;;  %v17949_v13 = vpack.c.bf16 %v17947_v10, %v17948_v23  ;;  %v17950_v12 = vld [vmem:[#allocation176_spill] sm:$0xff]  ;;  %v17951_v10 = vld [vmem:[#allocation7_spill] sm:$0xff] }
 0x2ee   : > { %17942 = vst [vmem:[#allocation180_spill] sm:$0xff] %v13323_v47  ;;  %v2972_v49 = vpop.f32.mrf.mxu2  ;;  %v4770_v8 = vrot.slane %v13094_v45, 2  ;;  %v5047_v25 = vrot.slane %v13096_v44, 3 }
 0x2ef   : > { %v13331_v50 = vpop.f32.mrf.mxu0  ;;  %17945 = vst [vmem:[#allocation189_spill] sm:$0xff] %v13333_v7  ;;  %v3051_v53 = vadd.f32 %v2972_v49, %v2700_v40  ;;  %v5345_v40 = vsel %vm5295_vm7, %v5343_v4, %v17288_v32  ;;  %v5048_v49 = vrot.slane %v13094_v45, 3  ;;  %v5340_v23 = vsel %vm5295_vm7, %v5338_v63, %v5339_v31  ;;  %v17952_v4 = vld [vmem:[#allocation227_spill] sm:$0xff]  ;;  %v17953_v45 = vld [vmem:[#allocation220_spill] sm:$0xff] }
 0x2f0   : > { %17944 = vst [vmem:[#allocation178_spill] sm:$0xff] %v13331_v50  ;;  %6717 = vrot.lane.b32.xlu2 %v17946_v28, %s10107_s19  ;;  %v13345_v42 = vpop.f32.mrf.mxu1  ;;  %v3746_v32 = vadd.f32 %v17952_v4, %v3398_v11  ;;  %v4772_v63 = vrot.slane %v13144_v6, 2  ;;  %v13375_v11 = vunpack.i.l.bf16 %v10068_v51  ;;  %v17955_v4 = vld [vmem:[#allocation136_spill] sm:$0xff]  ;;  %v5050_v7 = vrot.slane %v13144_v6, 3 }
 0x2f1   : > { %v3399_v28 = vadd.f32 %v3320_v43, %v3051_v53  ;;  %6515 = vrot.lane.b32.xlu1 %v17950_v12, %s10107_s19  ;;  %v4771_v12 = vsel %vm678_vm5, %v4769_v57, %v4770_v8  ;;  %v5049_v53 = vsel %vm2434_vm6, %v5047_v25, %v5048_v49  ;;  %v4777_v57 = vrot.slane %v13086_v24, 2 }
 0x2f2   : > { %9466 = vmatmul.msk.bf16.gmra.mxu0 %vm2152_vm9, %v17951_v10  ;;  %v5055_v25 = vrot.slane %v13086_v24, 3  ;;  %v5346_v10 = vrot.slane %v13253_v26, 4  ;;  %v13398_v24 = vadd.f32 %v13229_v60, %v3746_v32  ;;  %v5351_v6 = vrot.slane %v13189_v38, 4  ;;  %v17964_v60 = vld [vmem:[#allocation168_spill] sm:$0xff]  ;;  %v17965_v32 = vld [vmem:[#allocation170_spill] sm:$0xff] }
 0x2f3   : > { %6315 = vrot.lane.b32.xlu0 %v17949_v13, %s10107_s19  ;;  %v5342_v13 = vsel %vm5295_vm7, %v5339_v31, %v5341_v59  ;;  %v13361_v47 = vpop.permute.xlu2 %5585  ;;  %v13363_v44 = vpop.permute.xlu0 %4311  ;;  %9446 = vmatmul.msk.bf16.gmra.mxu3 %vm2152_vm9, %v17953_v45  ;;  %v13373_v31 = vunpack.i.h.bf16 %v10068_v51  ;;  %v17960_v51 = vld [vmem:[#allocation193_spill] sm:$0xff]  ;;  %v4773_v45 = vsel %vm678_vm5, %v4770_v8, %v4772_v63  ;;  %v3747_v1 = vadd.f32 %v17962_v34, %v3399_v28 }
 0x2f4   : > { %v13367_v43 = vpack.c.bf16 %v5342_v13, %v5340_v23  ;;  %v13377_v59 = vpop.permute.xlu1 %4305  ;;  %9430 = vmatmul.msk.bf16.gmra.mxu2 %vm2152_vm9, %v12745_v22  ;;  %9478 = vmatmul.msk.bf16.gmra.mxu1 %vm2152_vm9, %v17955_v4  ;;  %v13385_v23 = vunpack.i.h.bf16 %v10078_v14  ;;  %v13387_v13 = vunpack.i.l.bf16 %v10078_v14  ;;  %17959 = vst [vmem:[#allocation176_spill] sm:$0xff] %v13398_v24  ;;  %v5348_v14 = vrot.slane %v13195_v17, 4 }
 0x2f5   : > { %v3323_v22 = vpop.f32.mrf.mxu3  ;;  %v17966_v24 = vpack.c.bf16 %v17964_v60, %v17965_v32  ;;  %v5349_v8 = vrot.slane %v13185_v5, 4  ;;  %v5051_v63 = vsel %vm2434_vm6, %v5048_v49, %v5050_v7  ;;  %v4775_v7 = vrot.slane %v13082_v27, 2 }
 0x2f6   : > { %17954 = vst [vmem:[#allocation79_spill] sm:$0xff] %v13367_v43  ;;  %v2975_v58 = vpop.f32.mrf.mxu2  ;;  %v13405_v43 = vpack.c.bf16 %v13373_v31, %v13375_v11 }
 0x2f7   : > { %17956 = vst [vmem:[#allocation156_spill] sm:$0xff] %v13385_v23  ;;  %v13395_v36 = vpop.f32.mrf.mxu0  ;;  %v3052_v30 = vadd.f32 %v2975_v58, %v17960_v51  ;;  %v13420_v58 = vpack.c.bf16 %v13385_v23, %v13387_v13  ;;  %v17969_v51 = vrot.slane %v13197_v20, 4  ;;  %v5350_v34 = vsel %vm5295_vm7, %v5348_v14, %v5349_v8 }
 0x2f8   : > { %17957 = vst [vmem:[#allocation167_spill] sm:$0xff] %v13387_v13  ;;  %v13416_v50 = vpop.f32.mrf.mxu1 }
 0x2f9   : > { %17958 = vst [vmem:[#allocation166_spill] sm:$0xff] %v13395_v36  ;;  %v17963_v36 = vld [vmem:[#allocation179_spill] sm:$0xff]  ;;  %v3400_v28 = vadd.f32 %v3323_v22, %v3052_v30 }
 0x2fa   : > { %17961 = vst [vmem:[#allocation227_spill] sm:$0xff] %v13405_v43  ;;  %6719 = vrot.lane.b32.xlu2 %v17963_v36, %s10107_s19  ;;  %v17968_v36 = vld [vmem:[#allocation155_spill] sm:$0xff]  ;;  %v17998_v43 = vld [vmem:[#allocation17_spill] sm:$0xff] }
 0x2fb   : > { %6317 = vrot.lane.b32.xlu0 %v17966_v24, %s10107_s19  ;;  %17967 = vst [vmem:[#allocation136_spill] sm:$0xff] %v13420_v58  ;;  %6517 = vrot.lane.b32.xlu1 %v17968_v36, %s10107_s19  ;;  %v5347_v24 = vsel %vm5295_vm7, %v17969_v51, %v5346_v10  ;;  %v13430_v60 = vpop.permute.xlu2 %6697  ;;  %v13432_v32 = vpop.permute.xlu0 %6289  ;;  %v13436_v58 = vpack.c.bf16 %v4773_v45, %v4771_v12  ;;  %v4774_v51 = vrot.slane %v13092_v3, 2 }
 0x2fc   : > { %17970 = vst [vmem:[#allocation193_spill] sm:$0xff] %v13430_v60  ;;  %v13434_v0 = vpack.c.bf16 %v5347_v24, %v5345_v40  ;;  %v13441_v22 = vpop.permute.xlu1 %3779  ;;  %v13443_v36 = vpack.c.bf16 %v5051_v63, %v5049_v53  ;;  %v5352_v10 = vsel %vm5295_vm7, %v5349_v8, %v5351_v6  ;;  %v13449_v40 = vadd.f32 %v13289_v62, %v3747_v1  ;;  %v17976_v8 = vld [vmem:[#allocation230_spill] sm:$0xff]  ;;  %v17978_v60 = vld [vmem:[#allocation161_spill] sm:$0xff] }
 0x2fd   : > { %17971 = vst [vmem:[#allocation44_spill] sm:$0xff] %v13432_v32  ;;  %v13451_v45 = vpack.c.bf16 %v5352_v10, %v5350_v34  ;;  %v3325_v14 = vpop.f32.mrf.mxu3  ;;  %v5052_v53 = vrot.slane %v13092_v3, 3  ;;  %v5053_v6 = vrot.slane %v13082_v27, 3  ;;  %v3748_v63 = vadd.f32 %v17976_v8, %v3400_v28 }
 0x2fe   : > { %17972 = vst [vmem:[#allocation179_spill] sm:$0xff] %v13434_v0  ;;  %v2977_v24 = vpop.f32.mrf.mxu2  ;;  %v4776_v1 = vsel %vm678_vm5, %v4774_v51, %v4775_v7  ;;  %v4778_v62 = vsel %vm678_vm5, %v4775_v7, %v4777_v57  ;;  %v4779_v34 = vrot.slane %v13221_v21, 2  ;;  %v17979_v28 = vpack.c.bf16 %v12503_v37, %v12498_v48  ;;  %v17997_v0 = vld [vmem:[#allocation183_spill] sm:$0xff] }
 0x2ff   : > { %17973 = vst [vmem:[#allocation168_spill] sm:$0xff] %v13436_v58  ;;  %v13459_v32 = vpop.f32.mrf.mxu0  ;;  %v3053_v10 = vadd.f32 %v2977_v24, %v13319_v46  ;;  %v13465_v30 = vpack.c.bf16 %v4778_v62, %v4776_v1  ;;  %v5054_v12 = vsel %vm2434_vm6, %v5052_v53, %v5053_v6  ;;  %v5056_v49 = vsel %vm2434_vm6, %v5053_v6, %v5055_v25  ;;  %v17981_v25 = vld [vmem:[#allocation177_spill] sm:$0xff]  ;;  %v17985_v62 = vld [vmem:[#allocation223_spill] sm:$0xff] }
 0x300   : > { %17974 = vst [vmem:[#allocation170_spill] sm:$0xff] %v13443_v36  ;;  %v13475_v51 = vpop.f32.mrf.mxu1  ;;  %v13477_v57 = vpack.c.bf16 %v5056_v49, %v5054_v12  ;;  %v4780_v46 = vrot.slane %v13219_v2, 2  ;;  %v5057_v7 = vrot.slane %v13221_v21, 3  ;;  %v5058_v53 = vrot.slane %v13219_v2, 3 }
 0x301   : > { %17975 = vst [vmem:[#allocation155_spill] sm:$0xff] %v13451_v45  ;;  %v3401_v8 = vadd.f32 %v3325_v14, %v3053_v10  ;;  %v5358_v6 = vrot.slane %v13281_v55, 4  ;;  %v4784_v49 = vrot.slane %v13199_v9, 2  ;;  %v17986_v10 = vrot.slane %v13084_v39, 2 }
 0x302   : > { %17977 = vst [vmem:[#allocation230_spill] sm:$0xff] %v13465_v30  ;;  %6721 = vrot.lane.b32.xlu2 %v17978_v60, %s10107_s19  ;;  %v17982_v60 = vld [vmem:[#allocation173_spill] sm:$0xff]  ;;  %v4781_v14 = vsel %vm678_vm5, %v4779_v34, %v4780_v46  ;;  %v17987_v30 = vrot.slane %v13084_v39, 3  ;;  %v5364_v45 = vrot.slane %v13385_v23, 4 }
 0x303   : > { %6319 = vrot.lane.b32.xlu0 %v17979_v28, %s10107_s19  ;;  %17980 = vst [vmem:[#allocation161_spill] sm:$0xff] %v13477_v57  ;;  %6519 = vrot.lane.b32.xlu1 %v17981_v25, %s10107_s19  ;;  %v13489_v12 = vpop.permute.xlu2 %6699  ;;  %v13491_v1 = vpop.permute.xlu0 %6291  ;;  %v4783_v28 = vsel %vm678_vm5, %v4780_v46, %v17986_v10  ;;  %v5059_v25 = vsel %vm2434_vm6, %v5057_v7, %v5058_v53  ;;  %v4785_v46 = vrot.slane %v13197_v20, 2  ;;  %v5361_v7 = vrot.slane %v13377_v59, 4 }
 0x304   : > { %9467 = vmatmul.msk.bf16.gmra.mxu0 %vm2152_vm9, %v17982_v60  ;;  %17983 = vst [vmem:[#allocation177_spill] sm:$0xff] %v13489_v12  ;;  %9447 = vmatmul.msk.bf16.gmra.mxu3 %vm2152_vm9, %v17985_v62  ;;  %v5061_v24 = vsel %vm2434_vm6, %v5058_v53, %v17987_v30  ;;  %v13504_v12 = vpop.permute.xlu1 %10082  ;;  %v13510_v34 = vpack.c.bf16 %v4783_v28, %v4781_v14  ;;  %v17992_v10 = vrot.slane %v13276_v18, 4  ;;  %v17993_v14 = vrot.slane %v13253_v26, 2  ;;  %v17999_v60 = vld [vmem:[#allocation11_spill] sm:$0xff] }
 0x305   : > { %17984 = vst [vmem:[#allocation268_spill] sm:$0xff] %v13491_v1  ;;  %9431 = vmatmul.msk.bf16.gmra.mxu2 %vm2152_vm9, %v17955_v4  ;;  %v17988_v1 = vld [vmem:[#allocation172_spill] sm:$0xff]  ;;  %v13512_v58 = vpack.c.bf16 %v5061_v24, %v5059_v25  ;;  %v3749_v30 = vadd.f32 %v12965_v19, %v3401_v8  ;;  %v13518_v53 = vadd.f32 %v13345_v42, %v3748_v63  ;;  %v3328_v57 = vpop.f32.mrf.mxu3  ;;  %v5062_v28 = vrot.slane %v13199_v9, 3 }
 0x306   : > { %9479 = vmatmul.msk.bf16.gmra.mxu1 %vm2152_vm9, %v17988_v1  ;;  %17989 = vst [vmem:[#allocation172_spill] sm:$0xff] %v13510_v34  ;;  %v5360_v4 = vsel %vm5295_vm7, %v5358_v6, %v17992_v10  ;;  %v4786_v36 = vsel %vm678_vm5, %v4784_v49, %v4785_v46  ;;  %v4788_v24 = vsel %vm678_vm5, %v4785_v46, %v17993_v14  ;;  %v5063_v25 = vrot.slane %v13197_v20, 3  ;;  %v2980_v34 = vpop.f32.mrf.mxu2  ;;  %v17995_v49 = vld [vmem:[#allocation203_spill] sm:$0xff] }
 0x307   : > { %17990 = vst [vmem:[#allocation269_spill] sm:$0xff] %v13512_v58  ;;  %v13529_v19 = vpop.f32.mrf.mxu0  ;;  %v5353_v42 = vrot.slane %v13375_v11, 4  ;;  %v5354_v63 = vrot.slane %v13373_v31, 4  ;;  %v13533_v8 = vpack.c.bf16 %v4788_v24, %v4786_v36  ;;  %v5363_v6 = vrot.slane %v13387_v13, 4 }
 0x308   : > { %17991 = vst [vmem:[#allocation270_spill] sm:$0xff] %v13518_v53  ;;  %v3054_v10 = vadd.f32 %v2980_v34, %v17995_v49  ;;  %v5064_v58 = vsel %vm2434_vm6, %v5062_v28, %v5063_v25  ;;  %v17996_v46 = vrot.slane %v13253_v26, 3  ;;  %v18000_v36 = vpack.c.bf16 %v17998_v43, %v17999_v60  ;;  %v13548_v24 = vpop.f32.mrf.mxu1 }
 0x309   : > { %17994 = vst [vmem:[#allocation271_spill] sm:$0xff] %v13533_v8  ;;  %v5355_v34 = vsel %vm5295_vm7, %v5353_v42, %v5354_v63  ;;  %v18001_v28 = vrot.slane %v13187_v35, 4  ;;  %v5365_v43 = vsel %vm5295_vm7, %v5363_v6, %v5364_v45  ;;  %v4790_v60 = vrot.slane %v13185_v5, 2 }
 0x30a   : > { %v5066_v14 = vsel %vm2434_vm6, %v5063_v25, %v17996_v46  ;;  %6723 = vrot.lane.b32.xlu2 %v17997_v0, %s10107_s19  ;;  %v4789_v25 = vrot.slane %v13195_v17, 2  ;;  %v3402_v46 = vadd.f32 %v3328_v57, %v3054_v10  ;;  %v18003_v0 = vld [vmem:[#allocation190_spill] sm:$0xff]  ;;  %v4795_v57 = vrot.slane %v13373_v31, 2 }
 0x30b   : > { %7249 = vrot.lane.b32.xlu0 %v18000_v36, %s10107_s19  ;;  %v5357_v49 = vsel %vm5295_vm7, %v5354_v63, %v18001_v28  ;;  %v13554_v8 = vpack.c.bf16 %v5066_v14, %v5064_v58  ;;  %6521 = vrot.lane.b32.xlu1 %v18003_v0, %s10107_s19  ;;  %v13563_v36 = vpop.permute.xlu2 %6701  ;;  %v13565_v42 = vpop.permute.xlu0 %6293  ;;  %v5067_v63 = vrot.slane %v13195_v17, 3  ;;  %v5068_v58 = vrot.slane %v13185_v5, 3 }
 0x30c   : > { %v13559_v53 = vpack.c.bf16 %v5357_v49, %v5355_v34  ;;  %18005 = vst [vmem:[#allocation17_spill] sm:$0xff] %v13563_v36  ;;  %v4794_v14 = vrot.slane %v13375_v11, 2  ;;  %v3750_v10 = vadd.f32 %v13002_v16, %v3402_v46  ;;  %v13572_v34 = vpop.permute.xlu1 %6493  ;;  %v4791_v6 = vsel %vm678_vm5, %v4789_v25, %v4790_v60 }
 0x30d   : > { %18002 = vst [vmem:[#allocation203_spill] sm:$0xff] %v13554_v8  ;;  %v18008_v28 = vrot.slane %v13189_v38, 2  ;;  %v5072_v0 = vrot.slane %v13375_v11, 3  ;;  %v5069_v8 = vsel %vm2434_vm6, %v5067_v63, %v5068_v58  ;;  %v3330_v46 = vpop.f32.mrf.mxu3  ;;  %v18011_v25 = vrot.slane %v13363_v44, 4 }
 0x30e   : > { %18004 = vst [vmem:[#allocation183_spill] sm:$0xff] %v13559_v53  ;;  %v18010_v53 = vrot.slane %v13189_v38, 3  ;;  %v18014_v63 = vrot.slane %v13276_v18, 4 }
 0x30f   : > { %18006 = vst [vmem:[#allocation11_spill] sm:$0xff] %v13565_v42  ;;  %v4793_v49 = vsel %vm678_vm5, %v4790_v60, %v18008_v28  ;;  %v13580_v42 = vadd.f32 %v13416_v50, %v3749_v30  ;;  %v4796_v60 = vsel %vm678_vm5, %v4794_v14, %v4795_v57  ;;  %v18013_v50 = vrot.slane %v13187_v35, 2  ;;  %v13597_v28 = vpop.f32.mrf.mxu0 }
 0x310   : > { %18007 = vst [vmem:[#allocation190_spill] sm:$0xff] %v13572_v34  ;;  %v13582_v36 = vpack.c.bf16 %v4793_v49, %v4791_v6  ;;  %v5071_v16 = vsel %vm2434_vm6, %v5068_v58, %v18010_v53  ;;  %v5367_v34 = vsel %vm5295_vm7, %v5364_v45, %v18011_v25  ;;  %v2982_v6 = vpop.f32.mrf.mxu2  ;;  %v5362_v53 = vsel %vm5295_vm7, %v18014_v63, %v5361_v7  ;;  %v18018_v25 = vld [vmem:[#allocation191_spill] sm:$0xff]  ;;  %v13616_v7 = vpop.f32.mrf.mxu1  ;;  %v18022_v63 = vld [vmem:[#allocation174_spill] sm:$0xff] }
 0x311   : > { %v13591_v62 = vpack.c.bf16 %v5071_v16, %v5069_v8  ;;  %v4798_v30 = vsel %vm678_vm5, %v4795_v57, %v18013_v50  ;;  %v13602_v58 = vpack.c.bf16 %v5367_v34, %v5365_v43  ;;  %v5073_v45 = vrot.slane %v13373_v31, 3  ;;  %v18019_v50 = vld [vmem:[#allocation30_spill] sm:$0xff] }
 0x312   : > { %18009 = vst [vmem:[#allocation272_spill] sm:$0xff] %v13582_v36  ;;  %v13604_v49 = vpack.c.bf16 %v4798_v30, %v4796_v60  ;;  %v3055_v8 = vadd.f32 %v2982_v6, %v13328_v54  ;;  %v13608_v14 = vpack.c.bf16 %v5362_v53, %v5360_v4  ;;  %v4799_v16 = vrot.slane %v13281_v55, 2  ;;  %6725 = vrot.lane.b32.xlu2 %v18018_v25, %s10107_s19  ;;  %v18021_v6 = vld [vmem:[#allocation205_spill] sm:$0xff] }
 0x313   : > { %18012 = vst [vmem:[#allocation273_spill] sm:$0xff] %v13591_v62  ;;  %v4800_v57 = vrot.slane %v13276_v18, 2  ;;  %6903 = vrot.lane.b32.xlu0 %v18019_v50, %s10107_s19  ;;  %v5074_v43 = vsel %vm2434_vm6, %v5072_v0, %v5073_v45  ;;  %v18020_v34 = vrot.slane %v13187_v35, 3  ;;  %v5077_v4 = vrot.slane %v13281_v55, 3  ;;  %6523 = vrot.lane.b32.xlu1 %v18021_v6, %s10107_s19  ;;  %v13632_v50 = vpop.permute.xlu2 %6703  ;;  %v18042_v62 = vld [vmem:[#allocation16_spill] sm:$0xff] }
 0x314   : > { %18015 = vst [vmem:[#allocation274_spill] sm:$0xff] %v13602_v58  ;;  %v5078_v60 = vrot.slane %v13276_v18, 3  ;;  %v3403_v30 = vadd.f32 %v3330_v46, %v3055_v8  ;;  %9468 = vmatmul.msk.bf16.gmra.mxu0 %vm2152_vm9, %v18022_v63  ;;  %v4804_v0 = vrot.slane %v13387_v13, 2  ;;  %v18027_v46 = vrot.slane %v13377_v59, 2  ;;  %v18053_v58 = vld [vmem:[#allocation23_spill] sm:$0xff] }
 0x315   : > { %18016 = vst [vmem:[#allocation275_spill] sm:$0xff] %v13604_v49  ;;  %v5076_v54 = vsel %vm2434_vm6, %v5073_v45, %v18020_v34  ;;  %v4801_v25 = vsel %vm678_vm5, %v4799_v16, %v4800_v57  ;;  %v13634_v45 = vpop.permute.xlu0 %6295  ;;  %v18026_v34 = vld [vmem:[#allocation225_spill] sm:$0xff]  ;;  %v4805_v16 = vrot.slane %v13385_v23, 2  ;;  %v13646_v49 = vpop.permute.xlu1 %6495  ;;  %9432 = vmatmul.msk.bf16.gmra.mxu2 %vm2152_vm9, %v17988_v1  ;;  %v5083_v1 = vrot.slane %v13385_v23, 3 }
 0x316   : > { %18017 = vst [vmem:[#allocation276_spill] sm:$0xff] %v13608_v14  ;;  %v13628_v53 = vpack.c.bf16 %v5076_v54, %v5074_v43  ;;  %9448 = vmatmul.msk.bf16.gmra.mxu3 %vm2152_vm9, %v18026_v34  ;;  %v4803_v8 = vsel %vm678_vm5, %v4800_v57, %v18027_v46  ;;  %v5079_v6 = vsel %vm2434_vm6, %v5077_v4, %v5078_v60  ;;  %v18028_v43 = vrot.slane %v13377_v59, 3 }
 0x317   : > { %18024 = vst [vmem:[#allocation30_spill] sm:$0xff] %v13632_v50  ;;  %v13652_v50 = vpack.c.bf16 %v4803_v8, %v4801_v25  ;;  %v5082_v57 = vrot.slane %v13387_v13, 3  ;;  %v13658_v4 = vadd.f32 %v13475_v51, %v3750_v10  ;;  %v18033_v46 = vrot.slane %v13363_v44, 2  ;;  %v13667_v8 = vpop.f32.mrf.mxu0  ;;  %v18036_v10 = vld [vmem:[#allocation119_spill] sm:$0xff] }
 0x318   : > { %18023 = vst [vmem:[#allocation191_spill] sm:$0xff] %v13628_v53  ;;  %v5081_v54 = vsel %vm2434_vm6, %v5078_v60, %v18028_v43  ;;  %v4806_v60 = vsel %vm678_vm5, %v4804_v0, %v4805_v16  ;;  %v2985_v25 = vpop.f32.mrf.mxu2  ;;  %v6125_v23 = vrot.slane %v13361_v47, 4 }
 0x319   : > { %18025 = vst [vmem:[#allocation205_spill] sm:$0xff] %v13634_v45  ;;  %v18030_v45 = vld [vmem:[#allocation222_spill] sm:$0xff]  ;;  %v13654_v53 = vpack.c.bf16 %v5081_v54, %v5079_v6  ;;  %v4808_v43 = vsel %vm678_vm5, %v4805_v16, %v18033_v46  ;;  %v5084_v6 = vsel %vm2434_vm6, %v5082_v57, %v5083_v1  ;;  %v18035_v54 = vrot.slane %v13363_v44, 3 }
 0x31a   : > { %18029 = vst [vmem:[#allocation225_spill] sm:$0xff] %v13646_v49  ;;  %9480 = vmatmul.msk.bf16.gmra.mxu1 %vm2152_vm9, %v18030_v45  ;;  %v3333_v49 = vpop.f32.mrf.mxu3  ;;  %v13665_v36 = vpack.c.bf16 %v4808_v43, %v4806_v60  ;;  %v3056_v0 = vadd.f32 %v2985_v25, %v18036_v10  ;;  %v3751_v16 = vadd.f32 %v13060_v52, %v3403_v30  ;;  %v18038_v46 = vld [vmem:[#allocation210_spill] sm:$0xff]  ;;  %v18039_v60 = vld [vmem:[#allocation57_spill] sm:$0xff]  ;;  %v18040_v43 = vld [vmem:[#allocation56_spill] sm:$0xff]  ;;  %v13691_v25 = vunpack.i.l.bf16 %v13504_v12 }
 0x31b   : > { %18031 = vst [vmem:[#allocation222_spill] sm:$0xff] %v13652_v50  ;;  %v5086_v51 = vsel %vm2434_vm6, %v5083_v1, %v18035_v54  ;;  %6727 = vrot.lane.b32.xlu2 %v18038_v46, %s10107_s19  ;;  %6901 = vrot.lane.b32.xlu1 %v18042_v62, %s10107_s19  ;;  %v13688_v1 = vunpack.i.h.bf16 %v13504_v12  ;;  %v13693_v52 = vpop.permute.xlu2 %6705  ;;  %v18048_v54 = vld [vmem:[#allocation160_spill] sm:$0xff]  ;;  %v18051_v10 = vld [vmem:[#allocation159_spill] sm:$0xff]  ;;  %v5855_v46 = vrot.slane %v13361_v47, 2  ;;  %v5990_v12 = vrot.slane %v13361_v47, 3 }
 0x31c   : > { %18032 = vst [vmem:[#allocation277_spill] sm:$0xff] %v13654_v53  ;;  %v13674_v50 = vpack.c.bf16 %v5086_v51, %v5084_v6  ;;  %v13683_v53 = vpop.f32.mrf.mxu1  ;;  %v3404_v57 = vadd.f32 %v3333_v49, %v3056_v0  ;;  %v18047_v6 = vld [vmem:[#allocation114_spill] sm:$0xff]  ;;  %v13702_v49 = vadd.f32 %v13548_v24, %v3751_v16  ;;  %v5720_v0 = vrot.slane %v13361_v47, 1 }
 0x31d   : > { %18034 = vst [vmem:[#allocation278_spill] sm:$0xff] %v13665_v36  ;;  %v18041_v36 = vpack.c.bf16 %v18039_v60, %v18040_v43  ;;  %v13695_v30 = vpop.permute.xlu0 %6297  ;;  %v2372_v51 = vadd.f32 %v18048_v54, %v18047_v6  ;;  %v5987_v6 = vrot.slane %v13691_v25, 3  ;;  %v5988_v54 = vrot.slane %v13688_v1, 3  ;;  %v18065_v47 = vld [vmem:[#allocation18_spill] sm:$0xff] }
 0x31e   : > { %18037 = vst [vmem:[#allocation119_spill] sm:$0xff] %v13674_v50  ;;  %v3752_v43 = vadd.f32 %v13102_v61, %v3404_v57  ;;  %v5717_v24 = vrot.slane %v13691_v25, 1  ;;  %v18052_v50 = vld [vmem:[#allocation28_spill] sm:$0xff] }
 0x31f   : > { %7255 = vrot.lane.b32.xlu0 %v18041_v36, %s10107_s19  ;;  %18043 = vst [vmem:[#allocation210_spill] sm:$0xff] %v13688_v1  ;;  %v13699_v36 = vpop.permute.xlu1 %6497  ;;  %v2706_v62 = vadd.f32 %v18051_v10, %v2372_v51  ;;  %v5718_v51 = vrot.slane %v13688_v1, 1  ;;  %v5852_v10 = vrot.slane %v13691_v25, 2  ;;  %v18054_v61 = vpack.c.bf16 %v18052_v50, %v18053_v58  ;;  %v18055_v57 = vld [vmem:[#allocation68_spill] sm:$0xff]  ;;  %v18058_v58 = vld [vmem:[#allocation62_spill] sm:$0xff]  ;;  %v18059_v50 = vld [vmem:[#allocation53_spill] sm:$0xff] }
 0x320   : > { %18044 = vst [vmem:[#allocation57_spill] sm:$0xff] %v13691_v25  ;;  %v13724_v63 = vsel %vm2434_vm6, %v5987_v6, %v5988_v54 }
 0x321   : > { %18045 = vst [vmem:[#allocation56_spill] sm:$0xff] %v13693_v52  ;;  %v13709_v52 = vpop.f32.mrf.mxu0 }
 0x322   : > { %18046 = vst [vmem:[#allocation16_spill] sm:$0xff] %v13695_v30  ;;  %v3335_v60 = vpop.f32.mrf.mxu3  ;;  %v2987_v30 = vpop.f32.mrf.mxu2 }
 0x323   : > { %18049 = vst [vmem:[#allocation114_spill] sm:$0xff] %v13699_v36  ;;  %v3057_v16 = vadd.f32 %v2987_v30, %v2706_v62  ;;  %v5853_v36 = vrot.slane %v13688_v1, 2  ;;  %7251 = vrot.lane.b32.xlu2 %v18054_v61, %s10107_s19  ;;  %v13727_v30 = vsel %vm2434_vm6, %v5988_v54, %v5990_v12  ;;  %v6122_v62 = vrot.slane %v13691_v25, 4  ;;  %v13743_v54 = vpop.permute.xlu2 %6707 }
 0x324   : > { %18050 = vst [vmem:[#allocation160_spill] sm:$0xff] %v13702_v49  ;;  %v3816_v14 = vpop.f32.mrf.mxu1  ;;  %v6123_v49 = vrot.slane %v13688_v1, 4  ;;  %v18060_v61 = vpack.c.bf16 %v18058_v58, %v18059_v50  ;;  %v13741_v12 = vsel %vm1085_vm4, %v5717_v24, %v5718_v51 }
 0x325   : > { %18056 = vst [vmem:[#allocation159_spill] sm:$0xff] %v13724_v63  ;;  %v3405_v13 = vadd.f32 %v3335_v60, %v3057_v16  ;;  %v13745_v1 = vpop.permute.xlu0 %6299  ;;  %v13750_v60 = vsel %vm1085_vm4, %v5718_v51, %v5720_v0  ;;  %v13753_v16 = vsel %vm678_vm5, %v5852_v10, %v5853_v36  ;;  %v13756_v58 = vsel %vm678_vm5, %v5853_v36, %v5855_v46  ;;  %v18105_v63 = vld [vmem:[#allocation95_spill] sm:$0xff] }
 0x326   : > { %18057 = vst [vmem:[#allocation28_spill] sm:$0xff] %v13727_v30  ;;  %7253 = vrot.lane.b32.xlu1 %v18060_v61, %s10107_s19  ;;  %9449 = vmatmul.msk.bf16.gmra.mxu3 %vm2152_vm9, %v18065_v47  ;;  %v13759_v50 = vsel %vm5295_vm7, %v6122_v62, %v6123_v49  ;;  %v18071_v61 = vld [vmem:[#allocation6_spill] sm:$0xff]  ;;  %v13772_v36 = vadd.f32 %v13616_v7, %v3752_v43  ;;  %v18075_v7 = vld [vmem:[#allocation100_spill] sm:$0xff]  ;;  %v18076_v43 = vld [vmem:[#allocation97_spill] sm:$0xff] }
 0x327   : > { %6909 = vrot.lane.b32.xlu0 %v18055_v57, %s10107_s19  ;;  %v18061_v57 = vld [vmem:[#allocation49_spill] sm:$0xff]  ;;  %18062 = vst [vmem:[#allocation23_spill] sm:$0xff] %v13741_v12  ;;  %v13761_v24 = vpop.permute.xlu1 %6499  ;;  %9433 = vmatmul.msk.bf16.gmra.mxu2 %vm2152_vm9, %v18030_v45  ;;  %v13775_v46 = vsel %vm5295_vm7, %v6123_v49, %v6125_v23  ;;  %v3753_v0 = vadd.f32 %v13160_v56, %v3405_v13  ;;  %v18078_v12 = vld [vmem:[#allocation54_spill] sm:$0xff] }
 0x328   : > { %9517 = vmatmul.msk.bf16.vlgmr.msra.gmra.mxu0 %vm2152_vm9, %v18061_v57  ;;  %18063 = vst [vmem:[#allocation68_spill] sm:$0xff] %v13743_v54  ;;  %v18074_v54 = vld [vmem:[#allocation40_spill] sm:$0xff]  ;;  %v18077_v51 = vpack.c.bf16 %v18075_v7, %v18076_v43 }
 0x329   : > { %18064 = vst [vmem:[#allocation62_spill] sm:$0xff] %v13745_v1  ;;  %v13779_v6 = vpop.f32.mrf.mxu0  ;;  %v18073_v1 = vld [vmem:[#allocation107_spill] sm:$0xff] }
 0x32a   : > { %18066 = vst [vmem:[#allocation53_spill] sm:$0xff] %v13750_v60  ;;  %9481 = vmatmul.msk.bf16.gmra.mxu1 %vm2152_vm9, %v18071_v61  ;;  %v3338_v10 = vpop.f32.mrf.mxu3  ;;  %v2990_v45 = vpop.f32.mrf.mxu2 }
 0x32b   : > { %18067 = vst [vmem:[#allocation18_spill] sm:$0xff] %v13753_v16  ;;  %6905 = vrot.lane.b32.xlu2 %v18074_v54, %s10107_s19  ;;  %v13791_v62 = vpop.permute.xlu2 %6709  ;;  %v13800_v54 = vadd.f32 %v13683_v53, %v3753_v0  ;;  %v18089_v0 = vld [vmem:[#allocation83_spill] sm:$0xff] }
 0x32c   : > { %18068 = vst [vmem:[#allocation279_spill] sm:$0xff] %v13756_v58  ;;  %v3818_v23 = vpop.f32.mrf.mxu1 }
 0x32d   : > { %18069 = vst [vmem:[#allocation280_spill] sm:$0xff] %v13759_v50  ;;  %v13793_v50 = vpop.permute.xlu0 %6301 }
 0x32e   : > { %18070 = vst [vmem:[#allocation281_spill] sm:$0xff] %v13761_v24  ;;  %v3058_v24 = vadd.f32 %v2990_v45, %v18073_v1  ;;  %6907 = vrot.lane.b32.xlu1 %v18078_v12, %s10107_s19  ;;  %v18081_v1 = vld [vmem:[#allocation123_spill] sm:$0xff]  ;;  %v18082_v45 = vld [vmem:[#allocation4_spill] sm:$0xff] }
 0x32f   : > { %18072 = vst [vmem:[#allocation6_spill] sm:$0xff] %v13775_v46  ;;  %7261 = vrot.lane.b32.xlu0 %v18077_v51, %s10107_s19  ;;  %v2377_v56 = vadd.f32 %v18082_v45, %v18081_v1  ;;  %v13797_v13 = vpop.permute.xlu1 %6501  ;;  %v18084_v46 = vld [vmem:[#allocation94_spill] sm:$0xff]  ;;  %v18088_v1 = vld [vmem:[#allocation109_spill] sm:$0xff] }
 0x330   : > { %v3406_v49 = vadd.f32 %v3338_v10, %v3058_v24  ;;  %18079 = vst [vmem:[#allocation107_spill] sm:$0xff] %v13791_v62  ;;  %v18085_v62 = vld [vmem:[#allocation5_spill] sm:$0xff] }
 0x331   : > { %18080 = vst [vmem:[#allocation40_spill] sm:$0xff] %v13793_v50  ;;  %v2708_v7 = vadd.f32 %v18084_v46, %v2377_v56  ;;  %v13803_v24 = vpop.f32.mrf.mxu0  ;;  %v18086_v50 = vld [vmem:[#allocation66_spill] sm:$0xff] }
 0x332   : > { %18083 = vst [vmem:[#allocation100_spill] sm:$0xff] %v13797_v13  ;;  %v3340_v51 = vpop.f32.mrf.mxu3  ;;  %v2992_v43 = vpop.f32.mrf.mxu2  ;;  %v3754_v12 = vadd.f32 %v13206_v15, %v3406_v49  ;;  %v18087_v60 = vpack.c.bf16 %v18085_v62, %v18086_v50  ;;  %v18090_v46 = vld [vmem:[#allocation78_spill] sm:$0xff]  ;;  %v18096_v50 = vld [vmem:[#allocation20_spill] sm:$0xff] }
 0x333   : > { %v3059_v10 = vadd.f32 %v2992_v43, %v2708_v7  ;;  %v18091_v56 = vpack.c.bf16 %v18089_v0, %v18090_v46  ;;  %v13818_v7 = vpop.permute.xlu2 %6711  ;;  %v18094_v49 = vld [vmem:[#allocation34_spill] sm:$0xff]  ;;  %v4359_v46 = vrot.slane %v12954_v29, 1  ;;  %v18107_v29 = vld [vmem:[#allocation52_spill] sm:$0xff] }
 0x334   : > { %7257 = vrot.lane.b32.xlu2 %v18087_v60, %s10107_s19  ;;  %v3821_v45 = vpop.f32.mrf.mxu1  ;;  %18092 = vst [vmem:[#allocation97_spill] sm:$0xff] %v13818_v7  ;;  %v13830_v62 = vadd.f32 %v3816_v14, %v3754_v12  ;;  %v18103_v12 = vld [vmem:[#allocation138_spill] sm:$0xff]  ;;  %v18104_v7 = vld [vmem:[#allocation108_spill] sm:$0xff] }
 0x335   : > { %v3407_v53 = vadd.f32 %v3340_v51, %v3059_v10  ;;  %v13820_v15 = vpop.permute.xlu0 %6303  ;;  %v2382_v16 = vadd.f32 %v18104_v7, %v18103_v12 }
 0x336   : > { %7259 = vrot.lane.b32.xlu1 %v18091_v56, %s10107_s19  ;;  %18093 = vst [vmem:[#allocation54_spill] sm:$0xff] %v13820_v15  ;;  %9450 = vmatmul.msk.bf16.gmra.mxu3 %vm2152_vm9, %v18094_v49  ;;  %v18099_v15 = vld [vmem:[#allocation81_spill] sm:$0xff] }
 0x337   : > { %6915 = vrot.lane.b32.xlu0 %v18088_v1, %s10107_s19  ;;  %v13824_v60 = vpop.permute.xlu1 %6503  ;;  %9434 = vmatmul.msk.bf16.gmra.mxu2 %vm2152_vm9, %v18071_v61  ;;  %18097 = vst [vmem:[#allocation4_spill] sm:$0xff] %v13830_v62  ;;  %v18098_v1 = vld [vmem:[#allocation154_spill] sm:$0xff]  ;;  %v3755_v56 = vadd.f32 %v13270_v41, %v3407_v53  ;;  %v18100_v61 = vld [vmem:[#allocation144_spill] sm:$0xff]  ;;  %v4356_v41 = vrot.slane %v18107_v29, 1  ;;  %v4357_v53 = vrot.slane %v12899_v33, 1 }
 0x338   : > { %9518 = vmatmul.msk.bf16.gmra.mxu0 %vm2152_vm9, %v18061_v57  ;;  %18095 = vst [vmem:[#allocation123_spill] sm:$0xff] %v13824_v60  ;;  %v18101_v60 = vld [vmem:[#allocation141_spill] sm:$0xff]  ;;  %v18113_v33 = vld [vmem:[#allocation178_spill] sm:$0xff] }
 0x339   : > { %v13832_v10 = vpop.f32.mrf.mxu0  ;;  %v18102_v13 = vpack.c.bf16 %v18100_v61, %v18101_v60  ;;  %v13856_v60 = vadd.f32 %v3818_v23, %v3755_v56  ;;  %v18111_v61 = vld [vmem:[#allocation122_spill] sm:$0xff]  ;;  %v18118_v56 = vld [vmem:[#allocation131_spill] sm:$0xff] }
 0x33a   : > { %9482 = vmatmul.msk.bf16.gmra.mxu1 %vm2152_vm9, %v18096_v50  ;;  %v3343_v51 = vpop.f32.mrf.mxu3  ;;  %v2995_v43 = vpop.f32.mrf.mxu2  ;;  %v2710_v7 = vadd.f32 %v18111_v61, %v2382_v16  ;;  %v18117_v23 = vld [vmem:[#allocation158_spill] sm:$0xff] }
 0x33b   : > { %v3060_v0 = vadd.f32 %v2995_v43, %v18098_v1  ;;  %v13847_v43 = vpop.permute.xlu2 %6713  ;;  %18110 = vst [vmem:[#allocation109_spill] sm:$0xff] %v13856_v60  ;;  %v18119_v61 = vld [vmem:[#allocation126_spill] sm:$0xff] }
 0x33c   : > { %6911 = vrot.lane.b32.xlu2 %v18099_v15, %s10107_s19  ;;  %v3823_v14 = vpop.f32.mrf.mxu1  ;;  %18106 = vst [vmem:[#allocation94_spill] sm:$0xff] %v13847_v43 }
 0x33d   : > { %v3408_v58 = vadd.f32 %v3343_v51, %v3060_v0  ;;  %v13851_v15 = vpop.permute.xlu0 %6305 }
 0x33e   : > { %6913 = vrot.lane.b32.xlu1 %v18105_v63, %s10107_s19  ;;  %18108 = vst [vmem:[#allocation5_spill] sm:$0xff] %v13851_v15  ;;  %v4358_v63 = vsel %vm1085_vm4, %v4356_v41, %v4357_v53  ;;  %v18114_v15 = vld [vmem:[#allocation120_spill] sm:$0xff]  ;;  %v18120_v41 = vpack.c.bf16 %v18118_v56, %v18119_v61  ;;  %v18127_v61 = vld [vmem:[#allocation2_spill] sm:$0xff] }
 0x33f   : > { %7267 = vrot.lane.b32.xlu0 %v18102_v13, %s10107_s19  ;;  %v13853_v1 = vpop.permute.xlu1 %6505  ;;  %v4360_v13 = vsel %vm1085_vm4, %v4357_v53, %v4359_v46  ;;  %v3756_v30 = vadd.f32 %v18113_v33, %v3408_v58  ;;  %v18122_v53 = vld [vmem:[#allocation15_spill] sm:$0xff] }
 0x340   : > { %18109 = vst [vmem:[#allocation66_spill] sm:$0xff] %v13853_v1  ;;  %v13862_v29 = vpack.c.bf16 %v4360_v13, %v4358_v63  ;;  %v18115_v1 = vld [vmem:[#allocation106_spill] sm:$0xff] }
 0x341   : > { %v13859_v12 = vpop.f32.mrf.mxu0  ;;  %v18116_v25 = vpack.c.bf16 %v18114_v15, %v18115_v1  ;;  %v18124_v15 = vld [vmem:[#allocation32_spill] sm:$0xff]  ;;  %v4206_v1 = vld [vmem:[%s17057_s7 + $0x2] sm:$0x1] }
 0x342   : > { %v3345_v51 = vpop.f32.mrf.mxu3  ;;  %v2997_v0 = vpop.f32.mrf.mxu2  ;;  %18112 = vst [vmem:[#allocation83_spill] sm:$0xff] %v13862_v29 }
 0x343   : > { %v3061_v43 = vadd.f32 %v2997_v0, %v2710_v7  ;;  %v13879_v58 = vpop.permute.xlu2 %6715  ;;  %v4894_v7 = vsel %vm2201_vm8, %v4206_v1, 0 }
 0x344   : > { %7263 = vrot.lane.b32.xlu2 %v18116_v25, %s10107_s19  ;;  %v13871_v16 = vpop.f32.mrf.mxu1  ;;  %18121 = vst [vmem:[#allocation78_spill] sm:$0xff] %v13879_v58  ;;  %4903 = vmatpush.bf16.msra.mxu2 %v4894_v7 }
 0x345   : > { %v3409_v46 = vadd.f32 %v3345_v51, %v3061_v43  ;;  %v4204_v43 = vld [vmem:[%s17057_s7] sm:$0x1]  ;;  %v4207_v51 = vld [vmem:[%s17057_s7 + $0x3] sm:$0x1]  ;;  %v13902_v0 = vpop.permute.xlu0 %6307 }
 0x346   : > { %7265 = vrot.lane.b32.xlu1 %v18120_v41, %s10107_s19  ;;  %9451 = vmatmul.msk.bf16.gmra.mxu3 %vm2152_vm9, %v18122_v53  ;;  %v4648_v13 = vsel %vm2201_vm8, %v4204_v43, 0  ;;  %18126 = vst [vmem:[#allocation81_spill] sm:$0xff] %v13902_v0  ;;  %v5172_v33 = vsel %vm2201_vm8, %v4207_v51, 0  ;;  %v18128_v43 = vld [vmem:[#allocation228_spill] sm:$0xff]  ;;  %v18132_v0 = vld [vmem:[#allocation187_spill] sm:$0xff] }
 0x347   : > { %6921 = vrot.lane.b32.xlu0 %v18117_v23, %s10107_s19  ;;  %v13883_v25 = vpop.permute.xlu1 %6507  ;;  %9435 = vmatmul.msk.bf16.gmra.mxu2 %vm2152_vm9, %v18096_v50  ;;  %v13900_v50 = vadd.f32 %v3821_v45, %v3756_v30  ;;  %v4364_v1 = vrot.slane %v18128_v43, 1  ;;  %v18130_v30 = vld [vmem:[#allocation124_spill] sm:$0xff]  ;;  %v18131_v45 = vld [vmem:[#allocation194_spill] sm:$0xff]  ;;  %v18134_v51 = vld [vmem:[#allocation207_spill] sm:$0xff] }
 0x348   : > { %9519 = vmatmul.msk.bf16.gmra.mxu0 %vm2152_vm9, %v13862_v29  ;;  %18123 = vst [vmem:[#allocation20_spill] sm:$0xff] %v13883_v25  ;;  %4657 = vmatpush.bf16.msra.mxu1 %v4648_v13  ;;  %v18129_v25 = vld [vmem:[#allocation166_spill] sm:$0xff]  ;;  %v18133_v13 = vpack.c.bf16 %v18131_v45, %v18132_v0  ;;  %v18135_v29 = vld [vmem:[#allocation208_spill] sm:$0xff] }
 0x349   : > { %18125 = vst [vmem:[#allocation154_spill] sm:$0xff] %v13900_v50  ;;  %v13905_v56 = vpop.f32.mrf.mxu0  ;;  %5181 = vmatpush.bf16.msra.mxu3 %v5172_v33  ;;  %v3757_v58 = vadd.f32 %v18129_v25, %v3409_v46  ;;  %v2387_v50 = vadd.f32 %v18135_v29, %v18134_v51  ;;  %v18136_v33 = vld [vmem:[#allocation140_spill] sm:$0xff]  ;;  %v18139_v25 = vld [vmem:[#allocation27_spill] sm:$0xff]  ;;  %v4208_v0 = vld [vmem:[%s17057_s7 + $0x4] sm:$0x1] }
 0x34a   : > { %9483 = vmatmul.msk.bf16.gmra.mxu1 %vm2152_vm9, %v18124_v15  ;;  %v3348_v63 = vpop.f32.mrf.mxu3  ;;  %v3000_v23 = vpop.f32.mrf.mxu2  ;;  %v4362_v43 = vrot.slane %v18139_v25, 1  ;;  %v5458_v29 = vsel %vm2201_vm8, %v4208_v0, 0  ;;  %v18146_v0 = vld [vmem:[#allocation164_spill] sm:$0xff] }
 0x34b   : > { %v3062_v41 = vadd.f32 %v3000_v23, %v18127_v61  ;;  %v13920_v23 = vpop.permute.xlu2 %6717  ;;  %v18138_v61 = vld [vmem:[#allocation60_spill] sm:$0xff]  ;;  %5467 = vmatpush.bf16.msrb.mxu0 %v5458_v29 }
 0x34c   : > { %6917 = vrot.lane.b32.xlu2 %v18130_v30, %s10107_s19  ;;  %v3828_v7 = vpop.f32.mrf.mxu1  ;;  %18137 = vst [vmem:[#allocation144_spill] sm:$0xff] %v13920_v23  ;;  %v4361_v46 = vrot.slane %v18138_v61, 1  ;;  %v4365_v45 = vsel %vm1085_vm4, %v4362_v43, %v4364_v1  ;;  %v18142_v23 = vld [vmem:[#allocation139_spill] sm:$0xff]  ;;  %v18148_v29 = vld [vmem:[#allocation184_spill] sm:$0xff] }
 0x34d   : > { %v3410_v53 = vadd.f32 %v3348_v63, %v3062_v41  ;;  %v13931_v63 = vadd.f32 %v3823_v14, %v3757_v58  ;;  %v18141_v41 = vld [vmem:[#allocation209_spill] sm:$0xff]  ;;  %v7183_v60 = vrot.slane %v18142_v23, 4  ;;  %v13939_v62 = vpop.permute.xlu0 %6309  ;;  %v7181_v14 = vrot.slane %v12503_v37, 4  ;;  %v18149_v23 = vld [vmem:[#allocation195_spill] sm:$0xff] }
 0x34e   : > { %6919 = vrot.lane.b32.xlu1 %v18136_v33, %s10107_s19  ;;  %v7180_v33 = vrot.slane %v12498_v48, 4  ;;  %18143 = vst [vmem:[#allocation138_spill] sm:$0xff] %v13939_v62 }
 0x34f   : > { %7273 = vrot.lane.b32.xlu0 %v18133_v13, %s10107_s19  ;;  %v13924_v30 = vpop.permute.xlu1 %6509  ;;  %v2712_v13 = vadd.f32 %v18141_v41, %v2387_v50  ;;  %v3758_v58 = vadd.f32 %v13459_v32, %v3410_v53  ;;  %v18145_v50 = vld [vmem:[#allocation165_spill] sm:$0xff]  ;;  %v18150_v41 = vld [vmem:[#allocation188_spill] sm:$0xff] }
 0x350   : > { %18140 = vst [vmem:[#allocation141_spill] sm:$0xff] %v13924_v30  ;;  %v4363_v30 = vsel %vm1085_vm4, %v4361_v46, %v4362_v43  ;;  %v18147_v48 = vpack.c.bf16 %v18145_v50, %v18146_v0  ;;  %v18153_v32 = vld [vmem:[#allocation229_spill] sm:$0xff] }
 0x351   : > { %v13935_v25 = vpop.f32.mrf.mxu0  ;;  %v13941_v49 = vpack.c.bf16 %v4365_v45, %v4363_v30  ;;  %v7182_v30 = vsel %vm5295_vm7, %v7180_v33, %v7181_v14  ;;  %v7184_v45 = vsel %vm5295_vm7, %v7181_v14, %v7183_v60  ;;  %v18157_v33 = vld [vmem:[#allocation99_spill] sm:$0xff]  ;;  %v18158_v14 = vld [vmem:[#allocation242_spill] sm:$0xff] }
 0x352   : > { %v3350_v51 = vpop.f32.mrf.mxu3  ;;  %v3002_v61 = vpop.f32.mrf.mxu2  ;;  %v7232_v0 = vpack.c.bf16 %v7184_v45, %v7182_v30  ;;  %v4366_v60 = vrot.slane %v18157_v33, 1  ;;  %v18162_v45 = vld [vmem:[#allocation163_spill] sm:$0xff] }
 0x353   : > { %v3063_v1 = vadd.f32 %v3002_v61, %v2712_v13  ;;  %18144 = vst [vmem:[#allocation108_spill] sm:$0xff] %v13941_v49  ;;  %v18151_v13 = vpack.c.bf16 %v18149_v23, %v18150_v41  ;;  %v18160_v41 = vld [vmem:[#allocation214_spill] sm:$0xff] }
 0x354   : > { %7269 = vrot.lane.b32.xlu2 %v18147_v48, %s10107_s19  ;;  %v3831_v46 = vpop.f32.mrf.mxu1  ;;  %v13957_v37 = vpop.permute.xlu2 %6719  ;;  %v18155_v48 = vld [vmem:[#allocation213_spill] sm:$0xff] }
 0x355   : > { %v3411_v43 = vadd.f32 %v3350_v51, %v3063_v1  ;;  %18152 = vst [vmem:[#allocation95_spill] sm:$0xff] %v13957_v37  ;;  %v13970_v51 = vadd.f32 %v13871_v16, %v3758_v58  ;;  %v4367_v16 = vrot.slane %v18158_v14, 1  ;;  %v18159_v58 = vld [vmem:[#allocation12_spill] sm:$0xff]  ;;  %v13983_v62 = vpop.permute.xlu0 %6311  ;;  %v18167_v14 = vld [vmem:[#allocation35_spill] sm:$0xff] }
 0x356   : > { %7271 = vrot.lane.b32.xlu1 %v18151_v13, %s10107_s19  ;;  %9452 = vmatmul.msk.bf16.gmra.mxu3 %vm2152_vm9, %v18153_v32  ;;  %v2392_v13 = vadd.f32 %v18160_v41, %v18159_v58  ;;  %18161 = vst [vmem:[#allocation122_spill] sm:$0xff] %v13983_v62 }
 0x357   : > { %6927 = vrot.lane.b32.xlu0 %v18148_v29, %s10107_s19  ;;  %v13961_v53 = vpop.permute.xlu1 %6511  ;;  %9436 = vmatmul.msk.bf16.gmra.mxu2 %vm2152_vm9, %v18124_v15  ;;  %v3759_v23 = vadd.f32 %v13529_v19, %v3411_v43  ;;  %v18156_v15 = vld [vmem:[#allocation181_spill] sm:$0xff]  ;;  %v18163_v19 = vld [vmem:[#allocation38_spill] sm:$0xff] }
 0x358   : > { %9520 = vmatmul.msk.bf16.gmra.mxu0 %vm2152_vm9, %v13941_v49  ;;  %18154 = vst [vmem:[#allocation52_spill] sm:$0xff] %v13961_v53  ;;  %v4369_v43 = vrot.slane %v18163_v19, 1  ;;  %v2714_v58 = vadd.f32 %v18167_v14, %v2392_v13  ;;  %v18169_v53 = vld [vmem:[#allocation200_spill] sm:$0xff] }
 0x359   : > { %v13972_v50 = vpop.f32.mrf.mxu0  ;;  %v13994_v33 = vadd.f32 %v3828_v7, %v3759_v23  ;;  %v18195_v49 = vld [vmem:[#allocation24_spill] sm:$0xff] }
 0x35a   : > { %9484 = vmatmul.msk.bf16.gmra.mxu1 %vm2152_vm9, %v13441_v22  ;;  %v3353_v61 = vpop.f32.mrf.mxu3  ;;  %v3005_v1 = vpop.f32.mrf.mxu2 }
 0x35b   : > { %v3064_v29 = vadd.f32 %v3005_v1, %v18155_v48  ;;  %18166 = vst [vmem:[#allocation106_spill] sm:$0xff] %v13994_v33  ;;  %v18218_v33 = vld [vmem:[#allocation21_spill] sm:$0xff] }
 0x35c   : > { %6923 = vrot.lane.b32.xlu2 %v18156_v15, %s10107_s19  ;;  %v3833_v22 = vpop.f32.mrf.mxu1  ;;  %v13988_v1 = vpop.permute.xlu2 %6721  ;;  %v4370_v15 = vsel %vm1085_vm4, %v4367_v16, %v4369_v43  ;;  %v18179_v43 = vld [vmem:[#allocation211_spill] sm:$0xff] }
 0x35d   : > { %v3412_v30 = vadd.f32 %v3353_v61, %v3064_v29  ;;  %18164 = vst [vmem:[#allocation178_spill] sm:$0xff] %v13988_v1 }
 0x35e   : > { %6925 = vrot.lane.b32.xlu1 %v18162_v45, %s10107_s19 }
 0x35f   : > { %7279 = vrot.lane.b32.xlu0 %v7232_v0, %s10107_s19  ;;  %v13990_v48 = vpop.permute.xlu1 %6513  ;;  %v4368_v0 = vsel %vm1085_vm4, %v4366_v60, %v4367_v16  ;;  %v3760_v19 = vadd.f32 %v13597_v28, %v3412_v30  ;;  %v18172_v60 = vld [vmem:[#allocation204_spill] sm:$0xff]  ;;  %v18173_v16 = vld [vmem:[#allocation153_spill] sm:$0xff]  ;;  %v18176_v28 = vld [vmem:[#allocation206_spill] sm:$0xff] }
 0x360   : > { %18165 = vst [vmem:[#allocation120_spill] sm:$0xff] %v13990_v48  ;;  %v13999_v45 = vpack.c.bf16 %v4370_v15, %v4368_v0  ;;  %v18170_v48 = vld [vmem:[#allocation199_spill] sm:$0xff]  ;;  %v18174_v13 = vpack.c.bf16 %v18172_v60, %v18173_v16 }
 0x361   : > { %v13997_v61 = vpop.f32.mrf.mxu0  ;;  %v18171_v1 = vpack.c.bf16 %v18169_v53, %v18170_v48  ;;  %v14018_v53 = vpop.permute.xlu0 %6313  ;;  %v14025_v48 = vadd.f32 %v3831_v46, %v3760_v19  ;;  %v18186_v46 = vld [vmem:[#allocation216_spill] sm:$0xff] }
 0x362   : > { %v3355_v41 = vpop.f32.mrf.mxu3  ;;  %v3007_v62 = vpop.f32.mrf.mxu2  ;;  %18168 = vst [vmem:[#allocation158_spill] sm:$0xff] %v13999_v45 }
 0x363   : > { %v3065_v29 = vadd.f32 %v3007_v62, %v2714_v58  ;;  %18177 = vst [vmem:[#allocation126_spill] sm:$0xff] %v14018_v53  ;;  %v18181_v58 = vld [vmem:[#allocation47_spill] sm:$0xff] }
 0x364   : > { %7275 = vrot.lane.b32.xlu2 %v18171_v1, %s10107_s19  ;;  %v3836_v7 = vpop.f32.mrf.mxu1  ;;  %v14014_v62 = vpop.permute.xlu2 %6723  ;;  %v17369_v1 = vmov 0.0|0.0   ;;  %18180 = vst [vmem:[#allocation2_spill] sm:$0xff] %v14025_v48 }
 0x365   : > { %v3413_v23 = vadd.f32 %v3355_v41, %v3065_v29  ;;  %18175 = vst [vmem:[#allocation131_spill] sm:$0xff] %v14014_v62  ;;  %v18182_v29 = vld [vmem:[#allocation246_spill] sm:$0xff] }
 0x366   : > { %7277 = vrot.lane.b32.xlu1 %v18174_v13, %s10107_s19  ;;  %9501 = vmatmul.msk.bf16.vlgmr.msrb.gmra.mxu3 %vm2152_vm9, %v18176_v28  ;;  %v4374_v60 = vrot.slane %v18182_v29, 1  ;;  %v18183_v13 = vld [vmem:[#allocation192_spill] sm:$0xff]  ;;  %v18190_v29 = vld [vmem:[#allocation238_spill] sm:$0xff] }
 0x367   : > { %7583 = vrot.lane.b32.xlu0 %v18061_v57, %s10107_s19  ;;  %v14020_v30 = vpop.permute.xlu1 %6515  ;;  %9485 = vmatmul.msk.bf16.vlgmr.msrb.gmra.mxu2 %vm2152_vm9, %v18179_v43  ;;  %v3761_v16 = vadd.f32 %v13667_v8, %v3413_v23  ;;  %v18184_v28 = vld [vmem:[#allocation48_spill] sm:$0xff]  ;;  %v18189_v23 = vld [vmem:[#allocation239_spill] sm:$0xff] }
 0x368   : > { %9521 = vmatmul.msk.bf16.gmra.mxu0 %vm2152_vm9, %v13999_v45  ;;  %18178 = vst [vmem:[#allocation32_spill] sm:$0xff] %v14020_v30  ;;  %v18187_v30 = vmov 0.0|0.0  }
 0x369   : > { %v14027_v14 = vpop.f32.mrf.mxu0 }
 0x36a   : > { %4658 = vmatmul.bf16.vlgmr.msra.gmra.mxu1 %v17369_v1  ;;  %v3358_v0 = vpop.f32.mrf.mxu3  ;;  %v3010_v15 = vpop.f32.mrf.mxu2  ;;  %v18185_v1 = vld [vmem:[#allocation217_spill] sm:$0xff] }
 0x36b   : > { %v3066_v41 = vadd.f32 %v3010_v15, %v18181_v58  ;;  %v2397_v19 = vadd.f32 %v18186_v46, %v18185_v1  ;;  %v14043_v15 = vld [vmem:[%s17054_s4] ss:$0 sm:$0xff]  ;;  %v4371_v58 = vrot.slane %v18189_v23, 1  ;;  %v14052_v1 = vadd.f32 %v3833_v22, %v3761_v16  ;;  %v18197_v22 = vld [vmem:[#allocation212_spill] sm:$0xff] }
 0x36c   : > { %6929 = vrot.lane.b32.xlu2 %v18183_v13, %s10107_s19  ;;  %v3838_v43 = vpop.f32.mrf.mxu1  ;;  %v14045_v8 = vpop.permute.xlu2 %6725  ;;  %v4372_v13 = vrot.slane %v18190_v29, 1  ;;  %v1682_v57 = vadd.f32 %v14043_v15, %v18195_v49 }
 0x36d   : > { %v3414_v53 = vadd.f32 %v3358_v0, %v3066_v41  ;;  %18188 = vst [vmem:[#allocation228_spill] sm:$0xff] %v14045_v8  ;;  %v14054_v0 = vpop.permute.xlu0 %6315  ;;  %v18194_v41 = vld [vmem:[#allocation74_spill] sm:$0xff] }
 0x36e   : > { %7454 = vrot.lane.b32.xlu1 %v18187_v30, %s10107_s19  ;;  %v4375_v37 = vsel %vm1085_vm4, %v4372_v13, %v4374_v60  ;;  %18192 = vst [vmem:[#allocation124_spill] sm:$0xff] %v14052_v1  ;;  %v2716_v46 = vadd.f32 %v18194_v41, %v2397_v19  ;;  %v4373_v23 = vsel %vm1085_vm4, %v4371_v58, %v4372_v13  ;;  %v18198_v19 = vmov 0.0   ;;  %v18206_v13 = vld [vmem:[#allocation36_spill] sm:$0xff] }
 0x36f   : > { %7712 = vrot.lane.b32.xlu0 %v18184_v28, %s10107_s19  ;;  %v14049_v62 = vpop.permute.xlu1 %6517  ;;  %18193 = vst [vmem:[#allocation194_spill] sm:$0xff] %v14054_v0  ;;  %v14062_v48 = vpack.c.bf16 %v4375_v37, %v4373_v23  ;;  %v3762_v60 = vadd.f32 %v13709_v52, %v3414_v53  ;;  %v5296_v41 = vrot.slane %v18198_v19, 4  ;;  %v18199_v0 = vld [vmem:[#allocation89_spill] sm:$0xff]  ;;  %v18203_v53 = vld [vmem:[#allocation215_spill] sm:$0xff] }
 0x370   : > { %18191 = vst [vmem:[#allocation166_spill] sm:$0xff] %v14049_v62  ;;  %v18210_v62 = vld [vmem:[#allocation236_spill] sm:$0xff] }
 0x371   : > { %v14059_v8 = vpop.f32.mrf.mxu0  ;;  %18196 = vst [vmem:[#allocation187_spill] sm:$0xff] %v14062_v48 }
 0x372   : > { %v3360_v45 = vpop.f32.mrf.mxu3  ;;  %v3012_v28 = vpop.f32.mrf.mxu2 }
 0x373   : > { %v3067_v29 = vadd.f32 %v3012_v28, %v2716_v46  ;;  %v18201_v28 = vld [vmem:[#allocation9_spill] sm:$0xff]  ;;  %v1690_v46 = vadd.f32 %v14043_v15, %v18206_v13  ;;  %v18212_v13 = vld [vmem:[#allocation118_spill] sm:$0xff] }
 0x374   : > { %6931 = vrot.lane.b32.xlu2 %v18197_v22, %s10107_s19  ;;  %v3841_v16 = vpop.f32.mrf.mxu1  ;;  %v18207_v22 = vld [vmem:[#allocation29_spill] sm:$0xff] }
 0x375   : > { %v3415_v49 = vadd.f32 %v3360_v45, %v3067_v29  ;;  %v14073_v37 = vpop.permute.xlu2 %6727  ;;  %v14084_v45 = vadd.f32 %v3836_v7, %v3762_v60  ;;  %v1685_v19 = vadd.f32 %v14043_v15, %v18207_v22  ;;  %v18211_v60 = vld [vmem:[#allocation116_spill] sm:$0xff] }
 0x376   : > { %7841 = vrot.lane.b32.xlu1 %v18199_v0, %s10107_s19  ;;  %18200 = vst [vmem:[#allocation207_spill] sm:$0xff] %v14073_v37  ;;  %9502 = vmatmul.msk.bf16.gmra.mxu3 %vm2152_vm9, %v18201_v28  ;;  %v14092_v28 = vpop.permute.xlu0 %6317  ;;  %v4379_v37 = vrot.slane %v18210_v62, 1 }
 0x377   : > { %9046 = vrot.lane.b32.xlu0 %v1682_v57, %s10109_s20  ;;  %v14077_v52 = vpop.permute.xlu1 %6519  ;;  %9486 = vmatmul.msk.bf16.gmra.mxu2 %vm2152_vm9, %v18203_v53  ;;  %v14082_v57 = vpack.c.bf16 %v5296_v41, %v5296_v41  ;;  %18205 = vst [vmem:[#allocation60_spill] sm:$0xff] %v14084_v45  ;;  %v3763_v41 = vadd.f32 %v13779_v6, %v3415_v49 }
 0x378   : > { %9522 = vmatmul.msk.bf16.gmra.mxu0 %vm2152_vm9, %v14062_v48  ;;  %18202 = vst [vmem:[#allocation208_spill] sm:$0xff] %v14077_v52  ;;  %v18209_v52 = vld [vmem:[#allocation91_spill] sm:$0xff]  ;;  %v2402_v48 = vadd.f32 %v18212_v13, %v18211_v60 }
 0x379   : > { %18204 = vst [vmem:[#allocation140_spill] sm:$0xff] %v14082_v57  ;;  %v14088_v29 = vpop.f32.mrf.mxu0  ;;  %v14110_v49 = vadd.f32 %v3838_v43, %v3763_v41 }
 0x37a   : > { %4663 = vmatmul.bf16.gmra.mxu1 %v18187_v30  ;;  %v3363_v58 = vpop.f32.mrf.mxu3  ;;  %v3015_v23 = vpop.f32.mrf.mxu2  ;;  %18208 = vst [vmem:[#allocation27_spill] sm:$0xff] %v14092_v28  ;;  %v18214_v28 = vld [vmem:[#allocation237_spill] sm:$0xff] }
 0x37b   : > { %v3068_v53 = vadd.f32 %v3015_v23, %v18209_v52  ;;  %v4376_v52 = vrot.slane %v18214_v28, 1  ;;  %v18215_v23 = vld [vmem:[#allocation234_spill] sm:$0xff] }
 0x37c   : > { %7971 = vrot.lane.b32.xlu2 %v14082_v57, %s10107_s19  ;;  %v3843_v7 = vpop.f32.mrf.mxu1  ;;  %v4377_v62 = vrot.slane %v18215_v23, 1  ;;  %v18220_v23 = vld [vmem:[#allocation39_spill] sm:$0xff] }
 0x37d   : > { %v3416_v45 = vadd.f32 %v3363_v58, %v3068_v53  ;;  %v14103_v22 = vpop.permute.xlu2 %7251  ;;  %v1680_v58 = vadd.f32 %v14043_v15, %v18218_v33  ;;  %v18219_v53 = vld [vmem:[#allocation46_spill] sm:$0xff] }
 0x37e   : > { %9048 = vrot.lane.b32.xlu1 %v1685_v19, %s10109_s20  ;;  %18213 = vst [vmem:[#allocation209_spill] sm:$0xff] %v14103_v22  ;;  %v4380_v6 = vsel %vm1085_vm4, %v4377_v62, %v4379_v37  ;;  %v1697_v19 = vadd.f32 %v14043_v15, %v18219_v53  ;;  %v4378_v28 = vsel %vm1085_vm4, %v4376_v52, %v4377_v62  ;;  %v14127_v41 = vpop.permute.xlu0 %6319  ;;  %v18225_v62 = vld [vmem:[#allocation64_spill] sm:$0xff]  ;;  %v18230_v53 = vld [vmem:[#allocation3_spill] sm:$0xff] }
 0x37f   : > { %9052 = vrot.lane.b32.xlu0 %v1690_v46, %s10109_s20  ;;  %v14107_v30 = vpop.permute.xlu1 %6521  ;;  %v18217_v46 = vld [vmem:[#allocation218_spill] sm:$0xff]  ;;  %v1692_v22 = vadd.f32 %v14043_v15, %v18220_v23  ;;  %v14122_v43 = vpack.c.bf16 %v4380_v6, %v4378_v28  ;;  %18222 = vst [vmem:[#allocation164_spill] sm:$0xff] %v14127_v41  ;;  %v18233_v41 = vld [vmem:[#allocation125_spill] sm:$0xff] }
 0x380   : > { %18216 = vst [vmem:[#allocation139_spill] sm:$0xff] %v14107_v30  ;;  %v2718_v0 = vadd.f32 %v18217_v46, %v2402_v48  ;;  %v3764_v48 = vadd.f32 %v13803_v24, %v3416_v45  ;;  %v18226_v24 = vld [vmem:[#allocation231_spill] sm:$0xff]  ;;  %v18231_v23 = vld [vmem:[#allocation50_spill] sm:$0xff] }
 0x381   : > { %v14117_v13 = vpop.f32.mrf.mxu0  ;;  %18221 = vst [vmem:[#allocation165_spill] sm:$0xff] %v14122_v43 }
 0x382   : > { %v3365_v1 = vpop.f32.mrf.mxu3  ;;  %v3017_v60 = vpop.f32.mrf.mxu2  ;;  %v14140_v45 = vadd.f32 %v3841_v16, %v3764_v48 }
 0x383   : > { %v3069_v37 = vadd.f32 %v3017_v60, %v2718_v0  ;;  %v18224_v0 = vld [vmem:[#allocation25_spill] sm:$0xff] }
 0x384   : > { %9044 = vrot.lane.b32.xlu2 %v1680_v58, %s10109_s20  ;;  %v3846_v33 = vpop.f32.mrf.mxu1  ;;  %18227 = vst [vmem:[#allocation195_spill] sm:$0xff] %v14140_v45 }
 0x385   : > { %v3417_v46 = vadd.f32 %v3365_v1, %v3069_v37  ;;  %v14132_v52 = vpop.permute.xlu2 %6905  ;;  %v1700_v37 = vadd.f32 %v14043_v15, %v18231_v23 }
 0x386   : > { %9054 = vrot.lane.b32.xlu1 %v1692_v22, %s10109_s20  ;;  %18223 = vst [vmem:[#allocation184_spill] sm:$0xff] %v14132_v52  ;;  %9503 = vmatmul.msk.bf16.gmra.mxu3 %vm2152_vm9, %v18224_v0  ;;  %v18229_v22 = vld [vmem:[#allocation33_spill] sm:$0xff]  ;;  %v18232_v0 = vld [vmem:[#allocation224_spill] sm:$0xff]  ;;  %v18235_v52 = vld [vmem:[#allocation235_spill] sm:$0xff]  ;;  %v14162_v23 = vpop.permute.xlu0 %7249 }
 0x387   : > { %9058 = vrot.lane.b32.xlu0 %v1697_v19, %s10109_s20  ;;  %9487 = vmatmul.msk.bf16.gmra.mxu2 %vm2152_vm9, %v18225_v62  ;;  %v14142_v6 = vpop.permute.xlu1 %6523  ;;  %v1687_v58 = vadd.f32 %v14043_v15, %v18229_v22  ;;  %v1705_v19 = vadd.f32 %v14043_v15, %v18230_v53  ;;  %v3765_v16 = vadd.f32 %v13832_v10, %v3417_v46  ;;  %v4381_v22 = vrot.slane %v18233_v41, 1 }
 0x388   : > { %9523 = vmatmul.msk.bf16.gmra.mxu0 %vm2152_vm9, %v14122_v43  ;;  %18228 = vst [vmem:[#allocation188_spill] sm:$0xff] %v14142_v6  ;;  %v18234_v6 = vld [vmem:[#allocation254_spill] sm:$0xff]  ;;  %v4384_v43 = vrot.slane %v18235_v52, 1  ;;  %v18240_v52 = vld [vmem:[#allocation69_spill] sm:$0xff] }
 0x389   : > { %v14148_v28 = vpop.f32.mrf.mxu0  ;;  %v4382_v30 = vrot.slane %v18234_v6, 1  ;;  %18237 = vst [vmem:[#allocation213_spill] sm:$0xff] %v14162_v23  ;;  %v18239_v6 = vld [vmem:[#allocation75_spill] sm:$0xff] }
 0x38a   : > { %9533 = vmatmul.msk.bf16.gmra.mxu1 %vm2152_vm9, %v18226_v24  ;;  %v3368_v1 = vpop.f32.mrf.mxu3  ;;  %v3020_v60 = vpop.f32.mrf.mxu2 }
 0x38b   : > { %v3070_v62 = vadd.f32 %v3020_v60, %v18232_v0  ;;  %v4383_v10 = vsel %vm1085_vm4, %v4381_v22, %v4382_v30  ;;  %v4385_v46 = vsel %vm1085_vm4, %v4382_v30, %v4384_v43  ;;  %v18238_v60 = vld [vmem:[#allocation43_spill] sm:$0xff]  ;;  %v18242_v22 = vld [vmem:[#allocation226_spill] sm:$0xff] }
 0x38c   : > { %9050 = vrot.lane.b32.xlu2 %v1687_v58, %s10109_s20  ;;  %v3848_v48 = vpop.f32.mrf.mxu1  ;;  %v14166_v58 = vadd.f32 %v3843_v7, %v3765_v16  ;;  %v1695_v41 = vadd.f32 %v14043_v15, %v18238_v60  ;;  %v14179_v30 = vpack.c.bf16 %v4385_v46, %v4383_v10  ;;  %v18244_v60 = vld [vmem:[#allocation45_spill] sm:$0xff]  ;;  %v18246_v10 = vld [vmem:[#allocation88_spill] sm:$0xff] }
 0x38d   : > { %v3418_v53 = vadd.f32 %v3368_v1, %v3070_v62  ;;  %v1712_v1 = vadd.f32 %v14043_v15, %v18239_v6  ;;  %v1707_v62 = vadd.f32 %v14043_v15, %v18240_v52 }
 0x38e   : > { %9060 = vrot.lane.b32.xlu1 %v1700_v37, %s10109_s20  ;;  %v14160_v45 = vpop.permute.xlu2 %7257  ;;  %18243 = vst [vmem:[#allocation99_spill] sm:$0xff] %v14179_v30  ;;  %v14197_v46 = vpop.permute.xlu0 %6903 }
 0x38f   : > { %9064 = vrot.lane.b32.xlu0 %v1705_v19, %s10109_s20  ;;  %18236 = vst [vmem:[#allocation229_spill] sm:$0xff] %v14160_v45  ;;  %v14176_v45 = vpop.permute.xlu1 %6901  ;;  %v3766_v7 = vadd.f32 %v13859_v12, %v3418_v53  ;;  %v18247_v12 = vld [vmem:[#allocation232_spill] sm:$0xff] }
 0x390   : > { %18241 = vst [vmem:[#allocation181_spill] sm:$0xff] %v14176_v45  ;;  %v18254_v45 = vld [vmem:[#allocation257_spill] sm:$0xff] }
 0x391   : > { %v14172_v0 = vpop.f32.mrf.mxu0  ;;  %v14195_v53 = vadd.f32 %v3846_v33, %v3766_v7  ;;  %18249 = vst [vmem:[#allocation214_spill] sm:$0xff] %v14197_v46  ;;  %v4389_v33 = vrot.slane %v18254_v45, 1 }
 0x392   : > { %v3370_v19 = vpop.f32.mrf.mxu3  ;;  %v3022_v37 = vpop.f32.mrf.mxu2 }
 0x393   : > { %v3071_v23 = vadd.f32 %v3022_v37, %v18242_v22  ;;  %18248 = vst [vmem:[#allocation12_spill] sm:$0xff] %v14195_v53  ;;  %v18252_v22 = vld [vmem:[#allocation82_spill] sm:$0xff] }
 0x394   : > { %9056 = vrot.lane.b32.xlu2 %v1695_v41, %s10109_s20 }
 0x395   : > { %v3419_v16 = vadd.f32 %v3370_v19, %v3071_v23  ;;  %v18250_v19 = vld [vmem:[#allocation61_spill] sm:$0xff] }
 0x396   : > { %9066 = vrot.lane.b32.xlu1 %v1707_v62, %s10109_s20  ;;  %9504 = vmatmul.msk.bf16.gmra.mxu3 %vm2152_vm9, %v18244_v60  ;;  %v14189_v6 = vpop.permute.xlu2 %6911  ;;  %v1702_v41 = vadd.f32 %v14043_v15, %v18250_v19  ;;  %v1715_v60 = vadd.f32 %v14043_v15, %v18252_v22 }
 0x397   : > { %9070 = vrot.lane.b32.xlu0 %v1712_v1, %s10109_s20  ;;  %v3851_v43 = vpop.f32.mrf.mxu1  ;;  %18245 = vst [vmem:[#allocation242_spill] sm:$0xff] %v14189_v6  ;;  %9488 = vmatmul.msk.bf16.gmra.mxu2 %vm2152_vm9, %v18246_v10  ;;  %v18251_v1 = vld [vmem:[#allocation90_spill] sm:$0xff]  ;;  %v3767_v7 = vadd.f32 %v13905_v56, %v3419_v16  ;;  %v18260_v16 = vld [vmem:[#allocation73_spill] sm:$0xff] }
 0x398   : > { %9524 = vmatmul.msk.bf16.gmra.mxu0 %vm2152_vm9, %v14179_v30  ;;  %v1720_v37 = vadd.f32 %v14043_v15, %v18251_v1  ;;  %v18253_v10 = vld [vmem:[#allocation14_spill] sm:$0xff]  ;;  %v14212_v19 = vpop.permute.xlu1 %7253  ;;  %v18256_v30 = vld [vmem:[#allocation251_spill] sm:$0xff] }
 0x399   : > { %v14203_v62 = vpop.f32.mrf.mxu0  ;;  %18255 = vst [vmem:[#allocation163_spill] sm:$0xff] %v14212_v19  ;;  %v4386_v53 = vrot.slane %v18256_v30, 1 }
 0x39a   : > { %9534 = vmatmul.msk.bf16.gmra.mxu1 %vm2152_vm9, %v18247_v12  ;;  %v3373_v23 = vpop.f32.mrf.mxu3  ;;  %v3025_v52 = vpop.f32.mrf.mxu2  ;;  %v18257_v12 = vld [vmem:[#allocation250_spill] sm:$0xff] }
 0x39b   : > { %v3072_v6 = vadd.f32 %v3025_v52, %v18253_v10  ;;  %v4387_v22 = vrot.slane %v18257_v12, 1  ;;  %v14218_v10 = vadd.f32 %v3848_v48, %v3767_v7  ;;  %v18264_v48 = vld [vmem:[#allocation42_spill] sm:$0xff] }
 0x39c   : > { %9062 = vrot.lane.b32.xlu2 %v1702_v41, %s10109_s20  ;;  %v1710_v41 = vadd.f32 %v14043_v15, %v18260_v16 }
 0x39d   : > { %v3420_v1 = vadd.f32 %v3373_v23, %v3072_v6  ;;  %v4390_v52 = vsel %vm1085_vm4, %v4387_v22, %v4389_v33  ;;  %18258 = vst [vmem:[#allocation38_spill] sm:$0xff] %v14218_v10  ;;  %v4388_v30 = vsel %vm1085_vm4, %v4386_v53, %v4387_v22  ;;  %v14231_v33 = vpop.permute.xlu0 %7255  ;;  %v18266_v53 = vld [vmem:[#allocation22_spill] sm:$0xff] }
 0x39e   : > { %9072 = vrot.lane.b32.xlu1 %v1715_v60, %s10109_s20  ;;  %v14220_v45 = vpop.permute.xlu2 %7263  ;;  %v18262_v60 = vld [vmem:[#allocation93_spill] sm:$0xff]  ;;  %18263 = vst [vmem:[#allocation200_spill] sm:$0xff] %v14231_v33 }
 0x39f   : > { %v3853_v46 = vpop.f32.mrf.mxu1  ;;  %9076 = vrot.lane.b32.xlu0 %v1720_v37, %s10109_s20  ;;  %18259 = vst [vmem:[#allocation35_spill] sm:$0xff] %v14220_v45  ;;  %v18261_v37 = vld [vmem:[#allocation104_spill] sm:$0xff]  ;;  %v1722_v12 = vadd.f32 %v14043_v15, %v18262_v60  ;;  %v14234_v45 = vpack.c.bf16 %v4390_v52, %v4388_v30  ;;  %v3768_v10 = vadd.f32 %v13935_v25, %v3420_v1  ;;  %v18268_v52 = vld [vmem:[#allocation105_spill] sm:$0xff]  ;;  %v18269_v25 = vld [vmem:[#allocation247_spill] sm:$0xff] }
 0x3a0   : > { %v1727_v19 = vadd.f32 %v14043_v15, %v18261_v37  ;;  %v14244_v22 = vpop.permute.xlu1 %6907 }
 0x3a1   : > { %18265 = vst [vmem:[#allocation199_spill] sm:$0xff] %v14234_v45  ;;  %v14250_v1 = vadd.f32 %v3851_v43, %v3768_v10 }
 0x3a2   : > { %v3375_v56 = vpop.f32.mrf.mxu3  ;;  %v3027_v6 = vpop.f32.mrf.mxu2  ;;  %18267 = vst [vmem:[#allocation204_spill] sm:$0xff] %v14244_v22  ;;  %v18275_v22 = vld [vmem:[#allocation115_spill] sm:$0xff] }
 0x3a3   : > { %v3073_v7 = vadd.f32 %v3027_v6, %v18264_v48  ;;  %v18271_v6 = vld [vmem:[#allocation117_spill] sm:$0xff]  ;;  %v18272_v48 = vld [vmem:[#allocation110_spill] sm:$0xff]  ;;  %v4394_v43 = vrot.slane %v18275_v22, 1 }
 0x3a4   : > { %9068 = vrot.lane.b32.xlu2 %v1710_v41, %s10109_s20  ;;  %v1735_v30 = vadd.f32 %v14043_v15, %v18271_v6 }
 0x3a5   : > { %v14226_v23 = vpop.f32.mrf.mxu0  ;;  %v3421_v37 = vadd.f32 %v3375_v56, %v3073_v7  ;;  %v18270_v56 = vld [vmem:[#allocation86_spill] sm:$0xff]  ;;  %v1730_v7 = vadd.f32 %v14043_v15, %v18272_v48  ;;  %v14267_v6 = vpop.permute.xlu0 %6909  ;;  %v4391_v48 = vrot.slane %v13092_v3, 1 }
 0x3a6   : > { %9078 = vrot.lane.b32.xlu1 %v1722_v12, %s10109_s20  ;;  %9505 = vmatmul.msk.bf16.gmra.mxu3 %vm2152_vm9, %v18266_v53  ;;  %v1717_v41 = vadd.f32 %v14043_v15, %v18270_v56  ;;  %v14260_v53 = vpop.permute.xlu2 %6917  ;;  %18276 = vst [vmem:[#allocation206_spill] sm:$0xff] %v14267_v6 }
 0x3a7   : > { %v3856_v16 = vpop.f32.mrf.mxu1  ;;  %9082 = vrot.lane.b32.xlu0 %v1727_v19, %s10109_s20  ;;  %9489 = vmatmul.msk.bf16.gmra.mxu2 %vm2152_vm9, %v18268_v52  ;;  %18273 = vst [vmem:[#allocation153_spill] sm:$0xff] %v14260_v53  ;;  %v18274_v52 = vld [vmem:[#allocation72_spill] sm:$0xff]  ;;  %v3769_v10 = vadd.f32 %v13972_v50, %v3421_v37  ;;  %v4392_v53 = vrot.slane %v13082_v27, 1  ;;  %v18279_v37 = vld [vmem:[#allocation102_spill] sm:$0xff] }
 0x3a8   : > { %9525 = vmatmul.msk.bf16.gmra.mxu0 %vm2152_vm9, %v14234_v45  ;;  %v14275_v22 = vpop.permute.xlu1 %7259 }
 0x3a9   : > { %18278 = vst [vmem:[#allocation47_spill] sm:$0xff] %v14275_v22  ;;  %v4393_v3 = vsel %vm1085_vm4, %v4391_v48, %v4392_v53 }
 0x3aa   : > { %9535 = vmatmul.msk.bf16.gmra.mxu1 %vm2152_vm9, %v18269_v25  ;;  %v3378_v19 = vpop.f32.mrf.mxu3  ;;  %v3030_v60 = vpop.f32.mrf.mxu2 }
 0x3ab   : > { %v3074_v33 = vadd.f32 %v3030_v60, %v18274_v52  ;;  %v4395_v60 = vsel %vm1085_vm4, %v4392_v53, %v4394_v43  ;;  %v14273_v52 = vadd.f32 %v3853_v46, %v3769_v10  ;;  %v18282_v43 = vld [vmem:[#allocation85_spill] sm:$0xff] }
 0x3ac   : > { %9074 = vrot.lane.b32.xlu2 %v1717_v41, %s10109_s20  ;;  %v1725_v41 = vadd.f32 %v14043_v15, %v18279_v37  ;;  %v14287_v10 = vpack.c.bf16 %v4395_v60, %v4393_v3  ;;  %v18285_v53 = vld [vmem:[#allocation37_spill] sm:$0xff]  ;;  %v18287_v60 = vld [vmem:[#allocation132_spill] sm:$0xff] }
 0x3ad   : > { %v14256_v12 = vpop.f32.mrf.mxu0  ;;  %v3422_v45 = vadd.f32 %v3378_v19, %v3074_v33  ;;  %18277 = vst [vmem:[#allocation211_spill] sm:$0xff] %v14273_v52  ;;  %v14299_v48 = vpop.permute.xlu0 %7261 }
 0x3ae   : > { %9084 = vrot.lane.b32.xlu1 %v1730_v7, %s10109_s20  ;;  %v18281_v7 = vld [vmem:[#allocation121_spill] sm:$0xff]  ;;  %18283 = vst [vmem:[#allocation246_spill] sm:$0xff] %v14287_v10 }
 0x3af   : > { %v3858_v56 = vpop.f32.mrf.mxu1  ;;  %9088 = vrot.lane.b32.xlu0 %v1735_v30, %s10109_s20  ;;  %v18280_v30 = vld [vmem:[#allocation135_spill] sm:$0xff]  ;;  %v1737_v27 = vadd.f32 %v14043_v15, %v18281_v7  ;;  %v3770_v22 = vadd.f32 %v13997_v61, %v3422_v45  ;;  %18286 = vst [vmem:[#allocation217_spill] sm:$0xff] %v14299_v48  ;;  %v18288_v61 = vld [vmem:[#allocation240_spill] sm:$0xff] }
 0x3b0   : > { %v1742_v6 = vadd.f32 %v14043_v15, %v18280_v30  ;;  %v14292_v30 = vpop.permute.xlu2 %7269 }
 0x3b1   : > { %18284 = vst [vmem:[#allocation192_spill] sm:$0xff] %v14292_v30  ;;  %v14305_v45 = vadd.f32 %v3856_v16, %v3770_v22 }
 0x3b2   : > { %v3380_v50 = vpop.f32.mrf.mxu3  ;;  %v3032_v33 = vpop.f32.mrf.mxu2 }
 0x3b3   : > { %v3075_v46 = vadd.f32 %v3032_v33, %v18282_v43  ;;  %v18290_v33 = vld [vmem:[#allocation149_spill] sm:$0xff]  ;;  %v18291_v43 = vld [vmem:[#allocation142_spill] sm:$0xff] }
 0x3b4   : > { %9080 = vrot.lane.b32.xlu2 %v1725_v41, %s10109_s20  ;;  %v1750_v3 = vadd.f32 %v14043_v15, %v18290_v33  ;;  %v4397_v33 = vrot.slane %v13219_v2, 1 }
 0x3b5   : > { %v14281_v19 = vpop.f32.mrf.mxu0  ;;  %v3423_v52 = vadd.f32 %v3380_v50, %v3075_v46  ;;  %v18289_v50 = vld [vmem:[#allocation113_spill] sm:$0xff]  ;;  %v1745_v46 = vadd.f32 %v14043_v15, %v18291_v43  ;;  %v4399_v43 = vrot.slane %v13084_v39, 1 }
 0x3b6   : > { %9090 = vrot.lane.b32.xlu1 %v1737_v27, %s10109_s20  ;;  %9506 = vmatmul.msk.bf16.gmra.mxu3 %vm2152_vm9, %v18285_v53  ;;  %v1732_v41 = vadd.f32 %v14043_v15, %v18289_v50  ;;  %v14315_v53 = vpop.permute.xlu1 %6913  ;;  %v4396_v50 = vrot.slane %v13221_v21, 1 }
 0x3b7   : > { %v3861_v37 = vpop.f32.mrf.mxu1  ;;  %9094 = vrot.lane.b32.xlu0 %v1742_v6, %s10109_s20  ;;  %9490 = vmatmul.msk.bf16.gmra.mxu2 %vm2152_vm9, %v18287_v60  ;;  %18292 = vst [vmem:[#allocation216_spill] sm:$0xff] %v14315_v53  ;;  %v18293_v60 = vld [vmem:[#allocation101_spill] sm:$0xff]  ;;  %v3771_v16 = vadd.f32 %v14027_v14, %v3423_v52  ;;  %v4400_v14 = vsel %vm1085_vm4, %v4397_v33, %v4399_v43  ;;  %v18301_v43 = vld [vmem:[#allocation150_spill] sm:$0xff]  ;;  %v4402_v53 = vrot.slane %v13197_v20, 1 }
 0x3b8   : > { %9526 = vmatmul.msk.bf16.gmra.mxu0 %vm2152_vm9, %v14287_v10  ;;  %v14325_v10 = vpop.permute.xlu2 %6923 }
 0x3b9   : > { %18294 = vst [vmem:[#allocation239_spill] sm:$0xff] %v14325_v10  ;;  %v14329_v52 = vadd.f32 %v3858_v56, %v3771_v16  ;;  %v18300_v16 = vld [vmem:[#allocation63_spill] sm:$0xff] }
 0x3ba   : > { %9536 = vmatmul.msk.bf16.gmra.mxu1 %vm2152_vm9, %v18288_v61  ;;  %v3383_v6 = vpop.f32.mrf.mxu3  ;;  %v3035_v7 = vpop.f32.mrf.mxu2 }
 0x3bb   : > { %v3076_v30 = vadd.f32 %v3035_v7, %v18293_v60  ;;  %v4398_v7 = vsel %vm1085_vm4, %v4396_v50, %v4397_v33  ;;  %v18296_v60 = vld [vmem:[#allocation130_spill] sm:$0xff] }
 0x3bc   : > { %9086 = vrot.lane.b32.xlu2 %v1732_v41, %s10109_s20  ;;  %v14331_v41 = vpop.permute.xlu0 %6915  ;;  %v1740_v21 = vadd.f32 %v14043_v15, %v18296_v60  ;;  %v14338_v39 = vpack.c.bf16 %v4400_v14, %v4398_v7  ;;  %v18302_v60 = vld [vmem:[#allocation241_spill] sm:$0xff] }
 0x3bd   : > { %v14311_v27 = vpop.f32.mrf.mxu0  ;;  %v3424_v48 = vadd.f32 %v3383_v6, %v3076_v30  ;;  %18295 = vst [vmem:[#allocation238_spill] sm:$0xff] %v14331_v41  ;;  %v18297_v6 = vld [vmem:[#allocation112_spill] sm:$0xff] }
 0x3be   : > { %9096 = vrot.lane.b32.xlu1 %v1745_v46, %s10109_s20  ;;  %18298 = vst [vmem:[#allocation74_spill] sm:$0xff] %v14338_v39  ;;  %v14341_v10 = vpop.permute.xlu1 %7265 }
 0x3bf   : > { %v3863_v22 = vpop.f32.mrf.mxu1  ;;  %9100 = vrot.lane.b32.xlu0 %v1750_v3, %s10109_s20  ;;  %18299 = vst [vmem:[#allocation24_spill] sm:$0xff] %v14341_v10  ;;  %v3772_v33 = vadd.f32 %v14059_v8, %v3424_v48  ;;  %v4404_v48 = vrot.slane %v13253_v26, 1 }
 0x3c0   : > { %v14352_v7 = vpop.permute.xlu2 %7275 }
 0x3c1   : > { %18303 = vst [vmem:[#allocation212_spill] sm:$0xff] %v14352_v7  ;;  %v14361_v8 = vadd.f32 %v3861_v37, %v3772_v33  ;;  %v4401_v7 = vrot.slane %v13199_v9, 1 }
 0x3c2   : > { %v3385_v3 = vpop.f32.mrf.mxu3  ;;  %v3037_v2 = vpop.f32.mrf.mxu2 }
 0x3c3   : > { %v3077_v46 = vadd.f32 %v3037_v2, %v18297_v6  ;;  %v4403_v26 = vsel %vm1085_vm4, %v4401_v7, %v4402_v53 }
 0x3c4   : > { %9092 = vrot.lane.b32.xlu2 %v1740_v21, %s10109_s20  ;;  %v18304_v21 = vld [vmem:[#allocation146_spill] sm:$0xff] }
 0x3c5   : > { %v14335_v30 = vpop.f32.mrf.mxu0  ;;  %v3425_v56 = vadd.f32 %v3385_v3, %v3077_v46  ;;  %v1747_v3 = vadd.f32 %v14043_v15, %v18304_v21  ;;  %v14358_v46 = vpop.permute.xlu0 %7267 }
 0x3c6   : > { %9507 = vmatmul.msk.bf16.gmra.mxu3 %vm2152_vm9, %v18300_v16  ;;  %18305 = vst [vmem:[#allocation9_spill] sm:$0xff] %v14358_v46  ;;  %v18306_v16 = vld [vmem:[#allocation129_spill] sm:$0xff]  ;;  %v14367_v15 = vpop.permute.xlu1 %6919  ;;  %v4405_v46 = vsel %vm1085_vm4, %v4402_v53, %v4404_v48  ;;  %v18313_v48 = vld [vmem:[#allocation219_spill] sm:$0xff]  ;;  %v18314_v53 = vld [vmem:[#allocation258_spill] sm:$0xff] }
 0x3c7   : > { %v3866_v50 = vpop.f32.mrf.mxu1  ;;  %9491 = vmatmul.msk.bf16.gmra.mxu2 %vm2152_vm9, %v18301_v43  ;;  %18307 = vst [vmem:[#allocation215_spill] sm:$0xff] %v14367_v15  ;;  %v3773_v21 = vadd.f32 %v14088_v29, %v3425_v56  ;;  %v18312_v56 = vld [vmem:[#allocation76_spill] sm:$0xff] }
 0x3c8   : > { %9527 = vmatmul.msk.bf16.gmra.mxu0 %vm2152_vm9, %v14338_v39  ;;  %v14374_v33 = vpop.permute.xlu2 %6929 }
 0x3c9   : > { %18308 = vst [vmem:[#allocation36_spill] sm:$0xff] %v14374_v33  ;;  %v14379_v9 = vadd.f32 %v3863_v22, %v3773_v21  ;;  %v4406_v33 = vrot.slane %v13195_v17, 1 }
 0x3ca   : > { %9537 = vmatmul.msk.bf16.gmra.mxu1 %vm2152_vm9, %v18302_v60  ;;  %v3388_v14 = vpop.f32.mrf.mxu3  ;;  %v3040_v2 = vpop.f32.mrf.mxu2 }
 0x3cb   : > { %v3078_v10 = vadd.f32 %v3040_v2, %v18306_v16 }
 0x3cc   : > { %9098 = vrot.lane.b32.xlu2 %v1747_v3, %s10109_s20  ;;  %v18309_v3 = vld [vmem:[#allocation145_spill] sm:$0xff] }
 0x3cd   : > { %v14356_v6 = vpop.f32.mrf.mxu0  ;;  %v3426_v41 = vadd.f32 %v3388_v14, %v3078_v10  ;;  %v14377_v14 = vpack.c.bf16 %v4405_v46, %v4403_v26  ;;  %v14381_v16 = vpop.permute.xlu0 %6921  ;;  %v4409_v26 = vrot.slane %v13189_v38, 1 }
 0x3ce   : > { %18311 = vst [vmem:[#allocation91_spill] sm:$0xff] %v14381_v16  ;;  %v14391_v7 = vpop.permute.xlu1 %7271  ;;  %v4407_v16 = vrot.slane %v13185_v5, 1 }
 0x3cf   : > { %v3868_v43 = vpop.f32.mrf.mxu1  ;;  %18310 = vst [vmem:[#allocation29_spill] sm:$0xff] %v14377_v14 }
 0x3d0   : > { %18315 = vst [vmem:[#allocation236_spill] sm:$0xff] %v14391_v7  ;;  %v4410_v15 = vsel %vm1085_vm4, %v4407_v16, %v4409_v26  ;;  %v4408_v38 = vsel %vm1085_vm4, %v4406_v33, %v4407_v16  ;;  %v18324_v33 = vld [vmem:[#allocation220_spill] sm:$0xff] }
 0x3d2   : > { %v3390_v39 = vpop.f32.mrf.mxu3  ;;  %v3042_v2 = vpop.f32.mrf.mxu2 }
 0x3d3   : > { %v3079_v10 = vadd.f32 %v3042_v2, %v18309_v3  ;;  %v18316_v2 = vld [vmem:[#allocation171_spill] sm:$0xff] }
 0x3d5   : > { %v14371_v37 = vpop.f32.mrf.mxu0  ;;  %v3427_v29 = vadd.f32 %v3390_v39, %v3079_v10  ;;  %v14399_v10 = vpop.permute.xlu2 %6931 }
 0x3d6   : > { %9508 = vmatmul.msk.bf16.gmra.mxu3 %vm2152_vm9, %v18312_v56  ;;  %18317 = vst [vmem:[#allocation116_spill] sm:$0xff] %v14399_v10  ;;  %v14404_v7 = vpop.permute.xlu0 %7273  ;;  %v14412_v10 = vpop.permute.xlu1 %6925 }
 0x3d7   : > { %v3871_v20 = vpop.f32.mrf.mxu1  ;;  %9492 = vmatmul.msk.bf16.gmra.mxu2 %vm2152_vm9, %v18313_v48  ;;  %v3774_v48 = vadd.f32 %v14117_v13, %v3426_v41  ;;  %18318 = vst [vmem:[#allocation118_spill] sm:$0xff] %v14404_v7  ;;  %v14415_v41 = vpack.c.bf16 %v4410_v15, %v4408_v38  ;;  %v3775_v26 = vadd.f32 %v14148_v28, %v3427_v29  ;;  %v18322_v7 = vld [vmem:[#allocation103_spill] sm:$0xff]  ;;  %v18325_v15 = vld [vmem:[#allocation252_spill] sm:$0xff] }
 0x3d8   : > { %9528 = vmatmul.msk.bf16.gmra.mxu0 %vm2152_vm9, %v14377_v14  ;;  %18319 = vst [vmem:[#allocation237_spill] sm:$0xff] %v14412_v10  ;;  %v18327_v28 = vld [vmem:[#allocation176_spill] sm:$0xff] }
 0x3d9   : > { %18321 = vst [vmem:[#allocation234_spill] sm:$0xff] %v14415_v41 }
 0x3da   : > { %9538 = vmatmul.msk.bf16.gmra.mxu1 %vm2152_vm9, %v18314_v53  ;;  %v3393_v22 = vpop.f32.mrf.mxu3  ;;  %v3045_v46 = vpop.f32.mrf.mxu2 }
 0x3db   : > { %v3080_v39 = vadd.f32 %v3045_v46, %v18316_v2  ;;  %v14410_v2 = vadd.f32 %v3866_v50, %v3774_v48  ;;  %v14435_v48 = vadd.f32 %v3868_v43, %v3775_v26  ;;  %v4414_v43 = vrot.slane %v13187_v35, 1 }
 0x3dd   : > { %v14393_v21 = vpop.f32.mrf.mxu0  ;;  %v3428_v56 = vadd.f32 %v3393_v22, %v3080_v39  ;;  %v18320_v22 = vld [vmem:[#allocation152_spill] sm:$0xff]  ;;  %v14425_v50 = vpop.permute.xlu2 %7971 }
 0x3de   : > { %18323 = vst [vmem:[#allocation218_spill] sm:$0xff] %v14425_v50 }
 0x3df   : > { %v14397_v3 = vpop.f32.mrf.mxu1  ;;  %v3776_v26 = vadd.f32 %v14172_v0, %v3428_v56 }
 0x3e2   : > { %v3395_v14 = vpop.f32.mrf.mxu3  ;;  %v3047_v53 = vpop.f32.mrf.mxu2 }
 0x3e3   : > { %v3081_v13 = vadd.f32 %v3047_v53, %v18320_v22  ;;  %v4411_v22 = vrot.slane %v13375_v11, 1 }
 0x3e5   : > { %v14407_v46 = vpop.f32.mrf.mxu0  ;;  %v3429_v5 = vadd.f32 %v3395_v14, %v3081_v13  ;;  %v14431_v14 = vpop.permute.xlu0 %6927  ;;  %v4412_v13 = vrot.slane %v13373_v31, 1 }
 0x3e6   : > { %9509 = vmatmul.msk.bf16.gmra.mxu3 %vm2152_vm9, %v18322_v7  ;;  %18326 = vst [vmem:[#allocation21_spill] sm:$0xff] %v14431_v14  ;;  %v14441_v7 = vld [vmem:[%s17056_s6] ss:$0 sm:$0xff]  ;;  %v14455_v10 = vpop.permute.xlu2 %9044 }
 0x3e7   : > { %v4659_v17 = vpop.f32.mrf.mxu1  ;;  %9493 = vmatmul.msk.bf16.gmra.mxu2 %vm2152_vm9, %v18324_v33  ;;  %v4415_v14 = vsel %vm1085_vm4, %v4412_v13, %v4414_v43  ;;  %18329 = vst [vmem:[#allocation39_spill] sm:$0xff] %v14455_v10 }
 0x3e8   : > { %v14418_v39 = vadd.f32 %v4659_v17, %v14226_v23  ;;  %9529 = vmatmul.msk.bf16.gmra.mxu0 %vm2152_vm9, %v14415_v41  ;;  %v14445_v17 = vpop.permute.xlu1 %7277 }
 0x3e9   : > { %18328 = vst [vmem:[#allocation46_spill] sm:$0xff] %v14445_v17 }
 0x3ea   : > { %9539 = vmatmul.msk.bf16.gmra.mxu1 %vm2152_vm9, %v18325_v15  ;;  %v4056_v23 = vpop.f32.mrf.mxu3  ;;  %v3926_v16 = vpop.f32.mrf.mxu2 }
 0x3eb   : > { %v4006_v29 = vadd.f32 %v3926_v16, %v18327_v28  ;;  %v4413_v28 = vsel %vm1085_vm4, %v4411_v22, %v4412_v13  ;;  %v3777_v13 = vadd.f32 %v14203_v62, %v3429_v5 }
 0x3ec   : > { %v14465_v56 = vpack.c.bf16 %v4415_v14, %v4413_v28  ;;  %v18335_v14 = vld [vmem:[#allocation253_spill] sm:$0xff]  ;;  %v18337_v28 = vld [vmem:[#allocation270_spill] sm:$0xff] }
 0x3ed   : > { %v14433_v53 = vpop.f32.mrf.mxu0  ;;  %v4136_v33 = vadd.f32 %v4056_v23, %v4006_v29  ;;  %v14462_v35 = vpop.permute.xlu0 %7279  ;;  %v14486_v62 = vadd.f32 %v14397_v3, %v3777_v13 }
 0x3ee   : > { %18330 = vst [vmem:[#allocation25_spill] sm:$0xff] %v14462_v35  ;;  %v14488_v5 = vpop.permute.xlu2 %9050 }
 0x3ef   : > { %v4661_v38 = vpop.f32.mrf.mxu1  ;;  %v4172_v16 = vadd.f32 %v14441_v7, %v4136_v33  ;;  %18331 = vst [vmem:[#allocation64_spill] sm:$0xff] %v14465_v56  ;;  %v18332_v33 = vld [vmem:[#allocation137_spill] sm:$0xff] }
 0x3f0   : > { %v14448_v50 = vadd.f32 %v4661_v38, %v14256_v12  ;;  %v14460_v12 = vadd.f32 %v3871_v20, %v3776_v26  ;;  %v14475_v20 = vpop.permute.xlu1 %7454  ;;  %18336 = vst [vmem:[#allocation33_spill] sm:$0xff] %v14488_v5 }
 0x3f1   : > { %8788 = vrot.lane.b32.xlu1 %v4172_v16, %s10110_s23  ;;  %18333 = vst [vmem:[#allocation231_spill] sm:$0xff] %v14475_v20 }
 0x3f2   : > { %v4058_v31 = vpop.f32.mrf.mxu3  ;;  %v3928_v11 = vpop.f32.mrf.mxu2 }
 0x3f3   : > { %v4007_v0 = vadd.f32 %v3928_v11, %v13449_v40  ;;  %v18334_v40 = vld [vmem:[#allocation223_spill] sm:$0xff]  ;;  %v4419_v11 = vrot.slane %v13377_v59, 1 }
 0x3f5   : > { %v14458_v23 = vpop.f32.mrf.mxu0  ;;  %v4137_v38 = vadd.f32 %v4058_v31, %v4007_v0 }
 0x3f6   : > { %9510 = vmatmul.msk.bf16.gmra.mxu3 %vm2152_vm9, %v18332_v33 }
 0x3f7   : > { %v4664_v29 = vpop.f32.mrf.mxu1  ;;  %v4173_v43 = vadd.f32 %v14441_v7, %v4137_v38  ;;  %9494 = vmatmul.msk.bf16.gmra.mxu2 %vm2152_vm9, %v18334_v40  ;;  %v4417_v40 = vrot.slane %v13276_v18, 1  ;;  %v14510_v18 = vpop.permute.xlu2 %9056 }
 0x3f8   : > { %v14468_v22 = vadd.f32 %v4664_v29, %v14281_v19  ;;  %9530 = vmatmul.msk.bf16.gmra.mxu0 %vm2152_vm9, %v14465_v56  ;;  %v14492_v29 = vpop.permute.xlu0 %7583  ;;  %v14501_v5 = vpop.permute.xlu1 %7841  ;;  %18341 = vst [vmem:[#allocation125_spill] sm:$0xff] %v14510_v18  ;;  %v18347_v18 = vld [vmem:[#allocation156_spill] sm:$0xff] }
 0x3f9   : > { %8790 = vrot.lane.b32.xlu2 %v4173_v43, %s10110_s23  ;;  %18338 = vst [vmem:[#allocation3_spill] sm:$0xff] %v14492_v29  ;;  %v4416_v43 = vrot.slane %v13281_v55, 1  ;;  %v4420_v13 = vsel %vm1085_vm4, %v4417_v40, %v4419_v11  ;;  %v4422_v10 = vrot.slane %v18347_v18, 1 }
 0x3fa   : > { %9540 = vmatmul.msk.bf16.gmra.mxu1 %vm2152_vm9, %v18335_v14  ;;  %v4061_v19 = vpop.f32.mrf.mxu3  ;;  %v3931_v26 = vpop.f32.mrf.mxu2  ;;  %18339 = vst [vmem:[#allocation50_spill] sm:$0xff] %v14501_v5 }
 0x3fb   : > { %v4008_v31 = vadd.f32 %v3931_v26, %v18337_v28 }
 0x3fd   : > { %v14483_v16 = vpop.f32.mrf.mxu0  ;;  %v4138_v38 = vadd.f32 %v4061_v19, %v4008_v31  ;;  %v4418_v19 = vsel %vm1085_vm4, %v4416_v43, %v4417_v40 }
 0x3fe   : > { %v14508_v31 = vpack.c.bf16 %v4420_v13, %v4418_v19  ;;  %v4424_v19 = vrot.slane %v13363_v44, 1 }
 0x3ff   : > { %v4666_v0 = vpop.f32.mrf.mxu1  ;;  %v4174_v3 = vadd.f32 %v14441_v7, %v4138_v38  ;;  %v18342_v38 = vld [vmem:[#allocation147_spill] sm:$0xff] }
 0x400   : > { %v14495_v33 = vadd.f32 %v4666_v0, %v14311_v27  ;;  %18340 = vst [vmem:[#allocation224_spill] sm:$0xff] %v14508_v31 }
 0x401   : > { %8792 = vrot.lane.b32.xlu0 %v4174_v3, %s10110_s23  ;;  %v14519_v3 = vpop.permute.xlu0 %7712 }
 0x402   : > { %v4063_v59 = vpop.f32.mrf.mxu3  ;;  %v3933_v26 = vpop.f32.mrf.mxu2  ;;  %18343 = vst [vmem:[#allocation254_spill] sm:$0xff] %v14519_v3  ;;  %v4425_v3 = vsel %vm1085_vm4, %v4422_v10, %v4424_v19 }
 0x403   : > { %v4009_v27 = vadd.f32 %v3933_v26, %v13580_v42  ;;  %v18344_v42 = vld [vmem:[#allocation267_spill] sm:$0xff] }
 0x405   : > { %v14504_v28 = vpop.f32.mrf.mxu0  ;;  %v4139_v0 = vadd.f32 %v4063_v59, %v4009_v27  ;;  %v14529_v59 = vpop.permute.xlu1 %9048 }
 0x406   : > { %9511 = vmatmul.msk.bf16.gmra.mxu3 %vm2152_vm9, %v18342_v38  ;;  %18345 = vst [vmem:[#allocation235_spill] sm:$0xff] %v14529_v59 }
 0x407   : > { %v4669_v55 = vpop.f32.mrf.mxu1  ;;  %v4175_v43 = vadd.f32 %v14441_v7, %v4139_v0  ;;  %9495 = vmatmul.msk.bf16.gmra.mxu2 %vm2152_vm9, %v18026_v34  ;;  %v18346_v34 = vld [vmem:[#allocation167_spill] sm:$0xff] }
 0x408   : > { %v14513_v11 = vadd.f32 %v4669_v55, %v14335_v30  ;;  %9531 = vmatmul.msk.bf16.gmra.mxu0 %vm2152_vm9, %v14508_v31  ;;  %v4421_v38 = vrot.slane %v18346_v34, 1 }
 0x409   : > { %8794 = vrot.lane.b32.xlu1 %v4175_v43, %s10110_s23  ;;  %v14538_v43 = vpop.permute.xlu2 %9062  ;;  %v14542_v59 = vpop.permute.xlu0 %9046 }
 0x40a   : > { %9541 = vmatmul.msk.bf16.gmra.mxu1 %vm2152_vm9, %v18344_v42  ;;  %v4066_v30 = vpop.f32.mrf.mxu3  ;;  %v3936_v40 = vpop.f32.mrf.mxu2  ;;  %18348 = vst [vmem:[#allocation43_spill] sm:$0xff] %v14538_v43 }
 0x40b   : > { %v4010_v26 = vadd.f32 %v3936_v40, %v13658_v4  ;;  %18349 = vst [vmem:[#allocation75_spill] sm:$0xff] %v14542_v59  ;;  %v18350_v40 = vld [vmem:[#allocation160_spill] sm:$0xff] }
 0x40d   : > { %v14527_v13 = vpop.f32.mrf.mxu0  ;;  %v4140_v55 = vadd.f32 %v4066_v30, %v4010_v26  ;;  %v14551_v34 = vpop.permute.xlu1 %9054 }
 0x40e   : > { %18352 = vst [vmem:[#allocation226_spill] sm:$0xff] %v14551_v34 }
 0x40f   : > { %v4671_v27 = vpop.f32.mrf.mxu1  ;;  %v4176_v5 = vadd.f32 %v14441_v7, %v4140_v55 }
 0x410   : > { %v14534_v0 = vadd.f32 %v4671_v27, %v14356_v6  ;;  %v4423_v6 = vsel %vm1085_vm4, %v4421_v38, %v4422_v10  ;;  %v18354_v10 = vld [vmem:[#allocation261_spill] sm:$0xff] }
 0x411   : > { %8796 = vrot.lane.b32.xlu2 %v4176_v5, %s10110_s23  ;;  %v14549_v27 = vpack.c.bf16 %v4425_v3, %v4423_v6  ;;  %v18353_v5 = vld [vmem:[#allocation221_spill] sm:$0xff]  ;;  %v14565_v3 = vpop.permute.xlu2 %9068 }
 0x412   : > { %v4068_v44 = vpop.f32.mrf.mxu3  ;;  %v3938_v4 = vpop.f32.mrf.mxu2  ;;  %18355 = vst [vmem:[#allocation45_spill] sm:$0xff] %v14565_v3 }
 0x413   : > { %v4011_v26 = vadd.f32 %v3938_v4, %v18350_v40  ;;  %18351 = vst [vmem:[#allocation69_spill] sm:$0xff] %v14549_v27  ;;  %v14570_v4 = vpop.permute.xlu0 %9052 }
 0x414   : > { %18356 = vst [vmem:[#allocation88_spill] sm:$0xff] %v14570_v4 }
 0x415   : > { %v14545_v30 = vpop.f32.mrf.mxu0  ;;  %v4141_v55 = vadd.f32 %v4068_v44, %v4011_v26 }
 0x416   : > { %9512 = vmatmul.msk.bf16.gmra.mxu3 %vm2152_vm9, %v18353_v5 }
 0x417   : > { %v4674_v18 = vpop.f32.mrf.mxu1  ;;  %v4177_v43 = vadd.f32 %v14441_v7, %v4141_v55  ;;  %9496 = vmatmul.msk.bf16.gmra.mxu2 %vm2152_vm9, %v18065_v47  ;;  %v14576_v47 = vpop.permute.xlu1 %9060 }
 0x418   : > { %v14554_v19 = vadd.f32 %v4674_v18, %v14371_v37  ;;  %9532 = vmatmul.msk.bf16.gmra.mxu0 %vm2152_vm9, %v14549_v27  ;;  %18357 = vst [vmem:[#allocation61_spill] sm:$0xff] %v14576_v47 }
 0x419   : > { %8798 = vrot.lane.b32.xlu0 %v4177_v43, %s10110_s23  ;;  %v14582_v34 = vpop.permute.xlu2 %9074 }
 0x41a   : > { %9542 = vmatmul.msk.bf16.gmra.mxu1 %vm2152_vm9, %v18354_v10  ;;  %v4071_v37 = vpop.f32.mrf.mxu3  ;;  %v3941_v38 = vpop.f32.mrf.mxu2  ;;  %18358 = vst [vmem:[#allocation90_spill] sm:$0xff] %v14582_v34 }
 0x41b   : > { %v4012_v6 = vadd.f32 %v3941_v38, %v13772_v36  ;;  %v14585_v38 = vpop.permute.xlu0 %9058 }
 0x41c   : > { %18359 = vst [vmem:[#allocation82_spill] sm:$0xff] %v14585_v38 }
 0x41d   : > { %v14568_v44 = vpop.f32.mrf.mxu0  ;;  %v4142_v26 = vadd.f32 %v4071_v37, %v4012_v6  ;;  %v18360_v6 = vld [vmem:[#allocation7_spill] sm:$0xff] }
 0x41f   : > { %v4676_v40 = vpop.f32.mrf.mxu1  ;;  %v4178_v55 = vadd.f32 %v14441_v7, %v4142_v26  ;;  %v18361_v26 = vld [vmem:[#allocation34_spill] sm:$0xff] }
 0x420   : > { %v14574_v18 = vadd.f32 %v4676_v40, %v14393_v21 }
 0x421   : > { %8800 = vrot.lane.b32.xlu1 %v4178_v55, %s10110_s23  ;;  %v18362_v55 = vld [vmem:[#allocation262_spill] sm:$0xff] }
 0x422   : > { %v4073_v43 = vpop.f32.mrf.mxu3  ;;  %v3943_v5 = vpop.f32.mrf.mxu2 }
 0x423   : > { %v4013_v4 = vadd.f32 %v3943_v5, %v13800_v54  ;;  %v14599_v54 = vpop.permute.xlu1 %9066  ;;  %v18364_v5 = vld [vmem:[#allocation4_spill] sm:$0xff] }
 0x424   : > { %18363 = vst [vmem:[#allocation14_spill] sm:$0xff] %v14599_v54 }
 0x425   : > { %v14580_v3 = vpop.f32.mrf.mxu0  ;;  %v4143_v37 = vadd.f32 %v4073_v43, %v4013_v4 }
 0x426   : > { %9513 = vmatmul.msk.bf16.gmra.mxu3 %vm2152_vm9, %v18360_v6  ;;  %v14605_v6 = vpop.permute.xlu2 %9080 }
 0x427   : > { %v4679_v36 = vpop.f32.mrf.mxu1  ;;  %v4179_v40 = vadd.f32 %v14441_v7, %v4143_v37  ;;  %9497 = vmatmul.msk.bf16.gmra.mxu2 %vm2152_vm9, %v18361_v26  ;;  %18365 = vst [vmem:[#allocation257_spill] sm:$0xff] %v14605_v6  ;;  %v14610_v26 = vpop.permute.xlu0 %9064 }
 0x428   : > { %v14588_v21 = vadd.f32 %v4679_v36, %v14407_v46  ;;  %9579 = vmatmul.msk.bf16.vlgmr.msrb.gmra.mxu0 %vm2152_vm9, %v14082_v57  ;;  %18366 = vst [vmem:[#allocation251_spill] sm:$0xff] %v14610_v26 }
 0x429   : > { %8802 = vrot.lane.b32.xlu2 %v4179_v40, %s10110_s23 }
 0x42a   : > { %9543 = vmatmul.msk.bf16.gmra.mxu1 %vm2152_vm9, %v18362_v55  ;;  %v4076_v46 = vpop.f32.mrf.mxu3  ;;  %v3946_v4 = vpop.f32.mrf.mxu2 }
 0x42b   : > { %v4014_v36 = vadd.f32 %v3946_v4, %v18364_v5  ;;  %v14616_v35 = vpop.permute.xlu1 %9072  ;;  %v18368_v4 = vld [vmem:[#allocation109_spill] sm:$0xff] }
 0x42c   : > { %18367 = vst [vmem:[#allocation250_spill] sm:$0xff] %v14616_v35 }
 0x42d   : > { %v14602_v43 = vpop.f32.mrf.mxu0  ;;  %v4144_v37 = vadd.f32 %v4076_v46, %v4014_v36  ;;  %v18371_v36 = vld [vmem:[#allocation15_spill] sm:$0xff] }
 0x42f   : > { %v4681_v34 = vpop.f32.mrf.mxu1  ;;  %v4180_v47 = vadd.f32 %v14441_v7, %v4144_v37  ;;  %v18372_v37 = vld [vmem:[#allocation227_spill] sm:$0xff] }
 0x430   : > { %v14608_v38 = vadd.f32 %v4681_v34, %v14433_v53  ;;  %v18369_v53 = vld [vmem:[#allocation173_spill] sm:$0xff]  ;;  %v14626_v34 = vpop.permute.xlu2 %9086 }
 0x431   : > { %8804 = vrot.lane.b32.xlu0 %v4180_v47, %s10110_s23  ;;  %18370 = vst [vmem:[#allocation73_spill] sm:$0xff] %v14626_v34 }
 0x432   : > { %v4078_v40 = vpop.f32.mrf.mxu3  ;;  %v3948_v54 = vpop.f32.mrf.mxu2 }
 0x433   : > { %v4015_v5 = vadd.f32 %v3948_v54, %v18368_v4  ;;  %v14633_v54 = vpop.permute.xlu0 %9070  ;;  %v18374_v4 = vld [vmem:[#allocation154_spill] sm:$0xff]  ;;  %v14639_v34 = vpop.permute.xlu1 %9078 }
 0x434   : > { %18373 = vst [vmem:[#allocation104_spill] sm:$0xff] %v14633_v54 }
 0x435   : > { %v14614_v59 = vpop.f32.mrf.mxu0  ;;  %v4145_v6 = vadd.f32 %v4078_v40, %v4015_v5  ;;  %18375 = vst [vmem:[#allocation93_spill] sm:$0xff] %v14639_v34 }
 0x436   : > { %9514 = vmatmul.msk.bf16.gmra.mxu3 %vm2152_vm9, %v18369_v53 }
 0x437   : > { %v4684_v20 = vpop.f32.mrf.mxu1  ;;  %v4181_v47 = vadd.f32 %v14441_v7, %v4145_v6  ;;  %9498 = vmatmul.msk.bf16.gmra.mxu2 %vm2152_vm9, %v18371_v36 }
 0x438   : > { %v14620_v46 = vadd.f32 %v4684_v20, %v14458_v23  ;;  %9580 = vmatmul.msk.bf16.gmra.mxu0 %vm2152_vm9, %v14082_v57  ;;  %v14645_v26 = vpop.permute.xlu2 %9092  ;;  %v18399_v57 = vld [vmem:[#allocation13_spill] sm:$0xff] }
 0x439   : > { %8806 = vrot.lane.b32.xlu1 %v4181_v47, %s10110_s23  ;;  %18376 = vst [vmem:[#allocation42_spill] sm:$0xff] %v14645_v26 }
 0x43a   : > { %9544 = vmatmul.msk.bf16.gmra.mxu1 %vm2152_vm9, %v18372_v37  ;;  %v4081_v23 = vpop.f32.mrf.mxu3  ;;  %v3951_v20 = vpop.f32.mrf.mxu2 }
 0x43b   : > { %v4016_v5 = vadd.f32 %v3951_v20, %v18374_v4  ;;  %v14650_v29 = vpop.permute.xlu0 %9076 }
 0x43c   : > { %18377 = vst [vmem:[#allocation22_spill] sm:$0xff] %v14650_v29 }
 0x43d   : > { %v14636_v40 = vpop.f32.mrf.mxu0  ;;  %v4146_v6 = vadd.f32 %v4081_v23, %v4016_v5  ;;  %v18379_v5 = vld [vmem:[#allocation174_spill] sm:$0xff] }
 0x43f   : > { %v4686_v53 = vpop.f32.mrf.mxu1  ;;  %v4182_v36 = vadd.f32 %v14441_v7, %v4146_v6 }
 0x440   : > { %v14642_v35 = vadd.f32 %v4686_v53, %v14483_v16  ;;  %v18378_v16 = vld [vmem:[#allocation243_spill] sm:$0xff]  ;;  %v14660_v53 = vpop.permute.xlu1 %9084  ;;  %v14682_v26 = vpop.permute.xlu2 %9098 }
 0x441   : > { %8808 = vrot.lane.b32.xlu2 %v4182_v36, %s10110_s23  ;;  %18380 = vst [vmem:[#allocation105_spill] sm:$0xff] %v14660_v53  ;;  %v18381_v36 = vld [vmem:[#allocation180_spill] sm:$0xff] }
 0x442   : > { %v4083_v47 = vpop.f32.mrf.mxu3  ;;  %v3953_v54 = vpop.f32.mrf.mxu2  ;;  %18382 = vst [vmem:[#allocation247_spill] sm:$0xff] %v14682_v26 }
 0x443   : > { %v4017_v20 = vadd.f32 %v3953_v54, %v13931_v63  ;;  %v4209_v63 = vld [vmem:[%s17057_s7 + $0x5] sm:$0x1]  ;;  %v4211_v54 = vld [vmem:[%s17057_s7 + $0x7] sm:$0x1]  ;;  %v14685_v27 = vpop.permute.xlu0 %9082 }
 0x444   : > { %18383 = vst [vmem:[#allocation86_spill] sm:$0xff] %v14685_v27 }
 0x445   : > { %v14648_v17 = vpop.f32.mrf.mxu0  ;;  %v4147_v34 = vadd.f32 %v4083_v47, %v4017_v20 }
 0x446   : > { %9515 = vmatmul.msk.bf16.gmra.mxu3 %vm2152_vm9, %v18379_v5 }
 0x447   : > { %v4689_v4 = vpop.f32.mrf.mxu1  ;;  %v4183_v6 = vadd.f32 %v14441_v7, %v4147_v34  ;;  %9499 = vmatmul.msk.bf16.gmra.mxu2 %vm2152_vm9, %v18153_v32  ;;  %v5594_v34 = vsel %vm2201_vm8, %v4209_v63, 0  ;;  %v5864_v32 = vsel %vm2201_vm8, %v4211_v54, 0  ;;  %v4212_v54 = vld [vmem:[%s17057_s7 + $0x8] sm:$0x1] }
 0x448   : > { %v14654_v23 = vadd.f32 %v4689_v4, %v14504_v28  ;;  %9581 = vmatmul.msk.bf16.gmra.mxu0 %vm2152_vm9, %v18378_v16  ;;  %v4210_v28 = vld [vmem:[%s17057_s7 + $0x6] sm:$0x1]  ;;  %5603 = vmatpush.bf16.msrb.mxu1 %v5594_v34  ;;  %v5999_v34 = vsel %vm2201_vm8, %v4212_v54, 0 }
 0x449   : > { %v5729_v47 = vsel %vm2201_vm8, %v4210_v28, 0  ;;  %8810 = vrot.lane.b32.xlu0 %v4183_v6, %s10110_s23  ;;  %5873 = vmatpush.bf16.msrb.mxu3 %v5864_v32 }
 0x44a   : > { %9545 = vmatmul.msk.bf16.gmra.mxu1 %vm2152_vm9, %v18381_v36  ;;  %v4086_v20 = vpop.f32.mrf.mxu3  ;;  %v3956_v4 = vpop.f32.mrf.mxu2  ;;  %5738 = vmatpush.bf16.msrb.mxu2 %v5729_v47 }
 0x44b   : > { %v4018_v53 = vadd.f32 %v3956_v4, %v13970_v51  ;;  %v14695_v47 = vpop.permute.xlu1 %9090  ;;  %6008 = vmatpush.bf16.msra.mxu0 %v5999_v34  ;;  %v14712_v34 = vpop.permute.xlu0 %9088 }
 0x44c   : > { %18384 = vst [vmem:[#allocation117_spill] sm:$0xff] %v14695_v47  ;;  %v18389_v47 = vld [vmem:[#allocation71_spill] sm:$0xff] }
 0x44d   : > { %v14680_v5 = vpop.f32.mrf.mxu0  ;;  %v4148_v63 = vadd.f32 %v4086_v20, %v4018_v53  ;;  %v18385_v53 = vld [vmem:[#allocation106_spill] sm:$0xff]  ;;  %v18386_v20 = vld [vmem:[#allocation19_spill] sm:$0xff]  ;;  %18391 = vst [vmem:[#allocation115_spill] sm:$0xff] %v14712_v34 }
 0x44f   : > { %v4691_v29 = vpop.f32.mrf.mxu1  ;;  %v4184_v6 = vadd.f32 %v14441_v7, %v4148_v63 }
 0x450   : > { %v14688_v28 = vadd.f32 %v4691_v29, %v14527_v13 }
 0x451   : > { %8812 = vrot.lane.b32.xlu1 %v4184_v6, %s10110_s23  ;;  %v18390_v6 = vld [vmem:[#allocation182_spill] sm:$0xff] }
 0x452   : > { %v4088_v51 = vpop.f32.mrf.mxu3  ;;  %v3958_v32 = vpop.f32.mrf.mxu2 }
 0x453   : > { %v4019_v29 = vadd.f32 %v3958_v32, %v18385_v53  ;;  %v8791_v13 = vpop.permute.xlu2 %8790  ;;  %v18392_v53 = vld [vmem:[#allocation264_spill] sm:$0xff]  ;;  %v14729_v31 = vpop.permute.xlu0 %9094 }
 0x454   : > { %v14703_v63 = vsel %vm2152_vm9, %v18386_v20, %v8791_v13  ;;  %v18393_v13 = vld [vmem:[#allocation136_spill] sm:$0xff]  ;;  %v18395_v20 = vld [vmem:[#allocation2_spill] sm:$0xff]  ;;  %18397 = vst [vmem:[#allocation121_spill] sm:$0xff] %v14729_v31  ;;  %v18408_v31 = vld [vmem:[#allocation41_spill] sm:$0xff] }
 0x455   : > { %v14698_v4 = vpop.f32.mrf.mxu0  ;;  %18387 = vst [vmem:[#allocation110_spill] sm:$0xff] %v14703_v63  ;;  %v4149_v27 = vadd.f32 %v4088_v51, %v4019_v29  ;;  %v14722_v29 = vpop.permute.xlu1 %9096 }
 0x456   : > { %9516 = vmatmul.msk.bf16.gmra.mxu3 %vm2152_vm9, %v18390_v6  ;;  %18394 = vst [vmem:[#allocation102_spill] sm:$0xff] %v14722_v29 }
 0x457   : > { %v4694_v26 = vpop.f32.mrf.mxu1  ;;  %v4185_v32 = vadd.f32 %v14441_v7, %v4149_v27  ;;  %9500 = vmatmul.msk.bf16.gmra.mxu2 %vm2152_vm9, %v18392_v53 }
 0x458   : > { %v14706_v54 = vadd.f32 %v4694_v26, %v14545_v30  ;;  %9582 = vmatmul.msk.bf16.gmra.mxu0 %vm2152_vm9, %v18389_v47  ;;  %v18398_v47 = vld [vmem:[#allocation124_spill] sm:$0xff] }
 0x459   : > { %8814 = vrot.lane.b32.xlu2 %v4185_v32, %s10110_s23 }
 0x45a   : > { %18388 = vst [vmem:[#allocation72_spill] sm:$0xff] %v14706_v54  ;;  %9546 = vmatmul.msk.bf16.gmra.mxu1 %vm2152_vm9, %v18393_v13  ;;  %v4091_v30 = vpop.f32.mrf.mxu3  ;;  %v3961_v26 = vpop.f32.mrf.mxu2 }
 0x45b   : > { %v4020_v6 = vadd.f32 %v3961_v26, %v18395_v20  ;;  %v18403_v20 = vld [vmem:[#allocation89_spill] sm:$0xff] }
 0x45d   : > { %v14720_v51 = vpop.f32.mrf.mxu0  ;;  %v4150_v34 = vadd.f32 %v4091_v30, %v4020_v6 }
 0x45f   : > { %v4696_v63 = vpop.f32.mrf.mxu1  ;;  %v4186_v53 = vadd.f32 %v14441_v7, %v4150_v34  ;;  %v18402_v34 = vld [vmem:[#allocation248_spill] sm:$0xff] }
 0x460   : > { %v14726_v27 = vadd.f32 %v4696_v63, %v14568_v44 }
 0x461   : > { %8816 = vrot.lane.b32.xlu0 %v4186_v53, %s10110_s23  ;;  %v18404_v53 = vld [vmem:[#allocation48_spill] sm:$0xff] }
 0x462   : > { %18396 = vst [vmem:[#allocation135_spill] sm:$0xff] %v14726_v27  ;;  %v4093_v32 = vpop.f32.mrf.mxu3  ;;  %v3963_v56 = vpop.f32.mrf.mxu2 }
 0x463   : > { %v4021_v16 = vadd.f32 %v3963_v56, %v18398_v47  ;;  %v8789_v29 = vpop.permute.xlu1 %8788  ;;  %v18405_v56 = vmov 0.0|0.0  }
 0x464   : > { %v14737_v26 = vsel %vm2152_vm9, %v18399_v57, %v8789_v29  ;;  %v18407_v29 = vld [vmem:[#allocation60_spill] sm:$0xff] }
 0x465   : > { %v14732_v41 = vpop.f32.mrf.mxu0  ;;  %18400 = vst [vmem:[#allocation85_spill] sm:$0xff] %v14737_v26  ;;  %v4151_v44 = vadd.f32 %v4093_v32, %v4021_v16 }
 0x466   : > { %9563 = vmatmul.msk.bf16.vlgmr.msra.gmra.mxu3 %vm2152_vm9, %v18403_v20 }
 0x467   : > { %v4699_v30 = vpop.f32.mrf.mxu1  ;;  %v4187_v6 = vadd.f32 %v14441_v7, %v4151_v44  ;;  %9547 = vmatmul.msk.bf16.vlgmr.msra.gmra.mxu2 %vm2152_vm9, %v18404_v53 }
 0x468   : > { %v14740_v63 = vadd.f32 %v4699_v30, %v14580_v3  ;;  %9583 = vmatmul.msk.bf16.gmra.mxu0 %vm2152_vm9, %v18402_v34  ;;  %v14753_v3 = vpop.permute.xlu0 %9100 }
 0x469   : > { %8818 = vrot.lane.b32.xlu1 %v4187_v6, %s10110_s23  ;;  %18406 = vst [vmem:[#allocation132_spill] sm:$0xff] %v14753_v3  ;;  %v18410_v3 = vld [vmem:[#allocation26_spill] sm:$0xff] }
 0x46a   : > { %18401 = vst [vmem:[#allocation37_spill] sm:$0xff] %v14740_v63  ;;  %5604 = vmatmul.bf16.vlgmr.msrb.gmra.mxu1 %v18405_v56  ;;  %v4096_v57 = vpop.f32.mrf.mxu3  ;;  %v3966_v16 = vpop.f32.mrf.mxu2 }
 0x46b   : > { %v4022_v32 = vadd.f32 %v3966_v16, %v18407_v29  ;;  %v8797_v30 = vpop.permute.xlu2 %8796 }
 0x46c   : > { %v14758_v26 = vsel %vm2152_vm9, %v18408_v31, %v8797_v30 }
 0x46d   : > { %v14751_v47 = vpop.f32.mrf.mxu0  ;;  %18409 = vst [vmem:[#allocation240_spill] sm:$0xff] %v14758_v26  ;;  %v4152_v34 = vadd.f32 %v4096_v57, %v4022_v32  ;;  %v18413_v32 = vld [vmem:[#allocation255_spill] sm:$0xff] }
 0x46f   : > { %v4701_v44 = vpop.f32.mrf.mxu1  ;;  %v4188_v6 = vadd.f32 %v14441_v7, %v4152_v34 }
 0x470   : > { %v14761_v63 = vadd.f32 %v4701_v44, %v14602_v43 }
 0x471   : > { %8820 = vrot.lane.b32.xlu2 %v4188_v6, %s10110_s23 }
 0x472   : > { %v4098_v56 = vpop.f32.mrf.mxu3  ;;  %v3968_v27 = vpop.f32.mrf.mxu2 }
 0x473   : > { %v4023_v16 = vadd.f32 %v3968_v27, %v14110_v49  ;;  %v8793_v29 = vpop.permute.xlu0 %8792 }
 0x474   : > { %v14770_v31 = vsel %vm2152_vm9, %v18410_v3, %v8793_v29  ;;  %v18414_v3 = vld [vmem:[#allocation195_spill] sm:$0xff] }
 0x475   : > { %v14765_v54 = vpop.f32.mrf.mxu0  ;;  %18411 = vst [vmem:[#allocation113_spill] sm:$0xff] %v14770_v31  ;;  %v4153_v57 = vadd.f32 %v4098_v56, %v4023_v16  ;;  %v18415_v56 = vld [vmem:[#allocation31_spill] sm:$0xff] }
 0x476   : > { %9564 = vmatmul.msk.bf16.gmra.mxu3 %vm2152_vm9, %v18403_v20 }
 0x477   : > { %v4704_v30 = vpop.f32.mrf.mxu1  ;;  %v4189_v34 = vadd.f32 %v14441_v7, %v4153_v57  ;;  %9548 = vmatmul.msk.bf16.gmra.mxu2 %vm2152_vm9, %v18404_v53 }
 0x478   : > { %v14773_v43 = vadd.f32 %v4704_v30, %v14614_v59  ;;  %9584 = vmatmul.msk.bf16.gmra.mxu0 %vm2152_vm9, %v18413_v32  ;;  %v18418_v32 = vld [vmem:[#allocation55_spill] sm:$0xff] }
 0x479   : > { %8822 = vrot.lane.b32.xlu0 %v4189_v34, %s10110_s23 }
 0x47a   : > { %18412 = vst [vmem:[#allocation149_spill] sm:$0xff] %v14773_v43  ;;  %9595 = vmatmul.msk.bf16.gmra.mxu1 %vm2152_vm9, %v18226_v24  ;;  %v4101_v49 = vpop.f32.mrf.mxu3  ;;  %v3971_v27 = vpop.f32.mrf.mxu2  ;;  %v18429_v43 = vld [vmem:[#allocation38_spill] sm:$0xff] }
 0x47b   : > { %v4024_v44 = vadd.f32 %v3971_v27, %v18414_v3  ;;  %v8795_v6 = vpop.permute.xlu1 %8794 }
 0x47c   : > { %v14790_v16 = vsel %vm2152_vm9, %v18415_v56, %v8795_v6 }
 0x47d   : > { %v14785_v59 = vpop.f32.mrf.mxu0  ;;  %18416 = vst [vmem:[#allocation142_spill] sm:$0xff] %v14790_v16  ;;  %v4154_v30 = vadd.f32 %v4101_v49, %v4024_v44  ;;  %v18421_v44 = vld [vmem:[#allocation249_spill] sm:$0xff] }
 0x47f   : > { %v4706_v29 = vpop.f32.mrf.mxu1  ;;  %v4190_v24 = vadd.f32 %v14441_v7, %v4154_v30 }
 0x480   : > { %v14793_v57 = vadd.f32 %v4706_v29, %v14636_v40  ;;  %v18422_v29 = vld [vmem:[#allocation245_spill] sm:$0xff] }
 0x481   : > { %8824 = vrot.lane.b32.xlu1 %v4190_v24, %s10110_s23  ;;  %v18423_v24 = vld [vmem:[#allocation244_spill] sm:$0xff] }
 0x482   : > { %18417 = vst [vmem:[#allocation101_spill] sm:$0xff] %v14793_v57  ;;  %v4103_v34 = vpop.f32.mrf.mxu3  ;;  %v3973_v26 = vpop.f32.mrf.mxu2 }
 0x483   : > { %v4025_v27 = vadd.f32 %v3973_v26, %v14166_v58  ;;  %v8803_v3 = vpop.permute.xlu2 %8802  ;;  %v18424_v58 = vld [vmem:[#allocation232_spill] sm:$0xff] }
 0x484   : > { %v14802_v6 = vsel %vm2152_vm9, %v18418_v32, %v8803_v3 }
 0x485   : > { %v14797_v31 = vpop.f32.mrf.mxu0  ;;  %18419 = vst [vmem:[#allocation130_spill] sm:$0xff] %v14802_v6  ;;  %v4155_v49 = vadd.f32 %v4103_v34, %v4025_v27  ;;  %v18425_v34 = vld [vmem:[#allocation12_spill] sm:$0xff] }
 0x486   : > { %9565 = vmatmul.msk.bf16.gmra.mxu3 %vm2152_vm9, %v18422_v29 }
 0x487   : > { %v4709_v56 = vpop.f32.mrf.mxu1  ;;  %v4191_v30 = vadd.f32 %v14441_v7, %v4155_v49  ;;  %9549 = vmatmul.msk.bf16.gmra.mxu2 %vm2152_vm9, %v18423_v24  ;;  %v18430_v24 = vld [vmem:[#allocation59_spill] sm:$0xff] }
 0x488   : > { %v14805_v40 = vadd.f32 %v4709_v56, %v14648_v17  ;;  %9585 = vmatmul.msk.bf16.gmra.mxu0 %vm2152_vm9, %v18421_v44  ;;  %v18426_v56 = vld [vmem:[#allocation58_spill] sm:$0xff] }
 0x489   : > { %8826 = vrot.lane.b32.xlu2 %v4191_v30, %s10110_s23 }
 0x48a   : > { %18420 = vst [vmem:[#allocation112_spill] sm:$0xff] %v14805_v40  ;;  %9596 = vmatmul.msk.bf16.gmra.mxu1 %vm2152_vm9, %v18424_v58  ;;  %v4106_v26 = vpop.f32.mrf.mxu3  ;;  %v3976_v32 = vpop.f32.mrf.mxu2 }
 0x48b   : > { %v4026_v27 = vadd.f32 %v3976_v32, %v18425_v34  ;;  %v8799_v3 = vpop.permute.xlu0 %8798 }
 0x48c   : > { %v14822_v6 = vsel %vm2152_vm9, %v18426_v56, %v8799_v3 }
 0x48d   : > { %v14817_v17 = vpop.f32.mrf.mxu0  ;;  %18427 = vst [vmem:[#allocation63_spill] sm:$0xff] %v14822_v6  ;;  %v4156_v16 = vadd.f32 %v4106_v26, %v4026_v27  ;;  %v18433_v27 = vld [vmem:[#allocation10_spill] sm:$0xff] }
 0x48f   : > { %v4711_v49 = vpop.f32.mrf.mxu1  ;;  %v4192_v58 = vadd.f32 %v14441_v7, %v4156_v16  ;;  %v18434_v16 = vld [vmem:[#allocation87_spill] sm:$0xff] }
 0x490   : > { %v14825_v44 = vadd.f32 %v4711_v49, %v14680_v5 }
 0x491   : > { %8828 = vrot.lane.b32.xlu0 %v4192_v58, %s10110_s23  ;;  %v18435_v58 = vld [vmem:[#allocation233_spill] sm:$0xff] }
 0x492   : > { %18428 = vst [vmem:[#allocation150_spill] sm:$0xff] %v14825_v44  ;;  %v4108_v30 = vpop.f32.mrf.mxu3  ;;  %v3978_v40 = vpop.f32.mrf.mxu2  ;;  %v18439_v44 = vld [vmem:[#allocation65_spill] sm:$0xff] }
 0x493   : > { %v4027_v32 = vadd.f32 %v3978_v40, %v18429_v43  ;;  %v8801_v34 = vpop.permute.xlu1 %8800 }
 0x494   : > { %v14834_v3 = vsel %vm2152_vm9, %v18430_v24, %v8801_v34 }
 0x495   : > { %v14829_v57 = vpop.f32.mrf.mxu0  ;;  %18431 = vst [vmem:[#allocation241_spill] sm:$0xff] %v14834_v3  ;;  %v4157_v26 = vadd.f32 %v4108_v30, %v4027_v32  ;;  %v18436_v32 = vld [vmem:[#allocation77_spill] sm:$0xff] }
 0x496   : > { %9566 = vmatmul.msk.bf16.gmra.mxu3 %vm2152_vm9, %v18434_v16 }
 0x497   : > { %v4714_v56 = vpop.f32.mrf.mxu1  ;;  %v4193_v49 = vadd.f32 %v14441_v7, %v4157_v26  ;;  %9550 = vmatmul.msk.bf16.gmra.mxu2 %vm2152_vm9, %v18435_v58 }
 0x498   : > { %v14837_v5 = vadd.f32 %v4714_v56, %v14698_v4  ;;  %9586 = vmatmul.msk.bf16.gmra.mxu0 %vm2152_vm9, %v18433_v27 }
 0x499   : > { %8830 = vrot.lane.b32.xlu1 %v4193_v49, %s10110_s23 }
 0x49a   : > { %18432 = vst [vmem:[#allocation146_spill] sm:$0xff] %v14837_v5  ;;  %9597 = vmatmul.msk.bf16.gmra.mxu1 %vm2152_vm9, %v18269_v25  ;;  %v4111_v43 = vpop.f32.mrf.mxu3  ;;  %v3981_v40 = vpop.f32.mrf.mxu2  ;;  %v18438_v5 = vld [vmem:[#allocation211_spill] sm:$0xff] }
 0x49b   : > { %v4028_v24 = vadd.f32 %v3981_v40, %v14250_v1  ;;  %v8809_v30 = vpop.permute.xlu2 %8808 }
 0x49c   : > { %v14854_v34 = vsel %vm2152_vm9, %v18436_v32, %v8809_v30 }
 0x49d   : > { %v14849_v4 = vpop.f32.mrf.mxu0  ;;  %18437 = vst [vmem:[#allocation129_spill] sm:$0xff] %v14854_v34  ;;  %v4158_v26 = vadd.f32 %v4111_v43, %v4028_v24  ;;  %v18442_v24 = vld [vmem:[#allocation263_spill] sm:$0xff] }
 0x49f   : > { %v4716_v56 = vpop.f32.mrf.mxu1  ;;  %v4194_v25 = vadd.f32 %v14441_v7, %v4158_v26 }
 0x4a0   : > { %v14857_v3 = vadd.f32 %v4716_v56, %v14720_v51  ;;  %v18443_v56 = vld [vmem:[#allocation259_spill] sm:$0xff] }
 0x4a1   : > { %8832 = vrot.lane.b32.xlu2 %v4194_v25, %s10110_s23  ;;  %v18444_v25 = vld [vmem:[#allocation256_spill] sm:$0xff] }
 0x4a2   : > { %v4113_v49 = vpop.f32.mrf.mxu3  ;;  %v3983_v6 = vpop.f32.mrf.mxu2 }
 0x4a3   : > { %v4029_v1 = vadd.f32 %v3983_v6, %v18438_v5  ;;  %v8805_v40 = vpop.permute.xlu0 %8804 }
 0x4a4   : > { %v14866_v30 = vsel %vm2152_vm9, %v18439_v44, %v8805_v40 }
 0x4a5   : > { %v14861_v27 = vpop.f32.mrf.mxu0  ;;  %18440 = vst [vmem:[#allocation145_spill] sm:$0xff] %v14866_v30  ;;  %v4159_v43 = vadd.f32 %v4113_v49, %v4029_v1  ;;  %v18445_v1 = vld [vmem:[#allocation70_spill] sm:$0xff] }
 0x4a6   : > { %9567 = vmatmul.msk.bf16.gmra.mxu3 %vm2152_vm9, %v18443_v56 }
 0x4a7   : > { %v4719_v32 = vpop.f32.mrf.mxu1  ;;  %v4195_v26 = vadd.f32 %v14441_v7, %v4159_v43  ;;  %9551 = vmatmul.msk.bf16.gmra.mxu2 %vm2152_vm9, %v18444_v25 }
 0x4a8   : > { %v14869_v51 = vadd.f32 %v4719_v32, %v14732_v41  ;;  %9587 = vmatmul.msk.bf16.gmra.mxu0 %vm2152_vm9, %v18442_v24 }
 0x4a9   : > { %8834 = vrot.lane.b32.xlu0 %v4195_v26, %s10110_s23 }
 0x4aa   : > { %18441 = vst [vmem:[#allocation76_spill] sm:$0xff] %v14869_v51  ;;  %9598 = vmatmul.msk.bf16.gmra.mxu1 %vm2152_vm9, %v18288_v61  ;;  %v4116_v6 = vpop.f32.mrf.mxu3  ;;  %v3986_v44 = vpop.f32.mrf.mxu2  ;;  %v18448_v51 = vld [vmem:[#allocation98_spill] sm:$0xff] }
 0x4ab   : > { %v4030_v5 = vadd.f32 %v3986_v44, %v14305_v45  ;;  %v8807_v49 = vpop.permute.xlu1 %8806 }
 0x4ac   : > { %v14886_v40 = vsel %vm2152_vm9, %v18445_v1, %v8807_v49 }
 0x4ad   : > { %v14881_v41 = vpop.f32.mrf.mxu0  ;;  %18446 = vst [vmem:[#allocation219_spill] sm:$0xff] %v14886_v40  ;;  %v4160_v43 = vadd.f32 %v4116_v6, %v4030_v5  ;;  %v18451_v5 = vld [vmem:[#allocation266_spill] sm:$0xff] }
 0x4af   : > { %v4721_v32 = vpop.f32.mrf.mxu1  ;;  %v4196_v61 = vadd.f32 %v14441_v7, %v4160_v43 }
 0x4b0   : > { %v14889_v34 = vadd.f32 %v4721_v32, %v14751_v47  ;;  %v18452_v32 = vld [vmem:[#allocation265_spill] sm:$0xff] }
 0x4b1   : > { %8836 = vrot.lane.b32.xlu1 %v4196_v61, %s10110_s23  ;;  %v18453_v61 = vld [vmem:[#allocation260_spill] sm:$0xff] }
 0x4b2   : > { %18447 = vst [vmem:[#allocation171_spill] sm:$0xff] %v14889_v34  ;;  %v4118_v26 = vpop.f32.mrf.mxu3  ;;  %v3988_v30 = vpop.f32.mrf.mxu2 }
 0x4b3   : > { %v4031_v45 = vadd.f32 %v3988_v30, %v14329_v52  ;;  %v8815_v44 = vpop.permute.xlu2 %8814 }
 0x4b4   : > { %v14898_v49 = vsel %vm2152_vm9, %v18448_v51, %v8815_v44 }
 0x4b5   : > { %v14893_v24 = vpop.f32.mrf.mxu0  ;;  %18449 = vst [vmem:[#allocation152_spill] sm:$0xff] %v14898_v49  ;;  %v4161_v6 = vadd.f32 %v4118_v26, %v4031_v45  ;;  %v18454_v45 = vld [vmem:[#allocation84_spill] sm:$0xff] }
 0x4b6   : > { %9568 = vmatmul.msk.bf16.gmra.mxu3 %vm2152_vm9, %v18452_v32 }
 0x4b7   : > { %v4724_v1 = vpop.f32.mrf.mxu1  ;;  %v4197_v43 = vadd.f32 %v14441_v7, %v4161_v6  ;;  %9552 = vmatmul.msk.bf16.gmra.mxu2 %vm2152_vm9, %v18453_v61 }
 0x4b8   : > { %v14901_v47 = vadd.f32 %v4724_v1, %v14765_v54  ;;  %9588 = vmatmul.msk.bf16.gmra.mxu0 %vm2152_vm9, %v18451_v5 }
 0x4b9   : > { %8838 = vrot.lane.b32.xlu2 %v4197_v43, %s10110_s23 }
 0x4ba   : > { %18450 = vst [vmem:[#allocation103_spill] sm:$0xff] %v14901_v47  ;;  %9599 = vmatmul.msk.bf16.gmra.mxu1 %vm2152_vm9, %v18302_v60  ;;  %v4121_v52 = vpop.f32.mrf.mxu3  ;;  %v3991_v30 = vpop.f32.mrf.mxu2  ;;  %v18457_v47 = vld [vmem:[#allocation96_spill] sm:$0xff] }
 0x4bb   : > { %v4032_v51 = vadd.f32 %v3991_v30, %v14361_v8  ;;  %v8811_v26 = vpop.permute.xlu0 %8810 }
 0x4bc   : > { %v14918_v44 = vsel %vm2152_vm9, %v18454_v45, %v8811_v26 }
 0x4bd   : > { %v14913_v54 = vpop.f32.mrf.mxu0  ;;  %18455 = vst [vmem:[#allocation220_spill] sm:$0xff] %v14918_v44  ;;  %v4162_v6 = vadd.f32 %v4121_v52, %v4032_v51  ;;  %v18460_v51 = vld [vmem:[#allocation79_spill] sm:$0xff] }
 0x4bf   : > { %v4726_v1 = vpop.f32.mrf.mxu1  ;;  %v4198_v60 = vadd.f32 %v14441_v7, %v4162_v6 }
 0x4c0   : > { %v14921_v49 = vadd.f32 %v4726_v1, %v14785_v59  ;;  %v18461_v1 = vld [vmem:[#allocation133_spill] sm:$0xff] }
 0x4c1   : > { %8840 = vrot.lane.b32.xlu0 %v4198_v60, %s10110_s23  ;;  %v18462_v60 = vld [vmem:[#allocation151_spill] sm:$0xff] }
 0x4c2   : > { %18456 = vst [vmem:[#allocation252_spill] sm:$0xff] %v14921_v49  ;;  %v4123_v43 = vpop.f32.mrf.mxu3  ;;  %v3993_v40 = vpop.f32.mrf.mxu2  ;;  %v18467_v49 = vld [vmem:[#allocation111_spill] sm:$0xff] }
 0x4c3   : > { %v4033_v8 = vadd.f32 %v3993_v40, %v14379_v9  ;;  %v8813_v30 = vpop.permute.xlu1 %8812  ;;  %v18463_v9 = vld [vmem:[#allocation258_spill] sm:$0xff] }
 0x4c4   : > { %v14930_v26 = vsel %vm2152_vm9, %v18457_v47, %v8813_v30  ;;  %v18464_v30 = vld [vmem:[#allocation127_spill] sm:$0xff] }
 0x4c5   : > { %v14925_v5 = vpop.f32.mrf.mxu0  ;;  %18458 = vst [vmem:[#allocation176_spill] sm:$0xff] %v14930_v26  ;;  %v4163_v52 = vadd.f32 %v4123_v43, %v4033_v8 }
 0x4c6   : > { %9569 = vmatmul.msk.bf16.gmra.mxu3 %vm2152_vm9, %v18461_v1 }
 0x4c7   : > { %v4729_v45 = vpop.f32.mrf.mxu1  ;;  %v4199_v6 = vadd.f32 %v14441_v7, %v4163_v52  ;;  %9553 = vmatmul.msk.bf16.gmra.mxu2 %vm2152_vm9, %v18462_v60  ;;  %v18490_v60 = vld [vmem:[#allocation185_spill] sm:$0xff] }
 0x4c8   : > { %v14933_v59 = vadd.f32 %v4729_v45, %v14797_v31  ;;  %9589 = vmatmul.msk.bf16.gmra.mxu0 %vm2152_vm9, %v18460_v51 }
 0x4c9   : > { %8842 = vrot.lane.b32.xlu1 %v4199_v6, %s10110_s23 }
 0x4ca   : > { %18459 = vst [vmem:[#allocation137_spill] sm:$0xff] %v14933_v59  ;;  %9600 = vmatmul.msk.bf16.gmra.mxu1 %vm2152_vm9, %v18463_v9  ;;  %v4126_v40 = vpop.f32.mrf.mxu3  ;;  %v3996_v47 = vpop.f32.mrf.mxu2 }
 0x4cb   : > { %v4034_v43 = vadd.f32 %v3996_v47, %v14410_v2  ;;  %v8821_v8 = vpop.permute.xlu2 %8820 }
 0x4cc   : > { %v14950_v45 = vsel %vm2152_vm9, %v18464_v30, %v8821_v8 }
 0x4cd   : > { %v14945_v31 = vpop.f32.mrf.mxu0  ;;  %18465 = vst [vmem:[#allocation223_spill] sm:$0xff] %v14950_v45  ;;  %v4164_v26 = vadd.f32 %v4126_v40, %v4034_v43  ;;  %v18470_v43 = vld [vmem:[#allocation179_spill] sm:$0xff] }
 0x4cf   : > { %v4731_v52 = vpop.f32.mrf.mxu1  ;;  %v4200_v9 = vadd.f32 %v14441_v7, %v4164_v26  ;;  %v18471_v26 = vld [vmem:[#allocation189_spill] sm:$0xff] }
 0x4d0   : > { %v14953_v44 = vadd.f32 %v4731_v52, %v14817_v17 }
 0x4d1   : > { %8844 = vrot.lane.b32.xlu2 %v4200_v9, %s10110_s23  ;;  %v18472_v9 = vld [vmem:[#allocation134_spill] sm:$0xff] }
 0x4d2   : > { %18466 = vst [vmem:[#allocation253_spill] sm:$0xff] %v14953_v44  ;;  %v4128_v6 = vpop.f32.mrf.mxu3  ;;  %v3998_v51 = vpop.f32.mrf.mxu2 }
 0x4d3   : > { %v4035_v2 = vadd.f32 %v3998_v51, %v14435_v48  ;;  %v8817_v47 = vpop.permute.xlu0 %8816 }
 0x4d4   : > { %v14962_v8 = vsel %vm2152_vm9, %v18467_v49, %v8817_v47 }
 0x4d5   : > { %v14957_v59 = vpop.f32.mrf.mxu0  ;;  %18468 = vst [vmem:[#allocation270_spill] sm:$0xff] %v14962_v8  ;;  %v4165_v40 = vadd.f32 %v4128_v6, %v4035_v2  ;;  %v18473_v2 = vld [vmem:[#allocation128_spill] sm:$0xff] }
 0x4d6   : > { %9570 = vmatmul.msk.bf16.gmra.mxu3 %vm2152_vm9, %v18471_v26 }
 0x4d7   : > { %v4734_v30 = vpop.f32.mrf.mxu1  ;;  %v4201_v52 = vadd.f32 %v14441_v7, %v4165_v40  ;;  %9554 = vmatmul.msk.bf16.gmra.mxu2 %vm2152_vm9, %v18472_v9 }
 0x4d8   : > { %v14965_v17 = vadd.f32 %v4734_v30, %v14829_v57  ;;  %9590 = vmatmul.msk.bf16.gmra.mxu0 %vm2152_vm9, %v18470_v43 }
 0x4d9   : > { %8846 = vrot.lane.b32.xlu0 %v4201_v52, %s10110_s23 }
 0x4da   : > { %18469 = vst [vmem:[#allocation147_spill] sm:$0xff] %v14965_v17  ;;  %9601 = vmatmul.msk.bf16.gmra.mxu1 %vm2152_vm9, %v18325_v15  ;;  %v4131_v48 = vpop.f32.mrf.mxu3  ;;  %v4001_v49 = vpop.f32.mrf.mxu2  ;;  %v18476_v17 = vld [vmem:[#allocation148_spill] sm:$0xff] }
 0x4db   : > { %v4036_v51 = vadd.f32 %v4001_v49, %v14460_v12  ;;  %v8819_v6 = vpop.permute.xlu1 %8818 }
 0x4dc   : > { %v14982_v47 = vsel %vm2152_vm9, %v18473_v2, %v8819_v6 }
 0x4dd   : > { %v14977_v57 = vpop.f32.mrf.mxu0  ;;  %18474 = vst [vmem:[#allocation267_spill] sm:$0xff] %v14982_v47  ;;  %v4166_v40 = vadd.f32 %v4131_v48, %v4036_v51  ;;  %v18478_v51 = vld [vmem:[#allocation155_spill] sm:$0xff] }
 0x4df   : > { %v4736_v30 = vpop.f32.mrf.mxu1  ;;  %v4202_v15 = vadd.f32 %v14441_v7, %v4166_v40  ;;  %v18480_v40 = vld [vmem:[#allocation168_spill] sm:$0xff] }
 0x4e0   : > { %v14985_v45 = vadd.f32 %v4736_v30, %v14849_v4  ;;  %v18479_v4 = vld [vmem:[#allocation170_spill] sm:$0xff] }
 0x4e1   : > { %8848 = vrot.lane.b32.xlu1 %v4202_v15, %s10110_s23 }
 0x4e2   : > { %18475 = vst [vmem:[#allocation167_spill] sm:$0xff] %v14985_v45  ;;  %v4133_v52 = vpop.f32.mrf.mxu3  ;;  %v4003_v8 = vpop.f32.mrf.mxu2  ;;  %v18483_v45 = vld [vmem:[#allocation143_spill] sm:$0xff] }
 0x4e3   : > { %v4037_v12 = vadd.f32 %v4003_v8, %v14486_v62  ;;  %v8827_v49 = vpop.permute.xlu2 %8826 }
 0x4e4   : > { %v14994_v6 = vsel %vm2152_vm9, %v18476_v17, %v8827_v49 }
 0x4e5   : > { %v14989_v43 = vpop.f32.mrf.mxu0  ;;  %18477 = vst [vmem:[#allocation156_spill] sm:$0xff] %v14994_v6  ;;  %v4167_v48 = vadd.f32 %v4133_v52, %v4037_v12  ;;  %v18481_v12 = vld [vmem:[#allocation8_spill] sm:$0xff] }
 0x4e6   : > { %9571 = vmatmul.msk.bf16.gmra.mxu3 %vm2152_vm9, %v18479_v4 }
 0x4e7   : > { %v5605_v2 = vpop.f32.mrf.mxu1  ;;  %v4203_v30 = vadd.f32 %v14441_v7, %v4167_v48  ;;  %9555 = vmatmul.msk.bf16.gmra.mxu2 %vm2152_vm9, %v18480_v40 }
 0x4e8   : > { %9591 = vmatmul.msk.bf16.gmra.mxu0 %vm2152_vm9, %v18478_v51 }
 0x4e9   : > { %8850 = vrot.lane.b32.xlu2 %v4203_v30, %s10110_s23 }
 0x4ea   : > { %9602 = vmatmul.msk.bf16.gmra.mxu1 %vm2152_vm9, %v18335_v14  ;;  %v5183_v62 = vpop.f32.mrf.mxu3  ;;  %v4905_v8 = vpop.f32.mrf.mxu2 }
 0x4eb   : > { %v4985_v15 = vadd.f32 %v4905_v8, %v14418_v39  ;;  %v8823_v52 = vpop.permute.xlu0 %8822  ;;  %v18485_v8 = vld [vmem:[#allocation183_spill] sm:$0xff] }
 0x4ec   : > { %v15011_v49 = vsel %vm2152_vm9, %v18481_v12, %v8823_v52  ;;  %v18486_v52 = vld [vmem:[#allocation161_spill] sm:$0xff] }
 0x4ed   : > { %v15006_v17 = vpop.f32.mrf.mxu0  ;;  %18482 = vst [vmem:[#allocation160_spill] sm:$0xff] %v15011_v49  ;;  %v5263_v48 = vadd.f32 %v5183_v62, %v4985_v15  ;;  %v18487_v62 = vld [vmem:[#allocation230_spill] sm:$0xff] }
 0x4ef   : > { %v5607_v7 = vpop.f32.mrf.mxu1 }
 0x4f2   : > { %v5185_v6 = vpop.f32.mrf.mxu3  ;;  %v4907_v47 = vpop.f32.mrf.mxu2 }
 0x4f3   : > { %v4986_v14 = vadd.f32 %v4907_v47, %v14448_v50  ;;  %v8825_v30 = vpop.permute.xlu1 %8824 }
 0x4f4   : > { %v15018_v40 = vsel %vm2152_vm9, %v18483_v45, %v8825_v30 }
 0x4f5   : > { %v15013_v51 = vpop.f32.mrf.mxu0  ;;  %18484 = vst [vmem:[#allocation221_spill] sm:$0xff] %v15018_v40  ;;  %v5264_v39 = vadd.f32 %v5185_v6, %v4986_v14  ;;  %v18488_v6 = vld [vmem:[#allocation196_spill] sm:$0xff] }
 0x4f6   : > { %9572 = vmatmul.msk.bf16.gmra.mxu3 %vm2152_vm9, %v18486_v52  ;;  %v18492_v52 = vld [vmem:[#allocation276_spill] sm:$0xff] }
 0x4f7   : > { %v5610_v44 = vpop.f32.mrf.mxu1  ;;  %9556 = vmatmul.msk.bf16.gmra.mxu2 %vm2152_vm9, %v18487_v62 }
 0x4f8   : > { %9592 = vmatmul.msk.bf16.gmra.mxu0 %vm2152_vm9, %v18485_v8 }
 0x4fa   : > { %9603 = vmatmul.msk.bf16.gmra.mxu1 %vm2152_vm9, %v18344_v42  ;;  %v5188_v50 = vpop.f32.mrf.mxu3  ;;  %v4910_v47 = vpop.f32.mrf.mxu2 }
 0x4fb   : > { %v4987_v45 = vadd.f32 %v4910_v47, %v14468_v22  ;;  %v8833_v12 = vpop.permute.xlu2 %8832  ;;  %v5549_v22 = vadd.f32 %v14861_v27, %v5263_v48  ;;  %v18496_v48 = vld [vmem:[#allocation186_spill] sm:$0xff] }
 0x4fc   : > { %v15033_v14 = vsel %vm2152_vm9, %v18488_v6, %v8833_v12  ;;  %v18493_v12 = vld [vmem:[#allocation269_spill] sm:$0xff] }
 0x4fd   : > { %v15028_v15 = vpop.f32.mrf.mxu0  ;;  %18489 = vst [vmem:[#allocation261_spill] sm:$0xff] %v15033_v14  ;;  %v5265_v40 = vadd.f32 %v5188_v50, %v4987_v45  ;;  %v18494_v50 = vld [vmem:[#allocation172_spill] sm:$0xff] }
 0x4ff   : > { %v5612_v30 = vpop.f32.mrf.mxu1 }
 0x502   : > { %v5190_v49 = vpop.f32.mrf.mxu3  ;;  %v4912_v8 = vpop.f32.mrf.mxu2 }
 0x503   : > { %v4988_v62 = vadd.f32 %v4912_v8, %v14495_v33  ;;  %v8829_v42 = vpop.permute.xlu0 %8828  ;;  %v15051_v8 = vadd.f32 %v5605_v2, %v5549_v22 }
 0x504   : > { %v15040_v34 = vsel %vm2152_vm9, %v18490_v60, %v8829_v42  ;;  %v5550_v42 = vadd.f32 %v14881_v41, %v5264_v39  ;;  %v18501_v41 = vld [vmem:[#allocation203_spill] sm:$0xff] }
 0x505   : > { %v15035_v9 = vpop.f32.mrf.mxu0  ;;  %18491 = vst [vmem:[#allocation7_spill] sm:$0xff] %v15040_v34  ;;  %v5266_v47 = vadd.f32 %v5190_v49, %v4988_v62 }
 0x506   : > { %9573 = vmatmul.msk.bf16.gmra.mxu3 %vm2152_vm9, %v18493_v12  ;;  %18495 = vst [vmem:[#allocation34_spill] sm:$0xff] %v15051_v8  ;;  %v18498_v8 = vld [vmem:[#allocation197_spill] sm:$0xff] }
 0x507   : > { %v5615_v61 = vpop.f32.mrf.mxu1  ;;  %9557 = vmatmul.msk.bf16.gmra.mxu2 %vm2152_vm9, %v18494_v50 }
 0x508   : > { %9593 = vmatmul.msk.bf16.gmra.mxu0 %vm2152_vm9, %v18492_v52  ;;  %v15061_v52 = vadd.f32 %v5607_v7, %v5550_v42  ;;  %v18502_v7 = vld [vmem:[#allocation271_spill] sm:$0xff]  ;;  %v5552_v42 = vadd.f32 %v14913_v54, %v5266_v47  ;;  %v18507_v54 = vld [vmem:[#allocation273_spill] sm:$0xff] }
 0x50a   : > { %9604 = vmatmul.msk.bf16.gmra.mxu1 %vm2152_vm9, %v18354_v10  ;;  %v5193_v33 = vpop.f32.mrf.mxu3  ;;  %v4915_v60 = vpop.f32.mrf.mxu2 }
 0x50b   : > { %v4989_v27 = vadd.f32 %v4915_v60, %v14513_v11  ;;  %v8831_v49 = vpop.permute.xlu1 %8830 }
 0x50c   : > { %v15058_v62 = vsel %vm2152_vm9, %v18496_v48, %v8831_v49  ;;  %v5551_v49 = vadd.f32 %v14893_v24, %v5265_v40  ;;  %v18503_v40 = vld [vmem:[#allocation198_spill] sm:$0xff] }
 0x50d   : > { %v15053_v45 = vpop.f32.mrf.mxu0  ;;  %18497 = vst [vmem:[#allocation262_spill] sm:$0xff] %v15058_v62  ;;  %v5267_v14 = vadd.f32 %v5193_v33, %v4989_v27  ;;  %v18500_v62 = vld [vmem:[#allocation274_spill] sm:$0xff] }
 0x50e   : > { %v15079_v39 = vadd.f32 %v5610_v44, %v5551_v49 }
 0x50f   : > { %v5617_v6 = vpop.f32.mrf.mxu1 }
 0x512   : > { %v5195_v34 = vpop.f32.mrf.mxu3  ;;  %v4917_v10 = vpop.f32.mrf.mxu2 }
 0x513   : > { %v4990_v22 = vadd.f32 %v4917_v10, %v14534_v0  ;;  %v8839_v50 = vpop.permute.xlu2 %8838 }
 0x514   : > { %v15068_v11 = vsel %vm2152_vm9, %v18498_v8, %v8839_v50 }
 0x515   : > { %v15063_v2 = vpop.f32.mrf.mxu0  ;;  %18499 = vst [vmem:[#allocation4_spill] sm:$0xff] %v15068_v11  ;;  %v5268_v48 = vadd.f32 %v5195_v34, %v4990_v22  ;;  %v15089_v11 = vadd.f32 %v5612_v30, %v5552_v42  ;;  %v18508_v30 = vld [vmem:[#allocation272_spill] sm:$0xff] }
 0x516   : > { %9574 = vmatmul.msk.bf16.gmra.mxu3 %vm2152_vm9, %v18501_v41 }
 0x517   : > { %v5620_v60 = vpop.f32.mrf.mxu1  ;;  %9558 = vmatmul.msk.bf16.gmra.mxu2 %vm2152_vm9, %v18502_v7  ;;  %v18505_v7 = vld [vmem:[#allocation201_spill] sm:$0xff]  ;;  %v5554_v42 = vadd.f32 %v14945_v31, %v5268_v48  ;;  %v18513_v31 = vld [vmem:[#allocation191_spill] sm:$0xff] }
 0x518   : > { %9594 = vmatmul.msk.bf16.gmra.mxu0 %vm2152_vm9, %v18500_v62 }
 0x51a   : > { %9605 = vmatmul.msk.bf16.gmra.mxu1 %vm2152_vm9, %v18362_v55  ;;  %v5198_v0 = vpop.f32.mrf.mxu3  ;;  %v4920_v50 = vpop.f32.mrf.mxu2 }
 0x51b   : > { %v4991_v34 = vadd.f32 %v4920_v50, %v14554_v19  ;;  %v8835_v24 = vpop.permute.xlu0 %8834 }
 0x51c   : > { %v15086_v8 = vsel %vm2152_vm9, %v18503_v40, %v8835_v24  ;;  %v5553_v24 = vadd.f32 %v14925_v5, %v5267_v14 }
 0x51d   : > { %v15081_v33 = vpop.f32.mrf.mxu0  ;;  %18504 = vst [vmem:[#allocation109_spill] sm:$0xff] %v15086_v8  ;;  %v5269_v10 = vadd.f32 %v5198_v0, %v4991_v34  ;;  %v18509_v0 = vld [vmem:[#allocation67_spill] sm:$0xff]  ;;  %v18511_v8 = vld [vmem:[#allocation202_spill] sm:$0xff] }
 0x51e   : > { %v15107_v47 = vadd.f32 %v5615_v61, %v5553_v24 }
 0x51f   : > { %v5622_v27 = vpop.f32.mrf.mxu1 }
 0x522   : > { %v5200_v22 = vpop.f32.mrf.mxu3  ;;  %v4922_v55 = vpop.f32.mrf.mxu2 }
 0x523   : > { %v4992_v49 = vadd.f32 %v4922_v55, %v14574_v18  ;;  %v8837_v62 = vpop.permute.xlu1 %8836 }
 0x524   : > { %v15096_v19 = vsel %vm2152_vm9, %v18505_v7, %v8837_v62 }
 0x525   : > { %v15091_v44 = vpop.f32.mrf.mxu0  ;;  %18506 = vst [vmem:[#allocation173_spill] sm:$0xff] %v15096_v19  ;;  %v5270_v40 = vadd.f32 %v5200_v22, %v4992_v49  ;;  %v15117_v49 = vadd.f32 %v5617_v6, %v5554_v42  ;;  %v18514_v6 = vld [vmem:[#allocation275_spill] sm:$0xff] }
 0x526   : > { %9575 = vmatmul.msk.bf16.gmra.mxu3 %vm2152_vm9, %v18507_v54 }
 0x527   : > { %v5625_v50 = vpop.f32.mrf.mxu1  ;;  %9559 = vmatmul.msk.bf16.gmra.mxu2 %vm2152_vm9, %v18508_v30  ;;  %v5556_v42 = vadd.f32 %v14977_v57, %v5270_v40  ;;  %v18518_v57 = vld [vmem:[#allocation222_spill] sm:$0xff] }
 0x528   : > { %9642 = vmatmul.msk.bf16.vlgmr.msra.gmra.mxu0 %vm2152_vm9, %v18403_v20 }
 0x52a   : > { %9606 = vmatmul.msk.bf16.gmra.mxu1 %vm2152_vm9, %v18372_v37  ;;  %v5203_v18 = vpop.f32.mrf.mxu3  ;;  %v4925_v62 = vpop.f32.mrf.mxu2 }
 0x52b   : > { %v4993_v5 = vadd.f32 %v4925_v62, %v14588_v21  ;;  %v8845_v14 = vpop.permute.xlu2 %8844 }
 0x52c   : > { %v15114_v20 = vsel %vm2152_vm9, %v18509_v0, %v8845_v14  ;;  %v5555_v14 = vadd.f32 %v14957_v59, %v5269_v10 }
 0x52d   : > { %v15109_v7 = vpop.f32.mrf.mxu0  ;;  %18510 = vst [vmem:[#allocation15_spill] sm:$0xff] %v15114_v20  ;;  %v5271_v22 = vadd.f32 %v5203_v18, %v4993_v5  ;;  %v18515_v18 = vld [vmem:[#allocation51_spill] sm:$0xff] }
 0x52e   : > { %v15137_v48 = vadd.f32 %v5620_v60, %v5555_v14 }
 0x52f   : > { %v5627_v34 = vpop.f32.mrf.mxu1 }
 0x532   : > { %v5205_v55 = vpop.f32.mrf.mxu3  ;;  %v4927_v37 = vpop.f32.mrf.mxu2 }
 0x533   : > { %v4994_v24 = vadd.f32 %v4927_v37, %v14608_v38  ;;  %v8841_v19 = vpop.permute.xlu0 %8840 }
 0x534   : > { %v15124_v21 = vsel %vm2152_vm9, %v18511_v8, %v8841_v19 }
 0x535   : > { %v15119_v61 = vpop.f32.mrf.mxu0  ;;  %18512 = vst [vmem:[#allocation227_spill] sm:$0xff] %v15124_v21  ;;  %v5272_v0 = vadd.f32 %v5205_v55, %v4994_v24  ;;  %v15147_v24 = vadd.f32 %v5622_v27, %v5556_v42 }
 0x536   : > { %9576 = vmatmul.msk.bf16.gmra.mxu3 %vm2152_vm9, %v18513_v31 }
 0x537   : > { %v15126_v62 = vpop.f32.mrf.mxu1  ;;  %9560 = vmatmul.msk.bf16.gmra.mxu2 %vm2152_vm9, %v18514_v6 }
 0x538   : > { %9643 = vmatmul.msk.bf16.gmra.mxu0 %vm2152_vm9, %v18422_v29 }
 0x53a   : > { %9607 = vmatmul.msk.bf16.gmra.mxu1 %vm2152_vm9, %v18381_v36  ;;  %v5208_v38 = vpop.f32.mrf.mxu3  ;;  %v4930_v8 = vpop.f32.mrf.mxu2 }
 0x53b   : > { %v4995_v59 = vadd.f32 %v4930_v8, %v14620_v46  ;;  %v8843_v10 = vpop.permute.xlu1 %8842  ;;  %v5557_v46 = vadd.f32 %v14989_v43, %v5271_v22  ;;  %v4214_v43 = vld [vmem:[%s17057_s7 + $0xa] sm:$0x1] }
 0x53c   : > { %v15144_v29 = vsel %vm2152_vm9, %v18515_v18, %v8843_v10  ;;  %v18517_v10 = vld [vmem:[#allocation277_spill] sm:$0xff]  ;;  %v6370_v40 = vsel %vm2201_vm8, %v4214_v43, 0 }
 0x53d   : > { %v15139_v19 = vpop.f32.mrf.mxu0  ;;  %18516 = vst [vmem:[#allocation154_spill] sm:$0xff] %v15144_v29  ;;  %v5273_v55 = vadd.f32 %v5208_v38, %v4995_v59  ;;  %6379 = vmatpush.bf16.msra.mxu2 %v6370_v40 }
 0x53f   : > { %v5632_v5 = vpop.f32.mrf.mxu1 }
 0x542   : > { %v5210_v37 = vpop.f32.mrf.mxu3  ;;  %v4932_v36 = vpop.f32.mrf.mxu2 }
 0x543   : > { %v4996_v14 = vadd.f32 %v4932_v36, %v14642_v35  ;;  %v4213_v35 = vld [vmem:[%s17057_s7 + $0x9] sm:$0x1]  ;;  %v5558_v36 = vadd.f32 %v15006_v17, %v5272_v0  ;;  %v18519_v0 = vld [vmem:[#allocation57_spill] sm:$0xff] }
 0x544   : > { %v6134_v27 = vsel %vm2201_vm8, %v4213_v35, 0  ;;  %v4216_v35 = vld [vmem:[%s17057_s7 + $0xc] sm:$0x1] }
 0x545   : > { %v15149_v60 = vpop.f32.mrf.mxu0  ;;  %v5274_v8 = vadd.f32 %v5210_v37, %v4996_v14  ;;  %6143 = vmatpush.bf16.msra.mxu1 %v6134_v27  ;;  %v6778_v43 = vsel %vm2201_vm8, %v4216_v35, 0  ;;  %v18523_v35 = vld [vmem:[#allocation72_spill] sm:$0xff] }
 0x546   : > { %9577 = vmatmul.msk.bf16.gmra.mxu3 %vm2152_vm9, %v18517_v10  ;;  %6787 = vmatpush.bf16.msrb.mxu0 %v6778_v43 }
 0x547   : > { %v5635_v20 = vpop.f32.mrf.mxu1  ;;  %9561 = vmatmul.msk.bf16.gmra.mxu2 %vm2152_vm9, %v18518_v57 }
 0x548   : > { %9644 = vmatmul.msk.bf16.gmra.mxu0 %vm2152_vm9, %v18434_v16  ;;  %v4215_v16 = vld [vmem:[%s17057_s7 + $0xb] sm:$0x1] }
 0x549   : > { %v6574_v22 = vsel %vm2201_vm8, %v4215_v16, 0 }
 0x54a   : > { %9608 = vmatmul.msk.bf16.gmra.mxu1 %vm2152_vm9, %v18393_v13  ;;  %v5213_v38 = vpop.f32.mrf.mxu3  ;;  %v15173_v13 = vadd.f32 %v5625_v50, %v5557_v46  ;;  %v4935_v59 = vpop.f32.mrf.mxu2  ;;  %6583 = vmatpush.bf16.msra.mxu3 %v6574_v22  ;;  %v15183_v50 = vadd.f32 %v5627_v34, %v5558_v36  ;;  %v5559_v22 = vadd.f32 %v15013_v51, %v5273_v55  ;;  %v18522_v34 = vld [vmem:[#allocation278_spill] sm:$0xff] }
 0x54b   : > { %v4997_v42 = vadd.f32 %v4935_v59, %v14654_v23 }
 0x54d   : > { %v15175_v18 = vpop.f32.mrf.mxu0  ;;  %v5275_v14 = vadd.f32 %v5213_v38, %v4997_v42  ;;  %v18520_v38 = vld [vmem:[#allocation210_spill] sm:$0xff]  ;;  %v18521_v42 = vld [vmem:[#allocation119_spill] sm:$0xff] }
 0x54e   : > { %v5589_v59 = vpack.c.bf16 %v18520_v38, %v18519_v0 }
 0x54f   : > { %v5637_v37 = vpop.f32.mrf.mxu1 }
 0x552   : > { %v5215_v16 = vpop.f32.mrf.mxu3  ;;  %v4937_v46 = vpop.f32.mrf.mxu2 }
 0x553   : > { %v4998_v40 = vadd.f32 %v4937_v46, %v14688_v28  ;;  %v15199_v28 = vadd.f32 %v15126_v62, %v5559_v22  ;;  %v5561_v62 = vadd.f32 %v15035_v9, %v5275_v14  ;;  %v18527_v9 = vld [vmem:[#allocation37_spill] sm:$0xff] }
 0x555   : > { %v15185_v27 = vpop.f32.mrf.mxu0  ;;  %v5276_v17 = vadd.f32 %v5215_v16, %v4998_v40 }
 0x556   : > { %9578 = vmatmul.msk.bf16.gmra.mxu3 %vm2152_vm9, %v18521_v42 }
 0x557   : > { %v5640_v23 = vpop.f32.mrf.mxu1  ;;  %9562 = vmatmul.msk.bf16.gmra.mxu2 %vm2152_vm9, %v18522_v34 }
 0x558   : > { %9645 = vmatmul.msk.bf16.gmra.mxu0 %vm2152_vm9, %v18443_v56  ;;  %v5560_v56 = vadd.f32 %v15028_v15, %v5274_v8  ;;  %v18525_v15 = vld [vmem:[#allocation49_spill] sm:$0xff] }
 0x55a   : > { %9609 = vmatmul.msk.bf16.gmra.mxu1 %vm2152_vm9, %v5589_v59  ;;  %v5218_v36 = vpop.f32.mrf.mxu3  ;;  %v4940_v51 = vpop.f32.mrf.mxu2  ;;  %v15205_v0 = vadd.f32 %v5632_v5, %v5560_v56  ;;  %v18524_v59 = vld [vmem:[#allocation135_spill] sm:$0xff]  ;;  %v18526_v5 = vld [vmem:[#allocation140_spill] sm:$0xff] }
 0x55b   : > { %v4999_v43 = vadd.f32 %v4940_v51, %v18523_v35 }
 0x55d   : > { %v15201_v55 = vpop.f32.mrf.mxu0  ;;  %v5277_v46 = vadd.f32 %v5218_v36, %v4999_v43  ;;  %v15219_v36 = vadd.f32 %v5635_v20, %v5561_v62 }
 0x55f   : > { %v5642_v16 = vpop.f32.mrf.mxu1  ;;  %v5563_v20 = vadd.f32 %v15063_v2, %v5277_v46  ;;  %v18531_v2 = vld [vmem:[#allocation149_spill] sm:$0xff] }
 0x562   : > { %v5220_v40 = vpop.f32.mrf.mxu3  ;;  %v4942_v38 = vpop.f32.mrf.mxu2 }
 0x563   : > { %v5000_v21 = vadd.f32 %v4942_v38, %v18524_v59 }
 0x565   : > { %v15207_v29 = vpop.f32.mrf.mxu0  ;;  %v5278_v22 = vadd.f32 %v5220_v40, %v5000_v21 }
 0x566   : > { %9626 = vmatmul.msk.bf16.vlgmr.msrb.gmra.mxu3 %vm2152_vm9, %v18404_v53 }
 0x567   : > { %v5645_v34 = vpop.f32.mrf.mxu1  ;;  %9610 = vmatmul.msk.bf16.vlgmr.msrb.gmra.mxu2 %vm2152_vm9, %v18525_v15 }
 0x568   : > { %9646 = vmatmul.msk.bf16.gmra.mxu0 %vm2152_vm9, %v18452_v32  ;;  %v5562_v32 = vadd.f32 %v15053_v45, %v5276_v17  ;;  %v18529_v45 = vld [vmem:[#allocation83_spill] sm:$0xff] }
 0x56a   : > { %9658 = vmatmul.msk.bf16.vlgmr.msra.gmra.mxu1 %vm2152_vm9, %v18526_v5  ;;  %v5223_v8 = vpop.f32.mrf.mxu3  ;;  %v4945_v51 = vpop.f32.mrf.mxu2  ;;  %v15225_v53 = vadd.f32 %v5637_v37, %v5562_v32  ;;  %v18528_v5 = vld [vmem:[#allocation244_spill] sm:$0xff]  ;;  %v18530_v37 = vld [vmem:[#allocation243_spill] sm:$0xff] }
 0x56b   : > { %v5001_v21 = vadd.f32 %v4945_v51, %v18527_v9 }
 0x56d   : > { %v15221_v35 = vpop.f32.mrf.mxu0  ;;  %v5279_v43 = vadd.f32 %v5223_v8, %v5001_v21  ;;  %v15239_v8 = vadd.f32 %v5640_v23, %v5563_v20 }
 0x56f   : > { %v5647_v14 = vpop.f32.mrf.mxu1  ;;  %v5565_v23 = vadd.f32 %v15091_v44, %v5279_v43  ;;  %v18535_v44 = vld [vmem:[#allocation112_spill] sm:$0xff] }
 0x572   : > { %v5225_v56 = vpop.f32.mrf.mxu3  ;;  %v4947_v40 = vpop.f32.mrf.mxu2 }
 0x573   : > { %v5002_v59 = vadd.f32 %v4947_v40, %v14761_v63 }
 0x575   : > { %v15227_v38 = vpop.f32.mrf.mxu0  ;;  %v5280_v62 = vadd.f32 %v5225_v56, %v5002_v59 }
 0x576   : > { %9627 = vmatmul.msk.bf16.gmra.mxu3 %vm2152_vm9, %v18528_v5  ;;  %v18532_v5 = vld [vmem:[#allocation101_spill] sm:$0xff] }
 0x577   : > { %v5650_v15 = vpop.f32.mrf.mxu1  ;;  %9611 = vmatmul.msk.bf16.gmra.mxu2 %vm2152_vm9, %v18529_v45 }
 0x578   : > { %9647 = vmatmul.msk.bf16.gmra.mxu0 %vm2152_vm9, %v18461_v1  ;;  %v5564_v1 = vadd.f32 %v15081_v33, %v5278_v22  ;;  %v18533_v33 = vld [vmem:[#allocation108_spill] sm:$0xff] }
 0x57a   : > { %9659 = vmatmul.msk.bf16.gmra.mxu1 %vm2152_vm9, %v18530_v37  ;;  %v5228_v17 = vpop.f32.mrf.mxu3  ;;  %v4950_v63 = vpop.f32.mrf.mxu2  ;;  %v15245_v56 = vadd.f32 %v5642_v16, %v5564_v1  ;;  %v18534_v16 = vld [vmem:[#allocation71_spill] sm:$0xff] }
 0x57b   : > { %v5003_v46 = vadd.f32 %v4950_v63, %v18531_v2 }
 0x57d   : > { %v15241_v51 = vpop.f32.mrf.mxu0  ;;  %v5281_v21 = vadd.f32 %v5228_v17, %v5003_v46  ;;  %v15259_v17 = vadd.f32 %v5645_v34, %v5565_v23 }
 0x57f   : > { %v5652_v9 = vpop.f32.mrf.mxu1  ;;  %v5567_v34 = vadd.f32 %v15119_v61, %v5281_v21  ;;  %v18539_v61 = vld [vmem:[#allocation146_spill] sm:$0xff] }
 0x582   : > { %v5230_v32 = vpop.f32.mrf.mxu3  ;;  %v4952_v40 = vpop.f32.mrf.mxu2 }
 0x583   : > { %v5004_v45 = vadd.f32 %v4952_v40, %v18532_v5 }
 0x585   : > { %v15247_v59 = vpop.f32.mrf.mxu0  ;;  %v5282_v20 = vadd.f32 %v5230_v32, %v5004_v45  ;;  %v18536_v45 = vld [vmem:[#allocation150_spill] sm:$0xff] }
 0x586   : > { %9628 = vmatmul.msk.bf16.gmra.mxu3 %vm2152_vm9, %v18435_v58 }
 0x587   : > { %v5655_v37 = vpop.f32.mrf.mxu1  ;;  %9612 = vmatmul.msk.bf16.gmra.mxu2 %vm2152_vm9, %v18533_v33 }
 0x588   : > { %9648 = vmatmul.msk.bf16.gmra.mxu0 %vm2152_vm9, %v18471_v26  ;;  %v5566_v26 = vadd.f32 %v15109_v7, %v5280_v62  ;;  %v18537_v7 = vld [vmem:[#allocation158_spill] sm:$0xff] }
 0x58a   : > { %9660 = vmatmul.msk.bf16.gmra.mxu1 %vm2152_vm9, %v18534_v16  ;;  %v5233_v22 = vpop.f32.mrf.mxu3  ;;  %v4955_v63 = vpop.f32.mrf.mxu2  ;;  %v15265_v58 = vadd.f32 %v5647_v14, %v5566_v26  ;;  %v18538_v14 = vld [vmem:[#allocation248_spill] sm:$0xff] }
 0x58b   : > { %v5005_v43 = vadd.f32 %v4955_v63, %v18535_v44 }
 0x58d   : > { %v15261_v2 = vpop.f32.mrf.mxu0  ;;  %v5283_v1 = vadd.f32 %v5233_v22, %v5005_v43  ;;  %v15279_v22 = vadd.f32 %v5650_v15, %v5567_v34 }
 0x58f   : > { %v5657_v46 = vpop.f32.mrf.mxu1  ;;  %v5569_v15 = vadd.f32 %v15149_v60, %v5283_v1  ;;  %v18545_v60 = vld [vmem:[#allocation76_spill] sm:$0xff] }
 0x592   : > { %v5235_v32 = vpop.f32.mrf.mxu3  ;;  %v4957_v40 = vpop.f32.mrf.mxu2 }
 0x593   : > { %v5006_v33 = vadd.f32 %v4957_v40, %v18536_v45 }
 0x595   : > { %v15267_v5 = vpop.f32.mrf.mxu0  ;;  %v5284_v23 = vadd.f32 %v5235_v32, %v5006_v33 }
 0x596   : > { %9629 = vmatmul.msk.bf16.gmra.mxu3 %vm2152_vm9, %v18444_v25 }
 0x597   : > { %v5660_v16 = vpop.f32.mrf.mxu1  ;;  %9613 = vmatmul.msk.bf16.gmra.mxu2 %vm2152_vm9, %v18537_v7 }
 0x598   : > { %9649 = vmatmul.msk.bf16.gmra.mxu0 %vm2152_vm9, %v18479_v4  ;;  %v5568_v4 = vadd.f32 %v15139_v19, %v5282_v20  ;;  %v18543_v19 = vld [vmem:[#allocation187_spill] sm:$0xff] }
 0x59a   : > { %9661 = vmatmul.msk.bf16.gmra.mxu1 %vm2152_vm9, %v18538_v14  ;;  %v5238_v62 = vpop.f32.mrf.mxu3  ;;  %v4960_v63 = vpop.f32.mrf.mxu2  ;;  %v15285_v25 = vadd.f32 %v5652_v9, %v5568_v4  ;;  %v18541_v14 = vld [vmem:[#allocation161_spill] sm:$0xff]  ;;  %v18544_v9 = vld [vmem:[#allocation255_spill] sm:$0xff]  ;;  %v5570_v4 = vadd.f32 %v15175_v18, %v5284_v23 }
 0x59b   : > { %v5007_v21 = vadd.f32 %v4960_v63, %v18539_v61  ;;  %v18542_v63 = vld [vmem:[#allocation260_spill] sm:$0xff]  ;;  %v18549_v18 = vld [vmem:[#allocation165_spill] sm:$0xff] }
 0x59c   : > { %18540 = vst [vmem:[#allocation174_spill] sm:$0xff] %v15285_v25 }
 0x59d   : > { %v15281_v44 = vpop.f32.mrf.mxu0  ;;  %v5285_v26 = vadd.f32 %v5238_v62, %v5007_v21  ;;  %v15299_v62 = vadd.f32 %v5655_v37, %v5569_v15 }
 0x59f   : > { %v5662_v43 = vpop.f32.mrf.mxu1  ;;  %v5571_v37 = vadd.f32 %v15185_v27, %v5285_v26  ;;  %v18551_v27 = vld [vmem:[#allocation103_spill] sm:$0xff] }
 0x5a2   : > { %v5240_v32 = vpop.f32.mrf.mxu3  ;;  %v4962_v40 = vpop.f32.mrf.mxu2 }
 0x5a3   : > { %v5008_v33 = vadd.f32 %v4962_v40, %v14857_v3 }
 0x5a5   : > { %v15287_v45 = vpop.f32.mrf.mxu0  ;;  %v5286_v34 = vadd.f32 %v5240_v32, %v5008_v33  ;;  %v15305_v33 = vadd.f32 %v5657_v46, %v5570_v4  ;;  %v18550_v46 = vld [vmem:[#allocation249_spill] sm:$0xff] }
 0x5a6   : > { %9630 = vmatmul.msk.bf16.gmra.mxu3 %vm2152_vm9, %v18542_v63 }
 0x5a7   : > { %v5665_v7 = vpop.f32.mrf.mxu1  ;;  %9614 = vmatmul.msk.bf16.gmra.mxu2 %vm2152_vm9, %v18543_v19  ;;  %18546 = vst [vmem:[#allocation180_spill] sm:$0xff] %v15305_v33  ;;  %v18547_v19 = vld [vmem:[#allocation171_spill] sm:$0xff] }
 0x5a8   : > { %9650 = vmatmul.msk.bf16.gmra.mxu0 %vm2152_vm9, %v18541_v14 }
 0x5aa   : > { %9662 = vmatmul.msk.bf16.gmra.mxu1 %vm2152_vm9, %v18544_v9  ;;  %v5243_v20 = vpop.f32.mrf.mxu3  ;;  %v4965_v3 = vpop.f32.mrf.mxu2 }
 0x5ab   : > { %v5009_v1 = vadd.f32 %v4965_v3, %v18545_v60  ;;  %v18548_v3 = vld [vmem:[#allocation151_spill] sm:$0xff] }
 0x5ad   : > { %v15301_v61 = vpop.f32.mrf.mxu0  ;;  %v5287_v32 = vadd.f32 %v5243_v20, %v5009_v1  ;;  %v15319_v20 = vadd.f32 %v5660_v16, %v5571_v37 }
 0x5af   : > { %v5667_v21 = vpop.f32.mrf.mxu1  ;;  %v5573_v16 = vadd.f32 %v15207_v29, %v5287_v32  ;;  %v18557_v29 = vld [vmem:[#allocation137_spill] sm:$0xff] }
 0x5b2   : > { %v5245_v40 = vpop.f32.mrf.mxu3  ;;  %v4967_v14 = vpop.f32.mrf.mxu2 }
 0x5b3   : > { %v5010_v9 = vadd.f32 %v4967_v14, %v18547_v19 }
 0x5b5   : > { %v15307_v63 = vpop.f32.mrf.mxu0  ;;  %v5288_v15 = vadd.f32 %v5245_v40, %v5010_v9 }
 0x5b6   : > { %9631 = vmatmul.msk.bf16.gmra.mxu3 %vm2152_vm9, %v18548_v3 }
 0x5b7   : > { %v5670_v25 = vpop.f32.mrf.mxu1  ;;  %9615 = vmatmul.msk.bf16.gmra.mxu2 %vm2152_vm9, %v18549_v18  ;;  %v18553_v18 = vld [vmem:[#allocation252_spill] sm:$0xff] }
 0x5b8   : > { %9651 = vmatmul.msk.bf16.gmra.mxu0 %vm2152_vm9, %v18493_v12  ;;  %v5572_v12 = vadd.f32 %v15201_v55, %v5286_v34  ;;  %v18555_v55 = vld [vmem:[#allocation99_spill] sm:$0xff] }
 0x5ba   : > { %9663 = vmatmul.msk.bf16.gmra.mxu1 %vm2152_vm9, %v18550_v46  ;;  %v5248_v23 = vpop.f32.mrf.mxu3  ;;  %v4970_v60 = vpop.f32.mrf.mxu2  ;;  %v15325_v19 = vadd.f32 %v5662_v43, %v5572_v12  ;;  %v18556_v43 = vld [vmem:[#allocation10_spill] sm:$0xff] }
 0x5bb   : > { %v5011_v26 = vadd.f32 %v4970_v60, %v18551_v27  ;;  %v18554_v60 = vld [vmem:[#allocation134_spill] sm:$0xff] }
 0x5bc   : > { %18552 = vst [vmem:[#allocation106_spill] sm:$0xff] %v15325_v19 }
 0x5bd   : > { %v15321_v1 = vpop.f32.mrf.mxu0  ;;  %v5289_v40 = vadd.f32 %v5248_v23, %v5011_v26  ;;  %v15339_v23 = vadd.f32 %v5665_v7, %v5573_v16 }
 0x5bf   : > { %v5672_v4 = vpop.f32.mrf.mxu1  ;;  %v5575_v7 = vadd.f32 %v15227_v38, %v5289_v40  ;;  %v18563_v38 = vld [vmem:[#allocation147_spill] sm:$0xff] }
 0x5c2   : > { %v5250_v14 = vpop.f32.mrf.mxu3  ;;  %v4972_v9 = vpop.f32.mrf.mxu2 }
 0x5c3   : > { %v5012_v46 = vadd.f32 %v4972_v9, %v18553_v18 }
 0x5c5   : > { %v15327_v3 = vpop.f32.mrf.mxu0  ;;  %v5290_v37 = vadd.f32 %v5250_v14, %v5012_v46 }
 0x5c6   : > { %9632 = vmatmul.msk.bf16.gmra.mxu3 %vm2152_vm9, %v18554_v60 }
 0x5c7   : > { %v5675_v33 = vpop.f32.mrf.mxu1  ;;  %9616 = vmatmul.msk.bf16.gmra.mxu2 %vm2152_vm9, %v18555_v55  ;;  %v18559_v55 = vld [vmem:[#allocation253_spill] sm:$0xff] }
 0x5c8   : > { %9652 = vmatmul.msk.bf16.gmra.mxu0 %vm2152_vm9, %v18501_v41  ;;  %v5574_v41 = vadd.f32 %v15221_v35, %v5288_v15  ;;  %v18561_v35 = vld [vmem:[#allocation199_spill] sm:$0xff] }
 0x5ca   : > { %9664 = vmatmul.msk.bf16.gmra.mxu1 %vm2152_vm9, %v18556_v43  ;;  %v5253_v34 = vpop.f32.mrf.mxu3  ;;  %v4975_v27 = vpop.f32.mrf.mxu2  ;;  %v15345_v18 = vadd.f32 %v5667_v21, %v5574_v41  ;;  %v18562_v21 = vld [vmem:[#allocation263_spill] sm:$0xff] }
 0x5cb   : > { %v5013_v32 = vadd.f32 %v4975_v27, %v18557_v29  ;;  %v18560_v27 = vld [vmem:[#allocation168_spill] sm:$0xff] }
 0x5cc   : > { %18558 = vst [vmem:[#allocation19_spill] sm:$0xff] %v15345_v18 }
 0x5cd   : > { %v15341_v26 = vpop.f32.mrf.mxu0  ;;  %v5291_v14 = vadd.f32 %v5253_v34, %v5013_v32  ;;  %v15359_v34 = vadd.f32 %v5670_v25, %v5575_v7 }
 0x5cf   : > { %v5677_v12 = vpop.f32.mrf.mxu1  ;;  %v5577_v25 = vadd.f32 %v15247_v59, %v5291_v14  ;;  %v18568_v59 = vld [vmem:[#allocation34_spill] sm:$0xff] }
 0x5d2   : > { %v5255_v9 = vpop.f32.mrf.mxu3  ;;  %v4977_v46 = vpop.f32.mrf.mxu2 }
 0x5d3   : > { %v5014_v43 = vadd.f32 %v4977_v46, %v18559_v55 }
 0x5d5   : > { %v15347_v60 = vpop.f32.mrf.mxu0  ;;  %v5292_v16 = vadd.f32 %v5255_v9, %v5014_v43 }
 0x5d6   : > { %9633 = vmatmul.msk.bf16.gmra.mxu3 %vm2152_vm9, %v18560_v27 }
 0x5d7   : > { %v5680_v19 = vpop.f32.mrf.mxu1  ;;  %9617 = vmatmul.msk.bf16.gmra.mxu2 %vm2152_vm9, %v18561_v35  ;;  %v18564_v35 = vld [vmem:[#allocation167_spill] sm:$0xff] }
 0x5d8   : > { %9653 = vmatmul.msk.bf16.gmra.mxu0 %vm2152_vm9, %v18507_v54  ;;  %v5576_v54 = vadd.f32 %v15241_v51, %v5290_v37  ;;  %v18566_v51 = vld [vmem:[#allocation246_spill] sm:$0xff] }
 0x5da   : > { %9665 = vmatmul.msk.bf16.gmra.mxu1 %vm2152_vm9, %v18562_v21  ;;  %v5258_v15 = vpop.f32.mrf.mxu3  ;;  %v4980_v29 = vpop.f32.mrf.mxu2  ;;  %v15365_v55 = vadd.f32 %v5672_v4, %v5576_v54  ;;  %v18567_v4 = vld [vmem:[#allocation266_spill] sm:$0xff] }
 0x5db   : > { %v5015_v40 = vadd.f32 %v4980_v29, %v18563_v38  ;;  %v18565_v29 = vld [vmem:[#allocation230_spill] sm:$0xff] }
 0x5dd   : > { %v15361_v32 = vpop.f32.mrf.mxu0  ;;  %v5293_v9 = vadd.f32 %v5258_v15, %v5015_v40  ;;  %v15379_v15 = vadd.f32 %v5675_v33, %v5577_v25 }
 0x5df   : > { %v5682_v41 = vpop.f32.mrf.mxu1  ;;  %v5579_v33 = vadd.f32 %v15267_v5, %v5293_v9 }
 0x5e2   : > { %v5260_v46 = vpop.f32.mrf.mxu3  ;;  %v4982_v43 = vpop.f32.mrf.mxu2 }
 0x5e3   : > { %v5016_v21 = vadd.f32 %v4982_v43, %v18564_v35 }
 0x5e5   : > { %v15367_v27 = vpop.f32.mrf.mxu0  ;;  %v5294_v7 = vadd.f32 %v5260_v46, %v5016_v21 }
 0x5e6   : > { %9634 = vmatmul.msk.bf16.gmra.mxu3 %vm2152_vm9, %v18565_v29 }
 0x5e7   : > { %v6145_v18 = vpop.f32.mrf.mxu1  ;;  %9618 = vmatmul.msk.bf16.gmra.mxu2 %vm2152_vm9, %v18566_v51 }
 0x5e8   : > { %9654 = vmatmul.msk.bf16.gmra.mxu0 %vm2152_vm9, %v18513_v31  ;;  %v5578_v31 = vadd.f32 %v15261_v2, %v5292_v16  ;;  %v18570_v2 = vld [vmem:[#allocation74_spill] sm:$0xff] }
 0x5ea   : > { %9666 = vmatmul.msk.bf16.gmra.mxu1 %vm2152_vm9, %v18567_v4  ;;  %v5875_v37 = vpop.f32.mrf.mxu3  ;;  %v5740_v38 = vpop.f32.mrf.mxu2  ;;  %v15385_v35 = vadd.f32 %v5677_v12, %v5578_v31  ;;  %v18571_v12 = vld [vmem:[#allocation79_spill] sm:$0xff] }
 0x5eb   : > { %v5820_v14 = vadd.f32 %v5740_v38, %v18568_v59  ;;  %v18569_v38 = vld [vmem:[#allocation172_spill] sm:$0xff] }
 0x5ed   : > { %v15381_v40 = vpop.f32.mrf.mxu0  ;;  %v5955_v46 = vadd.f32 %v5875_v37, %v5820_v14  ;;  %v15399_v37 = vadd.f32 %v5680_v19, %v5579_v33 }
 0x5ef   : > { %v6147_v54 = vpop.f32.mrf.mxu1  ;;  %v6090_v19 = vadd.f32 %v15287_v45, %v5955_v46 }
 0x5f2   : > { %v5877_v43 = vpop.f32.mrf.mxu3  ;;  %v5742_v21 = vpop.f32.mrf.mxu2 }
 0x5f3   : > { %v5821_v51 = vadd.f32 %v5742_v21, %v15061_v52 }
 0x5f5   : > { %v15387_v29 = vpop.f32.mrf.mxu0  ;;  %v5956_v25 = vadd.f32 %v5877_v43, %v5821_v51 }
 0x5f6   : > { %9635 = vmatmul.msk.bf16.gmra.mxu3 %vm2152_vm9, %v18569_v38 }
 0x5f7   : > { %v6150_v4 = vpop.f32.mrf.mxu1  ;;  %9619 = vmatmul.msk.bf16.gmra.mxu2 %vm2152_vm9, %v18570_v2 }
 0x5f8   : > { %9655 = vmatmul.msk.bf16.gmra.mxu0 %vm2152_vm9, %v18517_v10  ;;  %v5580_v10 = vadd.f32 %v15281_v44, %v5294_v7  ;;  %v18573_v44 = vld [vmem:[#allocation29_spill] sm:$0xff] }
 0x5fa   : > { %9667 = vmatmul.msk.bf16.gmra.mxu1 %vm2152_vm9, %v18571_v12  ;;  %v5880_v16 = vpop.f32.mrf.mxu3  ;;  %v5745_v52 = vpop.f32.mrf.mxu2  ;;  %v15405_v43 = vadd.f32 %v5682_v41, %v5580_v10  ;;  %v18574_v41 = vld [vmem:[#allocation179_spill] sm:$0xff]  ;;  %v15419_v12 = vadd.f32 %v6145_v18, %v6090_v19 }
 0x5fb   : > { %v5822_v5 = vadd.f32 %v5745_v52, %v15079_v39  ;;  %v18572_v39 = vld [vmem:[#allocation271_spill] sm:$0xff] }
 0x5fc   : > { %18575 = vst [vmem:[#allocation182_spill] sm:$0xff] %v15419_v12 }
 0x5fd   : > { %v15401_v59 = vpop.f32.mrf.mxu0  ;;  %v5957_v14 = vadd.f32 %v5880_v16, %v5822_v5 }
 0x5ff   : > { %v6152_v9 = vpop.f32.mrf.mxu1  ;;  %v6092_v18 = vadd.f32 %v15307_v63, %v5957_v14 }
 0x602   : > { %v5882_v31 = vpop.f32.mrf.mxu3  ;;  %v5747_v21 = vpop.f32.mrf.mxu2 }
 0x603   : > { %v5823_v38 = vadd.f32 %v5747_v21, %v15089_v11 }
 0x605   : > { %v15407_v51 = vpop.f32.mrf.mxu0  ;;  %v5958_v33 = vadd.f32 %v5882_v31, %v5823_v38 }
 0x606   : > { %9636 = vmatmul.msk.bf16.gmra.mxu3 %vm2152_vm9, %v18572_v39 }
 0x607   : > { %v6155_v2 = vpop.f32.mrf.mxu1  ;;  %9620 = vmatmul.msk.bf16.gmra.mxu2 %vm2152_vm9, %v18573_v44  ;;  %v18576_v44 = vld [vmem:[#allocation28_spill] sm:$0xff] }
 0x608   : > { %9656 = vmatmul.msk.bf16.gmra.mxu0 %vm2152_vm9, %v18521_v42  ;;  %v6091_v42 = vadd.f32 %v15301_v61, %v5956_v25  ;;  %v18580_v61 = vld [vmem:[#allocation155_spill] sm:$0xff] }
 0x60a   : > { %9668 = vmatmul.msk.bf16.gmra.mxu1 %vm2152_vm9, %v18574_v41  ;;  %v5885_v7 = vpop.f32.mrf.mxu3  ;;  %v5750_v11 = vpop.f32.mrf.mxu2  ;;  %v15425_v10 = vadd.f32 %v6147_v54, %v6091_v42  ;;  %v18577_v41 = vld [vmem:[#allocation159_spill] sm:$0xff] }
 0x60b   : > { %v5824_v45 = vadd.f32 %v5750_v11, %v15107_v47  ;;  %v18578_v12 = vpack.c.bf16 %v18576_v44, %v18577_v41  ;;  %v18579_v47 = vld [vmem:[#allocation234_spill] sm:$0xff]  ;;  %v18581_v44 = vld [vmem:[#allocation193_spill] sm:$0xff] }
 0x60d   : > { %v15421_v16 = vpop.f32.mrf.mxu0  ;;  %v5959_v52 = vadd.f32 %v5885_v7, %v5824_v45 }
 0x60f   : > { %v6157_v46 = vpop.f32.mrf.mxu1 }
 0x612   : > { %v5887_v5 = vpop.f32.mrf.mxu3  ;;  %v5752_v31 = vpop.f32.mrf.mxu2 }
 0x613   : > { %v5825_v38 = vadd.f32 %v5752_v31, %v15117_v49  ;;  %v15441_v49 = vadd.f32 %v6150_v4, %v6092_v18  ;;  %v6094_v4 = vadd.f32 %v15327_v3, %v5959_v52 }
 0x615   : > { %v15427_v21 = vpop.f32.mrf.mxu0  ;;  %v5960_v19 = vadd.f32 %v5887_v5, %v5825_v38 }
 0x616   : > { %9637 = vmatmul.msk.bf16.gmra.mxu3 %vm2152_vm9, %v18508_v30 }
 0x617   : > { %v6160_v39 = vpop.f32.mrf.mxu1  ;;  %9621 = vmatmul.msk.bf16.gmra.mxu2 %vm2152_vm9, %v18579_v47  ;;  %v6095_v47 = vadd.f32 %v15341_v26, %v5960_v19  ;;  %v18586_v26 = vld [vmem:[#allocation276_spill] sm:$0xff] }
 0x618   : > { %9657 = vmatmul.msk.bf16.gmra.mxu0 %vm2152_vm9, %v18578_v12  ;;  %v6093_v12 = vadd.f32 %v15321_v1, %v5958_v33  ;;  %v18583_v1 = vld [vmem:[#allocation183_spill] sm:$0xff]  ;;  %v15461_v33 = vadd.f32 %v6155_v2, %v6094_v4 }
 0x61a   : > { %9669 = vmatmul.msk.bf16.gmra.mxu1 %vm2152_vm9, %v18580_v61  ;;  %v5890_v54 = vpop.f32.mrf.mxu3  ;;  %v5755_v25 = vpop.f32.mrf.mxu2  ;;  %v15447_v30 = vadd.f32 %v6152_v9, %v6093_v12 }
 0x61b   : > { %v5826_v14 = vadd.f32 %v5755_v25, %v15137_v48  ;;  %v18582_v48 = vld [vmem:[#allocation64_spill] sm:$0xff] }
 0x61d   : > { %v15443_v63 = vpop.f32.mrf.mxu0  ;;  %v5961_v11 = vadd.f32 %v5890_v54, %v5826_v14 }
 0x61f   : > { %v6162_v7 = vpop.f32.mrf.mxu1  ;;  %v6096_v2 = vadd.f32 %v15347_v60, %v5961_v11 }
 0x621   : > { %v15481_v19 = vadd.f32 %v6160_v39, %v6096_v2 }
 0x622   : > { %v5892_v45 = vpop.f32.mrf.mxu3  ;;  %v5757_v42 = vpop.f32.mrf.mxu2 }
 0x623   : > { %v5827_v31 = vadd.f32 %v5757_v42, %v15147_v24 }
 0x625   : > { %v15449_v5 = vpop.f32.mrf.mxu0  ;;  %v5962_v18 = vadd.f32 %v5892_v45, %v5827_v31  ;;  %v18584_v31 = vld [vmem:[#allocation177_spill] sm:$0xff] }
 0x626   : > { %9638 = vmatmul.msk.bf16.gmra.mxu3 %vm2152_vm9, %v18514_v6  ;;  %v15467_v6 = vadd.f32 %v6157_v46, %v6095_v47 }
 0x627   : > { %v6165_v38 = vpop.f32.mrf.mxu1  ;;  %9622 = vmatmul.msk.bf16.gmra.mxu2 %vm2152_vm9, %v18582_v48 }
 0x628   : > { %9706 = vmatmul.msk.bf16.vlgmr.msrb.gmra.mxu0 %vm2152_vm9, %v18581_v44  ;;  %v6097_v44 = vadd.f32 %v15361_v32, %v5962_v18  ;;  %v18589_v32 = vld [vmem:[#allocation69_spill] sm:$0xff]  ;;  %v4219_v18 = vld [vmem:[%s17057_s7 + $0xf] sm:$0x1] }
 0x629   : > { %v7460_v2 = vsel %vm2201_vm8, %v4219_v18, 0  ;;  %v18592_v18 = vld [vmem:[#allocation279_spill] sm:$0xff] }
 0x62a   : > { %9670 = vmatmul.msk.bf16.gmra.mxu1 %vm2152_vm9, %v18583_v1  ;;  %v5895_v9 = vpop.f32.mrf.mxu3  ;;  %v5760_v24 = vpop.f32.mrf.mxu2  ;;  %7469 = vmatpush.bf16.msrb.mxu3 %v7460_v2  ;;  %v18595_v2 = vld [vmem:[#allocation53_spill] sm:$0xff] }
 0x62b   : > { %v5828_v3 = vadd.f32 %v5760_v24, %v15173_v13  ;;  %v18585_v13 = vld [vmem:[#allocation224_spill] sm:$0xff] }
 0x62d   : > { %v15463_v41 = vpop.f32.mrf.mxu0  ;;  %v5963_v61 = vadd.f32 %v5895_v9, %v5828_v3 }
 0x62f   : > { %v6167_v52 = vpop.f32.mrf.mxu1  ;;  %v6098_v39 = vadd.f32 %v15367_v27, %v5963_v61  ;;  %v4218_v27 = vld [vmem:[%s17057_s7 + $0xe] sm:$0x1] }
 0x632   : > { %v5897_v54 = vpop.f32.mrf.mxu3  ;;  %v5762_v25 = vpop.f32.mrf.mxu2 }
 0x633   : > { %v5829_v12 = vadd.f32 %v5762_v25, %v15183_v50  ;;  %v18587_v25 = vld [vmem:[#allocation17_spill] sm:$0xff] }
 0x635   : > { %v15469_v14 = vpop.f32.mrf.mxu0  ;;  %v5964_v42 = vadd.f32 %v5897_v54, %v5829_v12  ;;  %v7330_v12 = vsel %vm2201_vm8, %v4218_v27, 0 }
 0x636   : > { %9639 = vmatmul.msk.bf16.gmra.mxu3 %vm2152_vm9, %v18518_v57  ;;  %v15487_v57 = vadd.f32 %v6162_v7, %v6097_v44  ;;  %v18590_v7 = vld [vmem:[#allocation274_spill] sm:$0xff]  ;;  %7339 = vmatpush.bf16.msrb.mxu2 %v7330_v12 }
 0x637   : > { %v6170_v45 = vpop.f32.mrf.mxu1  ;;  %9623 = vmatmul.msk.bf16.gmra.mxu2 %vm2152_vm9, %v18585_v13 }
 0x638   : > { %9707 = vmatmul.msk.bf16.gmra.mxu0 %vm2152_vm9, %v18584_v31 }
 0x63a   : > { %9671 = vmatmul.msk.bf16.gmra.mxu1 %vm2152_vm9, %v18586_v26  ;;  %v5900_v46 = vpop.f32.mrf.mxu3  ;;  %v5765_v50 = vpop.f32.mrf.mxu2  ;;  %v15513_v26 = vadd.f32 %v6165_v38, %v6098_v39 }
 0x63b   : > { %v5830_v60 = vadd.f32 %v5765_v50, %v15199_v28  ;;  %v18588_v28 = vld [vmem:[#allocation278_spill] sm:$0xff] }
 0x63d   : > { %v15483_v4 = vpop.f32.mrf.mxu0  ;;  %v5965_v48 = vadd.f32 %v5900_v46, %v5830_v60 }
 0x63f   : > { %v6172_v11 = vpop.f32.mrf.mxu1  ;;  %v6100_v27 = vadd.f32 %v15387_v29, %v5965_v48 }
 0x641   : > { %v15543_v48 = vadd.f32 %v6170_v45, %v6100_v27 }
 0x642   : > { %v5902_v1 = vpop.f32.mrf.mxu3  ;;  %v5767_v9 = vpop.f32.mrf.mxu2 }
 0x643   : > { %v5831_v3 = vadd.f32 %v5767_v9, %v15205_v0  ;;  %v4217_v0 = vld [vmem:[%s17057_s7 + $0xd] sm:$0x1] }
 0x644   : > { %v6982_v61 = vsel %vm2201_vm8, %v4217_v0, 0 }
 0x645   : > { %v15489_v24 = vpop.f32.mrf.mxu0  ;;  %v5966_v54 = vadd.f32 %v5902_v1, %v5831_v3  ;;  %6991 = vmatpush.bf16.msrb.mxu1 %v6982_v61  ;;  %v6099_v1 = vadd.f32 %v15381_v40, %v5964_v42  ;;  %v4220_v3 = vld [vmem:[%s17057_s7 + $0x10] sm:$0x1]  ;;  %v18591_v42 = vld [vmem:[#allocation30_spill] sm:$0xff] }
 0x646   : > { %9640 = vmatmul.msk.bf16.gmra.mxu3 %vm2152_vm9, %v18588_v28  ;;  %v7589_v28 = vsel %vm2201_vm8, %v4220_v3, 0  ;;  %v18593_v61 = vld [vmem:[#allocation18_spill] sm:$0xff] }
 0x647   : > { %v6175_v47 = vpop.f32.mrf.mxu1  ;;  %9624 = vmatmul.msk.bf16.gmra.mxu2 %vm2152_vm9, %v18589_v32  ;;  %7598 = vmatpush.bf16.msra.mxu0 %v7589_v28  ;;  %v15523_v38 = vadd.f32 %v6167_v52, %v6099_v1  ;;  %v18594_v12 = vpack.c.bf16 %v18592_v18, %v18593_v61  ;;  %v18596_v52 = vld [vmem:[#allocation23_spill] sm:$0xff] }
 0x648   : > { %9708 = vmatmul.msk.bf16.gmra.mxu0 %vm2152_vm9, %v18587_v25  ;;  %v18616_v25 = vld [vmem:[#allocation180_spill] sm:$0xff] }
 0x64a   : > { %9672 = vmatmul.msk.bf16.gmra.mxu1 %vm2152_vm9, %v18590_v7  ;;  %v5905_v13 = vpop.f32.mrf.mxu3  ;;  %v5770_v46 = vpop.f32.mrf.mxu2 }
 0x64b   : > { %v5832_v60 = vadd.f32 %v5770_v46, %v15219_v36  ;;  %v18598_v46 = vld [vmem:[#allocation6_spill] sm:$0xff] }
 0x64d   : > { %v15515_v50 = vpop.f32.mrf.mxu0  ;;  %v5967_v9 = vadd.f32 %v5905_v13, %v5832_v60  ;;  %v18597_v13 = vpack.c.bf16 %v18595_v2, %v18596_v52  ;;  %v18599_v60 = vld [vmem:[#allocation280_spill] sm:$0xff] }
 0x64f   : > { %v6177_v44 = vpop.f32.mrf.mxu1  ;;  %v6102_v45 = vadd.f32 %v15407_v51, %v5967_v9 }
 0x652   : > { %v5907_v32 = vpop.f32.mrf.mxu3  ;;  %v5772_v39 = vpop.f32.mrf.mxu2 }
 0x653   : > { %v5833_v0 = vadd.f32 %v5772_v39, %v15225_v53  ;;  %v18600_v53 = vpack.c.bf16 %v18598_v46, %v18599_v60  ;;  %v6101_v39 = vadd.f32 %v15401_v59, %v5966_v54  ;;  %v18601_v46 = vld [vmem:[#allocation56_spill] sm:$0xff]  ;;  %v15563_v60 = vadd.f32 %v6175_v47, %v6102_v45 }
 0x654   : > { %v18603_v59 = vld [vmem:[#allocation44_spill] sm:$0xff] }
 0x655   : > { %v15525_v7 = vpop.f32.mrf.mxu0  ;;  %v5968_v40 = vadd.f32 %v5907_v32, %v5833_v0  ;;  %v15549_v61 = vadd.f32 %v6172_v11, %v6101_v39  ;;  %v18604_v11 = vld [vmem:[#allocation181_spill] sm:$0xff] }
 0x656   : > { %9641 = vmatmul.msk.bf16.gmra.mxu3 %vm2152_vm9, %v18594_v12 }
 0x657   : > { %v6180_v36 = vpop.f32.mrf.mxu1  ;;  %9625 = vmatmul.msk.bf16.gmra.mxu2 %vm2152_vm9, %v18597_v13 }
 0x658   : > { %9709 = vmatmul.msk.bf16.gmra.mxu0 %vm2152_vm9, %v18591_v42  ;;  %v18610_v42 = vld [vmem:[#allocation107_spill] sm:$0xff] }
 0x65a   : > { %9673 = vmatmul.msk.bf16.gmra.mxu1 %vm2152_vm9, %v18600_v53  ;;  %v5910_v29 = vpop.f32.mrf.mxu3  ;;  %v5775_v1 = vpop.f32.mrf.mxu2 }
 0x65b   : > { %v5834_v28 = vadd.f32 %v5775_v1, %v15239_v8  ;;  %v18602_v8 = vld [vmem:[#allocation190_spill] sm:$0xff] }
 0x65d   : > { %v15545_v3 = vpop.f32.mrf.mxu0  ;;  %v5969_v0 = vadd.f32 %v5910_v29, %v5834_v28  ;;  %v6103_v29 = vadd.f32 %v15421_v16, %v5968_v40  ;;  %v18607_v16 = vld [vmem:[#allocation268_spill] sm:$0xff] }
 0x65f   : > { %v6182_v32 = vpop.f32.mrf.mxu1  ;;  %v15569_v39 = vadd.f32 %v6177_v44, %v6103_v29  ;;  %v6104_v47 = vadd.f32 %v15427_v21, %v5969_v0  ;;  %v18608_v44 = vld [vmem:[#allocation214_spill] sm:$0xff] }
 0x662   : > { %v5912_v18 = vpop.f32.mrf.mxu3  ;;  %v5777_v12 = vpop.f32.mrf.mxu2 }
 0x663   : > { %v5835_v52 = vadd.f32 %v5777_v12, %v15245_v56 }
 0x665   : > { %v15551_v2 = vpop.f32.mrf.mxu0  ;;  %v5970_v27 = vadd.f32 %v5912_v18, %v5835_v52 }
 0x666   : > { %9690 = vmatmul.msk.bf16.vlgmr.msra.gmra.mxu3 %vm2152_vm9, %v18602_v8 }
 0x667   : > { %v6185_v13 = vpop.f32.mrf.mxu1  ;;  %9674 = vmatmul.msk.bf16.vlgmr.msra.gmra.mxu2 %vm2152_vm9, %v18603_v59  ;;  %v18605_v59 = vld [vmem:[#allocation68_spill] sm:$0xff] }
 0x668   : > { %9710 = vmatmul.msk.bf16.gmra.mxu0 %vm2152_vm9, %v18601_v46 }
 0x66a   : > { %9722 = vmatmul.msk.bf16.vlgmr.msrb.gmra.mxu1 %vm2152_vm9, %v18604_v11  ;;  %v5915_v54 = vpop.f32.mrf.mxu3  ;;  %v5780_v56 = vpop.f32.mrf.mxu2  ;;  %v15583_v11 = vadd.f32 %v6180_v36, %v6104_v47 }
 0x66b   : > { %v5836_v51 = vadd.f32 %v5780_v56, %v15259_v17  ;;  %v18606_v17 = vld [vmem:[#allocation225_spill] sm:$0xff]  ;;  %v6105_v56 = vadd.f32 %v15443_v63, %v5970_v27  ;;  %v18612_v63 = vld [vmem:[#allocation11_spill] sm:$0xff] }
 0x66d   : > { %v15565_v53 = vpop.f32.mrf.mxu0  ;;  %v5971_v1 = vadd.f32 %v5915_v54, %v5836_v51 }
 0x66f   : > { %v6187_v9 = vpop.f32.mrf.mxu1  ;;  %v6106_v36 = vadd.f32 %v15449_v5, %v5971_v1 }
 0x672   : > { %v5917_v28 = vpop.f32.mrf.mxu3  ;;  %v5782_v18 = vpop.f32.mrf.mxu2 }
 0x673   : > { %v5837_v52 = vadd.f32 %v5782_v18, %v15265_v58 }
 0x675   : > { %v15571_v12 = vpop.f32.mrf.mxu0  ;;  %v5972_v45 = vadd.f32 %v5917_v28, %v5837_v52  ;;  %v15589_v28 = vadd.f32 %v6182_v32, %v6105_v56  ;;  %v18613_v32 = vld [vmem:[#allocation184_spill] sm:$0xff] }
 0x676   : > { %9691 = vmatmul.msk.bf16.gmra.mxu3 %vm2152_vm9, %v18606_v17 }
 0x677   : > { %v6190_v8 = vpop.f32.mrf.mxu1  ;;  %9675 = vmatmul.msk.bf16.gmra.mxu2 %vm2152_vm9, %v18607_v16 }
 0x678   : > { %9711 = vmatmul.msk.bf16.gmra.mxu0 %vm2152_vm9, %v18605_v59  ;;  %v18609_v59 = vld [vmem:[#allocation174_spill] sm:$0xff] }
 0x67a   : > { %9723 = vmatmul.msk.bf16.gmra.mxu1 %vm2152_vm9, %v18608_v44  ;;  %v5920_v40 = vpop.f32.mrf.mxu3  ;;  %v5785_v58 = vpop.f32.mrf.mxu2 }
 0x67b   : > { %v5838_v21 = vadd.f32 %v5785_v58, %v15279_v22  ;;  %v18611_v22 = vld [vmem:[#allocation114_spill] sm:$0xff] }
 0x67d   : > { %v15585_v54 = vpop.f32.mrf.mxu0  ;;  %v5973_v51 = vadd.f32 %v5920_v40, %v5838_v21  ;;  %v15603_v40 = vadd.f32 %v6185_v13, %v6106_v36 }
 0x67f   : > { %v6192_v0 = vpop.f32.mrf.mxu1  ;;  %18614 = vst [vmem:[#allocation264_spill] sm:$0xff] %v15603_v40  ;;  %v6108_v13 = vadd.f32 %v15469_v14, %v5973_v51  ;;  %v18617_v40 = vld [vmem:[#allocation97_spill] sm:$0xff] }
 0x682   : > { %v5922_v29 = vpop.f32.mrf.mxu3  ;;  %v5787_v18 = vpop.f32.mrf.mxu2 }
 0x683   : > { %v5839_v44 = vadd.f32 %v5787_v18, %v18609_v59 }
 0x685   : > { %v15591_v52 = vpop.f32.mrf.mxu0  ;;  %v5974_v47 = vadd.f32 %v5922_v29, %v5839_v44  ;;  %v6107_v44 = vadd.f32 %v15463_v41, %v5972_v45  ;;  %v18619_v41 = vld [vmem:[#allocation205_spill] sm:$0xff] }
 0x686   : > { %9692 = vmatmul.msk.bf16.gmra.mxu3 %vm2152_vm9, %v18611_v22 }
 0x687   : > { %v6195_v46 = vpop.f32.mrf.mxu1  ;;  %9676 = vmatmul.msk.bf16.gmra.mxu2 %vm2152_vm9, %v18612_v63  ;;  %v15609_v29 = vadd.f32 %v6187_v9, %v6107_v44  ;;  %v18620_v9 = vld [vmem:[#allocation204_spill] sm:$0xff] }
 0x688   : > { %9712 = vmatmul.msk.bf16.gmra.mxu0 %vm2152_vm9, %v18610_v42 }
 0x689   : > { %18615 = vst [vmem:[#allocation136_spill] sm:$0xff] %v15609_v29 }
 0x68a   : > { %9724 = vmatmul.msk.bf16.gmra.mxu1 %vm2152_vm9, %v18613_v32  ;;  %v5925_v27 = vpop.f32.mrf.mxu3  ;;  %v5790_v59 = vpop.f32.mrf.mxu2 }
 0x68b   : > { %v5840_v5 = vadd.f32 %v5790_v59, %v15299_v62  ;;  %v18618_v62 = vld [vmem:[#allocation281_spill] sm:$0xff] }
 0x68d   : > { %v15605_v58 = vpop.f32.mrf.mxu0  ;;  %v5975_v21 = vadd.f32 %v5925_v27, %v5840_v5  ;;  %v15623_v27 = vadd.f32 %v6190_v8, %v6108_v13 }
 0x68f   : > { %v6197_v1 = vpop.f32.mrf.mxu1  ;;  %18621 = vst [vmem:[#allocation2_spill] sm:$0xff] %v15623_v27  ;;  %v6110_v8 = vadd.f32 %v15489_v24, %v5975_v21  ;;  %v18624_v27 = vld [vmem:[#allocation94_spill] sm:$0xff] }
 0x692   : > { %v5927_v56 = vpop.f32.mrf.mxu3  ;;  %v5792_v18 = vpop.f32.mrf.mxu2 }
 0x693   : > { %v5841_v32 = vadd.f32 %v5792_v18, %v18616_v25 }
 0x695   : > { %v15611_v42 = vpop.f32.mrf.mxu0  ;;  %v5976_v36 = vadd.f32 %v5927_v56, %v5841_v32  ;;  %v6109_v32 = vadd.f32 %v15483_v4, %v5974_v47  ;;  %v18626_v4 = vld [vmem:[#allocation16_spill] sm:$0xff] }
 0x696   : > { %9693 = vmatmul.msk.bf16.gmra.mxu3 %vm2152_vm9, %v18618_v62 }
 0x697   : > { %v6200_v63 = vpop.f32.mrf.mxu1  ;;  %9677 = vmatmul.msk.bf16.gmra.mxu2 %vm2152_vm9, %v18619_v41  ;;  %v15629_v56 = vadd.f32 %v6192_v0, %v6109_v32  ;;  %v18623_v41 = vld [vmem:[#allocation106_spill] sm:$0xff] }
 0x698   : > { %9713 = vmatmul.msk.bf16.gmra.mxu0 %vm2152_vm9, %v18617_v40  ;;  %v18627_v0 = vld [vmem:[#allocation206_spill] sm:$0xff] }
 0x699   : > { %18622 = vst [vmem:[#allocation124_spill] sm:$0xff] %v15629_v56 }
 0x69a   : > { %9725 = vmatmul.msk.bf16.gmra.mxu1 %vm2152_vm9, %v18620_v9  ;;  %v5930_v45 = vpop.f32.mrf.mxu3  ;;  %v5795_v25 = vpop.f32.mrf.mxu2 }
 0x69b   : > { %v5842_v14 = vadd.f32 %v5795_v25, %v15319_v20  ;;  %v18625_v20 = vld [vmem:[#allocation100_spill] sm:$0xff] }
 0x69d   : > { %v15625_v59 = vpop.f32.mrf.mxu0  ;;  %v5977_v5 = vadd.f32 %v5930_v45, %v5842_v14  ;;  %v15643_v45 = vadd.f32 %v6195_v46, %v6110_v8 }
 0x69f   : > { %v6202_v51 = vpop.f32.mrf.mxu1  ;;  %18628 = vst [vmem:[#allocation13_spill] sm:$0xff] %v15643_v45  ;;  %v6112_v46 = vadd.f32 %v15525_v7, %v5977_v5  ;;  %v18630_v45 = vld [vmem:[#allocation78_spill] sm:$0xff] }
 0x6a2   : > { %v5932_v44 = vpop.f32.mrf.mxu3  ;;  %v5797_v18 = vpop.f32.mrf.mxu2 }
 0x6a3   : > { %v5843_v9 = vadd.f32 %v5797_v18, %v18623_v41 }
 0x6a5   : > { %v15631_v40 = vpop.f32.mrf.mxu0  ;;  %v5978_v13 = vadd.f32 %v5932_v44, %v5843_v9  ;;  %v6111_v9 = vadd.f32 %v15515_v50, %v5976_v36  ;;  %v18632_v50 = vld [vmem:[#allocation62_spill] sm:$0xff] }
 0x6a6   : > { %9694 = vmatmul.msk.bf16.gmra.mxu3 %vm2152_vm9, %v18625_v20 }
 0x6a7   : > { %v6205_v29 = vpop.f32.mrf.mxu1  ;;  %9678 = vmatmul.msk.bf16.gmra.mxu2 %vm2152_vm9, %v18626_v4  ;;  %v15649_v44 = vadd.f32 %v6197_v1, %v6111_v9  ;;  %v18629_v4 = vld [vmem:[#allocation19_spill] sm:$0xff]  ;;  %v18633_v1 = vld [vmem:[#allocation242_spill] sm:$0xff] }
 0x6a8   : > { %9714 = vmatmul.msk.bf16.gmra.mxu0 %vm2152_vm9, %v18624_v27 }
 0x6aa   : > { %9726 = vmatmul.msk.bf16.gmra.mxu1 %vm2152_vm9, %v18627_v0  ;;  %v5935_v47 = vpop.f32.mrf.mxu3  ;;  %v5800_v41 = vpop.f32.mrf.mxu2 }
 0x6ab   : > { %v5844_v24 = vadd.f32 %v5800_v41, %v15339_v23  ;;  %v18631_v23 = vld [vmem:[#allocation123_spill] sm:$0xff] }
 0x6ad   : > { %v15645_v25 = vpop.f32.mrf.mxu0  ;;  %v5979_v14 = vadd.f32 %v5935_v47, %v5844_v24  ;;  %v15663_v47 = vadd.f32 %v6200_v63, %v6112_v46 }
 0x6af   : > { %v6207_v21 = vpop.f32.mrf.mxu1  ;;  %18634 = vst [vmem:[#allocation89_spill] sm:$0xff] %v15663_v47  ;;  %v6114_v63 = vadd.f32 %v15551_v2, %v5979_v14  ;;  %v18635_v47 = vld [vmem:[#allocation144_spill] sm:$0xff] }
 0x6b2   : > { %v5937_v32 = vpop.f32.mrf.mxu3  ;;  %v5802_v18 = vpop.f32.mrf.mxu2 }
 0x6b3   : > { %v5845_v0 = vadd.f32 %v5802_v18, %v18629_v4 }
 0x6b5   : > { %v15651_v27 = vpop.f32.mrf.mxu0  ;;  %v5980_v8 = vadd.f32 %v5937_v32, %v5845_v0  ;;  %v6113_v0 = vadd.f32 %v15545_v3, %v5978_v13  ;;  %v18637_v3 = vld [vmem:[#allocation40_spill] sm:$0xff] }
 0x6b6   : > { %9695 = vmatmul.msk.bf16.gmra.mxu3 %vm2152_vm9, %v18631_v23 }
 0x6b7   : > { %v6210_v56 = vpop.f32.mrf.mxu1  ;;  %9679 = vmatmul.msk.bf16.gmra.mxu2 %vm2152_vm9, %v18632_v50  ;;  %v15669_v32 = vadd.f32 %v6202_v51, %v6113_v0  ;;  %v18638_v51 = vld [vmem:[#allocation216_spill] sm:$0xff] }
 0x6b8   : > { %9715 = vmatmul.msk.bf16.gmra.mxu0 %vm2152_vm9, %v18630_v45 }
 0x6ba   : > { %9727 = vmatmul.msk.bf16.gmra.mxu1 %vm2152_vm9, %v18633_v1  ;;  %v5940_v36 = vpop.f32.mrf.mxu3  ;;  %v5805_v4 = vpop.f32.mrf.mxu2 }
 0x6bb   : > { %v5846_v7 = vadd.f32 %v5805_v4, %v15359_v34  ;;  %v18636_v34 = vld [vmem:[#allocation66_spill] sm:$0xff] }
 0x6bd   : > { %v15665_v41 = vpop.f32.mrf.mxu0  ;;  %v5981_v24 = vadd.f32 %v5940_v36, %v5846_v7  ;;  %v15683_v36 = vadd.f32 %v6205_v29, %v6114_v63 }
 0x6bf   : > { %v6212_v5 = vpop.f32.mrf.mxu1  ;;  %18639 = vst [vmem:[#allocation48_spill] sm:$0xff] %v15683_v36  ;;  %v6116_v29 = vadd.f32 %v15571_v12, %v5981_v24  ;;  %v18640_v36 = vld [vmem:[#allocation95_spill] sm:$0xff] }
 0x6c2   : > { %v5942_v9 = vpop.f32.mrf.mxu3  ;;  %v5807_v18 = vpop.f32.mrf.mxu2 }
 0x6c3   : > { %v5847_v1 = vadd.f32 %v5807_v18, %v15365_v55 }
 0x6c5   : > { %v15671_v45 = vpop.f32.mrf.mxu0  ;;  %v5982_v46 = vadd.f32 %v5942_v9, %v5847_v1  ;;  %v6115_v1 = vadd.f32 %v15565_v53, %v5980_v8  ;;  %v18642_v53 = vld [vmem:[#allocation54_spill] sm:$0xff] }
 0x6c6   : > { %9696 = vmatmul.msk.bf16.gmra.mxu3 %vm2152_vm9, %v18636_v34 }
 0x6c7   : > { %v6215_v50 = vpop.f32.mrf.mxu1  ;;  %9680 = vmatmul.msk.bf16.gmra.mxu2 %vm2152_vm9, %v18637_v3  ;;  %v15689_v9 = vadd.f32 %v6207_v21, %v6115_v1  ;;  %v18643_v21 = vld [vmem:[#allocation238_spill] sm:$0xff] }
 0x6c8   : > { %9716 = vmatmul.msk.bf16.gmra.mxu0 %vm2152_vm9, %v18635_v47 }
 0x6ca   : > { %9728 = vmatmul.msk.bf16.gmra.mxu1 %vm2152_vm9, %v18638_v51  ;;  %v5945_v13 = vpop.f32.mrf.mxu3  ;;  %v5810_v55 = vpop.f32.mrf.mxu2 }
 0x6cb   : > { %v5848_v2 = vadd.f32 %v5810_v55, %v15379_v15  ;;  %v18641_v15 = vld [vmem:[#allocation20_spill] sm:$0xff] }
 0x6cd   : > { %v15685_v4 = vpop.f32.mrf.mxu0  ;;  %v5983_v7 = vadd.f32 %v5945_v13, %v5848_v2  ;;  %v15703_v13 = vadd.f32 %v6210_v56, %v6116_v29 }
 0x6cf   : > { %v6217_v14 = vpop.f32.mrf.mxu1  ;;  %18644 = vst [vmem:[#allocation60_spill] sm:$0xff] %v15703_v13  ;;  %v6118_v56 = vadd.f32 %v15591_v52, %v5983_v7  ;;  %v18646_v13 = vld [vmem:[#allocation178_spill] sm:$0xff] }
 0x6d0   : > { %v18651_v52 = vld [vmem:[#allocation182_spill] sm:$0xff] }
 0x6d2   : > { %v5947_v0 = vpop.f32.mrf.mxu3  ;;  %v5812_v18 = vpop.f32.mrf.mxu2 }
 0x6d3   : > { %v5849_v51 = vadd.f32 %v5812_v18, %v15385_v35 }
 0x6d5   : > { %v15691_v47 = vpop.f32.mrf.mxu0  ;;  %v5984_v63 = vadd.f32 %v5947_v0, %v5849_v51  ;;  %v6117_v51 = vadd.f32 %v15585_v54, %v5982_v46  ;;  %v18648_v54 = vld [vmem:[#allocation5_spill] sm:$0xff] }
 0x6d6   : > { %9697 = vmatmul.msk.bf16.gmra.mxu3 %vm2152_vm9, %v18641_v15 }
 0x6d7   : > { %v6220_v3 = vpop.f32.mrf.mxu1  ;;  %9681 = vmatmul.msk.bf16.gmra.mxu2 %vm2152_vm9, %v18642_v53  ;;  %v15709_v0 = vadd.f32 %v6212_v5, %v6117_v51  ;;  %v18649_v5 = vld [vmem:[#allocation153_spill] sm:$0xff] }
 0x6d8   : > { %9717 = vmatmul.msk.bf16.gmra.mxu0 %vm2152_vm9, %v18640_v36 }
 0x6d9   : > { %18645 = vst [vmem:[#allocation41_spill] sm:$0xff] %v15709_v0 }
 0x6da   : > { %9729 = vmatmul.msk.bf16.gmra.mxu1 %vm2152_vm9, %v18643_v21  ;;  %v5950_v8 = vpop.f32.mrf.mxu3  ;;  %v5815_v35 = vpop.f32.mrf.mxu2 }
 0x6db   : > { %v5850_v12 = vadd.f32 %v5815_v35, %v15399_v37  ;;  %v18647_v37 = vld [vmem:[#allocation141_spill] sm:$0xff] }
 0x6dd   : > { %v15705_v55 = vpop.f32.mrf.mxu0  ;;  %v5985_v2 = vadd.f32 %v5950_v8, %v5850_v12  ;;  %v15723_v8 = vadd.f32 %v6215_v50, %v6118_v56  ;;  %v6119_v12 = vadd.f32 %v15605_v58, %v5984_v63  ;;  %v18654_v58 = vld [vmem:[#allocation81_spill] sm:$0xff] }
 0x6df   : > { %v6222_v24 = vpop.f32.mrf.mxu1  ;;  %18650 = vst [vmem:[#allocation26_spill] sm:$0xff] %v15723_v8  ;;  %v6120_v50 = vadd.f32 %v15611_v42, %v5985_v2  ;;  %v18652_v8 = vld [vmem:[#allocation131_spill] sm:$0xff] }
 0x6e2   : > { %v5952_v1 = vpop.f32.mrf.mxu3  ;;  %v5817_v18 = vpop.f32.mrf.mxu2 }
 0x6e3   : > { %v5851_v21 = vadd.f32 %v5817_v18, %v15405_v43  ;;  %v15729_v18 = vadd.f32 %v6217_v14, %v6119_v12  ;;  %v18655_v14 = vld [vmem:[#allocation215_spill] sm:$0xff] }
 0x6e5   : > { %v15711_v36 = vpop.f32.mrf.mxu0  ;;  %v5986_v29 = vadd.f32 %v5952_v1, %v5851_v21 }
 0x6e6   : > { %9698 = vmatmul.msk.bf16.gmra.mxu3 %vm2152_vm9, %v18647_v37 }
 0x6e7   : > { %v6993_v53 = vpop.f32.mrf.mxu1  ;;  %9682 = vmatmul.msk.bf16.gmra.mxu2 %vm2152_vm9, %v18648_v54 }
 0x6e8   : > { %9718 = vmatmul.msk.bf16.gmra.mxu0 %vm2152_vm9, %v18646_v13 }
 0x6ea   : > { %9730 = vmatmul.msk.bf16.gmra.mxu1 %vm2152_vm9, %v18649_v5  ;;  %v6585_v46 = vpop.f32.mrf.mxu3  ;;  %v6381_v43 = vpop.f32.mrf.mxu2 }
 0x6eb   : > { %v6461_v7 = vadd.f32 %v6381_v43, %v18651_v52  ;;  %v18653_v43 = vld [vmem:[#allocation52_spill] sm:$0xff] }
 0x6ed   : > { %v15725_v35 = vpop.f32.mrf.mxu0  ;;  %v6665_v51 = vadd.f32 %v6585_v46, %v6461_v7  ;;  %v15743_v46 = vadd.f32 %v6220_v3, %v6120_v50 }
 0x6ef   : > { %v6995_v21 = vpop.f32.mrf.mxu1  ;;  %18656 = vst [vmem:[#allocation195_spill] sm:$0xff] %v15743_v46  ;;  %v6869_v3 = vadd.f32 %v15631_v40, %v6665_v51  ;;  %v18657_v46 = vld [vmem:[#allocation228_spill] sm:$0xff] }
 0x6f2   : > { %v6587_v1 = vpop.f32.mrf.mxu3  ;;  %v6383_v13 = vpop.f32.mrf.mxu2 }
 0x6f3   : > { %v6462_v5 = vadd.f32 %v6383_v13, %v15425_v10 }
 0x6f5   : > { %v15731_v54 = vpop.f32.mrf.mxu0  ;;  %v6666_v56 = vadd.f32 %v6587_v1, %v6462_v5  ;;  %v6121_v5 = vadd.f32 %v15625_v59, %v5986_v29  ;;  %v18659_v59 = vld [vmem:[#allocation138_spill] sm:$0xff] }
 0x6f6   : > { %9699 = vmatmul.msk.bf16.gmra.mxu3 %vm2152_vm9, %v18653_v43 }
 0x6f7   : > { %v6998_v0 = vpop.f32.mrf.mxu1  ;;  %9683 = vmatmul.msk.bf16.gmra.mxu2 %vm2152_vm9, %v18654_v58  ;;  %v15749_v12 = vadd.f32 %v6222_v24, %v6121_v5  ;;  %v18660_v24 = vld [vmem:[#allocation91_spill] sm:$0xff] }
 0x6f8   : > { %9719 = vmatmul.msk.bf16.gmra.mxu0 %vm2152_vm9, %v18652_v8 }
 0x6fa   : > { %9731 = vmatmul.msk.bf16.gmra.mxu1 %vm2152_vm9, %v18655_v14  ;;  %v6590_v63 = vpop.f32.mrf.mxu3  ;;  %v6386_v10 = vpop.f32.mrf.mxu2 }
 0x6fb   : > { %v6463_v42 = vadd.f32 %v6386_v10, %v15441_v49  ;;  %v18658_v49 = vld [vmem:[#allocation120_spill] sm:$0xff] }
 0x6fd   : > { %v15745_v13 = vpop.f32.mrf.mxu0  ;;  %v6667_v52 = vadd.f32 %v6590_v63, %v6463_v42  ;;  %v15763_v63 = vadd.f32 %v6993_v53, %v6869_v3 }
 0x6ff   : > { %v7000_v2 = vpop.f32.mrf.mxu1  ;;  %18661 = vst [vmem:[#allocation31_spill] sm:$0xff] %v15763_v63  ;;  %v6871_v53 = vadd.f32 %v15651_v27, %v6667_v52  ;;  %v18662_v63 = vld [vmem:[#allocation207_spill] sm:$0xff] }
 0x702   : > { %v6592_v7 = vpop.f32.mrf.mxu3  ;;  %v6388_v1 = vpop.f32.mrf.mxu2 }
 0x703   : > { %v6464_v14 = vadd.f32 %v6388_v1, %v15447_v30 }
 0x705   : > { %v15751_v8 = vpop.f32.mrf.mxu0  ;;  %v6668_v50 = vadd.f32 %v6592_v7, %v6464_v14  ;;  %v6870_v14 = vadd.f32 %v15645_v25, %v6666_v56  ;;  %v18664_v25 = vld [vmem:[#allocation122_spill] sm:$0xff] }
 0x706   : > { %9700 = vmatmul.msk.bf16.gmra.mxu3 %vm2152_vm9, %v18658_v49 }
 0x707   : > { %v7003_v58 = vpop.f32.mrf.mxu1  ;;  %9684 = vmatmul.msk.bf16.gmra.mxu2 %vm2152_vm9, %v18659_v59  ;;  %v15769_v7 = vadd.f32 %v6995_v21, %v6870_v14  ;;  %v18665_v21 = vld [vmem:[#allocation239_spill] sm:$0xff] }
 0x708   : > { %9720 = vmatmul.msk.bf16.gmra.mxu0 %vm2152_vm9, %v18657_v46 }
 0x70a   : > { %9732 = vmatmul.msk.bf16.gmra.mxu1 %vm2152_vm9, %v18660_v24  ;;  %v6595_v29 = vpop.f32.mrf.mxu3  ;;  %v6391_v30 = vpop.f32.mrf.mxu2 }
 0x70b   : > { %v6465_v40 = vadd.f32 %v6391_v30, %v15461_v33  ;;  %v18663_v33 = vld [vmem:[#allocation32_spill] sm:$0xff] }
 0x70d   : > { %v15765_v10 = vpop.f32.mrf.mxu0  ;;  %v6669_v42 = vadd.f32 %v6595_v29, %v6465_v40  ;;  %v15783_v29 = vadd.f32 %v6998_v0, %v6871_v53 }
 0x70f   : > { %v7005_v51 = vpop.f32.mrf.mxu1  ;;  %v6873_v0 = vadd.f32 %v15671_v45, %v6669_v42 }
 0x712   : > { %v6597_v5 = vpop.f32.mrf.mxu3  ;;  %v6393_v1 = vpop.f32.mrf.mxu2 }
 0x713   : > { %v6466_v24 = vadd.f32 %v6393_v1, %v15467_v6 }
 0x715   : > { %v15771_v46 = vpop.f32.mrf.mxu0  ;;  %v6670_v3 = vadd.f32 %v6597_v5, %v6466_v24  ;;  %v6872_v24 = vadd.f32 %v15665_v41, %v6668_v50  ;;  %v18667_v41 = vld [vmem:[#allocation126_spill] sm:$0xff] }
 0x716   : > { %9701 = vmatmul.msk.bf16.gmra.mxu3 %vm2152_vm9, %v18663_v33 }
 0x717   : > { %v7008_v59 = vpop.f32.mrf.mxu1  ;;  %9685 = vmatmul.msk.bf16.gmra.mxu2 %vm2152_vm9, %v18664_v25  ;;  %v15789_v5 = vadd.f32 %v7000_v2, %v6872_v24  ;;  %v18668_v2 = vld [vmem:[#allocation237_spill] sm:$0xff] }
 0x718   : > { %9721 = vmatmul.msk.bf16.gmra.mxu0 %vm2152_vm9, %v18662_v63 }
 0x71a   : > { %9733 = vmatmul.msk.bf16.gmra.mxu1 %vm2152_vm9, %v18665_v21  ;;  %v6600_v56 = vpop.f32.mrf.mxu3  ;;  %v6396_v6 = vpop.f32.mrf.mxu2 }
 0x71b   : > { %v6467_v27 = vadd.f32 %v6396_v6, %v15481_v19  ;;  %v18666_v19 = vld [vmem:[#allocation166_spill] sm:$0xff] }
 0x71d   : > { %v15785_v30 = vpop.f32.mrf.mxu0  ;;  %v6671_v40 = vadd.f32 %v6600_v56, %v6467_v27  ;;  %v15803_v56 = vadd.f32 %v7003_v58, %v6873_v0 }
 0x71f   : > { %v7010_v52 = vpop.f32.mrf.mxu1  ;;  %v6875_v58 = vadd.f32 %v15691_v47, %v6671_v40 }
 0x722   : > { %v6602_v14 = vpop.f32.mrf.mxu3  ;;  %v6398_v1 = vpop.f32.mrf.mxu2 }
 0x723   : > { %v6468_v21 = vadd.f32 %v6398_v1, %v15487_v57 }
 0x725   : > { %v15791_v63 = vpop.f32.mrf.mxu0  ;;  %v6672_v53 = vadd.f32 %v6602_v14, %v6468_v21 }
 0x726   : > { %9702 = vmatmul.msk.bf16.gmra.mxu3 %vm2152_vm9, %v18666_v19 }
 0x727   : > { %v7013_v25 = vpop.f32.mrf.mxu1  ;;  %9686 = vmatmul.msk.bf16.gmra.mxu2 %vm2152_vm9, %v18667_v41 }
 0x728   : > { %9770 = vmatmul.msk.bf16.vlgmr.msra.gmra.mxu0 %vm2152_vm9, %v18606_v17  ;;  %v6874_v17 = vadd.f32 %v15685_v4, %v6670_v3  ;;  %v18670_v4 = vld [vmem:[#allocation194_spill] sm:$0xff] }
 0x72a   : > { %9734 = vmatmul.msk.bf16.gmra.mxu1 %vm2152_vm9, %v18668_v2  ;;  %v6605_v50 = vpop.f32.mrf.mxu3  ;;  %v6401_v57 = vpop.f32.mrf.mxu2  ;;  %v15809_v24 = vadd.f32 %v7005_v51, %v6874_v17  ;;  %v18671_v51 = vld [vmem:[#allocation21_spill] sm:$0xff] }
 0x72b   : > { %v6469_v45 = vadd.f32 %v6401_v57, %v15513_v26  ;;  %v18669_v26 = vld [vmem:[#allocation208_spill] sm:$0xff] }
 0x72d   : > { %v15805_v6 = vpop.f32.mrf.mxu0  ;;  %v6673_v21 = vadd.f32 %v6605_v50, %v6469_v45  ;;  %v15823_v50 = vadd.f32 %v7008_v59, %v6875_v58 }
 0x72f   : > { %v7015_v42 = vpop.f32.mrf.mxu1  ;;  %v6877_v59 = vadd.f32 %v15711_v36, %v6673_v21  ;;  %v4222_v36 = vld [vmem:[%s17057_s7 + $0x12] sm:$0x1] }
 0x732   : > { %v6607_v27 = vpop.f32.mrf.mxu3  ;;  %v6403_v14 = vpop.f32.mrf.mxu2 }
 0x733   : > { %v6470_v2 = vadd.f32 %v6403_v14, %v15523_v38 }
 0x735   : > { %v15811_v1 = vpop.f32.mrf.mxu0  ;;  %v6674_v0 = vadd.f32 %v6607_v27, %v6470_v2  ;;  %v6876_v2 = vadd.f32 %v15705_v55, %v6672_v53  ;;  %v18673_v55 = vld [vmem:[#allocation27_spill] sm:$0xff]  ;;  %v4223_v53 = vld [vmem:[%s17057_s7 + $0x13] sm:$0x1] }
 0x736   : > { %9703 = vmatmul.msk.bf16.gmra.mxu3 %vm2152_vm9, %v18669_v26 }
 0x737   : > { %v7018_v41 = vpop.f32.mrf.mxu1  ;;  %9687 = vmatmul.msk.bf16.gmra.mxu2 %vm2152_vm9, %v18670_v4  ;;  %v15829_v27 = vadd.f32 %v7010_v52, %v6876_v2  ;;  %v18674_v52 = vld [vmem:[#allocation36_spill] sm:$0xff] }
 0x738   : > { %9771 = vmatmul.msk.bf16.gmra.mxu0 %vm2152_vm9, %v18611_v22 }
 0x73a   : > { %9735 = vmatmul.msk.bf16.gmra.mxu1 %vm2152_vm9, %v18671_v51  ;;  %v6610_v3 = vpop.f32.mrf.mxu3  ;;  %v6406_v38 = vpop.f32.mrf.mxu2 }
 0x73b   : > { %v6471_v47 = vadd.f32 %v6406_v38, %v15543_v48  ;;  %v18672_v48 = vld [vmem:[#allocation139_spill] sm:$0xff] }
 0x73d   : > { %v15825_v57 = vpop.f32.mrf.mxu0  ;;  %v6675_v45 = vadd.f32 %v6610_v3, %v6471_v47  ;;  %v7977_v3 = vsel %vm2201_vm8, %v4223_v53, 0  ;;  %v15855_v47 = vadd.f32 %v7013_v25, %v6877_v59 }
 0x73e   : > { %7986 = vmatpush.bf16.msra.mxu3 %v7977_v3 }
 0x73f   : > { %v7020_v40 = vpop.f32.mrf.mxu1  ;;  %v6879_v3 = vadd.f32 %v15731_v54, %v6675_v45 }
 0x742   : > { %v6612_v17 = vpop.f32.mrf.mxu3  ;;  %v6408_v14 = vpop.f32.mrf.mxu2 }
 0x743   : > { %v6472_v51 = vadd.f32 %v6408_v14, %v15549_v61  ;;  %v4221_v61 = vld [vmem:[%s17057_s7 + $0x11] sm:$0x1] }
 0x744   : > { %v7718_v21 = vsel %vm2201_vm8, %v4221_v61, 0  ;;  %v4224_v61 = vld [vmem:[%s17057_s7 + $0x14] sm:$0x1] }
 0x745   : > { %v15831_v22 = vpop.f32.mrf.mxu0  ;;  %v6676_v58 = vadd.f32 %v6612_v17, %v6472_v51  ;;  %v7847_v51 = vsel %vm2201_vm8, %v4222_v36, 0  ;;  %7727 = vmatpush.bf16.msra.mxu1 %v7718_v21  ;;  %v8101_v36 = vsel %vm2201_vm8, %v4224_v61, 0 }
 0x746   : > { %9704 = vmatmul.msk.bf16.gmra.mxu3 %vm2152_vm9, %v18672_v48  ;;  %7856 = vmatpush.bf16.msra.mxu2 %v7847_v51 }
 0x747   : > { %v7023_v4 = vpop.f32.mrf.mxu1  ;;  %9688 = vmatmul.msk.bf16.gmra.mxu2 %vm2152_vm9, %v18673_v55  ;;  %8110 = vmatpush.bf16.msrb.mxu0 %v8101_v36  ;;  %v6880_v61 = vadd.f32 %v15745_v13, %v6676_v58 }
 0x748   : > { %9772 = vmatmul.msk.bf16.gmra.mxu0 %vm2152_vm9, %v18618_v62  ;;  %v6878_v62 = vadd.f32 %v15725_v35, %v6674_v0  ;;  %v18675_v0 = vld [vmem:[#allocation188_spill] sm:$0xff] }
 0x74a   : > { %9736 = vmatmul.msk.bf16.gmra.mxu1 %vm2152_vm9, %v18674_v52  ;;  %v6615_v38 = vpop.f32.mrf.mxu3  ;;  %v6411_v2 = vpop.f32.mrf.mxu2  ;;  %v15865_v25 = vadd.f32 %v7015_v42, %v6878_v62  ;;  %v18677_v62 = vld [vmem:[#allocation116_spill] sm:$0xff] }
 0x74b   : > { %v6473_v14 = vadd.f32 %v6411_v2, %v15563_v60  ;;  %v15879_v2 = vadd.f32 %v7018_v41, %v6879_v3 }
 0x74d   : > { %v15857_v17 = vpop.f32.mrf.mxu0  ;;  %v6677_v55 = vadd.f32 %v6615_v38, %v6473_v14  ;;  %v18676_v38 = vld [vmem:[#allocation164_spill] sm:$0xff] }
 0x74f   : > { %v7025_v52 = vpop.f32.mrf.mxu1  ;;  %v6881_v41 = vadd.f32 %v15751_v8, %v6677_v55  ;;  %v18679_v8 = vld [vmem:[#allocation264_spill] sm:$0xff] }
 0x752   : > { %v6617_v53 = vpop.f32.mrf.mxu3  ;;  %v6413_v59 = vpop.f32.mrf.mxu2 }
 0x753   : > { %v6474_v51 = vadd.f32 %v6413_v59, %v15569_v39  ;;  %v15885_v59 = vadd.f32 %v7020_v40, %v6880_v61  ;;  %v15899_v40 = vadd.f32 %v7023_v4, %v6881_v41 }
 0x755   : > { %v15867_v21 = vpop.f32.mrf.mxu0  ;;  %v6678_v35 = vadd.f32 %v6617_v53, %v6474_v51 }
 0x756   : > { %9705 = vmatmul.msk.bf16.gmra.mxu3 %vm2152_vm9, %v18675_v0 }
 0x757   : > { %v7028_v60 = vpop.f32.mrf.mxu1  ;;  %9689 = vmatmul.msk.bf16.gmra.mxu2 %vm2152_vm9, %v18676_v38 }
 0x758   : > { %9773 = vmatmul.msk.bf16.gmra.mxu0 %vm2152_vm9, %v18625_v20 }
 0x75a   : > { %9737 = vmatmul.msk.bf16.gmra.mxu1 %vm2152_vm9, %v18677_v62  ;;  %v6620_v42 = vpop.f32.mrf.mxu3  ;;  %v6416_v39 = vpop.f32.mrf.mxu2 }
 0x75b   : > { %v6475_v54 = vadd.f32 %v6416_v39, %v15583_v11  ;;  %v18678_v11 = vld [vmem:[#allocation213_spill] sm:$0xff] }
 0x75d   : > { %v15881_v14 = vpop.f32.mrf.mxu0  ;;  %v6679_v36 = vadd.f32 %v6620_v42, %v6475_v54  ;;  %v6882_v42 = vadd.f32 %v15765_v10, %v6678_v35  ;;  %v18683_v10 = vld [vmem:[#allocation209_spill] sm:$0xff] }
 0x75f   : > { %v7030_v45 = vpop.f32.mrf.mxu1  ;;  %v6883_v4 = vadd.f32 %v15771_v46, %v6679_v36  ;;  %v18685_v46 = vld [vmem:[#allocation2_spill] sm:$0xff] }
 0x762   : > { %v6622_v53 = vpop.f32.mrf.mxu3  ;;  %v6418_v51 = vpop.f32.mrf.mxu2 }
 0x763   : > { %v6476_v62 = vadd.f32 %v6418_v51, %v15589_v28  ;;  %v18681_v51 = vld [vmem:[#allocation136_spill] sm:$0xff] }
 0x765   : > { %v15887_v20 = vpop.f32.mrf.mxu0  ;;  %v6680_v3 = vadd.f32 %v6622_v53, %v6476_v62 }
 0x766   : > { %9754 = vmatmul.msk.bf16.vlgmr.msrb.gmra.mxu3 %vm2152_vm9, %v18607_v16  ;;  %v15905_v16 = vadd.f32 %v7025_v52, %v6882_v42  ;;  %v18684_v52 = vld [vmem:[#allocation17_spill] sm:$0xff] }
 0x767   : > { %v7033_v38 = vpop.f32.mrf.mxu1  ;;  %9738 = vmatmul.msk.bf16.vlgmr.msrb.gmra.mxu2 %vm2152_vm9, %v18678_v11 }
 0x768   : > { %9774 = vmatmul.msk.bf16.gmra.mxu0 %vm2152_vm9, %v18631_v23  ;;  %18680 = vst [vmem:[#allocation55_spill] sm:$0xff] %v15905_v16 }
 0x76a   : > { %9786 = vmatmul.msk.bf16.vlgmr.msra.gmra.mxu1 %vm2152_vm9, %v18584_v31  ;;  %v6625_v13 = vpop.f32.mrf.mxu3  ;;  %v6421_v28 = vpop.f32.mrf.mxu2 }
 0x76b   : > { %v6477_v55 = vadd.f32 %v6421_v28, %v18679_v8  ;;  %v18682_v28 = vld [vmem:[#allocation11_spill] sm:$0xff] }
 0x76d   : > { %v15901_v58 = vpop.f32.mrf.mxu0  ;;  %v6681_v39 = vadd.f32 %v6625_v13, %v6477_v55  ;;  %v15919_v13 = vadd.f32 %v7028_v60, %v6883_v4 }
 0x76f   : > { %v7035_v62 = vpop.f32.mrf.mxu1  ;;  %v6885_v60 = vadd.f32 %v15791_v63, %v6681_v39  ;;  %v18691_v63 = vld [vmem:[#allocation13_spill] sm:$0xff] }
 0x772   : > { %v6627_v54 = vpop.f32.mrf.mxu3  ;;  %v6423_v61 = vpop.f32.mrf.mxu2 }
 0x773   : > { %v6478_v31 = vadd.f32 %v6423_v61, %v18681_v51 }
 0x775   : > { %v15907_v53 = vpop.f32.mrf.mxu0  ;;  %v6682_v41 = vadd.f32 %v6627_v54, %v6478_v31  ;;  %v6884_v54 = vadd.f32 %v15785_v30, %v6680_v3  ;;  %v18689_v30 = vld [vmem:[#allocation163_spill] sm:$0xff] }
 0x776   : > { %9755 = vmatmul.msk.bf16.gmra.mxu3 %vm2152_vm9, %v18682_v28 }
 0x777   : > { %v7038_v11 = vpop.f32.mrf.mxu1  ;;  %9739 = vmatmul.msk.bf16.gmra.mxu2 %vm2152_vm9, %v18683_v10  ;;  %v15925_v31 = vadd.f32 %v7030_v45, %v6884_v54  ;;  %v18687_v10 = vld [vmem:[#allocation124_spill] sm:$0xff]  ;;  %v18690_v45 = vld [vmem:[#allocation30_spill] sm:$0xff] }
 0x778   : > { %9775 = vmatmul.msk.bf16.gmra.mxu0 %vm2152_vm9, %v18636_v34 }
 0x779   : > { %18686 = vst [vmem:[#allocation245_spill] sm:$0xff] %v15925_v31 }
 0x77a   : > { %9787 = vmatmul.msk.bf16.gmra.mxu1 %vm2152_vm9, %v18684_v52  ;;  %v6630_v35 = vpop.f32.mrf.mxu3  ;;  %v6426_v8 = vpop.f32.mrf.mxu2 }
 0x77b   : > { %v6479_v36 = vadd.f32 %v6426_v8, %v18685_v46  ;;  %v18688_v8 = vld [vmem:[#allocation205_spill] sm:$0xff]  ;;  %v6886_v46 = vadd.f32 %v15805_v6, %v6682_v41  ;;  %v18694_v6 = vld [vmem:[#allocation200_spill] sm:$0xff] }
 0x77d   : > { %v15921_v55 = vpop.f32.mrf.mxu0  ;;  %v6683_v61 = vadd.f32 %v6630_v35, %v6479_v36  ;;  %v15939_v35 = vadd.f32 %v7033_v38, %v6885_v60 }
 0x77f   : > { %v7040_v42 = vpop.f32.mrf.mxu1  ;;  %v6887_v38 = vadd.f32 %v15811_v1, %v6683_v61  ;;  %v18696_v1 = vld [vmem:[#allocation89_spill] sm:$0xff] }
 0x782   : > { %v6632_v51 = vpop.f32.mrf.mxu3  ;;  %v6428_v34 = vpop.f32.mrf.mxu2 }
 0x783   : > { %v6480_v52 = vadd.f32 %v6428_v34, %v18687_v10 }
 0x785   : > { %v15927_v23 = vpop.f32.mrf.mxu0  ;;  %v6684_v4 = vadd.f32 %v6632_v51, %v6480_v52  ;;  %v15945_v51 = vadd.f32 %v7035_v62, %v6886_v46  ;;  %v18695_v62 = vld [vmem:[#allocation56_spill] sm:$0xff] }
 0x786   : > { %9756 = vmatmul.msk.bf16.gmra.mxu3 %vm2152_vm9, %v18688_v8 }
 0x787   : > { %v7043_v16 = vpop.f32.mrf.mxu1  ;;  %9740 = vmatmul.msk.bf16.gmra.mxu2 %vm2152_vm9, %v18689_v30  ;;  %18692 = vst [vmem:[#allocation232_spill] sm:$0xff] %v15945_v51 }
 0x788   : > { %9776 = vmatmul.msk.bf16.gmra.mxu0 %vm2152_vm9, %v18641_v15 }
 0x78a   : > { %9788 = vmatmul.msk.bf16.gmra.mxu1 %vm2152_vm9, %v18690_v45  ;;  %v6635_v3 = vpop.f32.mrf.mxu3  ;;  %v6431_v34 = vpop.f32.mrf.mxu2 }
 0x78b   : > { %v6481_v39 = vadd.f32 %v6431_v34, %v18691_v63  ;;  %v18693_v34 = vld [vmem:[#allocation16_spill] sm:$0xff]  ;;  %v6888_v63 = vadd.f32 %v15825_v57, %v6684_v4  ;;  %v18699_v57 = vld [vmem:[#allocation229_spill] sm:$0xff] }
 0x78d   : > { %v15941_v10 = vpop.f32.mrf.mxu0  ;;  %v6685_v36 = vadd.f32 %v6635_v3, %v6481_v39  ;;  %v15959_v3 = vadd.f32 %v7038_v11, %v6887_v38 }
 0x78f   : > { %v7045_v52 = vpop.f32.mrf.mxu1  ;;  %v6889_v11 = vadd.f32 %v15831_v22, %v6685_v36  ;;  %v18702_v22 = vld [vmem:[#allocation48_spill] sm:$0xff] }
 0x792   : > { %v6637_v54 = vpop.f32.mrf.mxu3  ;;  %v6433_v15 = vpop.f32.mrf.mxu2 }
 0x793   : > { %v6482_v45 = vadd.f32 %v6433_v15, %v15649_v44 }
 0x795   : > { %v15947_v30 = vpop.f32.mrf.mxu0  ;;  %v6686_v60 = vadd.f32 %v6637_v54, %v6482_v45  ;;  %v15965_v54 = vadd.f32 %v7040_v42, %v6888_v63  ;;  %v18700_v42 = vld [vmem:[#allocation68_spill] sm:$0xff] }
 0x796   : > { %9757 = vmatmul.msk.bf16.gmra.mxu3 %vm2152_vm9, %v18693_v34 }
 0x797   : > { %v7048_v31 = vpop.f32.mrf.mxu1  ;;  %9741 = vmatmul.msk.bf16.gmra.mxu2 %vm2152_vm9, %v18694_v6  ;;  %18697 = vst [vmem:[#allocation12_spill] sm:$0xff] %v15965_v54 }
 0x798   : > { %9777 = vmatmul.msk.bf16.gmra.mxu0 %vm2152_vm9, %v18647_v37 }
 0x79a   : > { %9789 = vmatmul.msk.bf16.gmra.mxu1 %vm2152_vm9, %v18695_v62  ;;  %v6640_v41 = vpop.f32.mrf.mxu3  ;;  %v6436_v44 = vpop.f32.mrf.mxu2 }
 0x79b   : > { %v6483_v61 = vadd.f32 %v6436_v44, %v18696_v1  ;;  %v18698_v44 = vld [vmem:[#allocation62_spill] sm:$0xff]  ;;  %v6890_v1 = vadd.f32 %v15857_v17, %v6686_v60  ;;  %v18705_v17 = vld [vmem:[#allocation47_spill] sm:$0xff] }
 0x79d   : > { %v15961_v15 = vpop.f32.mrf.mxu0  ;;  %v6687_v39 = vadd.f32 %v6640_v41, %v6483_v61  ;;  %v15979_v41 = vadd.f32 %v7043_v16, %v6889_v11 }
 0x79f   : > { %v7050_v45 = vpop.f32.mrf.mxu1  ;;  %18701 = vst [vmem:[#allocation58_spill] sm:$0xff] %v15979_v41  ;;  %v6891_v16 = vadd.f32 %v15867_v21, %v6687_v39  ;;  %v18707_v21 = vld [vmem:[#allocation60_spill] sm:$0xff] }
 0x7a2   : > { %v6642_v46 = vpop.f32.mrf.mxu3  ;;  %v6438_v37 = vpop.f32.mrf.mxu2 }
 0x7a3   : > { %v6484_v62 = vadd.f32 %v6438_v37, %v15669_v32 }
 0x7a5   : > { %v15967_v6 = vpop.f32.mrf.mxu0  ;;  %v6688_v38 = vadd.f32 %v6642_v46, %v6484_v62  ;;  %v15985_v46 = vadd.f32 %v7045_v52, %v6890_v1  ;;  %v18706_v52 = vld [vmem:[#allocation107_spill] sm:$0xff] }
 0x7a6   : > { %9758 = vmatmul.msk.bf16.gmra.mxu3 %vm2152_vm9, %v18698_v44 }
 0x7a7   : > { %v7053_v51 = vpop.f32.mrf.mxu1  ;;  %9742 = vmatmul.msk.bf16.gmra.mxu2 %vm2152_vm9, %v18699_v57  ;;  %18703 = vst [vmem:[#allocation38_spill] sm:$0xff] %v15985_v46  ;;  %v18709_v46 = vld [vmem:[#allocation41_spill] sm:$0xff] }
 0x7a8   : > { %9778 = vmatmul.msk.bf16.gmra.mxu0 %vm2152_vm9, %v18653_v43 }
 0x7aa   : > { %9790 = vmatmul.msk.bf16.gmra.mxu1 %vm2152_vm9, %v18700_v42  ;;  %v6645_v4 = vpop.f32.mrf.mxu3  ;;  %v6441_v32 = vpop.f32.mrf.mxu2 }
 0x7ab   : > { %v6485_v36 = vadd.f32 %v6441_v32, %v18702_v22  ;;  %v18704_v32 = vld [vmem:[#allocation40_spill] sm:$0xff]  ;;  %v6892_v22 = vadd.f32 %v15881_v14, %v6688_v38  ;;  %v18711_v14 = vld [vmem:[#allocation217_spill] sm:$0xff] }
 0x7ad   : > { %v15981_v37 = vpop.f32.mrf.mxu0  ;;  %v6689_v61 = vadd.f32 %v6645_v4, %v6485_v36  ;;  %v15999_v4 = vadd.f32 %v7048_v31, %v6891_v16 }
 0x7af   : > { %v7055_v62 = vpop.f32.mrf.mxu1  ;;  %v6893_v31 = vadd.f32 %v15887_v20, %v6689_v61  ;;  %v18713_v20 = vld [vmem:[#allocation26_spill] sm:$0xff] }
 0x7b2   : > { %v6647_v63 = vpop.f32.mrf.mxu3  ;;  %v6443_v43 = vpop.f32.mrf.mxu2 }
 0x7b3   : > { %v6486_v42 = vadd.f32 %v6443_v43, %v15689_v9 }
 0x7b5   : > { %v15987_v57 = vpop.f32.mrf.mxu0  ;;  %v6690_v11 = vadd.f32 %v6647_v63, %v6486_v42  ;;  %v16005_v63 = vadd.f32 %v7050_v45, %v6892_v22  ;;  %v18712_v45 = vld [vmem:[#allocation97_spill] sm:$0xff] }
 0x7b6   : > { %9759 = vmatmul.msk.bf16.gmra.mxu3 %vm2152_vm9, %v18704_v32 }
 0x7b7   : > { %v7058_v54 = vpop.f32.mrf.mxu1  ;;  %9743 = vmatmul.msk.bf16.gmra.mxu2 %vm2152_vm9, %v18705_v17  ;;  %18708 = vst [vmem:[#allocation59_spill] sm:$0xff] %v16005_v63 }
 0x7b8   : > { %9779 = vmatmul.msk.bf16.gmra.mxu0 %vm2152_vm9, %v18658_v49 }
 0x7ba   : > { %9791 = vmatmul.msk.bf16.gmra.mxu1 %vm2152_vm9, %v18706_v52  ;;  %v6650_v60 = vpop.f32.mrf.mxu3  ;;  %v6446_v9 = vpop.f32.mrf.mxu2 }
 0x7bb   : > { %v6487_v39 = vadd.f32 %v6446_v9, %v18707_v21  ;;  %v18710_v9 = vld [vmem:[#allocation54_spill] sm:$0xff]  ;;  %v6894_v21 = vadd.f32 %v15901_v58, %v6690_v11  ;;  %v18716_v58 = vld [vmem:[#allocation35_spill] sm:$0xff] }
 0x7bd   : > { %v16001_v43 = vpop.f32.mrf.mxu0  ;;  %v6691_v36 = vadd.f32 %v6650_v60, %v6487_v39  ;;  %v16019_v60 = vadd.f32 %v7053_v51, %v6893_v31 }
 0x7bf   : > { %v7060_v42 = vpop.f32.mrf.mxu1  ;;  %v6895_v51 = vadd.f32 %v15907_v53, %v6691_v36  ;;  %v18718_v53 = vld [vmem:[#allocation195_spill] sm:$0xff] }
 0x7c2   : > { %v6652_v1 = vpop.f32.mrf.mxu3  ;;  %v6448_v49 = vpop.f32.mrf.mxu2 }
 0x7c3   : > { %v6488_v52 = vadd.f32 %v6448_v49, %v18709_v46 }
 0x7c5   : > { %v16007_v17 = vpop.f32.mrf.mxu0  ;;  %v6692_v16 = vadd.f32 %v6652_v1, %v6488_v52  ;;  %v16025_v1 = vadd.f32 %v7055_v62, %v6894_v21  ;;  %v18717_v62 = vld [vmem:[#allocation94_spill] sm:$0xff] }
 0x7c6   : > { %9760 = vmatmul.msk.bf16.gmra.mxu3 %vm2152_vm9, %v18710_v9 }
 0x7c7   : > { %v7063_v41 = vpop.f32.mrf.mxu1  ;;  %9744 = vmatmul.msk.bf16.gmra.mxu2 %vm2152_vm9, %v18711_v14  ;;  %18714 = vst [vmem:[#allocation87_spill] sm:$0xff] %v16025_v1 }
 0x7c8   : > { %9780 = vmatmul.msk.bf16.gmra.mxu0 %vm2152_vm9, %v18663_v33 }
 0x7ca   : > { %9792 = vmatmul.msk.bf16.gmra.mxu1 %vm2152_vm9, %v18712_v45  ;;  %v6655_v38 = vpop.f32.mrf.mxu3  ;;  %v6451_v49 = vpop.f32.mrf.mxu2 }
 0x7cb   : > { %v6489_v61 = vadd.f32 %v6451_v49, %v18713_v20  ;;  %v18715_v49 = vld [vmem:[#allocation5_spill] sm:$0xff]  ;;  %v6896_v20 = vadd.f32 %v15921_v55, %v6692_v16  ;;  %v18721_v55 = vld [vmem:[#allocation24_spill] sm:$0xff] }
 0x7cd   : > { %v16021_v46 = vpop.f32.mrf.mxu0  ;;  %v6693_v39 = vadd.f32 %v6655_v38, %v6489_v61  ;;  %v16039_v38 = vadd.f32 %v7058_v54, %v6895_v51 }
 0x7cf   : > { %v7065_v52 = vpop.f32.mrf.mxu1  ;;  %v6897_v54 = vadd.f32 %v15927_v23, %v6693_v39  ;;  %v18723_v23 = vld [vmem:[#allocation31_spill] sm:$0xff] }
 0x7d2   : > { %v6657_v22 = vpop.f32.mrf.mxu3  ;;  %v6453_v33 = vpop.f32.mrf.mxu2 }
 0x7d3   : > { %v6490_v45 = vadd.f32 %v6453_v33, %v15729_v18 }
 0x7d5   : > { %v16027_v14 = vpop.f32.mrf.mxu0  ;;  %v6694_v31 = vadd.f32 %v6657_v22, %v6490_v45  ;;  %v16045_v22 = vadd.f32 %v7060_v42, %v6896_v20  ;;  %v18722_v42 = vld [vmem:[#allocation78_spill] sm:$0xff] }
 0x7d6   : > { %9761 = vmatmul.msk.bf16.gmra.mxu3 %vm2152_vm9, %v18715_v49 }
 0x7d7   : > { %v7068_v63 = vpop.f32.mrf.mxu1  ;;  %9745 = vmatmul.msk.bf16.gmra.mxu2 %vm2152_vm9, %v18716_v58  ;;  %18719 = vst [vmem:[#allocation233_spill] sm:$0xff] %v16045_v22 }
 0x7d8   : > { %9781 = vmatmul.msk.bf16.gmra.mxu0 %vm2152_vm9, %v18666_v19 }
 0x7da   : > { %9793 = vmatmul.msk.bf16.gmra.mxu1 %vm2152_vm9, %v18717_v62  ;;  %v6660_v11 = vpop.f32.mrf.mxu3  ;;  %v6456_v18 = vpop.f32.mrf.mxu2 }
 0x7db   : > { %v6491_v36 = vadd.f32 %v6456_v18, %v18718_v53  ;;  %v18720_v18 = vld [vmem:[#allocation81_spill] sm:$0xff]  ;;  %v6898_v53 = vadd.f32 %v15941_v10, %v6694_v31 }
 0x7dc   : > { %v18725_v10 = vld [vmem:[#allocation9_spill] sm:$0xff] }
 0x7dd   : > { %v16041_v33 = vpop.f32.mrf.mxu0  ;;  %v6695_v61 = vadd.f32 %v6660_v11, %v6491_v36  ;;  %v16059_v11 = vadd.f32 %v7063_v41, %v6897_v54 }
 0x7df   : > { %v7070_v45 = vpop.f32.mrf.mxu1  ;;  %v6899_v41 = vadd.f32 %v15947_v30, %v6695_v61 }
 0x7e2   : > { %v6662_v21 = vpop.f32.mrf.mxu3  ;;  %v6458_v19 = vpop.f32.mrf.mxu2 }
 0x7e3   : > { %v6492_v62 = vadd.f32 %v6458_v19, %v15749_v12 }
 0x7e5   : > { %v16047_v58 = vpop.f32.mrf.mxu0  ;;  %v6696_v51 = vadd.f32 %v6662_v21, %v6492_v62  ;;  %v16065_v21 = vadd.f32 %v7065_v52, %v6898_v53  ;;  %v18726_v52 = vld [vmem:[#allocation144_spill] sm:$0xff] }
 0x7e6   : > { %9762 = vmatmul.msk.bf16.gmra.mxu3 %vm2152_vm9, %v18720_v18 }
 0x7e7   : > { %v7729_v1 = vpop.f32.mrf.mxu1  ;;  %9746 = vmatmul.msk.bf16.gmra.mxu2 %vm2152_vm9, %v18721_v55 }
 0x7e8   : > { %9782 = vmatmul.msk.bf16.gmra.mxu0 %vm2152_vm9, %v18669_v26 }
 0x7ea   : > { %9794 = vmatmul.msk.bf16.gmra.mxu1 %vm2152_vm9, %v18722_v42  ;;  %v7471_v16 = vpop.f32.mrf.mxu3  ;;  %v7341_v12 = vpop.f32.mrf.mxu2 }
 0x7eb   : > { %v7421_v39 = vadd.f32 %v7341_v12, %v18723_v23  ;;  %v18724_v12 = vld [vmem:[#allocation138_spill] sm:$0xff] }
 0x7ed   : > { %v16061_v19 = vpop.f32.mrf.mxu0  ;;  %v7551_v36 = vadd.f32 %v7471_v16, %v7421_v39  ;;  %v16079_v16 = vadd.f32 %v7068_v63, %v6899_v41 }
 0x7ef   : > { %v7731_v62 = vpop.f32.mrf.mxu1  ;;  %v7680_v63 = vadd.f32 %v15967_v6, %v7551_v36 }
 0x7f2   : > { %v7473_v20 = vpop.f32.mrf.mxu3  ;;  %v7343_v26 = vpop.f32.mrf.mxu2 }
 0x7f3   : > { %v7422_v42 = vadd.f32 %v7343_v26, %v15769_v7 }
 0x7f5   : > { %v16067_v55 = vpop.f32.mrf.mxu0  ;;  %v7552_v54 = vadd.f32 %v7473_v20, %v7422_v42  ;;  %v6900_v42 = vadd.f32 %v15961_v15, %v6696_v51  ;;  %v18728_v15 = vld [vmem:[#allocation192_spill] sm:$0xff] }
 0x7f6   : > { %9763 = vmatmul.msk.bf16.gmra.mxu3 %vm2152_vm9, %v18724_v12 }
 0x7f7   : > { %v7734_v22 = vpop.f32.mrf.mxu1  ;;  %9747 = vmatmul.msk.bf16.gmra.mxu2 %vm2152_vm9, %v18725_v10  ;;  %v16085_v53 = vadd.f32 %v7070_v45, %v6900_v42  ;;  %v18729_v45 = vld [vmem:[#allocation95_spill] sm:$0xff] }
 0x7f8   : > { %9783 = vmatmul.msk.bf16.gmra.mxu0 %vm2152_vm9, %v18672_v48 }
 0x7fa   : > { %9795 = vmatmul.msk.bf16.gmra.mxu1 %vm2152_vm9, %v18726_v52  ;;  %v7476_v31 = vpop.f32.mrf.mxu3  ;;  %v7346_v7 = vpop.f32.mrf.mxu2 }
 0x7fb   : > { %v7423_v30 = vadd.f32 %v7346_v7, %v15783_v29  ;;  %v18727_v29 = vld [vmem:[#allocation122_spill] sm:$0xff] }
 0x7fd   : > { %v16081_v26 = vpop.f32.mrf.mxu0  ;;  %v7553_v23 = vadd.f32 %v7476_v31, %v7423_v30  ;;  %v16099_v31 = vadd.f32 %v7729_v1, %v7680_v63 }
 0x7ff   : > { %v7736_v61 = vpop.f32.mrf.mxu1  ;;  %18730 = vst [vmem:[#allocation77_spill] sm:$0xff] %v16099_v31  ;;  %v7682_v1 = vadd.f32 %v15987_v57, %v7553_v23  ;;  %v18731_v31 = vld [vmem:[#allocation3_spill] sm:$0xff] }
 0x802   : > { %v7478_v39 = vpop.f32.mrf.mxu3  ;;  %v7348_v20 = vpop.f32.mrf.mxu2 }
 0x803   : > { %v7424_v52 = vadd.f32 %v7348_v20, %v15789_v5 }
 0x805   : > { %v16087_v48 = vpop.f32.mrf.mxu0  ;;  %v7554_v41 = vadd.f32 %v7478_v39, %v7424_v52  ;;  %v7681_v52 = vadd.f32 %v15981_v37, %v7552_v54  ;;  %v18733_v37 = vld [vmem:[#allocation236_spill] sm:$0xff] }
 0x806   : > { %9764 = vmatmul.msk.bf16.gmra.mxu3 %vm2152_vm9, %v18727_v29 }
 0x807   : > { %v7739_v10 = vpop.f32.mrf.mxu1  ;;  %9748 = vmatmul.msk.bf16.gmra.mxu2 %vm2152_vm9, %v18728_v15  ;;  %v16105_v39 = vadd.f32 %v7731_v62, %v7681_v52  ;;  %v18734_v62 = vld [vmem:[#allocation178_spill] sm:$0xff] }
 0x808   : > { %9784 = vmatmul.msk.bf16.gmra.mxu0 %vm2152_vm9, %v18675_v0 }
 0x80a   : > { %9796 = vmatmul.msk.bf16.gmra.mxu1 %vm2152_vm9, %v18729_v45  ;;  %v7481_v51 = vpop.f32.mrf.mxu3  ;;  %v7351_v5 = vpop.f32.mrf.mxu2 }
 0x80b   : > { %v7425_v6 = vadd.f32 %v7351_v5, %v15803_v56  ;;  %v18732_v56 = vld [vmem:[#allocation126_spill] sm:$0xff] }
 0x80d   : > { %v16101_v7 = vpop.f32.mrf.mxu0  ;;  %v7555_v30 = vadd.f32 %v7481_v51, %v7425_v6  ;;  %v16119_v51 = vadd.f32 %v7734_v22, %v7682_v1 }
 0x80f   : > { %v7741_v36 = vpop.f32.mrf.mxu1  ;;  %v7684_v22 = vadd.f32 %v16007_v17, %v7555_v30 }
 0x812   : > { %v7483_v42 = vpop.f32.mrf.mxu3  ;;  %v7353_v20 = vpop.f32.mrf.mxu2 }
 0x813   : > { %v7426_v45 = vadd.f32 %v7353_v20, %v15809_v24 }
 0x815   : > { %v16107_v0 = vpop.f32.mrf.mxu0  ;;  %v7556_v63 = vadd.f32 %v7483_v42, %v7426_v45  ;;  %v7683_v45 = vadd.f32 %v16001_v43, %v7554_v41  ;;  %v18736_v43 = vld [vmem:[#allocation118_spill] sm:$0xff] }
 0x816   : > { %9765 = vmatmul.msk.bf16.gmra.mxu3 %vm2152_vm9, %v18732_v56 }
 0x817   : > { %v7744_v15 = vpop.f32.mrf.mxu1  ;;  %9749 = vmatmul.msk.bf16.gmra.mxu2 %vm2152_vm9, %v18733_v37  ;;  %v16125_v42 = vadd.f32 %v7736_v61, %v7683_v45  ;;  %v18737_v61 = vld [vmem:[#allocation131_spill] sm:$0xff] }
 0x818   : > { %9785 = vmatmul.msk.bf16.gmra.mxu0 %vm2152_vm9, %v18731_v31 }
 0x81a   : > { %9797 = vmatmul.msk.bf16.gmra.mxu1 %vm2152_vm9, %v18734_v62  ;;  %v7486_v54 = vpop.f32.mrf.mxu3  ;;  %v7356_v24 = vpop.f32.mrf.mxu2 }
 0x81b   : > { %v7427_v57 = vadd.f32 %v7356_v24, %v15823_v50  ;;  %v18735_v50 = vld [vmem:[#allocation194_spill] sm:$0xff] }
 0x81d   : > { %v16121_v5 = vpop.f32.mrf.mxu0  ;;  %v7557_v6 = vadd.f32 %v7486_v54, %v7427_v57  ;;  %v16139_v54 = vadd.f32 %v7739_v10, %v7684_v22 }
 0x81f   : > { %v7746_v23 = vpop.f32.mrf.mxu1  ;;  %v7686_v10 = vadd.f32 %v16027_v14, %v7557_v6 }
 0x822   : > { %v7488_v52 = vpop.f32.mrf.mxu3  ;;  %v7358_v20 = vpop.f32.mrf.mxu2 }
 0x823   : > { %v7428_v62 = vadd.f32 %v7358_v20, %v15829_v27 }
 0x825   : > { %v16127_v31 = vpop.f32.mrf.mxu0  ;;  %v7558_v1 = vadd.f32 %v7488_v52, %v7428_v62 }
 0x826   : > { %9766 = vmatmul.msk.bf16.gmra.mxu3 %vm2152_vm9, %v18735_v50 }
 0x827   : > { %v7749_v37 = vpop.f32.mrf.mxu1  ;;  %9750 = vmatmul.msk.bf16.gmra.mxu2 %vm2152_vm9, %v18736_v43 }
 0x828   : > { %9834 = vmatmul.msk.bf16.vlgmr.msrb.gmra.mxu0 %vm2152_vm9, %v18682_v28  ;;  %v7685_v28 = vadd.f32 %v16021_v46, %v7556_v63  ;;  %v18739_v46 = vld [vmem:[#allocation212_spill] sm:$0xff] }
 0x82a   : > { %9798 = vmatmul.msk.bf16.gmra.mxu1 %vm2152_vm9, %v18737_v61  ;;  %v7491_v41 = vpop.f32.mrf.mxu3  ;;  %v7361_v27 = vpop.f32.mrf.mxu2  ;;  %v16145_v45 = vadd.f32 %v7741_v36, %v7685_v28  ;;  %v18740_v36 = vld [vmem:[#allocation228_spill] sm:$0xff] }
 0x82b   : > { %v7429_v17 = vadd.f32 %v7361_v27, %v15855_v47  ;;  %v18738_v47 = vld [vmem:[#allocation27_spill] sm:$0xff] }
 0x82d   : > { %v16141_v24 = vpop.f32.mrf.mxu0  ;;  %v7559_v62 = vadd.f32 %v7491_v41, %v7429_v17  ;;  %v16159_v41 = vadd.f32 %v7744_v15, %v7686_v10 }
 0x82f   : > { %v7751_v30 = vpop.f32.mrf.mxu1  ;;  %v7688_v15 = vadd.f32 %v16047_v58, %v7559_v62  ;;  %v4226_v58 = vld [vmem:[%s17057_s7 + $0x16] sm:$0x1] }
 0x830   : > { %v8349_v62 = vsel %vm2201_vm8, %v4226_v58, 0 }
 0x831   : > { %8358 = vmatpush.bf16.msrb.mxu2 %v8349_v62  ;;  %v18746_v62 = vld [vmem:[#allocation55_spill] sm:$0xff] }
 0x832   : > { %v7493_v57 = vpop.f32.mrf.mxu3  ;;  %v7363_v52 = vpop.f32.mrf.mxu2 }
 0x833   : > { %v7430_v61 = vadd.f32 %v7363_v52, %v15865_v25 }
 0x835   : > { %v16147_v20 = vpop.f32.mrf.mxu0  ;;  %v7560_v22 = vadd.f32 %v7493_v57, %v7430_v61 }
 0x836   : > { %9767 = vmatmul.msk.bf16.gmra.mxu3 %vm2152_vm9, %v18738_v47 }
 0x837   : > { %v7754_v43 = vpop.f32.mrf.mxu1  ;;  %9751 = vmatmul.msk.bf16.gmra.mxu2 %vm2152_vm9, %v18739_v46 }
 0x838   : > { %9835 = vmatmul.msk.bf16.gmra.mxu0 %vm2152_vm9, %v18688_v8  ;;  %v7687_v8 = vadd.f32 %v16041_v33, %v7558_v1  ;;  %v18742_v33 = vld [vmem:[#allocation46_spill] sm:$0xff] }
 0x83a   : > { %9799 = vmatmul.msk.bf16.gmra.mxu1 %vm2152_vm9, %v18740_v36  ;;  %v7496_v63 = vpop.f32.mrf.mxu3  ;;  %v7366_v25 = vpop.f32.mrf.mxu2  ;;  %v16165_v28 = vadd.f32 %v7746_v23, %v7687_v8  ;;  %v18743_v23 = vld [vmem:[#allocation207_spill] sm:$0xff] }
 0x83b   : > { %v7431_v14 = vadd.f32 %v7366_v25, %v15879_v2  ;;  %v18741_v2 = vld [vmem:[#allocation164_spill] sm:$0xff]  ;;  %v16191_v25 = vadd.f32 %v7749_v37, %v7688_v15 }
 0x83d   : > { %v16161_v27 = vpop.f32.mrf.mxu0  ;;  %v7561_v61 = vadd.f32 %v7496_v63, %v7431_v14  ;;  %18744 = vst [vmem:[#allocation211_spill] sm:$0xff] %v16191_v25 }
 0x83f   : > { %v7756_v6 = vpop.f32.mrf.mxu1 }
 0x842   : > { %v7498_v17 = vpop.f32.mrf.mxu3  ;;  %v7368_v57 = vpop.f32.mrf.mxu2 }
 0x843   : > { %v7432_v36 = vadd.f32 %v7368_v57, %v15885_v59  ;;  %v4225_v59 = vld [vmem:[%s17057_s7 + $0x15] sm:$0x1] }
 0x844   : > { %v8225_v1 = vsel %vm2201_vm8, %v4225_v59, 0  ;;  %v4228_v59 = vld [vmem:[%s17057_s7 + $0x18] sm:$0x1] }
 0x845   : > { %v16167_v52 = vpop.f32.mrf.mxu0  ;;  %v7562_v10 = vadd.f32 %v7498_v17, %v7432_v36  ;;  %8234 = vmatpush.bf16.msrb.mxu1 %v8225_v1  ;;  %v8597_v58 = vsel %vm2201_vm8, %v4228_v59, 0 }
 0x846   : > { %9768 = vmatmul.msk.bf16.gmra.mxu3 %vm2152_vm9, %v18741_v2  ;;  %8606 = vmatpush.bf16.msra.mxu0 %v8597_v58 }
 0x847   : > { %v7759_v46 = vpop.f32.mrf.mxu1  ;;  %9752 = vmatmul.msk.bf16.gmra.mxu2 %vm2152_vm9, %v18742_v33 }
 0x848   : > { %9836 = vmatmul.msk.bf16.gmra.mxu0 %vm2152_vm9, %v18693_v34  ;;  %v4227_v34 = vld [vmem:[%s17057_s7 + $0x17] sm:$0x1] }
 0x849   : > { %v8473_v36 = vsel %vm2201_vm8, %v4227_v34, 0 }
 0x84a   : > { %9800 = vmatmul.msk.bf16.gmra.mxu1 %vm2152_vm9, %v18743_v23  ;;  %v7501_v63 = vpop.f32.mrf.mxu3  ;;  %v7371_v14 = vpop.f32.mrf.mxu2  ;;  %8482 = vmatpush.bf16.msrb.mxu3 %v8473_v36  ;;  %v7689_v23 = vadd.f32 %v16061_v19, %v7560_v22  ;;  %v18747_v22 = vld [vmem:[#allocation231_spill] sm:$0xff] }
 0x84b   : > { %v7433_v17 = vadd.f32 %v7371_v14, %v15899_v40  ;;  %v7690_v14 = vadd.f32 %v16067_v55, %v7561_v61 }
 0x84c   : > { %v16201_v37 = vadd.f32 %v7751_v30, %v7689_v23  ;;  %v18749_v30 = vld [vmem:[#allocation254_spill] sm:$0xff] }
 0x84d   : > { %v16193_v8 = vpop.f32.mrf.mxu0  ;;  %v7563_v33 = vadd.f32 %v7501_v63, %v7433_v17  ;;  %v18748_v63 = vld [vmem:[#allocation25_spill] sm:$0xff]  ;;  %v16215_v17 = vadd.f32 %v7754_v43, %v7690_v14 }
 0x84e   : > { %18745 = vst [vmem:[#allocation65_spill] sm:$0xff] %v16201_v37  ;;  %v18750_v37 = vld [vmem:[#allocation245_spill] sm:$0xff] }
 0x84f   : > { %v7761_v57 = vpop.f32.mrf.mxu1  ;;  %v7692_v43 = vadd.f32 %v16087_v48, %v7563_v33 }
 0x852   : > { %v7503_v34 = vpop.f32.mrf.mxu3  ;;  %v7373_v15 = vpop.f32.mrf.mxu2 }
 0x853   : > { %v7434_v36 = vadd.f32 %v7373_v15, %v18746_v62 }
 0x855   : > { %v16203_v1 = vpop.f32.mrf.mxu0  ;;  %v7564_v19 = vadd.f32 %v7503_v34, %v7434_v36 }
 0x856   : > { %9769 = vmatmul.msk.bf16.gmra.mxu3 %vm2152_vm9, %v18747_v22 }
 0x857   : > { %v7764_v40 = vpop.f32.mrf.mxu1  ;;  %9753 = vmatmul.msk.bf16.gmra.mxu2 %vm2152_vm9, %v18748_v63 }
 0x858   : > { %9837 = vmatmul.msk.bf16.gmra.mxu0 %vm2152_vm9, %v18698_v44  ;;  %v7691_v44 = vadd.f32 %v16081_v26, %v7562_v10  ;;  %v18752_v26 = vld [vmem:[#allocation214_spill] sm:$0xff] }
 0x85a   : > { %9801 = vmatmul.msk.bf16.gmra.mxu1 %vm2152_vm9, %v18749_v30  ;;  %v7506_v23 = vpop.f32.mrf.mxu3  ;;  %v7376_v59 = vpop.f32.mrf.mxu2  ;;  %v16221_v62 = vadd.f32 %v7756_v6, %v7691_v44  ;;  %v18753_v6 = vld [vmem:[#allocation114_spill] sm:$0xff] }
 0x85b   : > { %v7435_v55 = vadd.f32 %v7376_v59, %v15919_v13  ;;  %v18751_v13 = vld [vmem:[#allocation209_spill] sm:$0xff] }
 0x85d   : > { %v16217_v58 = vpop.f32.mrf.mxu0  ;;  %v7565_v34 = vadd.f32 %v7506_v23, %v7435_v55  ;;  %v16235_v23 = vadd.f32 %v7759_v46, %v7692_v43 }
 0x85f   : > { %v7766_v61 = vpop.f32.mrf.mxu1  ;;  %v7694_v46 = vadd.f32 %v16107_v0, %v7565_v34 }
 0x862   : > { %v7508_v15 = vpop.f32.mrf.mxu3  ;;  %v7378_v36 = vpop.f32.mrf.mxu2 }
 0x863   : > { %v7436_v30 = vadd.f32 %v7378_v36, %v18750_v37 }
 0x865   : > { %v16223_v63 = vpop.f32.mrf.mxu0  ;;  %v7566_v14 = vadd.f32 %v7508_v15, %v7436_v30 }
 0x866   : > { %9818 = vmatmul.msk.bf16.vlgmr.msra.gmra.mxu3 %vm2152_vm9, %v18751_v13  ;;  %v18755_v13 = vld [vmem:[#allocation232_spill] sm:$0xff] }
 0x867   : > { %v7769_v25 = vpop.f32.mrf.mxu1  ;;  %9802 = vmatmul.msk.bf16.vlgmr.msra.gmra.mxu2 %vm2152_vm9, %v18752_v26 }
 0x868   : > { %9838 = vmatmul.msk.bf16.gmra.mxu0 %vm2152_vm9, %v18704_v32  ;;  %v7693_v32 = vadd.f32 %v16101_v7, %v7564_v19  ;;  %v18757_v7 = vld [vmem:[#allocation184_spill] sm:$0xff] }
 0x86a   : > { %9850 = vmatmul.msk.bf16.vlgmr.msrb.gmra.mxu1 %vm2152_vm9, %v18753_v6  ;;  %v7511_v10 = vpop.f32.mrf.mxu3  ;;  %v7381_v37 = vpop.f32.mrf.mxu2  ;;  %v16241_v44 = vadd.f32 %v7761_v57, %v7693_v32  ;;  %v18758_v57 = vld [vmem:[#allocation281_spill] sm:$0xff] }
 0x86b   : > { %v7437_v48 = vadd.f32 %v7381_v37, %v15939_v35  ;;  %v18756_v35 = vld [vmem:[#allocation163_spill] sm:$0xff] }
 0x86c   : > { %18754 = vst [vmem:[#allocation259_spill] sm:$0xff] %v16241_v44 }
 0x86d   : > { %v16237_v59 = vpop.f32.mrf.mxu0  ;;  %v7567_v30 = vadd.f32 %v7511_v10, %v7437_v48  ;;  %v16255_v10 = vadd.f32 %v7764_v40, %v7694_v46 }
 0x86f   : > { %v7771_v33 = vpop.f32.mrf.mxu1  ;;  %v7696_v40 = vadd.f32 %v16127_v31, %v7567_v30  ;;  %v18765_v31 = vld [vmem:[#allocation58_spill] sm:$0xff] }
 0x872   : > { %v7513_v55 = vpop.f32.mrf.mxu3  ;;  %v7383_v15 = vpop.f32.mrf.mxu2 }
 0x873   : > { %v7438_v26 = vadd.f32 %v7383_v15, %v18755_v13 }
 0x875   : > { %v16243_v36 = vpop.f32.mrf.mxu0  ;;  %v7568_v43 = vadd.f32 %v7513_v55, %v7438_v26 }
 0x876   : > { %9819 = vmatmul.msk.bf16.gmra.mxu3 %vm2152_vm9, %v18756_v35 }
 0x877   : > { %v7774_v6 = vpop.f32.mrf.mxu1  ;;  %9803 = vmatmul.msk.bf16.gmra.mxu2 %vm2152_vm9, %v18757_v7  ;;  %v18760_v7 = vld [vmem:[#allocation12_spill] sm:$0xff] }
 0x878   : > { %9839 = vmatmul.msk.bf16.gmra.mxu0 %vm2152_vm9, %v18710_v9  ;;  %v7695_v9 = vadd.f32 %v16121_v5, %v7566_v14  ;;  %v18762_v5 = vld [vmem:[#allocation204_spill] sm:$0xff] }
 0x87a   : > { %9851 = vmatmul.msk.bf16.gmra.mxu1 %vm2152_vm9, %v18758_v57  ;;  %v7516_v19 = vpop.f32.mrf.mxu3  ;;  %v7386_v37 = vpop.f32.mrf.mxu2  ;;  %v16261_v15 = vadd.f32 %v7766_v61, %v7695_v9  ;;  %v18763_v61 = vld [vmem:[#allocation100_spill] sm:$0xff] }
 0x87b   : > { %v7439_v0 = vadd.f32 %v7386_v37, %v15959_v3  ;;  %v18761_v3 = vld [vmem:[#allocation200_spill] sm:$0xff] }
 0x87c   : > { %18759 = vst [vmem:[#allocation256_spill] sm:$0xff] %v16261_v15  ;;  %v18766_v15 = vld [vmem:[#allocation38_spill] sm:$0xff] }
 0x87d   : > { %v16257_v48 = vpop.f32.mrf.mxu0  ;;  %v7569_v32 = vadd.f32 %v7516_v19, %v7439_v0  ;;  %v16275_v19 = vadd.f32 %v7769_v25, %v7696_v40 }
 0x87f   : > { %v7776_v34 = vpop.f32.mrf.mxu1  ;;  %18764 = vst [vmem:[#allocation70_spill] sm:$0xff] %v16275_v19  ;;  %v7698_v25 = vadd.f32 %v16147_v20, %v7569_v32 }
 0x882   : > { %v7518_v55 = vpop.f32.mrf.mxu3  ;;  %v7388_v13 = vpop.f32.mrf.mxu2 }
 0x883   : > { %v7440_v57 = vadd.f32 %v7388_v13, %v18760_v7 }
 0x885   : > { %v16263_v26 = vpop.f32.mrf.mxu0  ;;  %v7570_v46 = vadd.f32 %v7518_v55, %v7440_v57 }
 0x886   : > { %9820 = vmatmul.msk.bf16.gmra.mxu3 %vm2152_vm9, %v18761_v3 }
 0x887   : > { %v7779_v44 = vpop.f32.mrf.mxu1  ;;  %9804 = vmatmul.msk.bf16.gmra.mxu2 %vm2152_vm9, %v18762_v5  ;;  %v7699_v32 = vadd.f32 %v16161_v27, %v7570_v46  ;;  %v18774_v27 = vld [vmem:[#allocation66_spill] sm:$0xff] }
 0x888   : > { %9840 = vmatmul.msk.bf16.gmra.mxu0 %vm2152_vm9, %v18715_v49  ;;  %v7697_v49 = vadd.f32 %v16141_v24, %v7568_v43  ;;  %v18768_v24 = vld [vmem:[#allocation206_spill] sm:$0xff] }
 0x88a   : > { %9852 = vmatmul.msk.bf16.gmra.mxu1 %vm2152_vm9, %v18763_v61  ;;  %v7521_v14 = vpop.f32.mrf.mxu3  ;;  %v7391_v7 = vpop.f32.mrf.mxu2  ;;  %v16281_v13 = vadd.f32 %v7771_v33, %v7697_v49  ;;  %v18769_v33 = vld [vmem:[#allocation123_spill] sm:$0xff] }
 0x88b   : > { %v7441_v30 = vadd.f32 %v7391_v7, %v18765_v31  ;;  %v18767_v7 = vld [vmem:[#allocation229_spill] sm:$0xff] }
 0x88d   : > { %v16277_v37 = vpop.f32.mrf.mxu0  ;;  %v7571_v9 = vadd.f32 %v7521_v14, %v7441_v30  ;;  %v16295_v14 = vadd.f32 %v7774_v6, %v7698_v25 }
 0x88f   : > { %v7781_v0 = vpop.f32.mrf.mxu1  ;;  %18770 = vst [vmem:[#allocation98_spill] sm:$0xff] %v16295_v14  ;;  %v7700_v6 = vadd.f32 %v16167_v52, %v7571_v9  ;;  %v18772_v14 = vld [vmem:[#allocation47_spill] sm:$0xff] }
 0x892   : > { %v7523_v55 = vpop.f32.mrf.mxu3  ;;  %v7393_v57 = vpop.f32.mrf.mxu2 }
 0x893   : > { %v7442_v61 = vadd.f32 %v7393_v57, %v18766_v15 }
 0x895   : > { %v16283_v5 = vpop.f32.mrf.mxu0  ;;  %v7572_v40 = vadd.f32 %v7523_v55, %v7442_v61  ;;  %v16301_v55 = vadd.f32 %v7776_v34, %v7699_v32 }
 0x896   : > { %9821 = vmatmul.msk.bf16.gmra.mxu3 %vm2152_vm9, %v18767_v7 }
 0x897   : > { %v7784_v19 = vpop.f32.mrf.mxu1  ;;  %9805 = vmatmul.msk.bf16.gmra.mxu2 %vm2152_vm9, %v18768_v24  ;;  %v18771_v24 = vld [vmem:[#allocation59_spill] sm:$0xff] }
 0x898   : > { %9841 = vmatmul.msk.bf16.gmra.mxu0 %vm2152_vm9, %v18720_v18 }
 0x89a   : > { %9853 = vmatmul.msk.bf16.gmra.mxu1 %vm2152_vm9, %v18769_v33  ;;  %v7526_v43 = vpop.f32.mrf.mxu3  ;;  %v7396_v15 = vpop.f32.mrf.mxu2 }
 0x89b   : > { %v7443_v20 = vadd.f32 %v7396_v15, %v15999_v4  ;;  %v18773_v4 = vld [vmem:[#allocation242_spill] sm:$0xff] }
 0x89d   : > { %v16297_v31 = vpop.f32.mrf.mxu0  ;;  %v7573_v18 = vadd.f32 %v7526_v43, %v7443_v20  ;;  %v16315_v43 = vadd.f32 %v7779_v44, %v7700_v6 }
 0x89f   : > { %v7786_v30 = vpop.f32.mrf.mxu1  ;;  %18775 = vst [vmem:[#allocation265_spill] sm:$0xff] %v16315_v43  ;;  %v7702_v44 = vadd.f32 %v16203_v1, %v7573_v18  ;;  %v18777_v43 = vld [vmem:[#allocation217_spill] sm:$0xff] }
 0x8a2   : > { %v7528_v49 = vpop.f32.mrf.mxu3  ;;  %v7398_v57 = vpop.f32.mrf.mxu2 }
 0x8a3   : > { %v7444_v33 = vadd.f32 %v7398_v57, %v18771_v24 }
 0x8a5   : > { %v16303_v61 = vpop.f32.mrf.mxu0  ;;  %v7574_v25 = vadd.f32 %v7528_v49, %v7444_v33 }
 0x8a6   : > { %9822 = vmatmul.msk.bf16.gmra.mxu3 %vm2152_vm9, %v18772_v14 }
 0x8a7   : > { %9806 = vmatmul.msk.bf16.gmra.mxu2 %vm2152_vm9, %v18773_v4  ;;  %v7789_v34 = vpop.f32.mrf.mxu1  ;;  %v7703_v18 = vadd.f32 %v16217_v58, %v7574_v25  ;;  %v18782_v58 = vld [vmem:[#allocation238_spill] sm:$0xff] }
 0x8a8   : > { %9842 = vmatmul.msk.bf16.gmra.mxu0 %vm2152_vm9, %v18724_v12  ;;  %v7701_v12 = vadd.f32 %v16193_v8, %v7572_v40  ;;  %v18779_v8 = vld [vmem:[#allocation20_spill] sm:$0xff]  ;;  %v16335_v40 = vadd.f32 %v7784_v19, %v7702_v44 }
 0x8aa   : > { %9854 = vmatmul.msk.bf16.gmra.mxu1 %vm2152_vm9, %v18774_v27  ;;  %v7531_v46 = vpop.f32.mrf.mxu3  ;;  %v7401_v24 = vpop.f32.mrf.mxu2  ;;  %v16321_v32 = vadd.f32 %v7781_v0, %v7701_v12  ;;  %v18776_v27 = vld [vmem:[#allocation87_spill] sm:$0xff]  ;;  %v16341_v12 = vadd.f32 %v7786_v30, %v7703_v18  ;;  %v18783_v30 = vld [vmem:[#allocation141_spill] sm:$0xff] }
 0x8ab   : > { %v7445_v52 = vadd.f32 %v7401_v24, %v16019_v60  ;;  %v18778_v60 = vld [vmem:[#allocation216_spill] sm:$0xff] }
 0x8ad   : > { %v16317_v15 = vpop.f32.mrf.mxu0  ;;  %v7575_v9 = vadd.f32 %v7531_v46, %v7445_v52 }
 0x8af   : > { %v7791_v33 = vpop.f32.mrf.mxu1  ;;  %v7704_v19 = vadd.f32 %v16223_v63, %v7575_v9 }
 0x8b2   : > { %v7533_v20 = vpop.f32.mrf.mxu3  ;;  %v7403_v49 = vpop.f32.mrf.mxu2 }
 0x8b3   : > { %v7446_v4 = vadd.f32 %v7403_v49, %v18776_v27  ;;  %v18780_v27 = vld [vmem:[#allocation233_spill] sm:$0xff] }
 0x8b5   : > { %v16323_v57 = vpop.f32.mrf.mxu0  ;;  %v7576_v6 = vadd.f32 %v7533_v20, %v7446_v4 }
 0x8b6   : > { %9823 = vmatmul.msk.bf16.gmra.mxu3 %vm2152_vm9, %v18777_v43 }
 0x8b7   : > { %9807 = vmatmul.msk.bf16.gmra.mxu2 %vm2152_vm9, %v18778_v60  ;;  %v18781_v60 = vld [vmem:[#allocation35_spill] sm:$0xff] }
 0x8b8   : > { %9843 = vmatmul.msk.bf16.gmra.mxu0 %vm2152_vm9, %v18727_v29  ;;  %v7794_v29 = vpop.f32.mrf.mxu1 }
 0x8ba   : > { %9855 = vmatmul.msk.bf16.gmra.mxu1 %vm2152_vm9, %v18779_v8  ;;  %v7536_v0 = vpop.f32.mrf.mxu3  ;;  %v7406_v46 = vpop.f32.mrf.mxu2 }
 0x8bb   : > { %v7447_v1 = vadd.f32 %v7406_v46, %v16039_v38 }
 0x8bd   : > { %v16337_v24 = vpop.f32.mrf.mxu0  ;;  %v7577_v4 = vadd.f32 %v7536_v0, %v7447_v1  ;;  %v16355_v0 = vadd.f32 %v7789_v34, %v7704_v19 }
 0x8bf   : > { %v7706_v34 = vadd.f32 %v16243_v36, %v7577_v4 }
 0x8c0   : > { %v7796_v38 = vpop.f32.mrf.mxu1 }
 0x8c2   : > { %v7538_v52 = vpop.f32.mrf.mxu3  ;;  %v7408_v20 = vpop.f32.mrf.mxu2 }
 0x8c3   : > { %v7448_v8 = vadd.f32 %v7408_v20, %v18780_v27 }
 0x8c5   : > { %v16343_v49 = vpop.f32.mrf.mxu0  ;;  %v7578_v44 = vadd.f32 %v7538_v52, %v7448_v8 }
 0x8c6   : > { %9824 = vmatmul.msk.bf16.gmra.mxu3 %vm2152_vm9, %v18781_v60 }
 0x8c7   : > { %9808 = vmatmul.msk.bf16.gmra.mxu2 %vm2152_vm9, %v18782_v58  ;;  %v18784_v58 = vld [vmem:[#allocation24_spill] sm:$0xff] }
 0x8c8   : > { %9844 = vmatmul.msk.bf16.gmra.mxu0 %vm2152_vm9, %v18732_v56  ;;  %v7705_v56 = vadd.f32 %v16237_v59, %v7576_v6  ;;  %v7799_v18 = vpop.f32.mrf.mxu1  ;;  %v18786_v59 = vld [vmem:[#allocation52_spill] sm:$0xff]  ;;  %v16375_v6 = vadd.f32 %v7794_v29, %v7706_v34 }
 0x8ca   : > { %9856 = vmatmul.msk.bf16.gmra.mxu1 %vm2152_vm9, %v18783_v30  ;;  %v7541_v25 = vpop.f32.mrf.mxu3  ;;  %v7411_v46 = vpop.f32.mrf.mxu2  ;;  %v16361_v20 = vadd.f32 %v7791_v33, %v7705_v56 }
 0x8cb   : > { %v7449_v63 = vadd.f32 %v7411_v46, %v16059_v11  ;;  %v18785_v11 = vld [vmem:[#allocation153_spill] sm:$0xff] }
 0x8cd   : > { %v16357_v1 = vpop.f32.mrf.mxu0  ;;  %v7579_v9 = vadd.f32 %v7541_v25, %v7449_v63 }
 0x8cf   : > { %v7708_v29 = vadd.f32 %v16263_v26, %v7579_v9  ;;  %v18791_v26 = vld [vmem:[#allocation77_spill] sm:$0xff] }
 0x8d0   : > { %v7801_v36 = vpop.f32.mrf.mxu1 }
 0x8d2   : > { %v7543_v52 = vpop.f32.mrf.mxu3  ;;  %v7413_v27 = vpop.f32.mrf.mxu2 }
 0x8d3   : > { %v7450_v30 = vadd.f32 %v7413_v27, %v16065_v21 }
 0x8d5   : > { %v16363_v8 = vpop.f32.mrf.mxu0  ;;  %v7580_v19 = vadd.f32 %v7543_v52, %v7450_v30 }
 0x8d6   : > { %9825 = vmatmul.msk.bf16.gmra.mxu3 %vm2152_vm9, %v18784_v58 }
 0x8d7   : > { %9809 = vmatmul.msk.bf16.gmra.mxu2 %vm2152_vm9, %v18785_v11  ;;  %v18787_v11 = vld [vmem:[#allocation9_spill] sm:$0xff] }
 0x8d8   : > { %9845 = vmatmul.msk.bf16.gmra.mxu0 %vm2152_vm9, %v18735_v50  ;;  %v7707_v50 = vadd.f32 %v16257_v48, %v7578_v44  ;;  %v7804_v34 = vpop.f32.mrf.mxu1  ;;  %v18789_v48 = vld [vmem:[#allocation120_spill] sm:$0xff] }
 0x8da   : > { %9857 = vmatmul.msk.bf16.gmra.mxu1 %vm2152_vm9, %v18786_v59  ;;  %v7546_v33 = vpop.f32.mrf.mxu3  ;;  %v7416_v25 = vpop.f32.mrf.mxu2  ;;  %v16381_v56 = vadd.f32 %v7796_v38, %v7707_v50  ;;  %v16395_v38 = vadd.f32 %v7799_v18, %v7708_v29 }
 0x8db   : > { %v7451_v4 = vadd.f32 %v7416_v25, %v16079_v16  ;;  %v18788_v16 = vld [vmem:[#allocation215_spill] sm:$0xff]  ;;  %v7709_v25 = vadd.f32 %v16277_v37, %v7580_v19  ;;  %v18794_v19 = vld [vmem:[#allocation32_spill] sm:$0xff] }
 0x8dc   : > { %v18793_v37 = vld [vmem:[#allocation91_spill] sm:$0xff] }
 0x8dd   : > { %v16377_v21 = vpop.f32.mrf.mxu0  ;;  %v7581_v46 = vadd.f32 %v7546_v33, %v7451_v4 }
 0x8df   : > { %v7710_v18 = vadd.f32 %v16283_v5, %v7581_v46 }
 0x8e0   : > { %v7806_v4 = vpop.f32.mrf.mxu1 }
 0x8e2   : > { %v7548_v63 = vpop.f32.mrf.mxu3  ;;  %v7418_v52 = vpop.f32.mrf.mxu2 }
 0x8e3   : > { %v7452_v30 = vadd.f32 %v7418_v52, %v16085_v53 }
 0x8e5   : > { %v16383_v27 = vpop.f32.mrf.mxu0  ;;  %v7582_v59 = vadd.f32 %v7548_v63, %v7452_v30  ;;  %v16401_v63 = vadd.f32 %v7801_v36, %v7709_v25 }
 0x8e6   : > { %9826 = vmatmul.msk.bf16.gmra.mxu3 %vm2152_vm9, %v18787_v11 }
 0x8e7   : > { %9810 = vmatmul.msk.bf16.gmra.mxu2 %vm2152_vm9, %v18788_v16 }
 0x8e8   : > { %9846 = vmatmul.msk.bf16.gmra.mxu0 %vm2152_vm9, %v18738_v47  ;;  %v8236_v36 = vpop.f32.mrf.mxu1 }
 0x8ea   : > { %9858 = vmatmul.msk.bf16.gmra.mxu1 %vm2152_vm9, %v18789_v48  ;;  %v7988_v44 = vpop.f32.mrf.mxu3  ;;  %v7858_v53 = vpop.f32.mrf.mxu2 }
 0x8eb   : > { %v7938_v9 = vadd.f32 %v7858_v53, %v18791_v26  ;;  %v16415_v53 = vadd.f32 %v7804_v34, %v7710_v18 }
 0x8ed   : > { %v16397_v33 = vpop.f32.mrf.mxu0  ;;  %v8068_v47 = vadd.f32 %v7988_v44, %v7938_v9 }
 0x8ee   : > { %18790 = vst [vmem:[#allocation84_spill] sm:$0xff] %v16397_v33  ;;  %v18792_v33 = vld [vmem:[#allocation192_spill] sm:$0xff] }
 0x8ef   : > { %v8192_v34 = vadd.f32 %v16303_v61, %v8068_v47 }
 0x8f2   : > { %v7990_v50 = vpop.f32.mrf.mxu3  ;;  %v7860_v52 = vpop.f32.mrf.mxu2 }
 0x8f3   : > { %v7939_v48 = vadd.f32 %v7860_v52, %v16105_v39 }
 0x8f5   : > { %v16403_v30 = vpop.f32.mrf.mxu0  ;;  %v8069_v29 = vadd.f32 %v7990_v50, %v7939_v48  ;;  %v8238_v48 = vpop.f32.mrf.mxu1 }
 0x8f6   : > { %9827 = vmatmul.msk.bf16.gmra.mxu3 %vm2152_vm9, %v18792_v33 }
 0x8f7   : > { %9811 = vmatmul.msk.bf16.gmra.mxu2 %vm2152_vm9, %v18793_v37  ;;  %v8193_v47 = vadd.f32 %v16317_v15, %v8069_v29  ;;  %v18801_v15 = vld [vmem:[#allocation237_spill] sm:$0xff]  ;;  %v18802_v29 = vld [vmem:[#allocation208_spill] sm:$0xff] }
 0x8f8   : > { %9847 = vmatmul.msk.bf16.gmra.mxu0 %vm2152_vm9, %v18741_v2  ;;  %v7711_v2 = vadd.f32 %v16297_v31, %v7582_v59  ;;  %v18798_v31 = vld [vmem:[#allocation166_spill] sm:$0xff] }
 0x8fa   : > { %9859 = vmatmul.msk.bf16.gmra.mxu1 %vm2152_vm9, %v18794_v19  ;;  %v7993_v44 = vpop.f32.mrf.mxu3  ;;  %v7863_v39 = vpop.f32.mrf.mxu2  ;;  %v16421_v25 = vadd.f32 %v7806_v4, %v7711_v2  ;;  %v16435_v4 = vadd.f32 %v8236_v36, %v8192_v34 }
 0x8fb   : > { %v7940_v5 = vadd.f32 %v7863_v39, %v16119_v51  ;;  %v18797_v51 = vld [vmem:[#allocation239_spill] sm:$0xff] }
 0x8fd   : > { %v16417_v26 = vpop.f32.mrf.mxu0  ;;  %v8070_v46 = vadd.f32 %v7993_v44, %v7940_v5  ;;  %v8241_v39 = vpop.f32.mrf.mxu1 }
 0x8fe   : > { %18795 = vst [vmem:[#allocation96_spill] sm:$0xff] %v16417_v26  ;;  %v18796_v26 = vld [vmem:[#allocation236_spill] sm:$0xff] }
 0x8ff   : > { %v8194_v36 = vadd.f32 %v16323_v57, %v8070_v46 }
 0x902   : > { %v7995_v9 = vpop.f32.mrf.mxu3  ;;  %v7865_v50 = vpop.f32.mrf.mxu2 }
 0x903   : > { %v7941_v19 = vadd.f32 %v7865_v50, %v16125_v42 }
 0x905   : > { %v16423_v52 = vpop.f32.mrf.mxu0  ;;  %v8071_v18 = vadd.f32 %v7995_v9, %v7941_v19  ;;  %v16441_v9 = vadd.f32 %v8238_v48, %v8193_v47 }
 0x906   : > { %9828 = vmatmul.msk.bf16.gmra.mxu3 %vm2152_vm9, %v18796_v26 }
 0x907   : > { %9812 = vmatmul.msk.bf16.gmra.mxu2 %vm2152_vm9, %v18797_v51 }
 0x908   : > { %9848 = vmatmul.msk.bf16.gmra.mxu0 %vm2152_vm9, %v18747_v22 }
 0x90a   : > { %9860 = vmatmul.msk.bf16.gmra.mxu1 %vm2152_vm9, %v18798_v31  ;;  %v7998_v59 = vpop.f32.mrf.mxu3  ;;  %v7868_v44 = vpop.f32.mrf.mxu2 }
 0x90b   : > { %v7942_v61 = vadd.f32 %v7868_v44, %v16139_v54  ;;  %v8243_v54 = vpop.f32.mrf.mxu1 }
 0x90d   : > { %v16437_v42 = vpop.f32.mrf.mxu0  ;;  %v8072_v5 = vadd.f32 %v7998_v59, %v7942_v61  ;;  %v16455_v59 = vadd.f32 %v8241_v39, %v8194_v36 }
 0x90e   : > { %18799 = vst [vmem:[#allocation133_spill] sm:$0xff] %v16437_v42  ;;  %v18800_v42 = vld [vmem:[#allocation118_spill] sm:$0xff] }
 0x90f   : > { %v8196_v39 = vadd.f32 %v16343_v49, %v8072_v5  ;;  %v18809_v49 = vld [vmem:[#allocation211_spill] sm:$0xff] }
 0x912   : > { %v8000_v2 = vpop.f32.mrf.mxu3  ;;  %v7870_v50 = vpop.f32.mrf.mxu2 }
 0x913   : > { %v7943_v31 = vadd.f32 %v7870_v50, %v16145_v45  ;;  %v8246_v61 = vpop.f32.mrf.mxu1 }
 0x915   : > { %v16443_v19 = vpop.f32.mrf.mxu0  ;;  %v8073_v34 = vadd.f32 %v8000_v2, %v7943_v31 }
 0x916   : > { %9829 = vmatmul.msk.bf16.gmra.mxu3 %vm2152_vm9, %v18800_v42 }
 0x917   : > { %9813 = vmatmul.msk.bf16.gmra.mxu2 %vm2152_vm9, %v18801_v15 }
 0x918   : > { %9849 = vmatmul.msk.bf16.gmra.mxu0 %vm2152_vm9, %v18747_v22  ;;  %v8195_v22 = vadd.f32 %v16337_v24, %v8071_v18  ;;  %v18807_v24 = vld [vmem:[#allocation139_spill] sm:$0xff] }
 0x91a   : > { %9861 = vmatmul.msk.bf16.gmra.mxu1 %vm2152_vm9, %v18802_v29  ;;  %v8003_v48 = vpop.f32.mrf.mxu3  ;;  %v7873_v45 = vpop.f32.mrf.mxu2  ;;  %v16461_v2 = vadd.f32 %v8243_v54, %v8195_v22  ;;  %v16475_v54 = vadd.f32 %v8246_v61, %v8196_v39 }
 0x91b   : > { %v7944_v57 = vadd.f32 %v7873_v45, %v16159_v41  ;;  %v18806_v41 = vld [vmem:[#allocation21_spill] sm:$0xff]  ;;  %v8248_v45 = vpop.f32.mrf.mxu1 }
 0x91d   : > { %v16457_v44 = vpop.f32.mrf.mxu0  ;;  %v8074_v46 = vadd.f32 %v8003_v48, %v7944_v57 }
 0x91e   : > { %18803 = vst [vmem:[#allocation258_spill] sm:$0xff] %v16457_v44  ;;  %v18805_v44 = vld [vmem:[#allocation212_spill] sm:$0xff] }
 0x91f   : > { %v8198_v61 = vadd.f32 %v16363_v8, %v8074_v46 }
 0x922   : > { %v8005_v47 = vpop.f32.mrf.mxu3  ;;  %v7875_v50 = vpop.f32.mrf.mxu2 }
 0x923   : > { %v7945_v29 = vadd.f32 %v7875_v50, %v16165_v28 }
 0x925   : > { %v16463_v31 = vpop.f32.mrf.mxu0  ;;  %v8075_v36 = vadd.f32 %v8005_v47, %v7945_v29 }
 0x926   : > { %18804 = vst [vmem:[#allocation127_spill] sm:$0xff] %v16463_v31  ;;  %9830 = vmatmul.msk.bf16.gmra.mxu3 %vm2152_vm9, %v18805_v44 }
 0x927   : > { %9814 = vmatmul.msk.bf16.gmra.mxu2 %vm2152_vm9, %v18806_v41 }
 0x928   : > { %9898 = vmatmul.msk.bf16.vlgmr.msra.gmra.mxu0 %vm2152_vm9, %v18756_v35  ;;  %v8197_v35 = vadd.f32 %v16357_v1, %v8073_v34  ;;  %v18813_v1 = vld [vmem:[#allocation36_spill] sm:$0xff] }
 0x929   : > { %v18814_v34 = vld [vmem:[#allocation188_spill] sm:$0xff] }
 0x92a   : > { %9862 = vmatmul.msk.bf16.gmra.mxu1 %vm2152_vm9, %v18807_v24  ;;  %v8008_v18 = vpop.f32.mrf.mxu3  ;;  %v7878_v48 = vpop.f32.mrf.mxu2  ;;  %v16483_v47 = vadd.f32 %v8248_v45, %v8197_v35  ;;  %v18811_v24 = vld [vmem:[#allocation65_spill] sm:$0xff] }
 0x92b   : > { %v7946_v5 = vadd.f32 %v7878_v48, %v18809_v49  ;;  %v8251_v48 = vpop.f32.mrf.mxu1  ;;  %v18812_v49 = vld [vmem:[#allocation46_spill] sm:$0xff] }
 0x92d   : > { %v16477_v28 = vpop.f32.mrf.mxu0  ;;  %v16481_v57 = vadd.f32 %v8008_v18, %v7946_v5  ;;  %v16499_v5 = vadd.f32 %v8251_v48, %v8198_v61  ;;  %v18817_v48 = vld [vmem:[#allocation25_spill] sm:$0xff] }
 0x92e   : > { %18808 = vst [vmem:[#allocation111_spill] sm:$0xff] %v16477_v28  ;;  %v18829_v28 = vld [vmem:[#allocation17_spill] sm:$0xff] }
 0x932   : > { %v8010_v22 = vpop.f32.mrf.mxu3  ;;  %v7880_v50 = vpop.f32.mrf.mxu2 }
 0x933   : > { %v7947_v31 = vadd.f32 %v7880_v50, %v18811_v24  ;;  %v8253_v35 = vpop.f32.mrf.mxu1 }
 0x935   : > { %v16485_v29 = vpop.f32.mrf.mxu0  ;;  %v16489_v39 = vadd.f32 %v8010_v22, %v7947_v31 }
 0x936   : > { %18810 = vst [vmem:[#allocation189_spill] sm:$0xff] %v16485_v29  ;;  %9831 = vmatmul.msk.bf16.gmra.mxu3 %vm2152_vm9, %v18812_v49 }
 0x937   : > { %9815 = vmatmul.msk.bf16.gmra.mxu2 %vm2152_vm9, %v18813_v1 }
 0x938   : > { %9899 = vmatmul.msk.bf16.gmra.mxu0 %vm2152_vm9, %v18761_v3  ;;  %v8199_v3 = vadd.f32 %v16377_v21, %v8075_v36  ;;  %v18819_v21 = vld [vmem:[#allocation3_spill] sm:$0xff] }
 0x93a   : > { %9863 = vmatmul.msk.bf16.gmra.mxu1 %vm2152_vm9, %v18814_v34  ;;  %v8013_v18 = vpop.f32.mrf.mxu3  ;;  %v7883_v45 = vpop.f32.mrf.mxu2  ;;  %v16507_v50 = vadd.f32 %v8253_v35, %v8199_v3 }
 0x93b   : > { %v7948_v46 = vadd.f32 %v7883_v45, %v16215_v17  ;;  %v18818_v17 = vld [vmem:[#allocation116_spill] sm:$0xff] }
 0x93d   : > { %v16501_v8 = vpop.f32.mrf.mxu0  ;;  %v16505_v31 = vadd.f32 %v8013_v18, %v7948_v46 }
 0x93e   : > { %18815 = vst [vmem:[#allocation128_spill] sm:$0xff] %v16501_v8  ;;  %v18824_v8 = vld [vmem:[#allocation50_spill] sm:$0xff] }
 0x942   : > { %v8015_v22 = vpop.f32.mrf.mxu3  ;;  %v7885_v24 = vpop.f32.mrf.mxu2 }
 0x943   : > { %v7949_v34 = vadd.f32 %v7885_v24, %v16221_v62 }
 0x945   : > { %v16509_v29 = vpop.f32.mrf.mxu0  ;;  %v16512_v61 = vadd.f32 %v8015_v22, %v7949_v34  ;;  %v18822_v22 = vld [vmem:[#allocation259_spill] sm:$0xff] }
 0x946   : > { %18816 = vst [vmem:[#allocation148_spill] sm:$0xff] %v16509_v29  ;;  %9832 = vmatmul.msk.bf16.gmra.mxu3 %vm2152_vm9, %v18817_v48  ;;  %v18823_v29 = vld [vmem:[#allocation218_spill] sm:$0xff] }
 0x947   : > { %9816 = vmatmul.msk.bf16.gmra.mxu2 %vm2152_vm9, %v18818_v17 }
 0x948   : > { %9900 = vmatmul.msk.bf16.gmra.mxu0 %vm2152_vm9, %v18767_v7 }
 0x94a   : > { %9864 = vmatmul.msk.bf16.gmra.mxu1 %vm2152_vm9, %v18819_v21  ;;  %v8018_v36 = vpop.f32.mrf.mxu3  ;;  %v7888_v18 = vpop.f32.mrf.mxu2 }
 0x94b   : > { %v7950_v62 = vadd.f32 %v7888_v18, %v16235_v23 }
 0x94d   : > { %v16522_v45 = vpop.f32.mrf.mxu0  ;;  %v16525_v46 = vadd.f32 %v8018_v36, %v7950_v62 }
 0x94e   : > { %18820 = vst [vmem:[#allocation170_spill] sm:$0xff] %v16522_v45 }
 0x952   : > { %v8020_v3 = vpop.f32.mrf.mxu3  ;;  %v7890_v35 = vpop.f32.mrf.mxu2 }
 0x953   : > { %v7951_v24 = vadd.f32 %v7890_v35, %v18822_v22 }
 0x955   : > { %v16527_v7 = vpop.f32.mrf.mxu0  ;;  %v16530_v34 = vadd.f32 %v8020_v3, %v7951_v24  ;;  %v18827_v24 = vld [vmem:[#allocation256_spill] sm:$0xff] }
 0x956   : > { %18821 = vst [vmem:[#allocation8_spill] sm:$0xff] %v16527_v7  ;;  %9833 = vmatmul.msk.bf16.gmra.mxu3 %vm2152_vm9, %v18823_v29 }
 0x957   : > { %9817 = vmatmul.msk.bf16.gmra.mxu2 %vm2152_vm9, %v18824_v8 }
 0x958   : > { %9901 = vmatmul.msk.bf16.gmra.mxu0 %vm2152_vm9, %v18772_v14 }
 0x95a   : > { %9865 = vmatmul.msk.bf16.gmra.mxu1 %vm2152_vm9, %v18819_v21  ;;  %v8023_v23 = vpop.f32.mrf.mxu3  ;;  %v7893_v36 = vpop.f32.mrf.mxu2  ;;  %v18828_v21 = vld [vmem:[#allocation184_spill] sm:$0xff] }
 0x95b   : > { %v7952_v62 = vadd.f32 %v7893_v36, %v16255_v10 }
 0x95d   : > { %v16540_v18 = vpop.f32.mrf.mxu0  ;;  %v16543_v3 = vadd.f32 %v8023_v23, %v7952_v62  ;;  %v18831_v62 = vld [vmem:[#allocation70_spill] sm:$0xff] }
 0x95e   : > { %18825 = vst [vmem:[#allocation143_spill] sm:$0xff] %v16540_v18 }
 0x962   : > { %v8025_v35 = vpop.f32.mrf.mxu3  ;;  %v7895_v22 = vpop.f32.mrf.mxu2 }
 0x963   : > { %v7953_v7 = vadd.f32 %v7895_v22, %v18827_v24 }
 0x965   : > { %v16545_v14 = vpop.f32.mrf.mxu0  ;;  %v16548_v45 = vadd.f32 %v8025_v35, %v7953_v7 }
 0x966   : > { %18826 = vst [vmem:[#allocation196_spill] sm:$0xff] %v16545_v14  ;;  %9882 = vmatmul.msk.bf16.vlgmr.msrb.gmra.mxu3 %vm2152_vm9, %v18828_v21  ;;  %v18834_v21 = vld [vmem:[#allocation30_spill] sm:$0xff] }
 0x967   : > { %9866 = vmatmul.msk.bf16.vlgmr.msrb.gmra.mxu2 %vm2152_vm9, %v18829_v28  ;;  %v18833_v28 = vld [vmem:[#allocation204_spill] sm:$0xff] }
 0x968   : > { %9902 = vmatmul.msk.bf16.gmra.mxu0 %vm2152_vm9, %v18777_v43 }
 0x96a   : > { %v8028_v10 = vpop.f32.mrf.mxu3  ;;  %v7898_v23 = vpop.f32.mrf.mxu2 }
 0x96b   : > { %v7954_v18 = vadd.f32 %v7898_v23, %v18831_v62 }
 0x96d   : > { %v16556_v36 = vpop.f32.mrf.mxu0  ;;  %v16559_v14 = vadd.f32 %v8028_v10, %v7954_v18  ;;  %v18835_v10 = vld [vmem:[#allocation98_spill] sm:$0xff] }
 0x96e   : > { %18830 = vst [vmem:[#allocation185_spill] sm:$0xff] %v16556_v36 }
 0x972   : > { %v8030_v22 = vpop.f32.mrf.mxu3  ;;  %v7900_v7 = vpop.f32.mrf.mxu2 }
 0x973   : > { %v7955_v35 = vadd.f32 %v7900_v7, %v16281_v13 }
 0x975   : > { %v16562_v24 = vpop.f32.mrf.mxu0  ;;  %v16564_v43 = vadd.f32 %v8030_v22, %v7955_v35 }
 0x976   : > { %18832 = vst [vmem:[#allocation269_spill] sm:$0xff] %v16562_v24  ;;  %9883 = vmatmul.msk.bf16.gmra.mxu3 %vm2152_vm9, %v18833_v28  ;;  %v18838_v28 = vld [vmem:[#allocation56_spill] sm:$0xff] }
 0x977   : > { %9867 = vmatmul.msk.bf16.gmra.mxu2 %vm2152_vm9, %v18834_v21 }
 0x978   : > { %9903 = vmatmul.msk.bf16.gmra.mxu0 %vm2152_vm9, %v18781_v60  ;;  %v18837_v60 = vld [vmem:[#allocation206_spill] sm:$0xff] }
 0x97a   : > { %v8033_v23 = vpop.f32.mrf.mxu3  ;;  %v7903_v18 = vpop.f32.mrf.mxu2 }
 0x97b   : > { %v7956_v62 = vadd.f32 %v7903_v18, %v18835_v10  ;;  %v18839_v10 = vld [vmem:[#allocation265_spill] sm:$0xff] }
 0x97d   : > { %v16573_v36 = vadd.f32 %v8033_v23, %v7956_v62  ;;  %v16575_v13 = vpop.f32.mrf.mxu0 }
 0x97e   : > { %18836 = vst [vmem:[#allocation186_spill] sm:$0xff] %v16575_v13 }
 0x982   : > { %v8035_v7 = vpop.f32.mrf.mxu3  ;;  %v7905_v22 = vpop.f32.mrf.mxu2 }
 0x983   : > { %v7957_v35 = vadd.f32 %v7905_v22, %v16301_v55 }
 0x985   : > { %v16578_v24 = vadd.f32 %v8035_v7, %v7957_v35  ;;  %v16586_v21 = vpop.f32.mrf.mxu0 }
 0x986   : > { %9884 = vmatmul.msk.bf16.gmra.mxu3 %vm2152_vm9, %v18837_v60  ;;  %v18841_v60 = vld [vmem:[#allocation242_spill] sm:$0xff] }
 0x987   : > { %9868 = vmatmul.msk.bf16.gmra.mxu2 %vm2152_vm9, %v18838_v28  ;;  %v18842_v28 = vld [vmem:[#allocation68_spill] sm:$0xff] }
 0x988   : > { %9904 = vmatmul.msk.bf16.gmra.mxu0 %vm2152_vm9, %v18784_v58 }
 0x98a   : > { %v8038_v23 = vpop.f32.mrf.mxu3  ;;  %v7908_v18 = vpop.f32.mrf.mxu2 }
 0x98b   : > { %v7958_v62 = vadd.f32 %v7908_v18, %v18839_v10 }
 0x98d   : > { %v16589_v13 = vadd.f32 %v8038_v23, %v7958_v62  ;;  %v16591_v7 = vpop.f32.mrf.mxu0 }
 0x98e   : > { %18840 = vst [vmem:[#allocation197_spill] sm:$0xff] %v16591_v7 }
 0x992   : > { %v8040_v55 = vpop.f32.mrf.mxu3  ;;  %v7910_v22 = vpop.f32.mrf.mxu2 }
 0x993   : > { %v7959_v58 = vadd.f32 %v7910_v22, %v16321_v32 }
 0x995   : > { %v16594_v35 = vadd.f32 %v8040_v55, %v7959_v58  ;;  %v16603_v62 = vpop.f32.mrf.mxu0 }
 0x996   : > { %9885 = vmatmul.msk.bf16.gmra.mxu3 %vm2152_vm9, %v18841_v60  ;;  %18843 = vst [vmem:[#allocation203_spill] sm:$0xff] %v16603_v62  ;;  %v18845_v60 = vld [vmem:[#allocation216_spill] sm:$0xff] }
 0x997   : > { %9869 = vmatmul.msk.bf16.gmra.mxu2 %vm2152_vm9, %v18842_v28  ;;  %v18846_v28 = vld [vmem:[#allocation107_spill] sm:$0xff] }
 0x998   : > { %9905 = vmatmul.msk.bf16.gmra.mxu0 %vm2152_vm9, %v18787_v11 }
 0x99a   : > { %v8043_v18 = vpop.f32.mrf.mxu3  ;;  %v7913_v23 = vpop.f32.mrf.mxu2 }
 0x99b   : > { %v7960_v10 = vadd.f32 %v7913_v23, %v16335_v40 }
 0x99d   : > { %v16605_v7 = vadd.f32 %v8043_v18, %v7960_v10  ;;  %v16612_v11 = vpop.f32.mrf.mxu0 }
 0x99e   : > { %18844 = vst [vmem:[#allocation198_spill] sm:$0xff] %v16612_v11 }
 0x9a2   : > { %v8045_v32 = vpop.f32.mrf.mxu3  ;;  %v7915_v55 = vpop.f32.mrf.mxu2 }
 0x9a3   : > { %v7961_v22 = vadd.f32 %v7915_v55, %v16341_v12 }
 0x9a5   : > { %v16608_v58 = vadd.f32 %v8045_v32, %v7961_v22  ;;  %v8608_v12 = vpop.f32.mrf.mxu0 }
 0x9a6   : > { %9886 = vmatmul.msk.bf16.gmra.mxu3 %vm2152_vm9, %v18845_v60  ;;  %v18847_v60 = vld [vmem:[#allocation238_spill] sm:$0xff] }
 0x9a7   : > { %9870 = vmatmul.msk.bf16.gmra.mxu2 %vm2152_vm9, %v18846_v28  ;;  %v18848_v28 = vld [vmem:[#allocation97_spill] sm:$0xff] }
 0x9a8   : > { %9906 = vmatmul.msk.bf16.gmra.mxu0 %vm2152_vm9, %v18792_v33 }
 0x9aa   : > { %v8048_v40 = vpop.f32.mrf.mxu3  ;;  %v7918_v18 = vpop.f32.mrf.mxu2 }
 0x9ab   : > { %v7962_v23 = vadd.f32 %v7918_v18, %v16355_v0 }
 0x9ad   : > { %v16619_v10 = vadd.f32 %v8048_v40, %v7962_v23  ;;  %v8610_v0 = vpop.f32.mrf.mxu0 }
 0x9b2   : > { %v8050_v32 = vpop.f32.mrf.mxu3  ;;  %v7920_v55 = vpop.f32.mrf.mxu2 }
 0x9b3   : > { %v7963_v22 = vadd.f32 %v7920_v55, %v16361_v20 }
 0x9b5   : > { %v16622_v33 = vadd.f32 %v8050_v32, %v7963_v22  ;;  %v8613_v55 = vpop.f32.mrf.mxu0 }
 0x9b6   : > { %9887 = vmatmul.msk.bf16.gmra.mxu3 %vm2152_vm9, %v18847_v60  ;;  %v18850_v60 = vld [vmem:[#allocation94_spill] sm:$0xff] }
 0x9b7   : > { %9871 = vmatmul.msk.bf16.gmra.mxu2 %vm2152_vm9, %v18848_v28 }
 0x9b8   : > { %9907 = vmatmul.msk.bf16.gmra.mxu0 %vm2152_vm9, %v18796_v26  ;;  %v18849_v26 = vld [vmem:[#allocation153_spill] sm:$0xff] }
 0x9ba   : > { %v8053_v11 = vpop.f32.mrf.mxu3  ;;  %v7923_v40 = vpop.f32.mrf.mxu2 }
 0x9bb   : > { %v7964_v18 = vadd.f32 %v7923_v40, %v16375_v6 }
 0x9bd   : > { %v16631_v23 = vadd.f32 %v8053_v11, %v7964_v18  ;;  %v8615_v18 = vpop.f32.mrf.mxu0 }
 0x9c2   : > { %v8055_v62 = vpop.f32.mrf.mxu3  ;;  %v7925_v20 = vpop.f32.mrf.mxu2 }
 0x9c3   : > { %v7965_v32 = vadd.f32 %v7925_v20, %v16381_v56 }
 0x9c5   : > { %v16634_v22 = vadd.f32 %v8055_v62, %v7965_v32 }
 0x9c6   : > { %9888 = vmatmul.msk.bf16.gmra.mxu3 %vm2152_vm9, %v18849_v26  ;;  %v8618_v26 = vpop.f32.mrf.mxu0 }
 0x9c7   : > { %9872 = vmatmul.msk.bf16.gmra.mxu2 %vm2152_vm9, %v18850_v60 }
 0x9c8   : > { %9908 = vmatmul.msk.bf16.gmra.mxu0 %vm2152_vm9, %v18800_v42  ;;  %v18851_v42 = vld [vmem:[#allocation78_spill] sm:$0xff] }
 0x9ca   : > { %v8058_v28 = vpop.f32.mrf.mxu3  ;;  %v7928_v6 = vpop.f32.mrf.mxu2 }
 0x9cb   : > { %v7966_v11 = vadd.f32 %v7928_v6, %v16395_v38 }
 0x9cd   : > { %v16643_v40 = vadd.f32 %v8058_v28, %v7966_v11 }
 0x9d2   : > { %v8060_v56 = vpop.f32.mrf.mxu3  ;;  %v7930_v20 = vpop.f32.mrf.mxu2 }
 0x9d3   : > { %v7967_v62 = vadd.f32 %v7930_v20, %v16401_v63  ;;  %v16657_v63 = vpop.f32.mrf.mxu0 }
 0x9d5   : > { %v16646_v32 = vadd.f32 %v8060_v56, %v7967_v62 }
 0x9d6   : > { %9889 = vmatmul.msk.bf16.gmra.mxu3 %vm2152_vm9, %v18788_v16  ;;  %v18852_v16 = vld [vmem:[#allocation144_spill] sm:$0xff] }
 0x9d7   : > { %9873 = vmatmul.msk.bf16.gmra.mxu2 %vm2152_vm9, %v18851_v42 }
 0x9d8   : > { %9909 = vmatmul.msk.bf16.gmra.mxu0 %vm2152_vm9, %v18805_v44 }
 0x9da   : > { %v8063_v38 = vpop.f32.mrf.mxu3  ;;  %v7933_v60 = vpop.f32.mrf.mxu2 }
 0x9db   : > { %v7968_v28 = vadd.f32 %v7933_v60, %v16415_v53 }
 0x9dd   : > { %v16655_v6 = vadd.f32 %v8063_v38, %v7968_v28  ;;  %v16669_v38 = vpop.f32.mrf.mxu0 }
 0x9e2   : > { %v8065_v11 = vpop.f32.mrf.mxu3  ;;  %v7935_v56 = vpop.f32.mrf.mxu2 }
 0x9e3   : > { %v7969_v20 = vadd.f32 %v7935_v56, %v16421_v25  ;;  %v16674_v25 = vld [vmem:[%s17058_s8] ss:$0 sm:$0xff] }
 0x9e5   : > { %v16660_v44 = vadd.f32 %v8065_v11, %v7969_v20 }
 0x9e6   : > { %9890 = vmatmul.msk.bf16.gmra.mxu3 %vm2152_vm9, %v18793_v37 }
 0x9e7   : > { %9874 = vmatmul.msk.bf16.gmra.mxu2 %vm2152_vm9, %v18852_v16 }
 0x9e8   : > { %9910 = vmatmul.msk.bf16.gmra.mxu0 %vm2152_vm9, %v18812_v49 }
 0x9ea   : > { %v8484_v53 = vpop.f32.mrf.mxu3  ;;  %v8360_v62 = vpop.f32.mrf.mxu2 }
 0x9eb   : > { %v8440_v42 = vadd.f32 %v8360_v62, %v16435_v4  ;;  %v8625_v4 = vpop.f32.mrf.mxu0 }
 0x9ed   : > { %v8564_v60 = vadd.f32 %v8484_v53, %v8440_v42  ;;  %v18853_v53 = vld [vmem:[#allocation95_spill] sm:$0xff]  ;;  %v8256_v42 = vpop.f32.mrf.mxu1 }
 0x9ef   : > { %v8688_v28 = vadd.f32 %v8608_v12, %v8564_v60 }
 0x9f1   : > { %v8724_v49 = vadd.f32 %v16674_v25, %v8688_v28 }
 0x9f2   : > { %v8486_v11 = vpop.f32.mrf.mxu3  ;;  %v8362_v37 = vpop.f32.mrf.mxu2 }
 0x9f3   : > { %v8441_v56 = vadd.f32 %v8362_v37, %v16441_v9  ;;  %8916 = vrot.lane.b32.xlu0 %v8724_v49, %s10111_s29 }
 0x9f5   : > { %v8565_v20 = vadd.f32 %v8486_v11, %v8441_v56  ;;  %v8258_v56 = vpop.f32.mrf.mxu1 }
 0x9f6   : > { %9891 = vmatmul.msk.bf16.gmra.mxu3 %vm2152_vm9, %v18797_v51 }
 0x9f7   : > { %v8689_v16 = vadd.f32 %v8610_v0, %v8565_v20  ;;  %9875 = vmatmul.msk.bf16.gmra.mxu2 %vm2152_vm9, %v18853_v53 }
 0x9f8   : > { %9911 = vmatmul.msk.bf16.gmra.mxu0 %vm2152_vm9, %v18817_v48  ;;  %v8628_v48 = vpop.f32.mrf.mxu0 }
 0x9f9   : > { %v8725_v12 = vadd.f32 %v16674_v25, %v8689_v16  ;;  %v18854_v16 = vld [vmem:[#allocation178_spill] sm:$0xff] }
 0x9fa   : > { %v8489_v62 = vpop.f32.mrf.mxu3  ;;  %v8365_v9 = vpop.f32.mrf.mxu2 }
 0x9fb   : > { %v8442_v60 = vadd.f32 %v8365_v9, %v16455_v59  ;;  %8918 = vrot.lane.b32.xlu1 %v8725_v12, %s10111_s29 }
 0x9fd   : > { %v8566_v28 = vadd.f32 %v8489_v62, %v8442_v60  ;;  %v8261_v60 = vpop.f32.mrf.mxu1 }
 0x9ff   : > { %v8690_v49 = vadd.f32 %v8613_v55, %v8566_v28 }
 0xa00   : > { %v8630_v12 = vpop.f32.mrf.mxu0 }
 0xa01   : > { %v8726_v11 = vadd.f32 %v16674_v25, %v8690_v49 }
 0xa02   : > { %v8491_v37 = vpop.f32.mrf.mxu3  ;;  %v8367_v51 = vpop.f32.mrf.mxu2 }
 0xa03   : > { %v8443_v0 = vadd.f32 %v8367_v51, %v16461_v2  ;;  %8920 = vrot.lane.b32.xlu2 %v8726_v11, %s10111_s29 }
 0xa05   : > { %v8567_v20 = vadd.f32 %v8491_v37, %v8443_v0  ;;  %v18855_v0 = vld [vmem:[#allocation131_spill] sm:$0xff] }
 0xa06   : > { %9892 = vmatmul.msk.bf16.gmra.mxu3 %vm2152_vm9, %v18801_v15 }
 0xa07   : > { %v8691_v59 = vadd.f32 %v8615_v18, %v8567_v20  ;;  %9876 = vmatmul.msk.bf16.gmra.mxu2 %vm2152_vm9, %v18854_v16 }
 0xa08   : > { %9912 = vmatmul.msk.bf16.gmra.mxu0 %vm2152_vm9, %v18823_v29  ;;  %v8633_v37 = vpop.f32.mrf.mxu0 }
 0xa09   : > { %v8727_v55 = vadd.f32 %v16674_v25, %v8691_v59 }
 0xa0a   : > { %v8494_v53 = vpop.f32.mrf.mxu3  ;;  %v8370_v62 = vpop.f32.mrf.mxu2 }
 0xa0b   : > { %v8444_v2 = vadd.f32 %v8370_v62, %v16475_v54  ;;  %8922 = vrot.lane.b32.xlu0 %v8727_v55, %s10111_s29 }
 0xa0d   : > { %v8568_v9 = vadd.f32 %v8494_v53, %v8444_v2 }
 0xa0f   : > { %v8692_v28 = vadd.f32 %v8618_v26, %v8568_v9  ;;  %v8263_v26 = vpop.f32.mrf.mxu1 }
 0xa10   : > { %v8635_v53 = vpop.f32.mrf.mxu0 }
 0xa11   : > { %v8728_v49 = vadd.f32 %v16674_v25, %v8692_v28  ;;  %v8200_v28 = vadd.f32 %v16383_v27, %v16481_v57  ;;  %v18857_v27 = vld [vmem:[#allocation84_spill] sm:$0xff] }
 0xa12   : > { %v8496_v11 = vpop.f32.mrf.mxu3  ;;  %v8372_v15 = vpop.f32.mrf.mxu2  ;;  %v8201_v57 = vadd.f32 %v18857_v27, %v16489_v39 }
 0xa13   : > { %v8445_v18 = vadd.f32 %v8372_v15, %v16483_v47  ;;  %8924 = vrot.lane.b32.xlu1 %v8728_v49, %s10111_s29 }
 0xa15   : > { %v8569_v51 = vadd.f32 %v8496_v11, %v8445_v18  ;;  %v18856_v11 = vld [vmem:[#allocation228_spill] sm:$0xff]  ;;  %v8324_v18 = vadd.f32 %v8256_v42, %v8200_v28  ;;  %v8202_v42 = vadd.f32 %v16403_v30, %v16505_v31 }
 0xa16   : > { %9893 = vmatmul.msk.bf16.gmra.mxu3 %vm2152_vm9, %v18806_v41  ;;  %v18859_v30 = vld [vmem:[#allocation96_spill] sm:$0xff] }
 0xa17   : > { %v8693_v54 = vadd.f32 %v16657_v63, %v8569_v51  ;;  %9877 = vmatmul.msk.bf16.gmra.mxu2 %vm2152_vm9, %v18855_v0  ;;  %v8266_v63 = vpop.f32.mrf.mxu1  ;;  %v8203_v31 = vadd.f32 %v18859_v30, %v16512_v61 }
 0xa18   : > { %9913 = vmatmul.msk.bf16.gmra.mxu0 %vm2152_vm9, %v18823_v29 }
 0xa19   : > { %v8729_v20 = vadd.f32 %v16674_v25, %v8693_v54 }
 0xa1a   : > { %v8499_v59 = vpop.f32.mrf.mxu3  ;;  %v8375_v47 = vpop.f32.mrf.mxu2 }
 0xa1b   : > { %v8446_v16 = vadd.f32 %v8375_v47, %v16499_v5  ;;  %8926 = vrot.lane.b32.xlu2 %v8729_v20, %s10111_s29 }
 0xa1d   : > { %v8570_v55 = vadd.f32 %v8499_v59, %v8446_v16 }
 0xa1f   : > { %v8694_v29 = vadd.f32 %v16669_v38, %v8570_v55  ;;  %v8638_v38 = vpop.f32.mrf.mxu0  ;;  %v8268_v0 = vpop.f32.mrf.mxu1 }
 0xa21   : > { %v8730_v41 = vadd.f32 %v16674_v25, %v8694_v29 }
 0xa22   : > { %v8501_v62 = vpop.f32.mrf.mxu3  ;;  %v8377_v2 = vpop.f32.mrf.mxu2 }
 0xa23   : > { %v8447_v9 = vadd.f32 %v8377_v2, %v16507_v50  ;;  %8928 = vrot.lane.b32.xlu0 %v8730_v41, %s10111_s29  ;;  %v18858_v2 = vld [vmem:[#allocation207_spill] sm:$0xff] }
 0xa25   : > { %v8571_v49 = vadd.f32 %v8501_v62, %v8447_v9 }
 0xa26   : > { %9894 = vmatmul.msk.bf16.gmra.mxu3 %vm2152_vm9, %v18813_v1 }
 0xa27   : > { %v8695_v5 = vadd.f32 %v8625_v4, %v8571_v49  ;;  %9878 = vmatmul.msk.bf16.gmra.mxu2 %vm2152_vm9, %v18856_v11  ;;  %v8325_v4 = vadd.f32 %v8258_v56, %v8201_v57  ;;  %v8640_v16 = vpop.f32.mrf.mxu0  ;;  %v8271_v62 = vpop.f32.mrf.mxu1  ;;  %v8326_v56 = vadd.f32 %v8261_v60, %v8202_v42  ;;  %v8204_v60 = vadd.f32 %v16423_v52, %v16525_v46  ;;  %v18861_v52 = vld [vmem:[#allocation133_spill] sm:$0xff] }
 0xa28   : > { %v8205_v46 = vadd.f32 %v18861_v52, %v16530_v34  ;;  %v18866_v52 = vld [vmem:[#allocation85_spill] sm:$0xff] }
 0xa29   : > { %v8731_v15 = vadd.f32 %v16674_v25, %v8695_v5 }
 0xa2a   : > { %v8504_v51 = vpop.f32.mrf.mxu3  ;;  %v8380_v54 = vpop.f32.mrf.mxu2 }
 0xa2b   : > { %v8448_v50 = vadd.f32 %v8380_v54, %v8324_v18  ;;  %8930 = vrot.lane.b32.xlu1 %v8731_v15, %s10111_s29 }
 0xa2d   : > { %v8572_v20 = vadd.f32 %v8504_v51, %v8448_v50 }
 0xa2f   : > { %v8696_v59 = vadd.f32 %v8628_v48, %v8572_v20  ;;  %v8643_v5 = vpop.f32.mrf.mxu0  ;;  %v8273_v18 = vpop.f32.mrf.mxu1  ;;  %v18860_v20 = vld [vmem:[#allocation254_spill] sm:$0xff] }
 0xa31   : > { %v8732_v1 = vadd.f32 %v16674_v25, %v8696_v59 }
 0xa32   : > { %v8506_v47 = vpop.f32.mrf.mxu3  ;;  %v8382_v55 = vpop.f32.mrf.mxu2 }
 0xa33   : > { %v8449_v29 = vadd.f32 %v8382_v55, %v8325_v4  ;;  %8932 = vrot.lane.b32.xlu2 %v8732_v1, %s10111_s29 }
 0xa35   : > { %v8573_v41 = vadd.f32 %v8506_v47, %v8449_v29 }
 0xa36   : > { %9895 = vmatmul.msk.bf16.gmra.mxu3 %vm2152_vm9, %v18818_v17 }
 0xa37   : > { %v8697_v39 = vadd.f32 %v8630_v12, %v8573_v41  ;;  %9879 = vmatmul.msk.bf16.gmra.mxu2 %vm2152_vm9, %v18858_v2  ;;  %v8327_v12 = vadd.f32 %v8263_v26, %v8203_v31  ;;  %v8645_v57 = vpop.f32.mrf.mxu0  ;;  %v8328_v26 = vadd.f32 %v8266_v63, %v8204_v60  ;;  %v8276_v1 = vpop.f32.mrf.mxu1  ;;  %v8329_v41 = vadd.f32 %v8268_v0, %v8205_v46 }
 0xa39   : > { %v8733_v48 = vadd.f32 %v16674_v25, %v8697_v39 }
 0xa3a   : > { %v8509_v9 = vpop.f32.mrf.mxu3  ;;  %v8385_v28 = vpop.f32.mrf.mxu2 }
 0xa3b   : > { %v8450_v49 = vadd.f32 %v8385_v28, %v8326_v56  ;;  %8934 = vrot.lane.b32.xlu0 %v8733_v48, %s10111_s29  ;;  %v16753_v56 = vpop.permute.xlu2 %8850 }
 0xa3d   : > { %v8574_v11 = vadd.f32 %v8509_v9, %v8450_v49  ;;  %v8206_v9 = vadd.f32 %v16443_v19, %v16543_v3  ;;  %v16764_v19 = vpop.permute.xlu0 %8846  ;;  %v18862_v3 = vld [vmem:[#allocation258_spill] sm:$0xff] }
 0xa3f   : > { %v8698_v15 = vadd.f32 %v8633_v37, %v8574_v11  ;;  %v8648_v42 = vpop.f32.mrf.mxu0  ;;  %v8278_v63 = vpop.f32.mrf.mxu1  ;;  %v8330_v0 = vadd.f32 %v8271_v62, %v8206_v9 }
 0xa41   : > { %v8734_v17 = vadd.f32 %v16674_v25, %v8698_v15 }
 0xa42   : > { %v8511_v51 = vpop.f32.mrf.mxu3  ;;  %v8387_v54 = vpop.f32.mrf.mxu2 }
 0xa43   : > { %v8451_v50 = vadd.f32 %v8387_v54, %v8327_v12  ;;  %8936 = vrot.lane.b32.xlu1 %v8734_v17, %s10111_s29  ;;  %v18863_v17 = vld [vmem:[#allocation113_spill] sm:$0xff]  ;;  %v18864_v54 = vld [vmem:[#allocation235_spill] sm:$0xff] }
 0xa45   : > { %v8575_v27 = vadd.f32 %v8511_v51, %v8451_v50 }
 0xa46   : > { %9896 = vmatmul.msk.bf16.gmra.mxu3 %vm2152_vm9, %v18824_v8 }
 0xa47   : > { %v8699_v61 = vadd.f32 %v8635_v53, %v8575_v27  ;;  %9880 = vmatmul.msk.bf16.gmra.mxu2 %vm2152_vm9, %v18860_v20  ;;  %v8650_v30 = vpop.f32.mrf.mxu0  ;;  %v8281_v15 = vpop.f32.mrf.mxu1 }
 0xa49   : > { %v8735_v37 = vadd.f32 %v16674_v25, %v8699_v61 }
 0xa4a   : > { %v8514_v59 = vpop.f32.mrf.mxu3  ;;  %v8390_v4 = vpop.f32.mrf.mxu2 }
 0xa4b   : > { %v8452_v47 = vadd.f32 %v8390_v4, %v8328_v26  ;;  %8938 = vrot.lane.b32.xlu2 %v8735_v37, %s10111_s29  ;;  %v16781_v26 = vpop.permute.xlu1 %8848 }
 0xa4d   : > { %v8576_v55 = vadd.f32 %v8514_v59, %v8452_v47  ;;  %v18865_v59 = vld [vmem:[#allocation127_spill] sm:$0xff] }
 0xa4f   : > { %v8700_v29 = vadd.f32 %v8638_v38, %v8576_v55  ;;  %v8653_v37 = vpop.f32.mrf.mxu0 }
 0xa51   : > { %v8736_v53 = vadd.f32 %v16674_v25, %v8700_v29  ;;  %v18867_v29 = vld [vmem:[#allocation39_spill] sm:$0xff] }
 0xa52   : > { %v8516_v39 = vpop.f32.mrf.mxu3  ;;  %v8392_v2 = vpop.f32.mrf.mxu2 }
 0xa53   : > { %v8453_v48 = vadd.f32 %v8392_v2, %v8329_v41  ;;  %8940 = vrot.lane.b32.xlu0 %v8736_v53, %s10111_s29  ;;  %v8283_v53 = vpop.f32.mrf.mxu1 }
 0xa55   : > { %v8577_v28 = vadd.f32 %v8516_v39, %v8453_v48 }
 0xa56   : > { %9897 = vmatmul.msk.bf16.gmra.mxu3 %vm2152_vm9, %v18824_v8  ;;  %v8207_v8 = vadd.f32 %v18862_v3, %v16548_v45 }
 0xa57   : > { %v8701_v34 = vadd.f32 %v8640_v16, %v8577_v28  ;;  %9881 = vmatmul.msk.bf16.gmra.mxu2 %vm2152_vm9, %v18860_v20 }
 0xa58   : > { %v8331_v60 = vadd.f32 %v8273_v18, %v8207_v8 }
 0xa59   : > { %v8737_v38 = vadd.f32 %v16674_v25, %v8701_v34 }
 0xa5a   : > { %v8519_v49 = vpop.f32.mrf.mxu3  ;;  %v8395_v31 = vpop.f32.mrf.mxu2 }
 0xa5b   : > { %v8454_v11 = vadd.f32 %v8395_v31, %v8330_v0  ;;  %8942 = vrot.lane.b32.xlu1 %v8737_v38, %s10111_s29  ;;  %v8655_v38 = vpop.f32.mrf.mxu0  ;;  %v18869_v0 = vld [vmem:[#allocation110_spill] sm:$0xff] }
 0xa5d   : > { %v8578_v16 = vadd.f32 %v8519_v49, %v8454_v11  ;;  %v8921_v62 = vpop.permute.xlu2 %8920  ;;  %v18870_v11 = vld [vmem:[#allocation75_spill] sm:$0xff] }
 0xa5e   : > { %v9174_v12 = vsel %vm424_vm1, %v18863_v17, %v8921_v62  ;;  %v8286_v62 = vpop.f32.mrf.mxu1 }
 0xa5f   : > { %v8702_v51 = vadd.f32 %v8643_v5, %v8578_v16  ;;  %v9207_v50 = vsel %vm9204_vm10, %v9174_v12, %v18864_v54  ;;  %v8208_v5 = vadd.f32 %v18865_v59, %v16559_v14  ;;  %v18868_v14 = vld [vmem:[#allocation111_spill] sm:$0xff]  ;;  %v18871_v12 = vld [vmem:[#allocation189_spill] sm:$0xff] }
 0xa60   : > { %9240 = vst.msk [vmem:[%s16771_s14 + $0x10] sm:$0xff] %vm9237_vm11, %v9207_v50  ;;  %v8209_v28 = vadd.f32 %v18868_v14, %v16564_v43  ;;  %v18872_v50 = vld [vmem:[#allocation63_spill] sm:$0xff] }
 0xa61   : > { %v8738_v45 = vadd.f32 %v16674_v25, %v8702_v51  ;;  %v8332_v39 = vadd.f32 %v8276_v1, %v8208_v5  ;;  %v8210_v51 = vadd.f32 %v18871_v12, %v16573_v36 }
 0xa62   : > { %v8521_v27 = vpop.f32.mrf.mxu3  ;;  %v8397_v61 = vpop.f32.mrf.mxu2  ;;  %v8333_v8 = vadd.f32 %v8278_v63, %v8209_v28 }
 0xa63   : > { %v8455_v20 = vadd.f32 %v8397_v61, %v8331_v60  ;;  %8944 = vrot.lane.b32.xlu2 %v8738_v45, %s10111_s29  ;;  %v8658_v63 = vpop.f32.mrf.mxu0  ;;  %v8334_v59 = vadd.f32 %v8281_v15, %v8210_v51  ;;  %v18880_v51 = vld [vmem:[#allocation170_spill] sm:$0xff] }
 0xa65   : > { %v8579_v4 = vadd.f32 %v8521_v27, %v8455_v20  ;;  %v8917_v47 = vpop.permute.xlu0 %8916  ;;  %v18873_v27 = vld [vmem:[#allocation226_spill] sm:$0xff] }
 0xa66   : > { %v9172_v46 = vsel %vm424_vm1, %v18866_v52, %v8917_v47  ;;  %v8288_v36 = vpop.f32.mrf.mxu1  ;;  %v18874_v52 = vld [vmem:[#allocation128_spill] sm:$0xff] }
 0xa67   : > { %v8703_v55 = vadd.f32 %v8645_v57, %v8579_v4  ;;  %v9205_v18 = vsel %vm9204_vm10, %v9172_v46, %v18867_v29  ;;  %v8211_v46 = vadd.f32 %v18874_v52, %v16578_v24  ;;  %v18875_v29 = vld [vmem:[#allocation142_spill] sm:$0xff]  ;;  %v18877_v24 = vld [vmem:[#allocation148_spill] sm:$0xff] }
 0xa68   : > { %9238 = vst.msk [vmem:[%s16771_s14] sm:$0xff] %vm9237_vm11, %v9205_v18 }
 0xa69   : > { %v8739_v41 = vadd.f32 %v16674_v25, %v8703_v55 }
 0xa6a   : > { %v8524_v2 = vpop.f32.mrf.mxu3  ;;  %v8400_v48 = vpop.f32.mrf.mxu2 }
 0xa6b   : > { %v8456_v9 = vadd.f32 %v8400_v48, %v8332_v39  ;;  %8946 = vrot.lane.b32.xlu0 %v8739_v41, %s10111_s29  ;;  %v18876_v39 = vld [vmem:[#allocation33_spill] sm:$0xff]  ;;  %v8335_v48 = vadd.f32 %v8283_v53, %v8211_v46  ;;  %v8660_v14 = vpop.f32.mrf.mxu0 }
 0xa6d   : > { %v8580_v34 = vadd.f32 %v8524_v2, %v8456_v9  ;;  %v8919_v57 = vpop.permute.xlu1 %8918 }
 0xa6e   : > { %v9173_v49 = vsel %vm424_vm1, %v18869_v0, %v8919_v57  ;;  %v8212_v57 = vadd.f32 %v18877_v24, %v16589_v13 }
 0xa6f   : > { %v8704_v31 = vadd.f32 %v8648_v42, %v8580_v34  ;;  %v9206_v3 = vsel %vm9204_vm10, %v9173_v49, %v18870_v11  ;;  %v8291_v49 = vpop.f32.mrf.mxu1 }
 0xa70   : > { %9239 = vst.msk [vmem:[%s16771_s14 + $0x8] sm:$0xff] %vm9237_vm11, %v9206_v3 }
 0xa71   : > { %v8740_v1 = vadd.f32 %v16674_v25, %v8704_v31  ;;  %v18878_v31 = vld [vmem:[#allocation240_spill] sm:$0xff] }
 0xa72   : > { %v8526_v16 = vpop.f32.mrf.mxu3  ;;  %v8402_v17 = vpop.f32.mrf.mxu2 }
 0xa73   : > { %v8457_v43 = vadd.f32 %v8402_v17, %v8333_v8  ;;  %8948 = vrot.lane.b32.xlu1 %v8740_v1, %s10111_s29  ;;  %v18879_v1 = vld [vmem:[#allocation88_spill] sm:$0xff]  ;;  %v8663_v13 = vpop.f32.mrf.mxu0 }
 0xa75   : > { %v8581_v54 = vadd.f32 %v8526_v16, %v8457_v43  ;;  %v8927_v42 = vpop.permute.xlu2 %8926  ;;  %v8336_v16 = vadd.f32 %v8286_v62, %v8212_v57  ;;  %v18887_v57 = vld [vmem:[#allocation130_spill] sm:$0xff] }
 0xa76   : > { %v9177_v45 = vsel %vm424_vm1, %v18872_v50, %v8927_v42  ;;  %v18881_v50 = vld [vmem:[#allocation145_spill] sm:$0xff] }
 0xa77   : > { %v8705_v60 = vadd.f32 %v8650_v30, %v8581_v54  ;;  %v9210_v61 = vsel %vm9204_vm10, %v9177_v45, %v18873_v27  ;;  %v8213_v54 = vadd.f32 %v18880_v51, %v16594_v35  ;;  %v18882_v27 = vld [vmem:[#allocation61_spill] sm:$0xff]  ;;  %v8293_v62 = vpop.f32.mrf.mxu1  ;;  %v18883_v35 = vld [vmem:[#allocation8_spill] sm:$0xff] }
 0xa78   : > { %9243 = vst.msk [vmem:[%s16771_s14 + $0x28] sm:$0xff] %vm9237_vm11, %v9210_v61  ;;  %v8214_v52 = vadd.f32 %v18883_v35, %v16605_v7  ;;  %v18890_v51 = vld [vmem:[#allocation220_spill] sm:$0xff]  ;;  %v18893_v35 = vld [vmem:[#allocation219_spill] sm:$0xff] }
 0xa79   : > { %v8741_v20 = vadd.f32 %v16674_v25, %v8705_v60 }
 0xa7a   : > { %v8529_v5 = vpop.f32.mrf.mxu3  ;;  %v8405_v4 = vpop.f32.mrf.mxu2 }
 0xa7b   : > { %v8458_v47 = vadd.f32 %v8405_v4, %v8334_v59  ;;  %8950 = vrot.lane.b32.xlu2 %v8741_v20, %s10111_s29  ;;  %v8337_v59 = vadd.f32 %v8288_v36, %v8213_v54 }
 0xa7d   : > { %v8582_v30 = vadd.f32 %v8529_v5, %v8458_v47  ;;  %v8923_v55 = vpop.permute.xlu0 %8922 }
 0xa7e   : > { %v9175_v18 = vsel %vm424_vm1, %v18875_v29, %v8923_v55  ;;  %v18884_v55 = vld [vmem:[#allocation241_spill] sm:$0xff] }
 0xa7f   : > { %v8706_v41 = vadd.f32 %v8653_v37, %v8582_v30  ;;  %v9208_v2 = vsel %vm9204_vm10, %v9175_v18, %v18876_v39  ;;  %v8665_v30 = vpop.f32.mrf.mxu0 }
 0xa80   : > { %9241 = vst.msk [vmem:[%s16771_s14 + $0x18] sm:$0xff] %vm9237_vm11, %v9208_v2  ;;  %v8338_v2 = vadd.f32 %v8291_v49, %v8214_v52 }
 0xa81   : > { %v8742_v15 = vadd.f32 %v16674_v25, %v8706_v41  ;;  %v18885_v41 = vld [vmem:[#allocation125_spill] sm:$0xff] }
 0xa82   : > { %v8531_v9 = vpop.f32.mrf.mxu3  ;;  %v8407_v28 = vpop.f32.mrf.mxu2 }
 0xa83   : > { %v8459_v34 = vadd.f32 %v8407_v28, %v8335_v48  ;;  %8952 = vrot.lane.b32.xlu0 %v8742_v15, %s10111_s29  ;;  %v8296_v48 = vpop.f32.mrf.mxu1  ;;  %v18886_v28 = vld [vmem:[#allocation143_spill] sm:$0xff] }
 0xa85   : > { %v8583_v0 = vadd.f32 %v8531_v9, %v8459_v34  ;;  %v8925_v37 = vpop.permute.xlu1 %8924  ;;  %v8215_v34 = vadd.f32 %v18886_v28, %v16608_v58 }
 0xa86   : > { %v9176_v11 = vsel %vm424_vm1, %v18878_v31, %v8925_v37  ;;  %v18888_v31 = vld [vmem:[#allocation82_spill] sm:$0xff] }
 0xa87   : > { %v8707_v3 = vadd.f32 %v8655_v38, %v8583_v0  ;;  %v9209_v8 = vsel %vm9204_vm10, %v9176_v11, %v18879_v1  ;;  %v8668_v49 = vpop.f32.mrf.mxu0  ;;  %v8339_v1 = vadd.f32 %v8293_v62, %v8215_v34  ;;  %v18897_v34 = vld [vmem:[#allocation251_spill] sm:$0xff] }
 0xa88   : > { %9242 = vst.msk [vmem:[%s16771_s14 + $0x20] sm:$0xff] %vm9237_vm11, %v9209_v8 }
 0xa89   : > { %v8743_v53 = vadd.f32 %v16674_v25, %v8707_v3 }
 0xa8a   : > { %v8534_v17 = vpop.f32.mrf.mxu3  ;;  %v8410_v43 = vpop.f32.mrf.mxu2 }
 0xa8b   : > { %v8460_v12 = vadd.f32 %v8410_v43, %v8336_v16  ;;  %8954 = vrot.lane.b32.xlu1 %v8743_v53, %s10111_s29  ;;  %v8298_v58 = vpop.f32.mrf.mxu1 }
 0xa8d   : > { %v8584_v42 = vadd.f32 %v8534_v17, %v8460_v12  ;;  %v8933_v38 = vpop.permute.xlu2 %8932  ;;  %v18889_v17 = vld [vmem:[#allocation196_spill] sm:$0xff] }
 0xa8e   : > { %v9180_v45 = vsel %vm424_vm1, %v18881_v50, %v8933_v38  ;;  %v8216_v43 = vadd.f32 %v18889_v17, %v16619_v10  ;;  %v18891_v38 = vld [vmem:[#allocation14_spill] sm:$0xff]  ;;  %v18892_v10 = vld [vmem:[#allocation185_spill] sm:$0xff] }
 0xa8f   : > { %v8708_v60 = vadd.f32 %v8658_v63, %v8584_v42  ;;  %v9213_v61 = vsel %vm9204_vm10, %v9180_v45, %v18882_v27  ;;  %v18900_v17 = vld [vmem:[#allocation250_spill] sm:$0xff] }
 0xa90   : > { %9246 = vst.msk [vmem:[%s16771_s14 + $0x40] sm:$0xff] %vm9237_vm11, %v9213_v61  ;;  %v8670_v61 = vpop.f32.mrf.mxu0 }
 0xa91   : > { %v8744_v20 = vadd.f32 %v16674_v25, %v8708_v60  ;;  %v8340_v60 = vadd.f32 %v8296_v48, %v8216_v43 }
 0xa92   : > { %v8536_v5 = vpop.f32.mrf.mxu3  ;;  %v8412_v4 = vpop.f32.mrf.mxu2 }
 0xa93   : > { %v8461_v47 = vadd.f32 %v8412_v4, %v8337_v59  ;;  %8956 = vrot.lane.b32.xlu2 %v8744_v20, %s10111_s29  ;;  %v8217_v59 = vadd.f32 %v18892_v10, %v16622_v33 }
 0xa95   : > { %v8585_v46 = vadd.f32 %v8536_v5, %v8461_v47  ;;  %v8929_v63 = vpop.permute.xlu0 %8928  ;;  %v8301_v47 = vpop.f32.mrf.mxu1 }
 0xa96   : > { %v9178_v29 = vsel %vm424_vm1, %v18884_v55, %v8929_v63  ;;  %v18894_v63 = vld [vmem:[#allocation43_spill] sm:$0xff] }
 0xa97   : > { %v8709_v18 = vadd.f32 %v8660_v14, %v8585_v46  ;;  %v9211_v39 = vsel %vm9204_vm10, %v9178_v29, %v18885_v41  ;;  %v8341_v29 = vadd.f32 %v8298_v58, %v8217_v59 }
 0xa98   : > { %9244 = vst.msk [vmem:[%s16771_s14 + $0x30] sm:$0xff] %vm9237_vm11, %v9211_v39  ;;  %v8673_v33 = vpop.f32.mrf.mxu0 }
 0xa99   : > { %v8745_v36 = vadd.f32 %v16674_v25, %v8709_v18 }
 0xa9a   : > { %v8539_v15 = vpop.f32.mrf.mxu3  ;;  %v8415_v9 = vpop.f32.mrf.mxu2 }
 0xa9b   : > { %v8462_v7 = vadd.f32 %v8415_v9, %v8338_v2  ;;  %8958 = vrot.lane.b32.xlu0 %v8745_v36, %s10111_s29  ;;  %v18895_v36 = vld [vmem:[#allocation269_spill] sm:$0xff] }
 0xa9c   : > { %v8218_v2 = vadd.f32 %v18895_v36, %v16631_v23  ;;  %v18896_v9 = vld [vmem:[#allocation129_spill] sm:$0xff]  ;;  %v18898_v23 = vld [vmem:[#allocation186_spill] sm:$0xff] }
 0xa9d   : > { %v8586_v24 = vadd.f32 %v8539_v15, %v8462_v7  ;;  %v8931_v14 = vpop.permute.xlu1 %8930 }
 0xa9e   : > { %v9179_v0 = vsel %vm424_vm1, %v18887_v57, %v8931_v14  ;;  %v8303_v14 = vpop.f32.mrf.mxu1 }
 0xa9f   : > { %v8710_v37 = vadd.f32 %v8663_v13, %v8586_v24  ;;  %v9212_v11 = vsel %vm9204_vm10, %v9179_v0, %v18888_v31  ;;  %v8342_v0 = vadd.f32 %v8301_v47, %v8218_v2 }
 0xaa0   : > { %9245 = vst.msk [vmem:[%s16771_s14 + $0x38] sm:$0xff] %vm9237_vm11, %v9212_v11 }
 0xaa1   : > { %v8746_v3 = vadd.f32 %v16674_v25, %v8710_v37 }
 0xaa2   : > { %v8541_v8 = vpop.f32.mrf.mxu3  ;;  %v8417_v53 = vpop.f32.mrf.mxu2 }
 0xaa3   : > { %v8463_v16 = vadd.f32 %v8417_v53, %v8339_v1  ;;  %8960 = vrot.lane.b32.xlu1 %v8746_v3, %s10111_s29  ;;  %v18899_v53 = vld [vmem:[#allocation270_spill] sm:$0xff] }
 0xaa5   : > { %v8587_v12 = vadd.f32 %v8541_v8, %v8463_v16  ;;  %v8939_v13 = vpop.permute.xlu2 %8938  ;;  %v8675_v8 = vpop.f32.mrf.mxu0 }
 0xaa6   : > { %v9183_v54 = vsel %vm424_vm1, %v18890_v51, %v8939_v13 }
 0xaa7   : > { %v8711_v42 = vadd.f32 %v8665_v30, %v8587_v12  ;;  %v9216_v50 = vsel %vm9204_vm10, %v9183_v54, %v18891_v38  ;;  %v8306_v54 = vpop.f32.mrf.mxu1  ;;  %v8220_v38 = vadd.f32 %v16586_v21, %v16643_v40  ;;  %v18903_v40 = vld [vmem:[#allocation197_spill] sm:$0xff] }
 0xaa8   : > { %9249 = vst.msk [vmem:[%s16771_s14 + $0x58] sm:$0xff] %vm9237_vm11, %v9216_v50 }
 0xaa9   : > { %v8747_v45 = vadd.f32 %v16674_v25, %v8711_v42 }
 0xaaa   : > { %v8544_v27 = vpop.f32.mrf.mxu3  ;;  %v8420_v62 = vpop.f32.mrf.mxu2 }
 0xaab   : > { %v8464_v20 = vadd.f32 %v8420_v62, %v8340_v60  ;;  %8962 = vrot.lane.b32.xlu2 %v8747_v45, %s10111_s29  ;;  %v18901_v60 = vld [vmem:[#allocation176_spill] sm:$0xff]  ;;  %v18902_v62 = vld [vmem:[#allocation45_spill] sm:$0xff] }
 0xaad   : > { %v8588_v5 = vadd.f32 %v8544_v27, %v8464_v20  ;;  %v8935_v4 = vpop.permute.xlu0 %8934  ;;  %v8678_v10 = vpop.f32.mrf.mxu0 }
 0xaae   : > { %v9181_v52 = vsel %vm424_vm1, %v18893_v35, %v8935_v4 }
 0xaaf   : > { %v8712_v46 = vadd.f32 %v8668_v49, %v8588_v5  ;;  %v9214_v30 = vsel %vm9204_vm10, %v9181_v52, %v18894_v63  ;;  %v8219_v49 = vadd.f32 %v18898_v23, %v16634_v22  ;;  %v8344_v5 = vadd.f32 %v8306_v54, %v8220_v38  ;;  %v8308_v21 = vpop.f32.mrf.mxu1  ;;  %v10096_v54 = vld [vmem:[%s17054_s4] ss:$0 sm:$0xff] }
 0xab0   : > { %9247 = vst.msk [vmem:[%s16771_s14 + $0x48] sm:$0xff] %vm9237_vm11, %v9214_v30  ;;  %v8221_v52 = vadd.f32 %v18903_v40, %v16646_v32  ;;  %v18904_v30 = vld [vmem:[#allocation152_spill] sm:$0xff]  ;;  %v18906_v32 = vld [vmem:[#allocation203_spill] sm:$0xff] }
 0xab1   : > { %v8748_v55 = vadd.f32 %v16674_v25, %v8712_v46  ;;  %v8343_v13 = vadd.f32 %v8303_v14, %v8219_v49 }
 0xab2   : > { %v8546_v18 = vpop.f32.mrf.mxu3  ;;  %v8422_v41 = vpop.f32.mrf.mxu2 }
 0xab3   : > { %v8465_v39 = vadd.f32 %v8422_v41, %v8341_v29  ;;  %8964 = vrot.lane.b32.xlu0 %v8748_v55, %s10111_s29 }
 0xab5   : > { %v8589_v15 = vadd.f32 %v8546_v18, %v8465_v39  ;;  %v8937_v48 = vpop.permute.xlu1 %8936  ;;  %v18905_v18 = vld [vmem:[#allocation104_spill] sm:$0xff]  ;;  %v8680_v2 = vpop.f32.mrf.mxu0 }
 0xab6   : > { %v9182_v7 = vsel %vm424_vm1, %v18896_v9, %v8937_v48  ;;  %v8222_v9 = vadd.f32 %v18906_v32, %v16655_v6 }
 0xab7   : > { %v8713_v28 = vadd.f32 %v8670_v61, %v8589_v15  ;;  %v9215_v24 = vsel %vm9204_vm10, %v9182_v7, %v18897_v34  ;;  %v8311_v34 = vpop.f32.mrf.mxu1 }
 0xab8   : > { %9248 = vst.msk [vmem:[%s16771_s14 + $0x50] sm:$0xff] %vm9237_vm11, %v9215_v24  ;;  %v18907_v24 = vld [vmem:[#allocation160_spill] sm:$0xff] }
 0xab9   : > { %v8749_v57 = vadd.f32 %v16674_v25, %v8713_v28 }
 0xaba   : > { %v8549_v37 = vpop.f32.mrf.mxu3  ;;  %v8425_v31 = vpop.f32.mrf.mxu2 }
 0xabb   : > { %v8466_v11 = vadd.f32 %v8425_v31, %v8342_v0  ;;  %8966 = vrot.lane.b32.xlu1 %v8749_v57, %s10111_s29  ;;  %v18908_v0 = vld [vmem:[#allocation93_spill] sm:$0xff] }
 0xabd   : > { %v8590_v3 = vadd.f32 %v8549_v37, %v8466_v11  ;;  %v8945_v1 = vpop.permute.xlu2 %8944  ;;  %v8346_v11 = vadd.f32 %v8311_v34, %v8222_v9  ;;  %v8683_v6 = vpop.f32.mrf.mxu0  ;;  %v18924_v34 = vld [vmem:[#allocation117_spill] sm:$0xff] }
 0xabe   : > { %v9186_v16 = vsel %vm424_vm1, %v18899_v53, %v8945_v1  ;;  %v18909_v1 = vld [vmem:[#allocation198_spill] sm:$0xff] }
 0xabf   : > { %v8714_v58 = vadd.f32 %v8673_v33, %v8590_v3  ;;  %v9219_v43 = vsel %vm9204_vm10, %v9186_v16, %v18900_v17  ;;  %v8345_v33 = vadd.f32 %v8308_v21, %v8221_v52  ;;  %v18916_v52 = vld [vmem:[#allocation7_spill] sm:$0xff] }
 0xac0   : > { %9252 = vst.msk [vmem:[%s16771_s14 + $0x70] sm:$0xff] %vm9237_vm11, %v9219_v43 }
 0xac1   : > { %v8750_v12 = vadd.f32 %v16674_v25, %v8714_v58  ;;  %v18910_v58 = vld [vmem:[#allocation267_spill] sm:$0xff] }
 0xac2   : > { %v8551_v51 = vpop.f32.mrf.mxu3  ;;  %v8427_v42 = vpop.f32.mrf.mxu2 }
 0xac3   : > { %v8467_v22 = vadd.f32 %v8427_v42, %v8343_v13  ;;  %8968 = vrot.lane.b32.xlu2 %v8750_v12, %s10111_s29  ;;  %v18911_v12 = vld [vmem:[#allocation90_spill] sm:$0xff]  ;;  %v18912_v42 = vld [vmem:[#allocation169_spill] sm:$0xff] }
 0xac5   : > { %v8591_v50 = vadd.f32 %v8551_v51, %v8467_v22  ;;  %v8941_v45 = vpop.permute.xlu0 %8940  ;;  %v8313_v51 = vpop.f32.mrf.mxu1  ;;  %v1755_v22 = vadd.f32 %v10096_v54, %v18912_v42  ;;  %v18933_v42 = vld [vmem:[#allocation4_spill] sm:$0xff] }
 0xac6   : > { %v9184_v27 = vsel %vm424_vm1, %v18901_v60, %v8941_v45 }
 0xac7   : > { %v8715_v61 = vadd.f32 %v8675_v8, %v8591_v50  ;;  %v9217_v20 = vsel %vm9204_vm10, %v9184_v27, %v18902_v62  ;;  %v8223_v8 = vadd.f32 %v18909_v1, %v16660_v44  ;;  %v8685_v62 = vpop.f32.mrf.mxu0 }
 0xac8   : > { %9250 = vst.msk [vmem:[%s16771_s14 + $0x60] sm:$0xff] %vm9237_vm11, %v9217_v20  ;;  %v18913_v20 = vld [vmem:[#allocation223_spill] sm:$0xff] }
 0xac9   : > { %v8751_v59 = vadd.f32 %v16674_v25, %v8715_v61  ;;  %v8347_v38 = vadd.f32 %v8313_v51, %v8223_v8  ;;  %v18929_v8 = vld [vmem:[#allocation227_spill] sm:$0xff] }
 0xaca   : > { %v8554_v4 = vpop.f32.mrf.mxu3  ;;  %v8430_v47 = vpop.f32.mrf.mxu2 }
 0xacb   : > { %v8468_v35 = vadd.f32 %v8430_v47, %v8344_v5  ;;  %8970 = vrot.lane.b32.xlu0 %v8751_v59, %s10111_s29  ;;  %v18914_v5 = vld [vmem:[#allocation22_spill] sm:$0xff]  ;;  %v18915_v47 = vld [vmem:[#allocation175_spill] sm:$0xff] }
 0xacd   : > { %v8592_v46 = vadd.f32 %v8554_v4, %v8468_v35  ;;  %v8943_v63 = vpop.permute.xlu1 %8942  ;;  %v1757_v35 = vadd.f32 %v10096_v54, %v18915_v47  ;;  %v18939_v47 = vld [vmem:[#allocation162_spill] sm:$0xff] }
 0xace   : > { %v9185_v55 = vsel %vm424_vm1, %v18904_v30, %v8943_v63  ;;  %v18917_v63 = vld [vmem:[#allocation105_spill] sm:$0xff] }
 0xacf   : > { %v8716_v29 = vadd.f32 %v8678_v10, %v8592_v46  ;;  %v9218_v41 = vsel %vm9204_vm10, %v9185_v55, %v18905_v18  ;;  %v18918_v55 = vld [vmem:[#allocation157_spill] sm:$0xff] }
 0xad0   : > { %9251 = vst.msk [vmem:[%s16771_s14 + $0x68] sm:$0xff] %vm9237_vm11, %v9218_v41  ;;  %v18919_v18 = vld [vmem:[#allocation221_spill] sm:$0xff] }
 0xad1   : > { %v8752_v39 = vadd.f32 %v16674_v25, %v8716_v29  ;;  %v1752_v29 = vadd.f32 %v10096_v54, %v18918_v55 }
 0xad2   : > { %v8556_v36 = vpop.f32.mrf.mxu3  ;;  %v8432_v15 = vpop.f32.mrf.mxu2 }
 0xad3   : > { %v8469_v48 = vadd.f32 %v8432_v15, %v8345_v33  ;;  %8972 = vrot.lane.b32.xlu1 %v8752_v39, %s10111_s29  ;;  %v18920_v39 = vld [vmem:[#allocation257_spill] sm:$0xff] }
 0xad5   : > { %v8593_v7 = vadd.f32 %v8556_v36, %v8469_v48  ;;  %v8951_v28 = vpop.permute.xlu2 %8950  ;;  %v18922_v48 = vld [vmem:[#allocation86_spill] sm:$0xff] }
 0xad6   : > { %v9189_v14 = vsel %vm424_vm1, %v18907_v24, %v8951_v28 }
 0xad7   : > { %v8717_v57 = vadd.f32 %v8680_v2, %v8593_v7  ;;  %v9222_v37 = vsel %vm9204_vm10, %v9189_v14, %v18908_v0  ;;  %v18921_v2 = vld [vmem:[#allocation156_spill] sm:$0xff]  ;;  %v18923_v7 = vld [vmem:[#allocation109_spill] sm:$0xff] }
 0xad8   : > { %9255 = vst.msk [vmem:[%s16771_s14 + $0x88] sm:$0xff] %vm9237_vm11, %v9222_v37  ;;  %v18926_v37 = vld [vmem:[#allocation73_spill] sm:$0xff] }
 0xad9   : > { %v8753_v31 = vadd.f32 %v16674_v25, %v8717_v57  ;;  %v18925_v57 = vld [vmem:[#allocation262_spill] sm:$0xff] }
 0xada   : > { %v8435_v23 = vpop.f32.mrf.mxu2  ;;  %v8559_v49 = vpop.f32.mrf.mxu3 }
 0xadb   : > { %v8470_v3 = vadd.f32 %v8435_v23, %v8346_v11  ;;  %8974 = vrot.lane.b32.xlu2 %v8753_v31, %s10111_s29  ;;  %v18927_v23 = vld [vmem:[#allocation261_spill] sm:$0xff] }
 0xadd   : > { %v8594_v53 = vadd.f32 %v8559_v49, %v8470_v3  ;;  %v8947_v16 = vpop.permute.xlu0 %8946  ;;  %v18928_v3 = vld [vmem:[#allocation115_spill] sm:$0xff] }
 0xade   : > { %v9187_v17 = vsel %vm424_vm1, %v18910_v58, %v8947_v16  ;;  %v18930_v16 = vld [vmem:[#allocation102_spill] sm:$0xff] }
 0xadf   : > { %v8718_v43 = vadd.f32 %v8683_v6, %v8594_v53  ;;  %v9220_v13 = vsel %vm9204_vm10, %v9187_v17, %v18911_v12 }
 0xae0   : > { %9253 = vst.msk [vmem:[%s16771_s14 + $0x78] sm:$0xff] %vm9237_vm11, %v9220_v13  ;;  %v18932_v13 = vld [vmem:[#allocation42_spill] sm:$0xff] }
 0xae1   : > { %v8754_v44 = vadd.f32 %v16674_v25, %v8718_v43  ;;  %v18931_v43 = vld [vmem:[#allocation173_spill] sm:$0xff] }
 0xae2   : > { %v8437_v50 = vpop.f32.mrf.mxu2  ;;  %v8561_v60 = vpop.f32.mrf.mxu3 }
 0xae3   : > { %v8471_v45 = vadd.f32 %v8437_v50, %v8347_v38  ;;  %9104 = vrot.lane.b32.xlu2 %v1755_v22, %s10109_s20  ;;  %8976 = vrot.lane.b32.xlu0 %v8754_v44, %s10111_s29  ;;  %v18934_v44 = vld [vmem:[#allocation121_spill] sm:$0xff] }
 0xae5   : > { %v8595_v27 = vadd.f32 %v8561_v60, %v8471_v45  ;;  %v8949_v61 = vpop.permute.xlu1 %8948  ;;  %v18935_v45 = vld [vmem:[#allocation154_spill] sm:$0xff] }
 0xae6   : > { %v9188_v10 = vsel %vm424_vm1, %v18913_v20, %v8949_v61  ;;  %v18937_v20 = vld [vmem:[#allocation15_spill] sm:$0xff] }
 0xae7   : > { %v8719_v59 = vadd.f32 %v8685_v62, %v8595_v27  ;;  %v9221_v4 = vsel %vm9204_vm10, %v9188_v10, %v18914_v5  ;;  %v18936_v27 = vld [vmem:[#allocation247_spill] sm:$0xff] }
 0xae8   : > { %9254 = vst.msk [vmem:[%s16771_s14 + $0x80] sm:$0xff] %vm9237_vm11, %v9221_v4 }
 0xae9   : > { %v8755_v21 = vadd.f32 %v16674_v25, %v8719_v59  ;;  %v18938_v59 = vld [vmem:[#allocation132_spill] sm:$0xff] }
 0xaeb   : > { %9106 = vrot.lane.b32.xlu0 %v1757_v35, %s10109_s20  ;;  %8978 = vrot.lane.b32.xlu1 %v8755_v21, %s10111_s29  ;;  %v9170_v35 = vsel %vm2152_vm9, %v18939_v47, %v16781_v26  ;;  %v18941_v26 = vld [vmem:[#allocation92_spill] sm:$0xff] }
 0xaed   : > { %v8957_v40 = vpop.permute.xlu2 %8956 }
 0xaee   : > { %v9192_v46 = vsel %vm424_vm1, %v18916_v52, %v8957_v40 }
 0xaef   : > { %v9225_v30 = vsel %vm9204_vm10, %v9192_v46, %v18917_v63  ;;  %v18940_v63 = vld [vmem:[#allocation80_spill] sm:$0xff] }
 0xaf0   : > { %9258 = vst.msk [vmem:[%s16771_s14 + $0xa0] sm:$0xff] %vm9237_vm11, %v9225_v30  ;;  %v9171_v30 = vsel %vm2152_vm9, %v18940_v63, %v16753_v56 }
 0xaf3   : > { %9102 = vrot.lane.b32.xlu1 %v1752_v29, %s10109_s20 }
 0xaf5   : > { %v8953_v25 = vpop.permute.xlu0 %8952 }
 0xaf6   : > { %v9190_v41 = vsel %vm424_vm1, %v18919_v18, %v8953_v25 }
 0xaf7   : > { %v9223_v33 = vsel %vm9204_vm10, %v9190_v41, %v18920_v39  ;;  %v9169_v41 = vsel %vm2152_vm9, %v18941_v26, %v16764_v19 }
 0xaf8   : > { %9256 = vst.msk [vmem:[%s16771_s14 + $0x90] sm:$0xff] %vm9237_vm11, %v9223_v33 }
 0xafd   : > { %v8955_v36 = vpop.permute.xlu1 %8954 }
 0xafe   : > { %v9191_v15 = vsel %vm424_vm1, %v18921_v2, %v8955_v36 }
 0xaff   : > { %v9224_v32 = vsel %vm9204_vm10, %v9191_v15, %v18922_v48 }
 0xb00   : > { %9257 = vst.msk [vmem:[%s16771_s14 + $0x98] sm:$0xff] %vm9237_vm11, %v9224_v32 }
 0xb05   : > { %v8963_v9 = vpop.permute.xlu2 %8962 }
 0xb06   : > { %v9195_v28 = vsel %vm424_vm1, %v18923_v7, %v8963_v9 }
 0xb07   : > { %v9228_v24 = vsel %vm9204_vm10, %v9195_v28, %v18924_v34 }
 0xb08   : > { %9261 = vst.msk [vmem:[%s16771_s14 + $0xb8] sm:$0xff] %vm9237_vm11, %v9228_v24 }
 0xb0d   : > { %v8959_v14 = vpop.permute.xlu0 %8958 }
 0xb0e   : > { %v9193_v0 = vsel %vm424_vm1, %v18925_v57, %v8959_v14 }
 0xb0f   : > { %v9226_v31 = vsel %vm9204_vm10, %v9193_v0, %v18926_v37 }
 0xb10   : > { %9259 = vst.msk [vmem:[%s16771_s14 + $0xa8] sm:$0xff] %vm9237_vm11, %v9226_v31 }
 0xb15   : > { %v8961_v11 = vpop.permute.xlu1 %8960 }
 0xb16   : > { %v9194_v49 = vsel %vm424_vm1, %v18927_v23, %v8961_v11 }
 0xb17   : > { %v9227_v6 = vsel %vm9204_vm10, %v9194_v49, %v18928_v3 }
 0xb18   : > { %9260 = vst.msk [vmem:[%s16771_s14 + $0xb0] sm:$0xff] %vm9237_vm11, %v9227_v6 }
 0xb1d   : > { %v8969_v1 = vpop.permute.xlu2 %8968 }
 0xb1e   : > { %v9198_v53 = vsel %vm424_vm1, %v18929_v8, %v8969_v1 }
 0xb1f   : > { %v9231_v58 = vsel %vm9204_vm10, %v9198_v53, %v18930_v16 }
 0xb20   : > { %9264 = vst.msk [vmem:[%s16771_s14 + $0xd0] sm:$0xff] %vm9237_vm11, %v9231_v58 }
 0xb25   : > { %v8965_v17 = vpop.permute.xlu0 %8964 }
 0xb26   : > { %v9196_v12 = vsel %vm424_vm1, %v18931_v43, %v8965_v17 }
 0xb27   : > { %v9229_v51 = vsel %vm9204_vm10, %v9196_v12, %v18932_v13 }
 0xb28   : > { %9262 = vst.msk [vmem:[%s16771_s14 + $0xc0] sm:$0xff] %vm9237_vm11, %v9229_v51 }
 0xb2d   : > { %v8967_v54 = vpop.permute.xlu1 %8966 }
 0xb2e   : > { %v9197_v22 = vsel %vm424_vm1, %v18933_v42, %v8967_v54 }
 0xb2f   : > { %v9230_v38 = vsel %vm9204_vm10, %v9197_v22, %v18934_v44 }
 0xb30   : > { %9263 = vst.msk [vmem:[%s16771_s14 + $0xc8] sm:$0xff] %vm9237_vm11, %v9230_v38 }
 0xb35   : > { %v8975_v4 = vpop.permute.xlu2 %8974 }
 0xb36   : > { %v9201_v39 = vsel %vm424_vm1, %v9169_v41, %v8975_v4 }
 0xb3d   : > { %v8971_v50 = vpop.permute.xlu0 %8970  ;;  %v9105_v40 = vpop.permute.xlu2 %9104 }
 0xb3e   : > { %v9199_v60 = vsel %vm424_vm1, %v18935_v45, %v8971_v50 }
 0xb3f   : > { %v9232_v61 = vsel %vm9204_vm10, %v9199_v60, %v18936_v27 }
 0xb40   : > { %9265 = vst.msk [vmem:[%s16771_s14 + $0xd8] sm:$0xff] %vm9237_vm11, %v9232_v61 }
 0xb45   : > { %v8973_v62 = vpop.permute.xlu1 %8972 }
 0xb46   : > { %v9200_v10 = vsel %vm424_vm1, %v18937_v20, %v8973_v62 }
 0xb47   : > { %v9233_v5 = vsel %vm9204_vm10, %v9200_v10, %v18938_v59 }
 0xb48   : > { %9266 = vst.msk [vmem:[%s16771_s14 + $0xe0] sm:$0xff] %vm9237_vm11, %v9233_v5 }
 0xb55   : > { %v8977_v21 = vpop.permute.xlu0 %8976 }
 0xb56   : > { %v9202_v52 = vsel %vm424_vm1, %v9170_v35, %v8977_v21 }
 0xb57   : > { %v9235_v46 = vsel %vm9204_vm10, %v9202_v52, %v9105_v40 }
 0xb58   : > { %9268 = vst.msk [vmem:[%s16771_s14 + $0xf0] sm:$0xff] %vm9237_vm11, %v9235_v46 }
 0xb5d   : > { %v9107_v55 = vpop.permute.xlu0 %9106  ;;  %v8979_v29 = vpop.permute.xlu1 %8978 }
 0xb5e   : > { %v9203_v25 = vsel %vm424_vm1, %v9171_v30, %v8979_v29 }
 0xb5f   : > { %v9236_v18 = vsel %vm9204_vm10, %v9203_v25, %v9107_v55 }
 0xb60   : > { %9269 = vst.msk [vmem:[%s16771_s14 + $0xf8] sm:$0xff] %vm9237_vm11, %v9236_v18 }
 0xb65   : > { %v9103_v33 = vpop.permute.xlu1 %9102 }
 0xb66   : > { %v9234_v36 = vsel %vm9204_vm10, %v9201_v39, %v9103_v33 }
 0xb67   : > { %9267 = vst.msk [vmem:[%s16771_s14 + $0xe8] sm:$0xff] %vm9237_vm11, %v9234_v36 }
 0xb68 PF: > { %s19_s30 = sadd.s32 1, %s10103_s30  }
 0xb69   : > { %p16_p4 = scmp.ge.s32.totalorder %s19_s30, 4  }
 0xb6b   :  { %18 = sbr.rel (!%p16_p4) target bundleno = 1 (0x1), region = 86 }

</bundles_post_ra>
